<compile_context>
chip_gen: v7x
topology: tpu7x:2x2x1
jax: 0.10.0
libtpu: 0.0.40
codegen_flags: <defaults>
</compile_context>

<pallas_src>
import functools
import numpy as np
import jax
import jax.numpy as jnp
from jax import lax
from jax.experimental import pallas as pl
from jax.experimental.pallas import tpu as pltpu

NUM_RBF = 16
NUM_POS_EMB = 16
MAX_REL = 32
NUM_CLASSES = 2 * MAX_REL + 2            # 66
NUM_CLASSES_PAD = 128                    # lane-friendly one-hot width
NUM_PAIRS = 25
PAIR_PAD = 32                            # 25 pair distances (+1 class lane) padded to 32
POS_LANE = 25                            # lane of d_flat carrying the positional class
RBF_COLS = NUM_PAIRS * NUM_RBF           # 400
EDGE_IN = NUM_POS_EMB + RBF_COLS         # 416
D_MIN, D_MAX = 2.0, 22.0
D_SIGMA = (D_MAX - D_MIN) / NUM_RBF
MU_STEP = (D_MAX - D_MIN) / (NUM_RBF - 1)
LN_EPS = 1e-5

ATOM = {"N": 0, "Ca": 1, "C": 2, "O": 3, "Cb": 4}
# pair 0 is a placeholder: its distance is replaced by D_neighbors from _dist
PAIRS = [("Ca", "Ca"),
         ("N", "N"), ("C", "C"), ("O", "O"), ("Cb", "Cb"),
         ("Ca", "N"), ("Ca", "C"), ("Ca", "O"), ("Ca", "Cb"),
         ("N", "C"), ("N", "O"), ("N", "Cb"),
         ("Cb", "C"), ("Cb", "O"), ("O", "C"),
         ("N", "Ca"), ("C", "Ca"), ("O", "Ca"), ("Cb", "Ca"),
         ("C", "N"), ("O", "N"), ("Cb", "N"),
         ("C", "Cb"), ("O", "Cb"), ("C", "O")]


def _round_up(x, m):
    return ((x + m - 1) // m) * m


# ----------------------------- Pallas kernel ------------------------------ #
def edge_feature_kernel(d_ref, wcomb_ref, werbf_ref, bias_ref, gamma_ref,
                        beta_ref, out_ref, *, inv_e):
    d = d_ref[...]                                            # [TR, 32] f32

    # Exact hi/lo bf16 split: rep entries are 0/1, so each matmul is a single
    # bf16 MXU pass and the sum reconstructs d exactly (to ~2^-17 relative).
    d_hi = d.astype(jnp.bfloat16)
    d_lo = (d - d_hi.astype(jnp.float32)).astype(jnp.bfloat16)

    # 0/1 replication matrix built in-kernel from iotas: rep[r, c] = (r == c//16)
    rows = lax.broadcasted_iota(jnp.int32, (PAIR_PAD, RBF_COLS), 0)
    cols = lax.broadcasted_iota(jnp.int32, (PAIR_PAD, RBF_COLS), 1)
    rep = (rows == (cols >> 4)).astype(jnp.bfloat16)          # [32, 400]

    d400 = (jnp.dot(d_hi, rep, preferred_element_type=jnp.float32)
            + jnp.dot(d_lo, rep, preferred_element_type=jnp.float32))  # [TR,400] f32

    # mu as a compile-time constant from an iota (NUM_RBF is a power of 2)
    ccols = lax.broadcasted_iota(jnp.int32, (1, RBF_COLS), 1)
    mu = D_MIN + jnp.bitwise_and(ccols, NUM_RBF - 1).astype(jnp.float32) * MU_STEP
    t = (d400 - mu) * (1.0 / D_SIGMA)                         # f32 (exact)
    # exp in f32 (safe on v5e's f32-only EUP); cast result to bf16 for the MXU.
    rbf = jnp.exp(-(t * t)).astype(jnp.bfloat16)              # [TR, 400] bf16

    # positional one-hot; class index packed as an exact integer float in lane 25
    dpos = d[:, POS_LANE:POS_LANE + 1].astype(jnp.int32)      # [TR, 1]
    classes = lax.broadcasted_iota(jnp.int32, (d.shape[0], NUM_CLASSES_PAD), 1)
    onehot = (classes == dpos).astype(jnp.bfloat16)           # [TR, 128] bf16

    edge = (jnp.dot(onehot, wcomb_ref[...], preferred_element_type=jnp.float32)
            + jnp.dot(rbf, werbf_ref[...], preferred_element_type=jnp.float32)
            + bias_ref[...])                                  # [TR, E_PAD] f32

    # Fused LayerNorm over the TRUE feature dim (padded columns are zero, so
    # they contribute nothing to the sums).
    s1 = jnp.sum(edge, axis=-1, keepdims=True)
    s2 = jnp.sum(edge * edge, axis=-1, keepdims=True)
    mean = s1 * inv_e
    var = jnp.maximum(s2 * inv_e - mean * mean, 0.0)
    out_ref[...] = ((edge - mean) * lax.rsqrt(var + LN_EPS)
                    * gamma_ref[...] + beta_ref[...])         # padded lanes -> 0


# ------------------------------ JAX glue ---------------------------------- #
def _backbone_atoms(X):
    N, Ca, C, O = X[:, :, 0], X[:, :, 1], X[:, :, 2], X[:, :, 3]
    b = Ca - N
    c = C - Ca
    a = jnp.cross(b, c)
    Cb = -0.58273431 * a + 0.56802827 * b - 0.54067466 * c + Ca
    return jnp.stack([N, Ca, C, O, Cb], axis=2)               # [B,L,5,3]


def _dist(Ca, mask, top_k):
    L = Ca.shape[1]
    K = min(top_k, L)
    m = mask.astype(jnp.float32)
    mask2d = m[:, None, :] * m[:, :, None]
    dX = Ca[:, None, :, :] - Ca[:, :, None, :]
    D = mask2d * jnp.sqrt(jnp.sum(dX ** 2, axis=-1) + 1e-6)
    D_max = jnp.max(D, axis=-1, keepdims=True)
    D_adjust = D + (1.0 - mask2d) * D_max
    neg, E_idx = lax.top_k(-D_adjust, K)
    return -neg, E_idx


def protein_features_pallas(params, X, mask, residue_idx, chain_labels,
                            top_k=30, row_tile=1024):
    B, L = X.shape[:2]
    K = min(top_k, L)
    E_out = params["w_edge"].shape[0]
    E_pad = _round_up(E_out, 128)

    atoms = _backbone_atoms(X.astype(jnp.float32))
    D_neighbors, E_idx = _dist(atoms[:, :, 1], mask, top_k)

    # data-dependent gathers (glue)
    # TODO(synk): the neighbour gather + 25-distance computation could be fused
    # into the kernel via PrefetchScalarGridSpec(E_idx) if profiles show the
    # XLA glue dominating HBM traffic; kept in plain JAX here.
    nbr_atoms = jax.vmap(lambda a, e: a[e])(atoms, E_idx)     # [B,L,K,5,3]
    offset = residue_idx[:, :, None] - residue_idx[:, None, :]
    offs = jnp.take_along_axis(offset, E_idx, axis=2)         # [B,L,K]
    same_chain = (chain_labels[:, :, None] == chain_labels[:, None, :]).astype(jnp.int32)
    E_chains = jnp.take_along_axis(same_chain, E_idx, axis=2) # [B,L,K]
    d_pos = (jnp.clip(offs + MAX_REL, 0, 2 * MAX_REL) * E_chains
             + (1 - E_chains) * (2 * MAX_REL + 1)).astype(jnp.int32)

    # compact 25 pairwise distances per edge (pair 0 = masked top-k distance)
    pa = np.array([ATOM[a] for a, _ in PAIRS])
    pb = np.array([ATOM[b] for _, b in PAIRS])
    a_sel = atoms[:, :, pa, :]                                # [B,L,25,3]
    b_sel = nbr_atoms[:, :, :, pb, :]                         # [B,L,K,25,3]
    diff = a_sel[:, :, None, :, :] - b_sel
    d25 = jnp.sqrt(jnp.sum(diff * diff, axis=-1) + 1e-6)      # [B,L,K,25]
    d25 = d25.at[..., 0].set(D_neighbors)

    # pack the positional class index (exact small ints) into lane 25, pad to 32
    d_pack = jnp.concatenate(
        [d25, d_pos[..., None].astype(jnp.float32),
         jnp.zeros(d25.shape[:-1] + (PAIR_PAD - NUM_PAIRS - 1,), jnp.float32)],
        axis=-1)                                              # [B,L,K,32]

    R = B * L * K
    TR = min(row_tile, _round_up(R, 256))
    R_pad = _round_up(R, TR)
    d_flat = jnp.pad(d_pack.reshape(R, PAIR_PAD), ((0, R_pad - R), (0, 0)))

    # fused positional weights: onehot @ (w_pos.T @ we_pos) + b_pos @ we_pos
    w_pos = params["w_pos"].astype(jnp.float32)               # [16, 66]
    b_pos = params["b_pos"].astype(jnp.float32)               # [16]
    w_edge_t = params["w_edge"].astype(jnp.float32).T         # [416, E]
    we_pos = w_edge_t[:NUM_POS_EMB]                           # [16, E]
    we_rbf = w_edge_t[NUM_POS_EMB:]                           # [400, E]
    wcomb = jnp.dot(w_pos.T, we_pos, precision=jax.lax.Precision.HIGHEST)
    bias = jnp.dot(b_pos[None, :], we_pos, precision=jax.lax.Precision.HIGHEST)

    # zero-pad the feature dim to E_pad (lane-dense output), weights in bf16
    def pad_cols(a):
        return jnp.pad(a, ((0, 0), (0, E_pad - E_out)))

    wcomb_pad = jnp.pad(pad_cols(wcomb),
                        ((0, NUM_CLASSES_PAD - NUM_CLASSES), (0, 0))).astype(jnp.bfloat16)
    we_rbf_pad = pad_cols(we_rbf).astype(jnp.bfloat16)        # [400, E_pad]
    bias_pad = pad_cols(bias)                                 # [1, E_pad] f32
    gamma_pad = pad_cols(params["ln_gamma"].astype(jnp.float32)[None, :])
    beta_pad = pad_cols(params["ln_beta"].astype(jnp.float32)[None, :])

    def row_spec(w):
        return pl.BlockSpec((TR, w), lambda i: (i, 0))

    def full_spec(s):
        return pl.BlockSpec(s, lambda i: (0, 0))

    flops_per_row = (2 * 2 * PAIR_PAD * RBF_COLS
                     + 2 * NUM_CLASSES_PAD * E_pad
                     + 2 * RBF_COLS * E_pad
                     + 10 * RBF_COLS + 8 * E_pad)
    cost = pl.CostEstimate(
        flops=int(R_pad * flops_per_row),
        transcendentals=int(R_pad * RBF_COLS),
        bytes_accessed=int(R_pad * (PAIR_PAD * 4 + E_pad * 4)
                           + 2 * (NUM_CLASSES_PAD * E_pad + RBF_COLS * E_pad)
                           + 4 * 3 * E_pad),
    )

    kernel = functools.partial(edge_feature_kernel, inv_e=1.0 / float(E_out))

    out = pl.pallas_call(
        kernel,
        out_shape=jax.ShapeDtypeStruct((R_pad, E_pad), jnp.float32),
        grid=(R_pad // TR,),
        in_specs=[row_spec(PAIR_PAD),                    # distances + class lane
                  full_spec((NUM_CLASSES_PAD, E_pad)),   # fused positional weight (bf16)
                  full_spec((RBF_COLS, E_pad)),          # RBF embedding weight (bf16)
                  full_spec((1, E_pad)),                 # fused positional bias
                  full_spec((1, E_pad)),                 # LN gamma
                  full_spec((1, E_pad))],                # LN beta
        out_specs=pl.BlockSpec((TR, E_pad), lambda i: (i, 0)),
        compiler_params=pltpu.CompilerParams(
            dimension_semantics=("parallel",),
            vmem_limit_bytes=64 * 1024 * 1024),
        cost_estimate=cost,
    )(d_flat, wcomb_pad, we_rbf_pad, bias_pad, gamma_pad, beta_pad)

    E = out[:R, :E_out].reshape(B, L, K, E_out)
    return E, E_idx


# ----------------------- pure-JAX reference (torch semantics) -------------- #
def _rbf(D):
    mu = jnp.linspace(D_MIN, D_MAX, NUM_RBF, dtype=jnp.float32)
    return jnp.exp(-(((D[..., None] - mu) / D_SIGMA) ** 2))


def _get_rbf(A, Bc, E_idx):
    D_AB = jnp.sqrt(jnp.sum((A[:, :, None, :] - Bc[:, None, :, :]) ** 2, axis=-1) + 1e-6)
    return _rbf(jnp.take_along_axis(D_AB, E_idx, axis=2))


def protein_features_reference(params, X, mask, residue_idx, chain_labels, top_k=30):
    atoms = _backbone_atoms(X.astype(jnp.float32))
    parts = {name: atoms[:, :, i] for name, i in ATOM.items()}
    D_neighbors, E_idx = _dist(parts["Ca"], mask, top_k)
    rbfs = [_rbf(D_neighbors)]
    for a, b in PAIRS[1:]:
        rbfs.append(_get_rbf(parts[a], parts[b], E_idx))
    RBFs = jnp.concatenate(rbfs, axis=-1)
    offset = residue_idx[:, :, None] - residue_idx[:, None, :]
    offs = jnp.take_along_axis(offset, E_idx, axis=2)
    same_chain = (chain_labels[:, :, None] == chain_labels[:, None, :]).astype(jnp.int32)
    E_chains = jnp.take_along_axis(same_chain, E_idx, axis=2)
    d = jnp.clip(offs + MAX_REL, 0, 2 * MAX_REL) * E_chains + (1 - E_chains) * (2 * MAX_REL + 1)
    onehot = jax.nn.one_hot(d, NUM_CLASSES, dtype=jnp.float32)
    E_pos = onehot @ params["w_pos"].T + params["b_pos"]
    Ecat = jnp.concatenate([E_pos, RBFs], axis=-1)
    Eemb = Ecat @ params["w_edge"].T
    mean = jnp.mean(Eemb, axis=-1, keepdims=True)
    var = jnp.mean((Eemb - mean) ** 2, axis=-1, keepdims=True)
    Eout = (Eemb - mean) * lax.rsqrt(var + LN_EPS) * params["ln_gamma"] + params["ln_beta"]
    return Eout, E_idx


# --------------------------------- main ------------------------------------ #
if __name__ == "__main__":
    B, L, top_k = 2, 16, 30
    edge_features = 32
    K = min(top_k, L)

    key = jax.random.PRNGKey(0)
    k1, k2, k3, k4, k5, k6 = jax.random.split(key, 6)

    # synthetic backbone coords roughly spread along a line so distances are varied
    X = (jax.random.normal(k1, (B, L, 4, 3), jnp.float32) * 2.0
         + jnp.arange(L, dtype=jnp.float32)[None, :, None, None] * 3.8)
    mask = jnp.ones((B, L), jnp.float32).at[1, -1].set(0.0)
    residue_idx = (jnp.arange(L) + 100 * (jnp.arange(L) >= L // 2)).astype(jnp.int32)[None, :].repeat(B, axis=0)
    chain_labels = (jnp.arange(L) >= L // 2).astype(jnp.int32)[None, :].repeat(B, axis=0)

    params = {
        "w_pos": jax.random.normal(k2, (NUM_POS_EMB, NUM_CLASSES), jnp.float32) * 0.1,
        "b_pos": jax.random.normal(k3, (NUM_POS_EMB,), jnp.float32) * 0.1,
        "w_edge": jax.random.normal(k4, (edge_features, EDGE_IN), jnp.float32) * 0.05,
        "ln_gamma": 1.0 + 0.1 * jax.random.normal(k5, (edge_features,), jnp.float32),
        "ln_beta": 0.1 * jax.random.normal(k6, (edge_features,), jnp.float32),
    }
    # TODO(synk): node_embedding / norm_nodes are declared in __init__ but never
    # used by _forward_all, so they are intentionally omitted here.

    E, E_idx = protein_features_pallas(params, X, mask, residue_idx, chain_labels, top_k=top_k)
    jax.block_until_ready(E)

    E_ref, E_idx_ref = protein_features_reference(params, X, mask, residue_idx, chain_labels, top_k=top_k)
    assert E.shape == (B, L, K, edge_features)
    assert E_idx.shape == (B, L, K)
    assert bool(jnp.array_equal(E_idx, E_idx_ref))
    max_err = float(jnp.max(jnp.abs(E - E_ref)))
    assert bool(jnp.allclose(E, E_ref, atol=3e-2, rtol=3e-2)), max_err
    print("KERNEL_OK")
</pallas_src>

<mosaic_0001>
module attributes {stable_mosaic.version = 11 : i64} {
  func.func @edge_feature_kernel(%arg0: i32, %arg1: memref<512x32xf32, #tpu.memory_space<vmem>>, %arg2: memref<128x128xbf16, #tpu.memory_space<vmem>>, %arg3: memref<400x128xbf16, #tpu.memory_space<vmem>>, %arg4: memref<1x128xf32, #tpu.memory_space<vmem>>, %arg5: memref<1x128xf32, #tpu.memory_space<vmem>>, %arg6: memref<1x128xf32, #tpu.memory_space<vmem>>, %arg7: memref<512x128xf32, #tpu.memory_space<vmem>>) attributes {dimension_semantics = [#tpu.dimension_semantics<parallel>], iteration_bounds = array<i64: 1>, scalar_prefetch = 0 : i64, scratch_operands = 0 : i64, tpu.core_type = #tpu.core_type<tc>, window_params = [{transform_indices = @transform_0, window_bounds = array<i64: 512, 32>}, {pipeline_mode = #tpu.pipeline_mode<synchronous>, transform_indices = @transform_1, window_bounds = array<i64: 128, 128>}, {pipeline_mode = #tpu.pipeline_mode<synchronous>, transform_indices = @transform_2, window_bounds = array<i64: 400, 128>}, {pipeline_mode = #tpu.pipeline_mode<synchronous>, transform_indices = @transform_3, window_bounds = array<i64: 1, 128>}, {pipeline_mode = #tpu.pipeline_mode<synchronous>, transform_indices = @transform_4, window_bounds = array<i64: 1, 128>}, {pipeline_mode = #tpu.pipeline_mode<synchronous>, transform_indices = @transform_5, window_bounds = array<i64: 1, 128>}, {transform_indices = @transform_6, window_bounds = array<i64: 512, 128>}]} {
    %c0 = arith.constant 0 : index
    %c0_0 = arith.constant 0 : index
    %0 = vector.load %arg1[%c0, %c0_0] : memref<512x32xf32, #tpu.memory_space<vmem>>, vector<512x32xf32>
    %1 = arith.truncf %0 : vector<512x32xf32> to vector<512x32xbf16>
    %2 = arith.extf %1 : vector<512x32xbf16> to vector<512x32xf32>
    %3 = arith.subf %0, %2 : vector<512x32xf32>
    %4 = arith.truncf %3 : vector<512x32xf32> to vector<512x32xbf16>
    %5 = tpu.iota {dimensions = array<i32: 0>} : vector<32x400xi32>
    %6 = tpu.iota {dimensions = array<i32: 1>} : vector<32x400xi32>
    %c4_i32 = arith.constant 4 : i32
    %7 = vector.broadcast %c4_i32 : i32 to vector<32x400xi32>
    %8 = arith.shrsi %6, %7 : vector<32x400xi32>
    %9 = arith.cmpi eq, %5, %8 : vector<32x400xi32>
    %10 = arith.extui %9 : vector<32x400xi1> to vector<32x400xi32>
    %11 = arith.sitofp %10 : vector<32x400xi32> to vector<32x400xf32>
    %12 = arith.truncf %11 : vector<32x400xf32> to vector<32x400xbf16>
    %cst = arith.constant dense<0.000000e+00> : vector<512x400xf32>
    %13 = tpu.matmul %1, %12, %cst {dimension_numbers = #tpu.dot_dimension_numbers<[1], [0], [0], [1], [0, 0, 1, 1], [], []>} : vector<512x32xbf16>, vector<32x400xbf16>, vector<512x400xf32> -> vector<512x400xf32>
    %cst_1 = arith.constant dense<0.000000e+00> : vector<512x400xf32>
    %14 = tpu.matmul %4, %12, %cst_1 {dimension_numbers = #tpu.dot_dimension_numbers<[1], [0], [0], [1], [0, 0, 1, 1], [], []>} : vector<512x32xbf16>, vector<32x400xbf16>, vector<512x400xf32> -> vector<512x400xf32>
    %15 = arith.addf %13, %14 : vector<512x400xf32>
    %16 = tpu.iota {dimensions = array<i32: 1>} : vector<1x400xi32>
    %c15_i32 = arith.constant 15 : i32
    %17 = vector.broadcast %c15_i32 : i32 to vector<1x400xi32>
    %18 = arith.andi %16, %17 : vector<1x400xi32>
    %19 = arith.sitofp %18 : vector<1x400xi32> to vector<1x400xf32>
    %cst_2 = arith.constant 1.33333337 : f32
    %20 = vector.broadcast %cst_2 : f32 to vector<1x400xf32>
    %21 = arith.mulf %19, %20 : vector<1x400xf32>
    %cst_3 = arith.constant 2.000000e+00 : f32
    %22 = vector.broadcast %cst_3 : f32 to vector<1x400xf32>
    %23 = arith.addf %22, %21 : vector<1x400xf32>
    %24 = vector.broadcast %23 : vector<1x400xf32> to vector<512x400xf32>
    %25 = arith.subf %15, %24 : vector<512x400xf32>
    %cst_4 = arith.constant 8.000000e-01 : f32
    %26 = vector.broadcast %cst_4 : f32 to vector<512x400xf32>
    %27 = arith.mulf %25, %26 : vector<512x400xf32>
    %28 = arith.mulf %27, %27 : vector<512x400xf32>
    %cst_5 = arith.constant 0.000000e+00 : f32
    %29 = vector.broadcast %cst_5 : f32 to vector<512x400xf32>
    %30 = arith.subf %29, %28 : vector<512x400xf32>
    %31 = math.exp %30 : vector<512x400xf32>
    %32 = arith.truncf %31 : vector<512x400xf32> to vector<512x400xbf16>
    %33 = vector.extract_strided_slice %0 {offsets = [0, 25], sizes = [512, 1], strides = [1, 1]} : vector<512x32xf32> to vector<512x1xf32>
    %34 = arith.fptosi %33 : vector<512x1xf32> to vector<512x1xi32>
    %35 = tpu.iota {dimensions = array<i32: 1>} : vector<512x128xi32>
    %36 = vector.broadcast %34 : vector<512x1xi32> to vector<512x128xi32>
    %37 = arith.cmpi eq, %35, %36 : vector<512x128xi32>
    %38 = arith.extui %37 : vector<512x128xi1> to vector<512x128xi32>
    %39 = arith.sitofp %38 : vector<512x128xi32> to vector<512x128xf32>
    %40 = arith.truncf %39 : vector<512x128xf32> to vector<512x128xbf16>
    %c0_6 = arith.constant 0 : index
    %c0_7 = arith.constant 0 : index
    %41 = vector.load %arg2[%c0_6, %c0_7] : memref<128x128xbf16, #tpu.memory_space<vmem>>, vector<128x128xbf16>
    %cst_8 = arith.constant dense<0.000000e+00> : vector<512x128xf32>
    %42 = tpu.matmul %40, %41, %cst_8 {dimension_numbers = #tpu.dot_dimension_numbers<[1], [0], [0], [1], [0, 0, 1, 1], [], []>} : vector<512x128xbf16>, vector<128x128xbf16>, vector<512x128xf32> -> vector<512x128xf32>
    %c0_9 = arith.constant 0 : index
    %c0_10 = arith.constant 0 : index
    %43 = vector.load %arg3[%c0_9, %c0_10] : memref<400x128xbf16, #tpu.memory_space<vmem>>, vector<400x128xbf16>
    %cst_11 = arith.constant dense<0.000000e+00> : vector<512x128xf32>
    %44 = tpu.matmul %32, %43, %cst_11 {dimension_numbers = #tpu.dot_dimension_numbers<[1], [0], [0], [1], [0, 0, 1, 1], [], []>} : vector<512x400xbf16>, vector<400x128xbf16>, vector<512x128xf32> -> vector<512x128xf32>
    %45 = arith.addf %42, %44 : vector<512x128xf32>
    %c0_12 = arith.constant 0 : index
    %c0_13 = arith.constant 0 : index
    %46 = vector.load %arg4[%c0_12, %c0_13] : memref<1x128xf32, #tpu.memory_space<vmem>>, vector<1x128xf32>
    %47 = vector.broadcast %46 : vector<1x128xf32> to vector<512x128xf32>
    %48 = arith.addf %45, %47 : vector<512x128xf32>
    %cst_14 = arith.constant dense<0.000000e+00> : vector<512xf32>
    %49 = vector.multi_reduction <add>, %48, %cst_14 [1] : vector<512x128xf32> to vector<512xf32>
    %50 = vector.shape_cast %49 : vector<512xf32> to vector<512x1xf32>
    %51 = arith.mulf %48, %48 : vector<512x128xf32>
    %cst_15 = arith.constant dense<0.000000e+00> : vector<512xf32>
    %52 = vector.multi_reduction <add>, %51, %cst_15 [1] : vector<512x128xf32> to vector<512xf32>
    %53 = vector.shape_cast %52 : vector<512xf32> to vector<512x1xf32>
    %cst_16 = arith.constant 3.125000e-02 : f32
    %54 = vector.broadcast %cst_16 : f32 to vector<512x1xf32>
    %55 = arith.mulf %50, %54 : vector<512x1xf32>
    %cst_17 = arith.constant 3.125000e-02 : f32
    %56 = vector.broadcast %cst_17 : f32 to vector<512x1xf32>
    %57 = arith.mulf %53, %56 : vector<512x1xf32>
    %58 = arith.mulf %55, %55 : vector<512x1xf32>
    %59 = arith.subf %57, %58 : vector<512x1xf32>
    %cst_18 = arith.constant 0.000000e+00 : f32
    %60 = vector.broadcast %cst_18 : f32 to vector<512x1xf32>
    %61 = arith.maximumf %59, %60 : vector<512x1xf32>
    %62 = vector.broadcast %55 : vector<512x1xf32> to vector<512x128xf32>
    %63 = arith.subf %48, %62 : vector<512x128xf32>
    %cst_19 = arith.constant 9.99999974E-6 : f32
    %64 = vector.broadcast %cst_19 : f32 to vector<512x1xf32>
    %65 = arith.addf %61, %64 : vector<512x1xf32>
    %66 = math.rsqrt %65 : vector<512x1xf32>
    %67 = vector.broadcast %66 : vector<512x1xf32> to vector<512x128xf32>
    %68 = arith.mulf %63, %67 : vector<512x128xf32>
    %c0_20 = arith.constant 0 : index
    %c0_21 = arith.constant 0 : index
    %69 = vector.load %arg5[%c0_20, %c0_21] : memref<1x128xf32, #tpu.memory_space<vmem>>, vector<1x128xf32>
    %70 = vector.broadcast %69 : vector<1x128xf32> to vector<512x128xf32>
    %71 = arith.mulf %68, %70 : vector<512x128xf32>
    %c0_22 = arith.constant 0 : index
    %c0_23 = arith.constant 0 : index
    %72 = vector.load %arg6[%c0_22, %c0_23] : memref<1x128xf32, #tpu.memory_space<vmem>>, vector<1x128xf32>
    %73 = vector.broadcast %72 : vector<1x128xf32> to vector<512x128xf32>
    %74 = arith.addf %71, %73 : vector<512x128xf32>
    %c0_24 = arith.constant 0 : index
    %c0_25 = arith.constant 0 : index
    %75 = vector.load %arg7[%c0_24, %c0_25] : memref<512x128xf32, #tpu.memory_space<vmem>>, vector<512x128xf32>
    tpu.vector_store %arg7[%c0_24, %c0_25], %74 {strides = array<i32>} : memref<512x128xf32, #tpu.memory_space<vmem>>, vector<512x128xf32>,
    return
  }
  func.func @transform_0(%arg0: i32) -> (i32, i32) {
    %c0_i32 = arith.constant 0 : i32
    %c0_i32_0 = arith.constant 0 : i32
    return %arg0, %c0_i32 : i32, i32
  }
  func.func @transform_1(%arg0: i32) -> (i32, i32) {
    %c0_i32 = arith.constant 0 : i32
    %c0_i32_0 = arith.constant 0 : i32
    %c0_i32_1 = arith.constant 0 : i32
    return %c0_i32, %c0_i32_0 : i32, i32
  }
  func.func @transform_2(%arg0: i32) -> (i32, i32) {
    %c0_i32 = arith.constant 0 : i32
    %c0_i32_0 = arith.constant 0 : i32
    %c0_i32_1 = arith.constant 0 : i32
    return %c0_i32, %c0_i32_0 : i32, i32
  }
  func.func @transform_3(%arg0: i32) -> (i32, i32) {
    %c0_i32 = arith.constant 0 : i32
    %c0_i32_0 = arith.constant 0 : i32
    %c0_i32_1 = arith.constant 0 : i32
    return %c0_i32, %c0_i32_0 : i32, i32
  }
  func.func @transform_4(%arg0: i32) -> (i32, i32) {
    %c0_i32 = arith.constant 0 : i32
    %c0_i32_0 = arith.constant 0 : i32
    %c0_i32_1 = arith.constant 0 : i32
    return %c0_i32, %c0_i32_0 : i32, i32
  }
  func.func @transform_5(%arg0: i32) -> (i32, i32) {
    %c0_i32 = arith.constant 0 : i32
    %c0_i32_0 = arith.constant 0 : i32
    %c0_i32_1 = arith.constant 0 : i32
    return %c0_i32, %c0_i32_0 : i32, i32
  }
  func.func @transform_6(%arg0: i32) -> (i32, i32) {
    %c0_i32 = arith.constant 0 : i32
    %c0_i32_0 = arith.constant 0 : i32
    return %arg0, %c0_i32 : i32, i32
  }
}

</mosaic_0001>

<bundles_post_ra>
// kernel: tpu_custom_call.1
= control target key start
LH: loop header
LB: loop body
LE: loop exit
PB: predicated region body
PF: predicated region fallthrough
CT: control target
= control target key end

     0   :  { %11 = vsyncpa [#allocation3], 0  ;;  %s12103_s0 = inlined_call_operand.hbm [shape: f32[512,32], index: 0, kind: input, shape index: {}]   ;;  %s12104_s1 = inlined_call_operand.hbm [shape: bf16[128,128], index: 1, kind: input, shape index: {}]   ;;  %s12105_s2 = inlined_call_operand.hbm [shape: bf16[400,128], index: 2, kind: input, shape index: {}]   ;;  %s12106_s3 = inlined_call_operand.hbm [shape: f32[1,128], index: 3, kind: input, shape index: {}]   ;;  %s12107_s4 = inlined_call_operand.hbm [shape: f32[1,128], index: 4, kind: input, shape index: {}]   ;;  %s12108_s5 = inlined_call_operand.hbm [shape: f32[1,128], index: 5, kind: input, shape index: {}]   ;;  %s12109_s6 = inlined_call_operand.hbm [shape: f32[512,128], index: 6, kind: output, shape index: {}]  }
   0x1   :  { %12 = vsyncpa [#allocation6], 0 }
   0x2   :  { %13 = vsyncpa [#allocation9], 0 }
   0x3   :  { %14 = vsyncpa [#allocation12], 0 }
   0x4   :  { %15 = vsyncpa [#allocation4], 0  ;;  %s8544_s21 = smov [#allocation5]   ;;  %s8380_s25 = scalar_lea.hbm %s12104_s1, 1024 }
   0x5   :  { %s33_s22 = sshll.u32 %s8544_s21, 4  ;;  %p8381_p0 = scmp.ne.s32.totalorder %s12104_s1, %s8380_s25  ;;  %s34_s22 = int_to_ptr.vmem [resolvable:$true] %s33_s22 }
   0x6   :  { %p8384_p1 = scmp.lt.u32.totalorder %s8380_s25, %s12104_s1 }
   0x8   :  { %p8386_p2 = pnand %p8384_p1, %p8381_p0 }
   0xa   :  { %8389 = shalt.err (!%p8386_p2)
}
   0xb   :  { %s8390_s30 = scalar_lea.vmem %s34_s22, 1024  ;;  %p8395_p4 = scmp.lt.s32.totalorder %s34_s22, %s34_s22 }
   0xc   :  { %p8391_p3 = scmp.ne.s32.totalorder %s34_s22, %s8390_s30  ;;  %p8396_p5 = scmp.lt.s32.totalorder %s8390_s30, %s8390_s30 }
   0xe   :  { %p8397_p6 = por %p8396_p5, %p8395_p4 }
  0x10   :  { %p8398_p7 = pnand %p8397_p6, %p8391_p3 }
  0x12   :  { %8401 = shalt.err (!%p8398_p7)
}
  0x13   :  { %s8545_s7 = smov 64   ;;  %s8546_s8 = smov 4  }
  0x14   :  { %39 = dma.hbm_to_vmem [thread:$0]  %s12104_s1, 1024, %s34_s22, [#allocation6], %s8545_s7, %s8545_s7, %s8546_s8  }
  0x15   :  { %s8547_s11 = smov [#allocation8]   ;;  %s8548_s13 = smov [#allocation2]  }
  0x16   :  { %s58_s12 = sshll.u32 %s8547_s11, 4  ;;  %s21_s14 = sshll.u32 %s8548_s13, 4  ;;  %s59_s12 = int_to_ptr.vmem [resolvable:$true] %s58_s12  ;;  %s22_s14 = int_to_ptr.vmem [resolvable:$true] %s21_s14 }
  0x17   :  { %s8402_s17 = scalar_lea.hbm %s12106_s3, 16 }
  0x18   :  { %p8403_p8 = scmp.ne.s32.totalorder %s12106_s3, %s8402_s17  ;;  %p8406_p9 = scmp.lt.u32.totalorder %s8402_s17, %s12106_s3 }
  0x1a   :  { %p8408_p10 = pnand %p8406_p9, %p8403_p8 }
  0x1c   :  { %8411 = shalt.err (!%p8408_p10)
}
  0x1d   :  { %s8412_s1 = scalar_lea.vmem %s59_s12, 16  ;;  %s8416_s22 = scalar_lea.vmem %s59_s12, 32 }
  0x1e   :  { %p8413_p11 = scmp.ne.s32.totalorder %s59_s12, %s8412_s1  ;;  %p8417_p12 = scmp.lt.s32.totalorder %s59_s12, %s59_s12 }
  0x1f   :  { %p8418_p13 = scmp.lt.s32.totalorder %s8416_s22, %s8412_s1 }
  0x21   :  { %p8419_p0 = por %p8418_p13, %p8417_p12 }
  0x23   :  { %p8420_p1 = pnand %p8419_p0, %p8413_p11 }
  0x25   :  { %8423 = shalt.err (!%p8420_p1)
}
  0x26   :  { %61 = dma.hbm_to_vmem [thread:$0]  %s12106_s3, 16, %s59_s12, [#allocation9]  }
  0x27   :  { %s8424_s27 = scalar_lea.hbm %s12103_s0, 8192 }
  0x28   :  { %p8425_p2 = scmp.ne.s32.totalorder %s12103_s0, %s8424_s27  ;;  %p8428_p3 = scmp.lt.u32.totalorder %s8424_s27, %s12103_s0 }
  0x2a   :  { %p8430_p4 = pnand %p8428_p3, %p8425_p2 }
  0x2c   :  { %8433 = shalt.err (!%p8430_p4)
}
  0x2d   :  { %s8434_s10 = scalar_lea.vmem %s22_s14, 8192  ;;  %p8439_p6 = scmp.lt.s32.totalorder %s22_s14, %s22_s14 }
  0x2e   :  { %p8435_p5 = scmp.ne.s32.totalorder %s22_s14, %s8434_s10  ;;  %p8440_p7 = scmp.lt.s32.totalorder %s8434_s10, %s8434_s10 }
  0x30   :  { %p8441_p8 = por %p8440_p7, %p8439_p6 }
  0x32   :  { %p8442_p9 = pnand %p8441_p8, %p8435_p5 }
  0x34   :  { %8445 = shalt.err (!%p8442_p9)
}
  0x35   :  { %s8549_s3 = smov 128   ;;  %s8550_s11 = smov 8  }
  0x36   :  { %27 = dma.hbm_to_vmem [thread:$0]  %s12103_s0, 8192, %s22_s14, [#allocation3], %s8549_s3, %s8549_s3, %s8550_s11  }
  0x37   :  { %s8551_s15 = smov [#allocation7]   ;;  %s8552_s17 = smov [#allocation10]  }
  0x38   :  { %s45_s16 = sshll.u32 %s8551_s15, 4  ;;  %s68_s18 = sshll.u32 %s8552_s17, 4  ;;  %s46_s16 = int_to_ptr.vmem [resolvable:$true] %s45_s16  ;;  %s69_s18 = int_to_ptr.vmem [resolvable:$true] %s68_s18 }
  0x39   :  { %s8446_s21 = scalar_lea.hbm %s12105_s2, 3200 }
  0x3a   :  { %p8447_p10 = scmp.ne.s32.totalorder %s12105_s2, %s8446_s21  ;;  %p8450_p11 = scmp.lt.u32.totalorder %s8446_s21, %s12105_s2 }
  0x3c   :  { %p8452_p12 = pnand %p8450_p11, %p8447_p10 }
  0x3e   :  { %8455 = shalt.err (!%p8452_p12)
}
  0x3f   :  { %s8456_s0 = scalar_lea.vmem %s46_s16, 3200  ;;  %p8461_p0 = scmp.lt.s32.totalorder %s46_s16, %s46_s16 }
  0x40   :  { %p8457_p13 = scmp.ne.s32.totalorder %s46_s16, %s8456_s0  ;;  %p8462_p1 = scmp.lt.s32.totalorder %s8456_s0, %s8456_s0 }
  0x42   :  { %p8463_p2 = por %p8462_p1, %p8461_p0 }
  0x44   :  { %p8464_p3 = pnand %p8463_p2, %p8457_p13 }
  0x46   :  { %8467 = shalt.err (!%p8464_p3)
}
  0x47   :  { %51 = dma.hbm_to_vmem [thread:$0]  %s12105_s2, 3200, %s46_s16, [#allocation6], %s8545_s7, %s8545_s7, %s8546_s8  }
  0x48   :  { %s8468_s28 = scalar_lea.hbm %s12107_s4, 16 }
  0x49   :  { %p8469_p4 = scmp.ne.s32.totalorder %s12107_s4, %s8468_s28  ;;  %p8472_p5 = scmp.lt.u32.totalorder %s8468_s28, %s12107_s4 }
  0x4b   :  { %p8474_p6 = pnand %p8472_p5, %p8469_p4 }
  0x4d   :  { %8477 = shalt.err (!%p8474_p6)
}
  0x4e   :  { %s8478_s12 = scalar_lea.vmem %s69_s18, 16  ;;  %s8482_s13 = scalar_lea.vmem %s69_s18, 32 }
  0x4f   :  { %p8479_p7 = scmp.ne.s32.totalorder %s69_s18, %s8478_s12  ;;  %p8483_p8 = scmp.lt.s32.totalorder %s69_s18, %s69_s18 }
  0x50   :  { %p8484_p9 = scmp.lt.s32.totalorder %s8482_s13, %s8478_s12 }
  0x52   :  { %p8485_p10 = por %p8484_p9, %p8483_p8 }
  0x54   :  { %p8486_p11 = pnand %p8485_p10, %p8479_p7 }
  0x56   :  { %8489 = shalt.err (!%p8486_p11)
}
  0x57   :  { %71 = dma.hbm_to_vmem [thread:$0]  %s12107_s4, 16, %s69_s18, [#allocation9]  }
  0x58   :  { %s8553_s8 = smov [#allocation11]   ;;  %s8490_s19 = scalar_lea.hbm %s12108_s5, 16 }
  0x59   :  { %s78_s15 = sshll.u32 %s8553_s8, 4  ;;  %p8491_p12 = scmp.ne.s32.totalorder %s12108_s5, %s8490_s19  ;;  %s79_s15 = int_to_ptr.vmem [resolvable:$true] %s78_s15 }
  0x5a   :  { %p8494_p13 = scmp.lt.u32.totalorder %s8490_s19, %s12108_s5 }
  0x5c   :  { %p8496_p0 = pnand %p8494_p13, %p8491_p12 }
  0x5e   :  { %8499 = shalt.err (!%p8496_p0)
}
  0x5f   :  { %s8500_s23 = scalar_lea.vmem %s79_s15, 16  ;;  %s8504_s4 = scalar_lea.vmem %s79_s15, 32 }
  0x60   :  { %p8501_p1 = scmp.ne.s32.totalorder %s79_s15, %s8500_s23  ;;  %p8505_p2 = scmp.lt.s32.totalorder %s79_s15, %s79_s15 }
  0x61   :  { %p8506_p3 = scmp.lt.s32.totalorder %s8504_s4, %s8500_s23 }
  0x63   :  { %p8507_p4 = por %p8506_p3, %p8505_p2 }
  0x65   :  { %p8508_p5 = pnand %p8507_p4, %p8501_p1 }
  0x67   :  { %8511 = shalt.err (!%p8508_p5)
}
  0x68   :  { %81 = dma.hbm_to_vmem [thread:$0]  %s12108_s5, 16, %s79_s15, [#allocation12]  }
  0x69   :  { %8534 = dma.done.wait [#allocation3], 8192  }
  0x6a   :  { %8535 = vsyncadd [#allocation3], 4294959104 }
  0x6b   :  { %8536 = dma.done.wait [#allocation6], 4224  }
  0x6c   :  { %8537 = vsyncadd [#allocation6], 4294963072 }
  0x6d   :  { %8538 = dma.done.wait [#allocation9], 32  }
  0x6e   :  { %8539 = vsyncadd [#allocation9], 4294967264 }
  0x6f   :  { %8540 = dma.done.wait [#allocation12], 16  }
  0x70   :  { %8541 = vsyncadd [#allocation12], 4294967280  ;;  %v357_v0 = vlaneseq  ;;  %v12140_v1 = vmov 0   ;;  %v101_v12 = vld [vmem:[#allocation2] sm:$0xff]  ;;  %v102_v13 = vld [vmem:[#allocation2 + $0x8] sm:$0xff]  ;;  %s8557_s5 = smov [#allocation13]  }
  0x71   :  { %556 = vmatprep.mubr.bf16.mxu0 %v12140_v1  ;;  %636 = vmatprep.mubr.bf16.mxu1 %v12140_v1  ;;  %v117_v16 = vld [vmem:[#allocation2 + $0x80] sm:$0xff]  ;;  %v118_v17 = vld [vmem:[#allocation2 + $0x88] sm:$0xff]  ;;  %v8719_v19 = vpack.c.bf16 %v102_v13, %v101_v12  ;;  %v12110_v21 = vmov 1.0|1.0   ;;  %v103_v24 = vld [vmem:[#allocation2 + $0x10] sm:$0xff]  ;;  %s6598_s0 = sshll.u32 %s8557_s5, 4  ;;  %s6599_s0 = int_to_ptr.vmem [resolvable:$true] %s6598_s0 }
  0x72   :  { %v8676_v2 = vshrl.u32 %v357_v0, 7  ;;  %v8678_v3 = vand.u32 127, %v357_v0  ;;  %v8721_v20 = vpack.c.bf16 %v118_v17, %v117_v16  ;;  %v104_v29 = vld [vmem:[#allocation2 + $0x18] sm:$0xff]  ;;  %v119_v30 = vld [vmem:[#allocation2 + $0x90] sm:$0xff]  ;;  %v105_v38 = vld [vmem:[#allocation2 + $0x20] sm:$0xff]  ;;  %s8512_s14 = scalar_lea.vmem %s6599_s0, 8192  ;;  %p8517_p7 = scmp.lt.s32.totalorder %s6599_s0, %s6599_s0 }
  0x73   :  { %12192 = vst [vmem:[#allocation22_spill] sm:$0xff] %v8719_v19  ;;  %v197_v25 = vunpack.c.l.bf16 %v8719_v19  ;;  %v198_v26 = vunpack.c.h.bf16 %v8719_v19  ;;  %v120_v31 = vld [vmem:[#allocation2 + $0x98] sm:$0xff]  ;;  %v8778_v39 = vpack.c.bf16 %v104_v29, %v103_v24  ;;  %v106_v41 = vld [vmem:[#allocation2 + $0x28] sm:$0xff]  ;;  %v121_v42 = vld [vmem:[#allocation2 + $0xa0] sm:$0xff]  ;;  %p8513_p6 = scmp.ne.s32.totalorder %s6599_s0, %s8512_s14  ;;  %p8518_p8 = scmp.lt.s32.totalorder %s8512_s14, %s8512_s14 }
  0x74   :  { %12185 = vst [vmem:[#allocation19_spill] sm:$0xff] %v8678_v3  ;;  %v8681_v4 = vadd.s32 8, %v8676_v2  ;;  %v8684_v5 = vadd.s32 128, %v8678_v3  ;;  %v367_v6 = vshra.s32 %v8678_v3, 4  ;;  %v8688_v7 = vadd.s32 16, %v8676_v2  ;;  %12193 = vst [vmem:[#allocation23_spill] sm:$0xff] %v8721_v20 }
  0x75   :  { %v8691_v8 = vadd.s32 24, %v8676_v2  ;;  %v8694_v9 = vadd.s32 384, %v8678_v3  ;;  %v8700_v11 = vadd.s32 256, %v8678_v3  ;;  %v213_v27 = vunpack.c.l.bf16 %v8721_v20  ;;  %12200 = vst [vmem:[#allocation24_spill] sm:$0xff] %v8778_v39  ;;  %v122_v43 = vld [vmem:[#allocation2 + $0xa8] sm:$0xff]  ;;  %v107_v63 = vld [vmem:[#allocation2 + $0x30] sm:$0xff]  ;;  %p8519_p9 = por %p8518_p8, %p8517_p7 }
  0x76   :  { %v368_v10 = vshra.s32 %v8684_v5, 4  ;;  %vm371_vm0 = vcmp.eq.s32.totalorder %v8676_v2, %v367_v6  ;;  %vm375_vm1 = vcmp.eq.s32.totalorder %v8681_v4, %v367_v6  ;;  %vm379_vm6 = vcmp.eq.s32.totalorder %v8688_v7, %v367_v6  ;;  %v108_v0 = vld [vmem:[#allocation2 + $0x38] sm:$0xff]  ;;  %v110_v18 = vld [vmem:[#allocation2 + $0x48] sm:$0xff]  ;;  %v125_v22 = vld [vmem:[#allocation2 + $0xc0] sm:$0xff] }
  0x77   :  { %12186 = vst [vmem:[#allocation20_spill] sm:$0xff] %v8694_v9  ;;  %12187 = vst [vmem:[#allocation21_spill] sm:$0xff] %v8700_v11  ;;  %v8703_v14 = vshra.s32 %v8694_v9, 4  ;;  %vm383_vm9 = vcmp.eq.s32.totalorder %v8691_v8, %v367_v6  ;;  %v8738_v23 = vshra.s32 %v8700_v11, 4  ;;  %v214_v28 = vunpack.c.h.bf16 %v8721_v20  ;;  %v148_v9 = vld [vmem:[#allocation2 + $0x178] sm:$0xff]  ;;  %p8520_p10 = pnand %p8519_p9, %p8513_p6 }
  0x78   :  { %vm372_vm2 = vcmp.eq.s32.totalorder %v8676_v2, %v368_v10  ;;  %vm376_vm3 = vcmp.eq.s32.totalorder %v8681_v4, %v368_v10  ;;  %vm8707_vm4 = vmpackc.low %vm375_vm1, %vm371_vm0  ;;  %vm380_vm5 = vcmp.eq.s32.totalorder %v8688_v7, %v368_v10  ;;  %vm384_vm8 = vcmp.eq.s32.totalorder %v8691_v8, %v368_v10 }
  0x79   :  { %vm8713_vm7 = vmpackc.low %vm376_vm3, %vm372_vm2  ;;  %vm374_vm11 = vcmp.eq.s32.totalorder %v8676_v2, %v8703_v14  ;;  %vm378_vm12 = vcmp.eq.s32.totalorder %v8681_v4, %v8703_v14  ;;  %vm373_vm14 = vcmp.eq.s32.totalorder %v8676_v2, %v8738_v23  ;;  %vm377_vm15 = vcmp.eq.s32.totalorder %v8681_v4, %v8738_v23  ;;  %v123_v2 = vld [vmem:[#allocation2 + $0xb0] sm:$0xff]  ;;  %v124_v4 = vld [vmem:[#allocation2 + $0xb8] sm:$0xff] }
  0x7a   :  { %6630 = vmatprep.subr.msk.bf16.mxu0 %vm8713_vm7, %v12110_v21  ;;  %7105 = vmatprep.subr.msk.bf16.mxu1 %vm8713_vm7, %v12110_v21  ;;  %vm8729_vm10 = vmpackc.low %vm384_vm8, %vm380_vm5  ;;  %v261_v33 = vsub.f32 %v101_v12, %v197_v25  ;;  %v262_v34 = vsub.f32 %v102_v13, %v198_v26  ;;  %v277_v35 = vsub.f32 %v117_v16, %v213_v27  ;;  %vm427_vm1 = vcmask 261120  }
  0x7b   :  { %6632 = vmatpush1.bf16.msk.msra.mxu0 %vm8707_vm4, %v12110_v21  ;;  %7107 = vmatpush1.bf16.msk.msra.mxu1 %vm8707_vm4, %v12110_v21  ;;  %vm8760_vm13 = vmpackc.low %vm383_vm9, %vm379_vm6  ;;  %v278_v36 = vsub.f32 %v118_v17, %v214_v28  ;;  %v8780_v40 = vpack.c.bf16 %v120_v31, %v119_v30  ;;  %v199_v47 = vunpack.c.l.bf16 %v8778_v39  ;;  %v200_v48 = vunpack.c.h.bf16 %v8778_v39  ;;  %v109_v17 = vld [vmem:[#allocation2 + $0x40] sm:$0xff] }
  0x7c   :  { %6634 = vmatprep.subr.msk.bf16.mxu0 %vm8729_vm10, %v12110_v21  ;;  %7106 = vmatprep.subr.msk.bf16.mxu1 %vm8729_vm10, %v12110_v21  ;;  %vm8774_vm0 = vmpackc.low %vm378_vm12, %vm374_vm11  ;;  %v8788_v44 = vpack.c.bf16 %v262_v34, %v261_v33  ;;  %v8812_v51 = vpack.c.bf16 %v106_v41, %v105_v38  ;;  %v8814_v52 = vpack.c.bf16 %v122_v43, %v121_v42  ;;  %vm4408_vm9 = vcmask 130048  }
  0x7d   :  { %12201 = vst [vmem:[#allocation25_spill] sm:$0xff] %v8780_v40  ;;  %v8790_v45 = vpack.c.bf16 %v278_v36, %v277_v35  ;;  %vm8801_vm2 = vmpackc.low %vm377_vm15, %vm373_vm14  ;;  %v215_v49 = vunpack.c.l.bf16 %v8780_v40  ;;  %v216_v50 = vunpack.c.h.bf16 %v8780_v40  ;;  %v263_v53 = vsub.f32 %v103_v24, %v199_v47  ;;  %v126_v24 = vld [vmem:[#allocation2 + $0xc8] sm:$0xff]  ;;  %v127_v47 = vld [vmem:[#allocation2 + $0xd0] sm:$0xff] }
  0x7e   :  { %12204 = vst [vmem:[#allocation26_spill] sm:$0xff] %v8812_v51  ;;  %12205 = vst [vmem:[#allocation27_spill] sm:$0xff] %v8814_v52  ;;  %v264_v54 = vsub.f32 %v104_v29, %v200_v48  ;;  %v201_v57 = vunpack.c.l.bf16 %v8812_v51  ;;  %v202_v58 = vunpack.c.h.bf16 %v8812_v51  ;;  %v217_v61 = vunpack.c.l.bf16 %v8814_v52  ;;  %v128_v48 = vld [vmem:[#allocation2 + $0xd8] sm:$0xff] }
  0x7f   :  { %6636 = vmatpush1.bf16.msk.msra.mxu0 %vm8760_vm13, %v12110_v21  ;;  %7108 = vmatpush1.bf16.msk.msra.mxu1 %vm8760_vm13, %v12110_v21  ;;  %v279_v55 = vsub.f32 %v119_v30, %v215_v49  ;;  %v280_v56 = vsub.f32 %v120_v31, %v216_v50  ;;  %v218_v62 = vunpack.c.h.bf16 %v8814_v52  ;;  %v8842_v12 = vpack.c.bf16 %v108_v0, %v107_v63 }
  0x80   :  { %6670 = vmatprep.subr.msk.bf16.mxu1 %vm8774_vm0, %v12110_v21  ;;  %6710 = vmatprep.subr.msk.bf16.mxu0 %vm8713_vm7, %v12110_v21  ;;  %v8833_v59 = vpack.c.bf16 %v264_v54, %v263_v53  ;;  %v265_v6 = vsub.f32 %v105_v38, %v201_v57  ;;  %v266_v10 = vsub.f32 %v106_v41, %v202_v58  ;;  %v111_v38 = vld [vmem:[#allocation2 + $0x50] sm:$0xff]  ;;  %v112_v41 = vld [vmem:[#allocation2 + $0x58] sm:$0xff] }
  0x81   :  { %v8835_v60 = vpack.c.bf16 %v280_v56, %v279_v55  ;;  %12206 = vst [vmem:[#allocation28_spill] sm:$0xff] %v8842_v12  ;;  %v281_v13 = vsub.f32 %v121_v42, %v217_v61  ;;  %v282_v15 = vsub.f32 %v122_v43, %v218_v62  ;;  %v8849_v16 = vpack.c.bf16 %v124_v4, %v123_v2 }
  0x82   :  { %6637 = vmatmul.mubr.msk.bf16.vlgmr.msra.gmra.mrb[0].mxu0 %vm427_vm1, %v8788_v44  ;;  %6645 = vmatmul.mubr.msk.bf16.vlgmr.msra.gmra.mrb[0].mxu1 %vm427_vm1, %v8790_v45  ;;  %v8853_v25 = vpack.c.bf16 %v266_v10, %v265_v6  ;;  %v203_v26 = vunpack.c.l.bf16 %v8842_v12  ;;  %v204_v28 = vunpack.c.h.bf16 %v8842_v12  ;;  %v8861_v32 = vpack.c.bf16 %v110_v18, %v109_v17  ;;  %v129_v6 = vld [vmem:[#allocation2 + $0xe0] sm:$0xff]  ;;  %v130_v10 = vld [vmem:[#allocation2 + $0xe8] sm:$0xff] }
  0x83   :  { %6672 = vmatpush1.bf16.msk.msra.mxu1 %vm8801_vm2, %v12110_v21  ;;  %566 = vmatprep.mubr.bf16.mxu0 %v12140_v1  ;;  %12207 = vst [vmem:[#allocation29_spill] sm:$0xff] %v8849_v16  ;;  %v8856_v27 = vpack.c.bf16 %v282_v15, %v281_v13  ;;  %v219_v29 = vunpack.c.l.bf16 %v8849_v16  ;;  %v220_v30 = vunpack.c.h.bf16 %v8849_v16  ;;  %v8863_v33 = vpack.c.bf16 %v126_v24, %v125_v22 }
  0x84   :  { %646 = vmatprep.mubr.bf16.mxu1 %v12140_v1  ;;  %6712 = vmatpush1.bf16.msk.msra.mxu0 %vm8707_vm4, %v12110_v21  ;;  %v267_v31 = vsub.f32 %v107_v63, %v203_v26  ;;  %12208 = vst [vmem:[#allocation30_spill] sm:$0xff] %v8861_v32  ;;  %v268_v34 = vsub.f32 %v108_v0, %v204_v28  ;;  %v205_v42 = vunpack.c.l.bf16 %v8861_v32  ;;  %v206_v43 = vunpack.c.h.bf16 %v8861_v32  ;;  %v113_v63 = vld [vmem:[#allocation2 + $0x60] sm:$0xff]  ;;  %v114_v0 = vld [vmem:[#allocation2 + $0x68] sm:$0xff] }
  0x85   :  { %6714 = vmatprep.subr.msk.bf16.mxu0 %vm8729_vm10, %v12110_v21  ;;  %12209 = vst [vmem:[#allocation31_spill] sm:$0xff] %v8863_v33  ;;  %v283_v35 = vsub.f32 %v123_v2, %v219_v29  ;;  %v284_v36 = vsub.f32 %v124_v4, %v220_v30  ;;  %v221_v53 = vunpack.c.l.bf16 %v8863_v33  ;;  %v222_v54 = vunpack.c.h.bf16 %v8863_v33 }
  0x86   :  { %v8873_v49 = vpack.c.bf16 %v268_v34, %v267_v31  ;;  %v269_v55 = vsub.f32 %v109_v17, %v205_v42  ;;  %v270_v56 = vsub.f32 %v110_v18, %v206_v43  ;;  %v8879_v57 = vpack.c.bf16 %v112_v41, %v111_v38  ;;  %v132_v42 = vld [vmem:[#allocation2 + $0xf8] sm:$0xff] }
  0x87   :  { %v8875_v50 = vpack.c.bf16 %v284_v36, %v283_v35  ;;  %v285_v58 = vsub.f32 %v125_v22, %v221_v53  ;;  %v286_v61 = vsub.f32 %v126_v24, %v222_v54  ;;  %v8885_v62 = vpack.c.bf16 %v128_v48, %v127_v47  ;;  %v115_v36 = vld [vmem:[#allocation2 + $0x70] sm:$0xff] }
  0x88   :  { %6716 = vmatpush1.bf16.msk.msra.mxu0 %vm8760_vm13, %v12110_v21  ;;  %12210 = vst [vmem:[#allocation32_spill] sm:$0xff] %v8879_v57  ;;  %vm382_vm3 = vcmp.eq.s32.totalorder %v8688_v7, %v8703_v14  ;;  %vm386_vm4 = vcmp.eq.s32.totalorder %v8691_v8, %v8703_v14  ;;  %vm381_vm5 = vcmp.eq.s32.totalorder %v8688_v7, %v8738_v23  ;;  %v207_v2 = vunpack.c.l.bf16 %v8879_v57 }
  0x89   :  { %4505 = vmatprep.subr.bf16.mxu0 %v12140_v1  ;;  %12211 = vst [vmem:[#allocation33_spill] sm:$0xff] %v8885_v62  ;;  %v208_v4 = vunpack.c.h.bf16 %v8879_v57  ;;  %vm8897_vm6 = vmpackc.low %vm386_vm4, %vm382_vm3  ;;  %vm385_vm7 = vcmp.eq.s32.totalorder %v8691_v8, %v8738_v23  ;;  %v8903_v15 = vpack.c.bf16 %v270_v56, %v269_v55  ;;  %v8905_v17 = vpack.c.bf16 %v286_v61, %v285_v58 }
  0x8a   :  { %6638 = vmatmul.mubr.msk.bf16.gmra.mrb[4].mxu0 %vm427_vm1, %v8833_v59  ;;  %6646 = vmatmul.mubr.msk.bf16.gmra.mrb[4].mxu1 %vm427_vm1, %v8835_v60  ;;  %v223_v14 = vunpack.c.l.bf16 %v8885_v62  ;;  %v224_v7 = vunpack.c.h.bf16 %v8885_v62  ;;  %vm8912_vm8 = vmpackc.low %vm385_vm7, %vm381_vm5  ;;  %v271_v8 = vsub.f32 %v111_v38, %v207_v2  ;;  %v8922_v22 = vpack.c.bf16 %v114_v0, %v113_v63  ;;  %v116_v38 = vld [vmem:[#allocation2 + $0x78] sm:$0xff] }
  0x8b   :  { %576 = vmatprep.mubr.bf16.mxu0 %v12140_v1  ;;  %656 = vmatprep.mubr.bf16.mxu1 %v12140_v1  ;;  %v272_v23 = vsub.f32 %v112_v41, %v208_v4  ;;  %v8928_v28 = vpack.c.bf16 %v130_v10, %v129_v6  ;;  %v131_v41 = vld [vmem:[#allocation2 + $0xf0] sm:$0xff]  ;;  %v133_v4 = vld [vmem:[#allocation2 + $0x100] sm:$0xff] }
  0x8c   :  { %6674 = vmatprep.subr.msk.bf16.mxu1 %vm8897_vm6, %v12110_v21  ;;  %12216 = vst [vmem:[#allocation34_spill] sm:$0xff] %v8922_v22  ;;  %v287_v24 = vsub.f32 %v127_v47, %v223_v14  ;;  %v288_v26 = vsub.f32 %v128_v48, %v224_v7  ;;  %v209_v37 = vunpack.c.l.bf16 %v8922_v22  ;;  %v210_v29 = vunpack.c.h.bf16 %v8922_v22 }
  0x8d   :  { %6676 = vmatpush1.bf16.msk.msra.mxu1 %vm8912_vm8, %v12110_v21  ;;  %12217 = vst [vmem:[#allocation35_spill] sm:$0xff] %v8928_v28  ;;  %v8934_v30 = vpack.c.bf16 %v272_v23, %v271_v8  ;;  %v225_v34 = vunpack.c.l.bf16 %v8928_v28  ;;  %v226_v35 = vunpack.c.h.bf16 %v8928_v28  ;;  %v8940_v48 = vpack.c.bf16 %v116_v38, %v115_v36 }
  0x8e   :  { %6750 = vmatprep.subr.msk.bf16.mxu1 %vm8774_vm0, %v12110_v21  ;;  %v8936_v31 = vpack.c.bf16 %v288_v26, %v287_v24  ;;  %v273_v43 = vsub.f32 %v113_v63, %v209_v37  ;;  %v274_v47 = vsub.f32 %v114_v0, %v210_v29  ;;  %v8946_v55 = vpack.c.bf16 %v132_v42, %v131_v41  ;;  %v146_v21 = vld [vmem:[#allocation2 + $0x168] sm:$0xff] }
  0x8f   :  { %12218 = vst [vmem:[#allocation36_spill] sm:$0xff] %v8940_v48  ;;  %v289_v53 = vsub.f32 %v129_v6, %v225_v34  ;;  %v290_v54 = vsub.f32 %v130_v10, %v226_v35  ;;  %v211_v56 = vunpack.c.l.bf16 %v8940_v48  ;;  %v212_v58 = vunpack.c.h.bf16 %v8940_v48  ;;  %v134_v6 = vld [vmem:[#allocation2 + $0x108] sm:$0xff]  ;;  %v135_v34 = vld [vmem:[#allocation2 + $0x110] sm:$0xff]  ;;  %v136_v35 = vld [vmem:[#allocation2 + $0x118] sm:$0xff] }
  0x90   :  { %12219 = vst [vmem:[#allocation37_spill] sm:$0xff] %v8946_v55  ;;  %v8952_v61 = vpack.c.bf16 %v274_v47, %v273_v43  ;;  %v227_v0 = vunpack.c.l.bf16 %v8946_v55  ;;  %v228_v2 = vunpack.c.h.bf16 %v8946_v55  ;;  %v8962_v23 = vpack.c.bf16 %v134_v6, %v133_v4 }
  0x91   :  { %v8954_v63 = vpack.c.bf16 %v290_v54, %v289_v53  ;;  %v275_v10 = vsub.f32 %v115_v36, %v211_v56  ;;  %v276_v14 = vsub.f32 %v116_v38, %v212_v58  ;;  %v137_v53 = vld [vmem:[#allocation2 + $0x120] sm:$0xff]  ;;  %v138_v54 = vld [vmem:[#allocation2 + $0x128] sm:$0xff] }
  0x92   :  { %6639 = vmatmul.mubr.msk.bf16.gmra.mrb[8].mxu0 %vm427_vm1, %v8853_v25  ;;  %6647 = vmatmul.mubr.msk.bf16.gmra.mrb[8].mxu1 %vm427_vm1, %v8856_v27  ;;  %v291_v7 = vsub.f32 %v131_v41, %v227_v0  ;;  %v292_v8 = vsub.f32 %v132_v42, %v228_v2  ;;  %12220 = vst [vmem:[#allocation38_spill] sm:$0xff] %v8962_v23  ;;  %v229_v37 = vunpack.c.l.bf16 %v8962_v23  ;;  %v230_v29 = vunpack.c.h.bf16 %v8962_v23  ;;  %v7637_v56 = vld [vmem:[#allocation7] sm:$0xff]  }
  0x93   :  { %586 = vmatprep.mubr.bf16.mxu0 %v12140_v1  ;;  %666 = vmatprep.mubr.bf16.mxu1 %v12140_v1  ;;  %v8966_v24 = vpack.c.bf16 %v276_v14, %v275_v10  ;;  %v8976_v41 = vpack.c.bf16 %v136_v35, %v135_v34  ;;  %v8988_v2 = vpack.c.bf16 %v138_v54, %v137_v53  ;;  %v139_v14 = vld [vmem:[#allocation2 + $0x130] sm:$0xff] }
  0x94   :  { %v8968_v26 = vpack.c.bf16 %v292_v8, %v291_v7  ;;  %v293_v36 = vsub.f32 %v133_v4, %v229_v37  ;;  %v294_v38 = vsub.f32 %v134_v6, %v230_v29  ;;  %v140_v7 = vld [vmem:[#allocation2 + $0x138] sm:$0xff] }
  0x95   :  { %12221 = vst [vmem:[#allocation39_spill] sm:$0xff] %v8976_v41  ;;  %v231_v43 = vunpack.c.l.bf16 %v8976_v41  ;;  %v232_v47 = vunpack.c.h.bf16 %v8976_v41  ;;  %12222 = vst [vmem:[#allocation40_spill] sm:$0xff] %v8988_v2  ;;  %v233_v6 = vunpack.c.l.bf16 %v8988_v2  ;;  %v234_v10 = vunpack.c.h.bf16 %v8988_v2 }
  0x96   :  { %v8980_v42 = vpack.c.bf16 %v294_v38, %v293_v36  ;;  %v9001_v29 = vpack.c.bf16 %v140_v7, %v139_v14 }
  0x97   :  { %v295_v58 = vsub.f32 %v135_v34, %v231_v43  ;;  %v296_v0 = vsub.f32 %v136_v35, %v232_v47  ;;  %v297_v8 = vsub.f32 %v137_v53, %v233_v6  ;;  %v298_v37 = vsub.f32 %v138_v54, %v234_v10  ;;  %v7638_v34 = vld [vmem:[#allocation7 + $0x8] sm:$0xff]   ;;  %v141_v43 = vld [vmem:[#allocation2 + $0x140] sm:$0xff]  ;;  %v143_v10 = vld [vmem:[#allocation2 + $0x150] sm:$0xff] }
  0x98   :  { %12223 = vst [vmem:[#allocation41_spill] sm:$0xff] %v9001_v29  ;;  %v235_v36 = vunpack.c.l.bf16 %v9001_v29  ;;  %v236_v38 = vunpack.c.h.bf16 %v9001_v29  ;;  %v142_v47 = vld [vmem:[#allocation2 + $0x148] sm:$0xff] }
  0x99   :  { %v8993_v4 = vpack.c.bf16 %v296_v0, %v295_v58  ;;  %v9006_v35 = vpack.c.bf16 %v298_v37, %v297_v8  ;;  %v144_v8 = vld [vmem:[#allocation2 + $0x158] sm:$0xff] }
  0x9a   :  { %6640 = vmatmul.mubr.msk.bf16.gmra.mrb[12].mxu0 %vm427_vm1, %v8873_v49  ;;  %6648 = vmatmul.mubr.msk.bf16.gmra.mrb[12].mxu1 %vm427_vm1, %v8875_v50  ;;  %v299_v53 = vsub.f32 %v139_v14, %v235_v36  ;;  %v300_v54 = vsub.f32 %v140_v7, %v236_v38  ;;  %v9026_v37 = vpack.c.bf16 %v144_v8, %v143_v10 }
  0x9b   :  { %596 = vmatprep.mubr.bf16.mxu0 %v12140_v1  ;;  %676 = vmatprep.mubr.bf16.mxu1 %v12140_v1 }
  0x9c   :  { %v9018_v58 = vpack.c.bf16 %v300_v54, %v299_v53  ;;  %12225 = vst [vmem:[#allocation43_spill] sm:$0xff] %v9026_v37  ;;  %v239_v38 = vunpack.c.l.bf16 %v9026_v37  ;;  %v240_v53 = vunpack.c.h.bf16 %v9026_v37  ;;  %v145_v54 = vld [vmem:[#allocation2 + $0x160] sm:$0xff] }
  0xa2   :  { %6641 = vmatmul.mubr.msk.bf16.gmra.mrb[16].mxu0 %vm427_vm1, %v8903_v15  ;;  %6649 = vmatmul.mubr.msk.bf16.gmra.mrb[16].mxu1 %vm427_vm1, %v8905_v17 }
  0xa3   :  { %606 = vmatprep.mubr.bf16.mxu0 %v12140_v1  ;;  %686 = vmatprep.mubr.bf16.mxu1 %v12140_v1 }
  0xaa   :  { %6642 = vmatmul.mubr.msk.bf16.gmra.mrb[20].mxu0 %vm427_vm1, %v8934_v30  ;;  %6650 = vmatmul.mubr.msk.bf16.gmra.mrb[20].mxu1 %vm427_vm1, %v8936_v31 }
  0xab   :  { %616 = vmatprep.mubr.bf16.mxu0 %v12140_v1  ;;  %696 = vmatprep.mubr.bf16.mxu1 %v12140_v1 }
  0xb2   :  { %6643 = vmatmul.mubr.msk.bf16.gmra.mrb[24].mxu0 %vm427_vm1, %v8952_v61  ;;  %6651 = vmatmul.mubr.msk.bf16.gmra.mrb[24].mxu1 %vm427_vm1, %v8954_v63 }
  0xb3   :  { %626 = vmatprep.mubr.bf16.mxu0 %v12140_v1  ;;  %706 = vmatprep.mubr.bf16.mxu1 %v12140_v1 }
  0xba   :  { %6644 = vmatmul.mubr.msk.bf16.gmra.mrb[28].mxu0 %vm427_vm1, %v8966_v24  ;;  %6652 = vmatmul.mubr.msk.bf16.gmra.mrb[28].mxu1 %vm427_vm1, %v8968_v26 }
  0xbb   :  { %716 = vmatprep.mubr.bf16.mxu1 %v12140_v1  ;;  %1358 = vmatprep.mubr.bf16.mxu0 %v12140_v1 }
  0xc2   :  { %6653 = vmatmul.mubr.msk.bf16.gmra.mrb[32].mxu1 %vm427_vm1, %v8980_v42  ;;  %6717 = vmatmul.mubr.msk.bf16.vlgmr.msra.gmra.mrb[0].mxu0 %vm427_vm1, %v8719_v19  ;;  %v157_v19 = vld [vmem:[#allocation2 + $0x1c0] sm:$0xff] }
  0xc3   :  { %726 = vmatprep.mubr.bf16.mxu1 %v12140_v1  ;;  %1368 = vmatprep.mubr.bf16.mxu0 %v12140_v1 }
  0xc4   :  { %4506 = vmatpush1.bf16.msra.mxu0 %v7637_v56  ;;  %v9014_v56 = vpack.c.bf16 %v142_v47, %v141_v43 }
  0xc5   :  { %4507 = vmatprep.subr.bf16.mxu0 %v12140_v1 }
  0xc6   :  { %12224 = vst [vmem:[#allocation42_spill] sm:$0xff] %v9014_v56  ;;  %v237_v0 = vunpack.c.l.bf16 %v9014_v56  ;;  %v238_v6 = vunpack.c.h.bf16 %v9014_v56 }
  0xc8   :  { %4508 = vmatpush1.bf16.msra.mxu0 %v7638_v34  ;;  %v301_v14 = vsub.f32 %v141_v43, %v237_v0  ;;  %v302_v7 = vsub.f32 %v142_v47, %v238_v6  ;;  %v7639_v34 = vld [vmem:[#allocation7 + $0x10] sm:$0xff]   ;;  %v303_v43 = vsub.f32 %v143_v10, %v239_v38  ;;  %v304_v47 = vsub.f32 %v144_v8, %v240_v53  ;;  %v7640_v53 = vld [vmem:[#allocation7 + $0x18] sm:$0xff]  }
  0xc9   :  { %4509 = vmatprep.subr.bf16.mxu0 %v12140_v1  ;;  %v9039_v0 = vpack.c.bf16 %v146_v21, %v145_v54 }
  0xca   :  { %6654 = vmatmul.mubr.msk.bf16.gmra.mrb[36].mxu1 %vm427_vm1, %v8993_v4  ;;  %6718 = vmatmul.mubr.msk.bf16.gmra.mrb[4].mxu0 %vm427_vm1, %v8778_v39  ;;  %v9031_v36 = vpack.c.bf16 %v302_v7, %v301_v14  ;;  %v9043_v6 = vpack.c.bf16 %v304_v47, %v303_v43  ;;  %v156_v39 = vld [vmem:[#allocation2 + $0x1b8] sm:$0xff] }
  0xcb   :  { %736 = vmatprep.mubr.bf16.mxu1 %v12140_v1  ;;  %1378 = vmatprep.mubr.bf16.mxu0 %v12140_v1  ;;  %12226 = vst [vmem:[#allocation44_spill] sm:$0xff] %v9039_v0  ;;  %v241_v14 = vunpack.c.l.bf16 %v9039_v0  ;;  %v242_v7 = vunpack.c.h.bf16 %v9039_v0 }
  0xcc   :  { %4510 = vmatpush1.bf16.msra.mxu0 %v7639_v34  ;;  %v147_v34 = vld [vmem:[#allocation2 + $0x170] sm:$0xff] }
  0xcd   :  { %4511 = vmatprep.subr.bf16.mxu0 %v12140_v1  ;;  %v305_v10 = vsub.f32 %v145_v54, %v241_v14  ;;  %v306_v8 = vsub.f32 %v146_v21, %v242_v7  ;;  %v9051_v38 = vpack.c.bf16 %v148_v9, %v147_v34 }
  0xcf   :  { %12227 = vst [vmem:[#allocation45_spill] sm:$0xff] %v9051_v38  ;;  %v9056_v43 = vpack.c.bf16 %v306_v8, %v305_v10  ;;  %v243_v47 = vunpack.c.l.bf16 %v9051_v38  ;;  %v244_v11 = vunpack.c.h.bf16 %v9051_v38 }
  0xd0   :  { %4512 = vmatpush1.bf16.msra.mxu0 %v7640_v53  ;;  %v151_v53 = vld [vmem:[#allocation2 + $0x190] sm:$0xff] }
  0xd1   :  { %4513 = vmatprep.subr.bf16.mxu0 %v12140_v1  ;;  %v307_v21 = vsub.f32 %v147_v34, %v243_v47  ;;  %v308_v54 = vsub.f32 %v148_v9, %v244_v11  ;;  %v7641_v47 = vld [vmem:[#allocation7 + $0x20] sm:$0xff]  }
  0xd2   :  { %6655 = vmatmul.mubr.msk.bf16.gmra.mrb[40].mxu1 %vm427_vm1, %v9006_v35  ;;  %6719 = vmatmul.mubr.msk.bf16.gmra.mrb[8].mxu0 %vm427_vm1, %v8812_v51  ;;  %v153_v51 = vld [vmem:[#allocation2 + $0x1a0] sm:$0xff] }
  0xd3   :  { %746 = vmatprep.mubr.bf16.mxu1 %v12140_v1  ;;  %1388 = vmatprep.mubr.bf16.mxu0 %v12140_v1  ;;  %v9068_v7 = vpack.c.bf16 %v308_v54, %v307_v21 }
  0xd4   :  { %4514 = vmatpush1.bf16.msra.mxu0 %v7641_v47  ;;  %v155_v47 = vld [vmem:[#allocation2 + $0x1b0] sm:$0xff] }
  0xd5   :  { %4515 = vmatprep.subr.bf16.mxu0 %v12140_v1 }
  0xda   :  { %6656 = vmatmul.mubr.msk.bf16.gmra.mrb[44].mxu1 %vm427_vm1, %v9018_v58  ;;  %6720 = vmatmul.mubr.msk.bf16.gmra.mrb[12].mxu0 %vm427_vm1, %v8842_v12  ;;  %v152_v12 = vld [vmem:[#allocation2 + $0x198] sm:$0xff] }
  0xdb   :  { %756 = vmatprep.mubr.bf16.mxu1 %v12140_v1  ;;  %1398 = vmatprep.mubr.bf16.mxu0 %v12140_v1  ;;  %v9076_v34 = vpack.c.bf16 %v152_v12, %v151_v53 }
  0xdd   :  { %12229 = vst [vmem:[#allocation47_spill] sm:$0xff] %v9076_v34  ;;  %v247_v54 = vunpack.c.l.bf16 %v9076_v34 }
  0xe2   :  { %6657 = vmatmul.mubr.msk.bf16.gmra.mrb[48].mxu1 %vm427_vm1, %v9031_v36  ;;  %6721 = vmatmul.mubr.msk.bf16.gmra.mrb[16].mxu0 %vm427_vm1, %v8861_v32  ;;  %v149_v32 = vld [vmem:[#allocation2 + $0x180] sm:$0xff] }
  0xe3   :  { %766 = vmatprep.mubr.bf16.mxu1 %v12140_v1  ;;  %1408 = vmatprep.mubr.bf16.mxu0 %v12140_v1 }
  0xea   :  { %6658 = vmatmul.mubr.msk.bf16.gmra.mrb[52].mxu1 %vm427_vm1, %v9043_v6  ;;  %6722 = vmatmul.mubr.msk.bf16.gmra.mrb[20].mxu0 %vm427_vm1, %v8879_v57  ;;  %v150_v57 = vld [vmem:[#allocation2 + $0x188] sm:$0xff] }
  0xeb   :  { %776 = vmatprep.mubr.bf16.mxu1 %v12140_v1  ;;  %1418 = vmatprep.mubr.bf16.mxu0 %v12140_v1  ;;  %v9064_v14 = vpack.c.bf16 %v150_v57, %v149_v32 }
  0xed   :  { %12228 = vst [vmem:[#allocation46_spill] sm:$0xff] %v9064_v14  ;;  %v245_v10 = vunpack.c.l.bf16 %v9064_v14  ;;  %v246_v8 = vunpack.c.h.bf16 %v9064_v14 }
  0xef   :  { %v309_v9 = vsub.f32 %v149_v32, %v245_v10  ;;  %v310_v11 = vsub.f32 %v150_v57, %v246_v8  ;;  %v311_v32 = vsub.f32 %v151_v53, %v247_v54  ;;  %v9101_v53 = vpack.c.bf16 %v156_v39, %v155_v47  ;;  %v7642_v54 = vld [vmem:[#allocation7 + $0x28] sm:$0xff]  }
  0xf0   :  { %4516 = vmatpush1.bf16.msra.mxu0 %v7642_v54  ;;  %v159_v54 = vld [vmem:[#allocation2 + $0x1d0] sm:$0xff] }
  0xf1   :  { %v9081_v21 = vpack.c.bf16 %v310_v11, %v309_v9  ;;  %12233 = vst [vmem:[#allocation51_spill] sm:$0xff] %v9101_v53  ;;  %4517 = vmatprep.subr.bf16.mxu0 %v12140_v1 }
  0xf2   :  { %6659 = vmatmul.mubr.msk.bf16.gmra.mrb[56].mxu1 %vm427_vm1, %v9056_v43  ;;  %6723 = vmatmul.mubr.msk.bf16.gmra.mrb[24].mxu0 %vm427_vm1, %v8922_v22  ;;  %v248_v22 = vunpack.c.h.bf16 %v9076_v34 }
  0xf3   :  { %786 = vmatprep.mubr.bf16.mxu1 %v12140_v1  ;;  %1428 = vmatprep.mubr.bf16.mxu0 %v12140_v1  ;;  %12230 = vst [vmem:[#allocation48_spill] sm:$0xff] %v9081_v21 }
  0xf4   :  { %v312_v57 = vsub.f32 %v152_v12, %v248_v22 }
  0xf6   :  { %v9093_v8 = vpack.c.bf16 %v312_v57, %v311_v32  ;;  %v251_v57 = vunpack.c.l.bf16 %v9101_v53 }
  0xf8   :  { %12232 = vst [vmem:[#allocation50_spill] sm:$0xff] %v9093_v8 }
  0xfa   :  { %6660 = vmatmul.mubr.msk.bf16.gmra.mrb[60].mxu1 %vm427_vm1, %v9068_v7  ;;  %6724 = vmatmul.mubr.msk.bf16.gmra.mrb[28].mxu0 %vm427_vm1, %v8940_v48  ;;  %v154_v48 = vld [vmem:[#allocation2 + $0x1a8] sm:$0xff] }
  0xfb   :  { %796 = vmatprep.mubr.bf16.mxu1 %v12140_v1  ;;  %1438 = vmatprep.mubr.bf16.mxu0 %v12140_v1  ;;  %v9089_v10 = vpack.c.bf16 %v154_v48, %v153_v51 }
  0xfd   :  { %12231 = vst [vmem:[#allocation49_spill] sm:$0xff] %v9089_v10  ;;  %v249_v9 = vunpack.c.l.bf16 %v9089_v10  ;;  %v250_v11 = vunpack.c.h.bf16 %v9089_v10 }
  0xff   :  { %v313_v12 = vsub.f32 %v153_v51, %v249_v9  ;;  %v314_v22 = vsub.f32 %v154_v48, %v250_v11  ;;  %v315_v51 = vsub.f32 %v155_v47, %v251_v57  ;;  %v7644_v57 = vld [vmem:[#allocation7 + $0x38] sm:$0xff]  }
 0x101   :  { %v9106_v32 = vpack.c.bf16 %v314_v22, %v313_v12 }
 0x102   :  { %6661 = vmatmul.mubr.msk.bf16.gmra.mrb[64].mxu1 %vm427_vm1, %v9081_v21  ;;  %6725 = vmatmul.mubr.msk.bf16.gmra.mrb[32].mxu0 %vm427_vm1, %v8721_v20  ;;  %v252_v20 = vunpack.c.h.bf16 %v9101_v53 }
 0x103   :  { %806 = vmatprep.mubr.bf16.mxu1 %v12140_v1  ;;  %1448 = vmatprep.mubr.bf16.mxu0 %v12140_v1  ;;  %12234 = vst [vmem:[#allocation52_spill] sm:$0xff] %v9106_v32 }
 0x104   :  { %v316_v48 = vsub.f32 %v156_v39, %v252_v20 }
 0x106   :  { %v9118_v11 = vpack.c.bf16 %v316_v48, %v315_v51 }
 0x108   :  { %12236 = vst [vmem:[#allocation54_spill] sm:$0xff] %v9118_v11 }
 0x10a   :  { %6662 = vmatmul.mubr.msk.bf16.gmra.mrb[68].mxu1 %vm427_vm1, %v9093_v8  ;;  %6726 = vmatmul.mubr.msk.bf16.gmra.mrb[36].mxu0 %vm427_vm1, %v8780_v40  ;;  %v158_v40 = vld [vmem:[#allocation2 + $0x1c8] sm:$0xff]  ;;  %v160_v8 = vld [vmem:[#allocation2 + $0x1d8] sm:$0xff] }
 0x10b   :  { %816 = vmatprep.mubr.bf16.mxu1 %v12140_v1  ;;  %1458 = vmatprep.mubr.bf16.mxu0 %v12140_v1  ;;  %v9114_v9 = vpack.c.bf16 %v158_v40, %v157_v19  ;;  %v9126_v47 = vpack.c.bf16 %v160_v8, %v159_v54 }
 0x10d   :  { %12235 = vst [vmem:[#allocation53_spill] sm:$0xff] %v9114_v9  ;;  %v253_v12 = vunpack.c.l.bf16 %v9114_v9  ;;  %v254_v22 = vunpack.c.h.bf16 %v9114_v9  ;;  %12237 = vst [vmem:[#allocation55_spill] sm:$0xff] %v9126_v47  ;;  %v255_v48 = vunpack.c.l.bf16 %v9126_v47 }
 0x10f   :  { %v317_v20 = vsub.f32 %v157_v19, %v253_v12  ;;  %v318_v39 = vsub.f32 %v158_v40, %v254_v22  ;;  %v7645_v19 = vld [vmem:[#allocation7 + $0x40] sm:$0xff]   ;;  %v319_v40 = vsub.f32 %v159_v54, %v255_v48  ;;  %v7646_v22 = vld [vmem:[#allocation7 + $0x48] sm:$0xff]  }
 0x111   :  { %v9131_v51 = vpack.c.bf16 %v318_v39, %v317_v20 }
 0x112   :  { %6663 = vmatmul.mubr.msk.bf16.gmra.mrb[72].mxu1 %vm427_vm1, %v9106_v32  ;;  %6727 = vmatmul.mubr.msk.bf16.gmra.mrb[40].mxu0 %vm427_vm1, %v8814_v52  ;;  %v7643_v32 = vld [vmem:[#allocation7 + $0x30] sm:$0xff]   ;;  %v256_v52 = vunpack.c.h.bf16 %v9126_v47 }
 0x113   :  { %826 = vmatprep.mubr.bf16.mxu1 %v12140_v1  ;;  %1468 = vmatprep.mubr.bf16.mxu0 %v12140_v1  ;;  %12238 = vst [vmem:[#allocation56_spill] sm:$0xff] %v9131_v51 }
 0x114   :  { %4518 = vmatpush1.bf16.msra.mxu0 %v7643_v32  ;;  %v320_v32 = vsub.f32 %v160_v8, %v256_v52  ;;  %v7647_v52 = vld [vmem:[#allocation7 + $0x50] sm:$0xff]  }
 0x115   :  { %4519 = vmatprep.subr.bf16.mxu0 %v12140_v1 }
 0x116   :  { %v9145_v20 = vpack.c.bf16 %v320_v32, %v319_v40 }
 0x118   :  { %4520 = vmatpush1.bf16.msra.mxu0 %v7644_v57  ;;  %12240 = vst [vmem:[#allocation58_spill] sm:$0xff] %v9145_v20 }
 0x119   :  { %4521 = vmatprep.subr.bf16.mxu0 %v12140_v1 }
 0x11a   :  { %6664 = vmatmul.mubr.msk.bf16.gmra.mrb[76].mxu1 %vm427_vm1, %v9118_v11  ;;  %6728 = vmatmul.mubr.msk.bf16.gmra.mrb[44].mxu0 %vm427_vm1, %v8849_v16  ;;  %v161_v11 = vld [vmem:[#allocation2 + $0x1e0] sm:$0xff]  ;;  %v162_v16 = vld [vmem:[#allocation2 + $0x1e8] sm:$0xff] }
 0x11b   :  { %836 = vmatprep.mubr.bf16.mxu1 %v12140_v1  ;;  %1478 = vmatprep.mubr.bf16.mxu0 %v12140_v1  ;;  %v9140_v12 = vpack.c.bf16 %v162_v16, %v161_v11 }
 0x11c   :  { %4522 = vmatpush1.bf16.msra.mxu0 %v7645_v19  ;;  %v7648_v19 = vld [vmem:[#allocation7 + $0x58] sm:$0xff]  }
 0x11d   :  { %12239 = vst [vmem:[#allocation57_spill] sm:$0xff] %v9140_v12  ;;  %4523 = vmatprep.subr.bf16.mxu0 %v12140_v1  ;;  %v257_v39 = vunpack.c.l.bf16 %v9140_v12  ;;  %v258_v57 = vunpack.c.h.bf16 %v9140_v12 }
 0x11f   :  { %v321_v8 = vsub.f32 %v161_v11, %v257_v39  ;;  %v322_v54 = vsub.f32 %v162_v16, %v258_v57  ;;  %v7649_v16 = vld [vmem:[#allocation7 + $0x60] sm:$0xff]   ;;  %v7650_v57 = vld [vmem:[#allocation7 + $0x68] sm:$0xff]  }
 0x120   :  { %4524 = vmatpush1.bf16.msra.mxu0 %v7646_v22 }
 0x121   :  { %4525 = vmatprep.subr.bf16.mxu0 %v12140_v1  ;;  %v9159_v40 = vpack.c.bf16 %v322_v54, %v321_v8  ;;  %v7651_v8 = vld [vmem:[#allocation7 + $0x70] sm:$0xff]  }
 0x122   :  { %6665 = vmatmul.mubr.msk.bf16.gmra.mrb[80].mxu1 %vm427_vm1, %v9131_v51  ;;  %6729 = vmatmul.mubr.msk.bf16.gmra.mrb[48].mxu0 %vm427_vm1, %v8863_v33  ;;  %v163_v51 = vld [vmem:[#allocation2 + $0x1f0] sm:$0xff]  ;;  %v164_v33 = vld [vmem:[#allocation2 + $0x1f8] sm:$0xff] }
 0x123   :  { %846 = vmatprep.mubr.bf16.mxu1 %v12140_v1  ;;  %1488 = vmatprep.mubr.bf16.mxu0 %v12140_v1  ;;  %v9154_v48 = vpack.c.bf16 %v164_v33, %v163_v51  ;;  %12242 = vst [vmem:[#allocation60_spill] sm:$0xff] %v9159_v40 }
 0x124   :  { %4526 = vmatpush1.bf16.msra.mxu0 %v7647_v52 }
 0x125   :  { %12241 = vst [vmem:[#allocation59_spill] sm:$0xff] %v9154_v48  ;;  %4527 = vmatprep.subr.bf16.mxu0 %v12140_v1  ;;  %v259_v32 = vunpack.c.l.bf16 %v9154_v48  ;;  %v260_v22 = vunpack.c.h.bf16 %v9154_v48 }
 0x127   :  { %v323_v11 = vsub.f32 %v163_v51, %v259_v32  ;;  %v324_v39 = vsub.f32 %v164_v33, %v260_v22  ;;  %v7652_v33 = vld [vmem:[#allocation7 + $0x78] sm:$0xff]   ;;  %v12244_v51 = vmov 1.0|1.0  }
 0x128   :  { %4528 = vmatpush1.bf16.msra.mxu0 %v7648_v19 }
 0x129   :  { %4529 = vmatprep.subr.bf16.mxu0 %v12140_v1  ;;  %v9171_v52 = vpack.c.bf16 %v324_v39, %v323_v11 }
 0x12a   :  { %6666 = vmatmul.mubr.msk.bf16.gmra.mrb[84].mxu1 %vm427_vm1, %v9145_v20  ;;  %6730 = vmatmul.mubr.msk.bf16.gmra.mrb[52].mxu0 %vm427_vm1, %v8885_v62 }
 0x12b   :  { %856 = vmatprep.mubr.bf16.mxu1 %v12140_v1  ;;  %1498 = vmatprep.mubr.bf16.mxu0 %v12140_v1  ;;  %12243 = vst [vmem:[#allocation61_spill] sm:$0xff] %v9171_v52 }
 0x12c   :  { %4530 = vmatpush1.bf16.msra.mxu0 %v7649_v16 }
 0x12d   :  { %4531 = vmatprep.subr.bf16.mxu0 %v12140_v1 }
 0x130   :  { %4532 = vmatpush1.bf16.msra.mxu0 %v7650_v57 }
 0x131   :  { %4533 = vmatprep.subr.bf16.mxu0 %v12140_v1 }
 0x132   :  { %6667 = vmatmul.mubr.msk.bf16.gmra.mrb[88].mxu1 %vm427_vm1, %v9159_v40  ;;  %6731 = vmatmul.mubr.msk.bf16.gmra.mrb[56].mxu0 %vm427_vm1, %v8928_v28 }
 0x133   :  { %866 = vmatprep.mubr.bf16.mxu1 %v12140_v1  ;;  %1508 = vmatprep.mubr.bf16.mxu0 %v12140_v1 }
 0x134   :  { %4534 = vmatpush1.bf16.msra.mxu0 %v7651_v8 }
 0x135   :  { %4535 = vmatprep.subr.bf16.mxu0 %v12140_v1 }
 0x138   :  { %4536 = vmatpush1.bf16.msra.mxu0 %v7652_v33 }
 0x139   :  { %4794 = vmatprep.subr.bf16.mxu0 %v12140_v1 }
 0x13a   :  { %6668 = vmatmul.mubr.msk.bf16.gmra.mrb[92].mxu1 %vm427_vm1, %v9171_v52  ;;  %6732 = vmatmul.mubr.msk.bf16.gmra.mrb[60].mxu0 %vm427_vm1, %v8946_v55 }
 0x13b   :  { %909 = vmatprep.mubr.bf16.mxu1 %v12140_v1  ;;  %1518 = vmatprep.mubr.bf16.mxu0 %v12140_v1 }
 0x142   :  { %6677 = vmatmul.mubr.msk.bf16.vlgmr.msra.gmra.mrb[96].mxu1 %vm427_vm1, %v8788_v44  ;;  %6733 = vmatmul.mubr.msk.bf16.gmra.mrb[64].mxu0 %vm427_vm1, %v8962_v23 }
 0x143   :  { %6752 = vmatpush1.bf16.msk.msra.mxu1 %vm8801_vm2, %v12244_v51  ;;  %919 = vmatprep.mubr.bf16.mxu1 %v12140_v1 }
 0x144   :  { %1528 = vmatprep.mubr.bf16.mxu0 %v12140_v1  ;;  %6754 = vmatprep.subr.msk.bf16.mxu1 %vm8897_vm6, %v12244_v51 }
 0x147   :  { %6756 = vmatpush1.bf16.msk.msra.mxu1 %vm8912_vm8, %v12244_v51 }
 0x14a   :  { %6678 = vmatmul.mubr.msk.bf16.gmra.mrb[100].mxu1 %vm427_vm1, %v8833_v59  ;;  %6734 = vmatmul.mubr.msk.bf16.gmra.mrb[68].mxu0 %vm427_vm1, %v8976_v41 }
 0x14b   :  { %929 = vmatprep.mubr.bf16.mxu1 %v12140_v1  ;;  %1538 = vmatprep.mubr.bf16.mxu0 %v12140_v1 }
 0x152   :  { %6679 = vmatmul.mubr.msk.bf16.gmra.mrb[104].mxu1 %vm427_vm1, %v8853_v25  ;;  %6735 = vmatmul.mubr.msk.bf16.gmra.mrb[72].mxu0 %vm427_vm1, %v8988_v2  ;;  %v2033_v2 = vand.u32 15, %v8684_v5 }
 0x153   :  { %939 = vmatprep.mubr.bf16.mxu1 %v12140_v1  ;;  %1548 = vmatprep.mubr.bf16.mxu0 %v12140_v1 }
 0x155   :  { %v9209_v44 = vpop.f32.mrb[0].mxu1 }
 0x156   :  { %v9211_v46 = vpop.f32.mrb[1].mxu1 }
 0x157   :  { %v9213_v59 = vpop.f32.mrb[2].mxu1 }
 0x158   :  { %v9215_v13 = vpop.f32.mrb[3].mxu1 }
 0x15a   :  { %6680 = vmatmul.mubr.msk.bf16.gmra.mrb[108].mxu1 %vm427_vm1, %v8873_v49  ;;  %6736 = vmatmul.mubr.msk.bf16.gmra.mrb[76].mxu0 %vm427_vm1, %v9001_v29  ;;  %v2032_v29 = vand.u32 15, %v8678_v3 }
 0x15b   :  { %949 = vmatprep.mubr.bf16.mxu1 %v12140_v1  ;;  %1558 = vmatprep.mubr.bf16.mxu0 %v12140_v1 }
 0x15d   :  { %v9223_v25 = vpop.f32.mrb[4].mxu1 }
 0x15e   :  { %v9225_v18 = vpop.f32.mrb[5].mxu1 }
 0x15f   :  { %v9227_v54 = vpop.f32.mrb[6].mxu1 }
 0x160   :  { %v9229_v19 = vpop.f32.mrb[7].mxu1 }
 0x162   :  { %6681 = vmatmul.mubr.msk.bf16.gmra.mrb[112].mxu1 %vm427_vm1, %v8903_v15  ;;  %6737 = vmatmul.mubr.msk.bf16.gmra.mrb[80].mxu0 %vm427_vm1, %v9014_v56 }
 0x163   :  { %959 = vmatprep.mubr.bf16.mxu1 %v12140_v1  ;;  %1568 = vmatprep.mubr.bf16.mxu0 %v12140_v1 }
 0x165   :  { %v9237_v49 = vpop.f32.mrb[8].mxu1 }
 0x166   :  { %v9239_v32 = vpop.f32.mrb[9].mxu1 }
 0x167   :  { %v9241_v22 = vpop.f32.mrb[10].mxu1 }
 0x168   :  { %v9243_v16 = vpop.f32.mrb[11].mxu1 }
 0x16a   :  { %6682 = vmatmul.mubr.msk.bf16.gmra.mrb[116].mxu1 %vm427_vm1, %v8934_v30  ;;  %6738 = vmatmul.mubr.msk.bf16.gmra.mrb[84].mxu0 %vm427_vm1, %v9026_v37 }
 0x16b   :  { %969 = vmatprep.mubr.bf16.mxu1 %v12140_v1  ;;  %1578 = vmatprep.mubr.bf16.mxu0 %v12140_v1 }
 0x16d   :  { %v9251_v15 = vpop.f32.mrb[12].mxu1 }
 0x16e   :  { %v9253_v11 = vpop.f32.mrb[13].mxu1 }
 0x16f   :  { %v9255_v39 = vpop.f32.mrb[14].mxu1 }
 0x170   :  { %v9257_v57 = vpop.f32.mrb[15].mxu1 }
 0x172   :  { %6683 = vmatmul.mubr.msk.bf16.gmra.mrb[120].mxu1 %vm427_vm1, %v8952_v61  ;;  %6739 = vmatmul.mubr.msk.bf16.gmra.mrb[88].mxu0 %vm427_vm1, %v9039_v0 }
 0x173   :  { %979 = vmatprep.mubr.bf16.mxu1 %v12140_v1  ;;  %1588 = vmatprep.mubr.bf16.mxu0 %v12140_v1 }
 0x175   :  { %v9265_v30 = vpop.f32.mrb[16].mxu1 }
 0x176   :  { %v9267_v8 = vpop.f32.mrb[17].mxu1 }
 0x177   :  { %v9269_v33 = vpop.f32.mrb[18].mxu1 }
 0x178   :  { %v9271_v51 = vpop.f32.mrb[19].mxu1 }
 0x17a   :  { %6684 = vmatmul.mubr.msk.bf16.gmra.mrb[124].mxu1 %vm427_vm1, %v8966_v24  ;;  %6740 = vmatmul.mubr.msk.bf16.gmra.mrb[92].mxu0 %vm427_vm1, %v9051_v38 }
 0x17b   :  { %989 = vmatprep.mubr.bf16.mxu1 %v12140_v1  ;;  %1598 = vmatprep.mubr.bf16.mxu0 %v12140_v1 }
 0x17d   :  { %v9279_v61 = vpop.f32.mrb[20].mxu1 }
 0x17e   :  { %v9281_v0 = vpop.f32.mrb[21].mxu1 }
 0x17f   :  { %v9283_v37 = vpop.f32.mrb[22].mxu1 }
 0x180   :  { %12245 = vst [vmem:[#allocation62_spill] sm:$0xff] %v9283_v37  ;;  %v9285_v56 = vpop.f32.mrb[23].mxu1 }
 0x181   :  { %12246 = vst [vmem:[#allocation63_spill] sm:$0xff] %v9285_v56 }
 0x182   :  { %6685 = vmatmul.mubr.msk.bf16.gmra.mrb[128].mxu1 %vm427_vm1, %v8790_v45  ;;  %6741 = vmatmul.mubr.msk.bf16.gmra.mrb[96].mxu0 %vm427_vm1, %v9064_v14  ;;  %v2036_v45 = vcvt.s32.f32 %v2032_v29  ;;  %v12251_v14 = vmov 0  }
 0x183   :  { %999 = vmatprep.mubr.bf16.mxu1 %v12140_v1  ;;  %1608 = vmatprep.mubr.bf16.mxu0 %v12140_v1  ;;  %v2037_v1 = vcvt.s32.f32 %v2033_v2 }
 0x184   :  { %v2040_v5 = vmul.f32 1.3333334, %v2036_v45 }
 0x185   :  { %v9293_v24 = vpop.f32.mrb[24].mxu1  ;;  %v2041_v28 = vmul.f32 1.3333334, %v2037_v1 }
 0x186   :  { %12247 = vst [vmem:[#allocation64_spill] sm:$0xff] %v9293_v24  ;;  %v9295_v38 = vpop.f32.mrb[25].mxu1 }
 0x187   :  { %12248 = vst [vmem:[#allocation65_spill] sm:$0xff] %v9295_v38  ;;  %v9299_v41 = vpop.f32.mrb[26].mxu1  ;;  %v9323_v2 = vadd.f32 2.0, %v2041_v28 }
 0x188   :  { %12249 = vst [vmem:[#allocation66_spill] sm:$0xff] %v9299_v41  ;;  %v9301_v23 = vpop.f32.mrb[27].mxu1 }
 0x189   :  { %12250 = vst [vmem:[#allocation67_spill] sm:$0xff] %v9301_v23 }
 0x18a   :  { %6686 = vmatmul.mubr.msk.bf16.gmra.mrb[132].mxu1 %vm427_vm1, %v8835_v60  ;;  %6742 = vmatmul.mubr.msk.bf16.gmra.mrb[100].mxu0 %vm427_vm1, %v9076_v34  ;;  %v9321_v60 = vadd.f32 2.0, %v2040_v5 }
 0x18b   :  { %1009 = vmatprep.mubr.bf16.mxu1 %v12251_v14  ;;  %1618 = vmatprep.mubr.bf16.mxu0 %v12251_v14 }
 0x18d   :  { %v9309_v55 = vpop.f32.mrb[28].mxu1 }
 0x18e   :  { %12252 = vst [vmem:[#allocation68_spill] sm:$0xff] %v9309_v55  ;;  %v9311_v3 = vpop.f32.mrb[29].mxu1 }
 0x18f   :  { %12253 = vst [vmem:[#allocation69_spill] sm:$0xff] %v9311_v3  ;;  %v9313_v62 = vpop.f32.mrb[30].mxu1 }
 0x190   :  { %12254 = vst [vmem:[#allocation70_spill] sm:$0xff] %v9313_v62  ;;  %v9315_v52 = vpop.f32.mrb[31].mxu1 }
 0x191   :  { %12255 = vst [vmem:[#allocation71_spill] sm:$0xff] %v9315_v52 }
 0x192   :  { %6687 = vmatmul.mubr.msk.bf16.gmra.mrb[136].mxu1 %vm427_vm1, %v8856_v27  ;;  %6743 = vmatmul.mubr.msk.bf16.gmra.mrb[104].mxu0 %vm427_vm1, %v9089_v10 }
 0x193   :  { %1019 = vmatprep.mubr.bf16.mxu1 %v12251_v14  ;;  %1628 = vmatprep.mubr.bf16.mxu0 %v12251_v14 }
 0x195   :  { %v9327_v29 = vpop.f32.mrb[32].mxu1  ;;  %v1360_v1 = vpop.f32.mrb[0].mxu0 }
 0x196   :  { %12256 = vst [vmem:[#allocation72_spill] sm:$0xff] %v9327_v29  ;;  %v9329_v45 = vpop.f32.mrb[33].mxu1  ;;  %v2048_v34 = vsub.f32 %v1360_v1, %v9321_v60  ;;  %v1362_v40 = vpop.f32.mrb[1].mxu0 }
 0x197   :  { %12257 = vst [vmem:[#allocation73_spill] sm:$0xff] %v9329_v45  ;;  %v9332_v27 = vpop.f32.mrb[34].mxu1  ;;  %v2049_v10 = vsub.f32 %v1362_v40, %v9323_v2  ;;  %v1364_v5 = vpop.f32.mrb[2].mxu0 }
 0x198   :  { %12258 = vst [vmem:[#allocation74_spill] sm:$0xff] %v9332_v27  ;;  %v9335_v20 = vpop.f32.mrb[35].mxu1  ;;  %v2304_v28 = vmul.f32 0.8, %v2048_v34  ;;  %v2052_v52 = vsub.f32 %v1364_v5, %v9321_v60  ;;  %v1366_v62 = vpop.f32.mrb[3].mxu0 }
 0x199   :  { %12259 = vst [vmem:[#allocation75_spill] sm:$0xff] %v9335_v20  ;;  %v2305_v3 = vmul.f32 0.8, %v2049_v10  ;;  %v2053_v29 = vsub.f32 %v1366_v62, %v9323_v2 }
 0x19a   :  { %6688 = vmatmul.mubr.msk.bf16.gmra.mrb[140].mxu1 %vm427_vm1, %v8875_v50  ;;  %6744 = vmatmul.mubr.msk.bf16.gmra.mrb[108].mxu0 %vm427_vm1, %v9101_v53  ;;  %v2560_v1 = vmul.f32 %v2304_v28, %v2304_v28  ;;  %v2308_v27 = vmul.f32 0.8, %v2052_v52 }
 0x19b   :  { %1029 = vmatprep.mubr.bf16.mxu1 %v12251_v14  ;;  %1638 = vmatprep.mubr.bf16.mxu0 %v12251_v14  ;;  %v2561_v40 = vmul.f32 %v2305_v3, %v2305_v3  ;;  %v2309_v34 = vmul.f32 0.8, %v2053_v29 }
 0x19c   :  { %v2816_v20 = vsub.f32 0.0, %v2560_v1  ;;  %v2564_v5 = vmul.f32 %v2308_v27, %v2308_v27 }
 0x19d   :  { %v9345_v45 = vpop.f32.mrb[36].mxu1  ;;  %v2817_v10 = vsub.f32 0.0, %v2561_v40  ;;  %v2565_v62 = vmul.f32 %v2309_v34, %v2309_v34  ;;  %v1370_v55 = vpop.f32.mrb[4].mxu0 }
 0x19e   :  { %12260 = vst [vmem:[#allocation76_spill] sm:$0xff] %v9345_v45  ;;  %v9347_v23 = vpop.f32.mrb[37].mxu1  ;;  %v3072_v50 = vmul.f32 1.442695, %v2816_v20  ;;  %v2820_v41 = vsub.f32 0.0, %v2564_v5  ;;  %v2056_v28 = vsub.f32 %v1370_v55, %v9321_v60  ;;  %v1372_v52 = vpop.f32.mrb[5].mxu0 }
 0x19f   :  { %12261 = vst [vmem:[#allocation77_spill] sm:$0xff] %v9347_v23  ;;  %v9350_v53 = vpop.f32.mrb[38].mxu1  ;;  %v3074_v38 = vmul.f32 1.442695, %v2817_v10  ;;  %v2821_v24 = vsub.f32 0.0, %v2565_v62  ;;  %v2057_v3 = vsub.f32 %v1372_v52, %v9323_v2  ;;  %v1374_v29 = vpop.f32.mrb[6].mxu0 }
 0x1a0   :  { %12262 = vst [vmem:[#allocation78_spill] sm:$0xff] %v9350_v53  ;;  %v9353_v27 = vpop.f32.mrb[39].mxu1  ;;  %7670 = vpow2.f32 %v3072_v50  ;;  %v3080_v1 = vmul.f32 1.442695, %v2820_v41  ;;  %v2312_v40 = vmul.f32 0.8, %v2056_v28  ;;  %v2060_v34 = vsub.f32 %v1374_v29, %v9321_v60 }
 0x1a1   :  { %12263 = vst [vmem:[#allocation79_spill] sm:$0xff] %v9353_v27  ;;  %v1376_v23 = vpop.f32.mrb[7].mxu0  ;;  %7672 = vpow2.f32 %v3074_v38  ;;  %v3082_v20 = vmul.f32 1.442695, %v2821_v24  ;;  %v2313_v5 = vmul.f32 0.8, %v2057_v3 }
 0x1a2   :  { %v2061_v55 = vsub.f32 %v1376_v23, %v9323_v2  ;;  %6689 = vmatmul.mubr.msk.bf16.gmra.mrb[144].mxu1 %vm427_vm1, %v8905_v17  ;;  %6745 = vmatmul.mubr.msk.bf16.gmra.mrb[112].mxu0 %vm427_vm1, %v9114_v9  ;;  %7674 = vpow2.f32 %v3080_v1  ;;  %v2568_v10 = vmul.f32 %v2312_v40, %v2312_v40  ;;  %v2316_v62 = vmul.f32 0.8, %v2060_v34 }
 0x1a3   :  { %1039 = vmatprep.mubr.bf16.mxu1 %v12251_v14  ;;  %7676 = vpow2.f32 %v3082_v20  ;;  %1648 = vmatprep.mubr.bf16.mxu0 %v12251_v14  ;;  %v2569_v41 = vmul.f32 %v2313_v5, %v2313_v5 }
 0x1a4   :  { %v2317_v38 = vmul.f32 0.8, %v2061_v55  ;;  %v2824_v24 = vsub.f32 0.0, %v2568_v10  ;;  %v2572_v50 = vmul.f32 %v2316_v62, %v2316_v62 }
 0x1a5   :  { %v9363_v28 = vpop.f32.mrb[40].mxu1  ;;  %v2825_v23 = vsub.f32 0.0, %v2569_v41  ;;  %v1380_v17 = vpop.f32.mrb[8].mxu0 }
 0x1a6   :  { %12264 = vst [vmem:[#allocation80_spill] sm:$0xff] %v9363_v28  ;;  %v2573_v52 = vmul.f32 %v2317_v38, %v2317_v38  ;;  %v9365_v3 = vpop.f32.mrb[41].mxu1  ;;  %v3088_v29 = vmul.f32 1.442695, %v2824_v24  ;;  %v2828_v1 = vsub.f32 0.0, %v2572_v50  ;;  %v2064_v40 = vsub.f32 %v1380_v17, %v9321_v60  ;;  %v1382_v34 = vpop.f32.mrb[9].mxu0 }
 0x1a7   :  { %12265 = vst [vmem:[#allocation81_spill] sm:$0xff] %v9365_v3  ;;  %v9368_v9 = vpop.f32.mrb[42].mxu1  ;;  %v3090_v20 = vmul.f32 1.442695, %v2825_v23  ;;  %v2065_v5 = vsub.f32 %v1382_v34, %v9323_v2  ;;  %v1384_v55 = vpop.f32.mrb[10].mxu0 }
 0x1a8   :  { %12266 = vst [vmem:[#allocation82_spill] sm:$0xff] %v9368_v9  ;;  %v2829_v27 = vsub.f32 0.0, %v2573_v52  ;;  %v9371_v10 = vpop.f32.mrb[43].mxu1  ;;  %7678 = vpow2.f32 %v3088_v29  ;;  %v3096_v62 = vmul.f32 1.442695, %v2828_v1  ;;  %v2068_v38 = vsub.f32 %v1384_v55, %v9321_v60  ;;  %v1386_v3 = vpop.f32.mrb[11].mxu0 }
 0x1a9   :  { %12267 = vst [vmem:[#allocation83_spill] sm:$0xff] %v9371_v10  ;;  %v2320_v41 = vmul.f32 0.8, %v2064_v40  ;;  %7680 = vpow2.f32 %v3090_v20  ;;  %v2321_v50 = vmul.f32 0.8, %v2065_v5  ;;  %v2069_v17 = vsub.f32 %v1386_v3, %v9323_v2 }
 0x1aa   :  { %v3098_v24 = vmul.f32 1.442695, %v2829_v27  ;;  %v9375_v28 = vpop.eup %7670  ;;  %6690 = vmatmul.mubr.msk.bf16.gmra.mrb[148].mxu1 %vm427_vm1, %v8936_v31  ;;  %6746 = vmatmul.mubr.msk.bf16.gmra.mrb[116].mxu0 %vm427_vm1, %v9126_v47  ;;  %7682 = vpow2.f32 %v3096_v62  ;;  %v2324_v52 = vmul.f32 0.8, %v2068_v38 }
 0x1ab   :  { %v2576_v23 = vmul.f32 %v2320_v41, %v2320_v41  ;;  %v9381_v29 = vpop.eup %7672  ;;  %1049 = vmatprep.mubr.bf16.mxu1 %v12251_v14  ;;  %1658 = vmatprep.mubr.bf16.mxu0 %v12251_v14  ;;  %v2577_v27 = vmul.f32 %v2321_v50, %v2321_v50  ;;  %v2325_v3 = vmul.f32 0.8, %v2069_v17 }
 0x1ac   :  { %7684 = vpow2.f32 %v3098_v24  ;;  %v9385_v1 = vpop.eup %7674  ;;  %v2580_v34 = vmul.f32 %v2324_v52, %v2324_v52 }
 0x1ad   :  { %v2832_v40 = vsub.f32 0.0, %v2576_v23  ;;  %v9387_v31 = vpop.eup %7676  ;;  %v9389_v20 = vpop.f32.mrb[44].mxu1  ;;  %v2833_v5 = vsub.f32 0.0, %v2577_v27  ;;  %v2581_v55 = vmul.f32 %v2325_v3, %v2325_v3 }
 0x1ae   :  { %12268 = vst [vmem:[#allocation84_spill] sm:$0xff] %v9389_v20  ;;  %v1390_v62 = vpop.f32.mrb[12].mxu0  ;;  %v9393_v38 = vpop.f32.mrb[45].mxu1  ;;  %v2836_v47 = vsub.f32 0.0, %v2580_v34 }
 0x1af   :  { %12269 = vst [vmem:[#allocation85_spill] sm:$0xff] %v9393_v38  ;;  %v3104_v24 = vmul.f32 1.442695, %v2832_v40  ;;  %v2072_v50 = vsub.f32 %v1390_v62, %v9321_v60  ;;  %v1392_v17 = vpop.f32.mrb[13].mxu0  ;;  %v9398_v52 = vpop.f32.mrb[46].mxu1  ;;  %v2837_v20 = vsub.f32 0.0, %v2581_v55 }
 0x1b0   :  { %12270 = vst [vmem:[#allocation86_spill] sm:$0xff] %v9398_v52  ;;  %v3106_v10 = vmul.f32 1.442695, %v2833_v5  ;;  %v2073_v27 = vsub.f32 %v1392_v17, %v9323_v2  ;;  %v1394_v3 = vpop.f32.mrb[14].mxu0  ;;  %v9401_v9 = vpop.f32.mrb[47].mxu1 }
 0x1b1   :  { %12271 = vst [vmem:[#allocation87_spill] sm:$0xff] %v9401_v9  ;;  %7686 = vpow2.f32 %v3104_v24  ;;  %v3112_v41 = vmul.f32 1.442695, %v2836_v47  ;;  %v2328_v38 = vmul.f32 0.8, %v2072_v50  ;;  %v2076_v40 = vsub.f32 %v1394_v3, %v9321_v60  ;;  %v1396_v34 = vpop.f32.mrb[15].mxu0 }
 0x1b2   :  { %7688 = vpow2.f32 %v3106_v10  ;;  %v3114_v62 = vmul.f32 1.442695, %v2837_v20  ;;  %v2329_v53 = vmul.f32 0.8, %v2073_v27  ;;  %v2077_v23 = vsub.f32 %v1396_v34, %v9323_v2  ;;  %v9405_v45 = vpop.eup %7678  ;;  %6691 = vmatmul.mubr.msk.bf16.gmra.mrb[152].mxu1 %vm427_vm1, %v8954_v63  ;;  %6747 = vmatmul.mubr.msk.bf16.gmra.mrb[120].mxu0 %vm427_vm1, %v9140_v12 }
 0x1b3   :  { %7690 = vpow2.f32 %v3112_v41  ;;  %v2584_v5 = vmul.f32 %v2328_v38, %v2328_v38  ;;  %v2332_v47 = vmul.f32 0.8, %v2076_v40  ;;  %v9411_v55 = vpop.eup %7680  ;;  %1059 = vmatprep.mubr.bf16.mxu1 %v12251_v14  ;;  %1668 = vmatprep.mubr.bf16.mxu0 %v12251_v14 }
 0x1b4   :  { %7692 = vpow2.f32 %v3114_v62  ;;  %v2585_v10 = vmul.f32 %v2329_v53, %v2329_v53  ;;  %v2333_v20 = vmul.f32 0.8, %v2077_v23  ;;  %v9415_v24 = vpop.eup %7682 }
 0x1b5   :  { %v2840_v50 = vsub.f32 0.0, %v2584_v5  ;;  %v2588_v17 = vmul.f32 %v2332_v47, %v2332_v47  ;;  %v9419_v27 = vpop.f32.mrb[48].mxu1  ;;  %v1400_v3 = vpop.f32.mrb[16].mxu0 }
 0x1b6   :  { %v9417_v63 = vpop.eup %7684  ;;  %12272 = vst [vmem:[#allocation88_spill] sm:$0xff] %v9419_v27  ;;  %v2841_v41 = vsub.f32 0.0, %v2585_v10  ;;  %v2589_v38 = vmul.f32 %v2333_v20, %v2333_v20  ;;  %v9423_v34 = vpop.f32.mrb[49].mxu1  ;;  %v2080_v53 = vsub.f32 %v1400_v3, %v9321_v60 }
 0x1b7   :  { %12273 = vst [vmem:[#allocation89_spill] sm:$0xff] %v9423_v34  ;;  %v3120_v62 = vmul.f32 1.442695, %v2840_v50  ;;  %v2844_v12 = vsub.f32 0.0, %v2588_v17  ;;  %v1402_v23 = vpop.f32.mrb[17].mxu0  ;;  %v9428_v47 = vpop.f32.mrb[50].mxu1 }
 0x1b8   :  { %12274 = vst [vmem:[#allocation90_spill] sm:$0xff] %v9428_v47  ;;  %v3122_v9 = vmul.f32 1.442695, %v2841_v41  ;;  %v2845_v27 = vsub.f32 0.0, %v2589_v38  ;;  %v2081_v10 = vsub.f32 %v1402_v23, %v9323_v2  ;;  %v1404_v20 = vpop.f32.mrb[18].mxu0  ;;  %v9431_v52 = vpop.f32.mrb[51].mxu1 }
 0x1b9   :  { %12275 = vst [vmem:[#allocation91_spill] sm:$0xff] %v9431_v52  ;;  %7694 = vpow2.f32 %v3120_v62  ;;  %v3128_v40 = vmul.f32 1.442695, %v2844_v12  ;;  %v2336_v34 = vmul.f32 0.8, %v2080_v53  ;;  %v2084_v50 = vsub.f32 %v1404_v20, %v9321_v60  ;;  %v1406_v17 = vpop.f32.mrb[19].mxu0 }
 0x1ba   :  { %7696 = vpow2.f32 %v3122_v9  ;;  %v3130_v3 = vmul.f32 1.442695, %v2845_v27  ;;  %v2337_v21 = vmul.f32 0.8, %v2081_v10  ;;  %v2085_v5 = vsub.f32 %v1406_v17, %v9323_v2  ;;  %6692 = vmatmul.mubr.msk.bf16.gmra.mrb[156].mxu1 %vm427_vm1, %v8968_v26  ;;  %6748 = vmatmul.mubr.msk.bf16.gmra.mrb[124].mxu0 %vm427_vm1, %v9154_v48 }
 0x1bb   :  { %v9435_v56 = vpop.eup %7686  ;;  %7698 = vpow2.f32 %v3128_v40  ;;  %v2592_v41 = vmul.f32 %v2336_v34, %v2336_v34  ;;  %v2340_v12 = vmul.f32 0.8, %v2084_v50  ;;  %1069 = vmatprep.mubr.bf16.mxu1 %v12251_v14  ;;  %v12276_v9 = vpack.c.bf16 %v9387_v31, %v9381_v29 }
 0x1bc   :  { %v9441_v38 = vpop.eup %7688  ;;  %7700 = vpow2.f32 %v3130_v3  ;;  %v2593_v27 = vmul.f32 %v2337_v21, %v2337_v21  ;;  %v2341_v62 = vmul.f32 0.8, %v2085_v5 }
 0x1bd   :  { %4537 = vmatprep.mubr.bf16.mxu0 %v12276_v9  ;;  %v9447_v53 = vpop.eup %7690  ;;  %v2848_v26 = vsub.f32 0.0, %v2592_v41  ;;  %v2596_v23 = vmul.f32 %v2340_v12, %v2340_v12  ;;  %v9451_v40 = vpop.f32.mrb[52].mxu1 }
 0x1be   :  { %v9449_v10 = vpop.eup %7692  ;;  %12277 = vst [vmem:[#allocation92_spill] sm:$0xff] %v9451_v40  ;;  %v2849_v34 = vsub.f32 0.0, %v2593_v27  ;;  %v2597_v20 = vmul.f32 %v2341_v62, %v2341_v62  ;;  %v1410_v50 = vpop.f32.mrb[20].mxu0  ;;  %v8310_v40 = vld [vmem:[#allocation2 + $0x10] sm:$0xff] }
 0x1bf   :  { %v9455_v3 = vpop.f32.mrb[53].mxu1  ;;  %v3136_v29 = vmul.f32 1.442695, %v2848_v26  ;;  %v2852_v31 = vsub.f32 0.0, %v2596_v23  ;;  %v2088_v21 = vsub.f32 %v1410_v50, %v9321_v60  ;;  %v1412_v5 = vpop.f32.mrb[21].mxu0  ;;  %v7497_v52 = vtrunc.f32 %v8310_v40 }
 0x1c0   :  { %12278 = vst [vmem:[#allocation93_spill] sm:$0xff] %v9455_v3  ;;  %v9460_v12 = vpop.f32.mrb[54].mxu1  ;;  %v3138_v9 = vmul.f32 1.442695, %v2849_v34  ;;  %v2853_v48 = vsub.f32 0.0, %v2597_v20  ;;  %v2089_v27 = vsub.f32 %v1412_v5, %v9323_v2  ;;  %v1414_v62 = vpop.f32.mrb[22].mxu0  ;;  %v12281_v40 = vpack.c.bf16 %v9385_v1, %v9375_v28 }
 0x1c1   :  { %12279 = vst [vmem:[#allocation94_spill] sm:$0xff] %v9460_v12  ;;  %v9463_v17 = vpop.f32.mrb[55].mxu1  ;;  %7702 = vpow2.f32 %v3136_v29  ;;  %v3144_v26 = vmul.f32 1.442695, %v2852_v31  ;;  %v2344_v23 = vmul.f32 0.8, %v2088_v21  ;;  %v2092_v50 = vsub.f32 %v1414_v62, %v9321_v60 }
 0x1c2   :  { %12280 = vst [vmem:[#allocation95_spill] sm:$0xff] %v9463_v17  ;;  %v1416_v3 = vpop.f32.mrb[23].mxu0  ;;  %7704 = vpow2.f32 %v3138_v9  ;;  %v3146_v47 = vmul.f32 1.442695, %v2853_v48  ;;  %v2345_v41 = vmul.f32 0.8, %v2089_v27  ;;  %6693 = vmatmul.mubr.msk.bf16.gmra.mrb[160].mxu1 %vm427_vm1, %v8980_v42  ;;  %4538 = vmatmul.mubr.bf16.vlgmr.msra.gmra.mrb[128].mxu0 %v12281_v40  ;;  %v12282_v48 = vpack.c.bf16 %v9417_v63, %v9411_v55 }
 0x1c3   :  { %v2093_v12 = vsub.f32 %v1416_v3, %v9323_v2  ;;  %v9467_v34 = vpop.eup %7694  ;;  %7706 = vpow2.f32 %v3144_v26  ;;  %v2600_v20 = vmul.f32 %v2344_v23, %v2344_v23  ;;  %v2348_v29 = vmul.f32 0.8, %v2092_v50  ;;  %1079 = vmatprep.mubr.bf16.mxu1 %v12251_v14  ;;  %v8311_v27 = vld [vmem:[#allocation2] sm:$0xff]  ;;  %v8312_v26 = vld [vmem:[#allocation2 + $0x18] sm:$0xff]  ;;  %v8313_v40 = vld [vmem:[#allocation2 + $0x8] sm:$0xff] }
 0x1c4   :  { %v9474_v31 = vpop.eup %7696  ;;  %7708 = vpow2.f32 %v3146_v47  ;;  %4545 = vmatprep.mubr.bf16.mxu0 %v12282_v48  ;;  %v2601_v3 = vmul.f32 %v2345_v41, %v2345_v41  ;;  %v7498_v5 = vcvt.f32.s32 %v7497_v52  ;;  %v8556_v1 = vmov 25  }
 0x1c5   :  { %v2349_v21 = vmul.f32 0.8, %v2093_v12  ;;  %v9480_v42 = vpop.eup %7698  ;;  %v2856_v9 = vsub.f32 0.0, %v2600_v20  ;;  %v2604_v28 = vmul.f32 %v2348_v29, %v2348_v29  ;;  %7636 = vset.pattern.permute.xlu1 %v8556_v1  ;;  %7635 = vset.pattern.permute.xlu0 %v8556_v1  ;;  %v7493_v62 = vtrunc.f32 %v8311_v27  ;;  %v9484_v50 = vpop.f32.mrb[56].mxu1  ;;  %v7653_v12 = vld [vmem:[#allocation7 + $0x80] sm:$0xff]  }
 0x1c6   :  { %v7499_v47 = vtrunc.f32 %v8312_v26  ;;  %v9482_v23 = vpop.eup %7700  ;;  %12283 = vst [vmem:[#allocation96_spill] sm:$0xff] %v9484_v50  ;;  %v2857_v55 = vsub.f32 0.0, %v2601_v3  ;;  %v1420_v41 = vpop.f32.mrb[24].mxu0  ;;  %3783 = vperm.xlu1 %7636, %v7498_v5   ;;  %v7495_v20 = vtrunc.f32 %v8313_v40  ;;  %4795 = vmatpush1.bf16.msra.mxu0 %v7653_v12 }
 0x1c7   :  { %v2605_v63 = vmul.f32 %v2349_v21, %v2349_v21  ;;  %v9488_v29 = vpop.f32.mrb[57].mxu1  ;;  %v3152_v48 = vmul.f32 1.442695, %v2856_v9  ;;  %v2860_v1 = vsub.f32 0.0, %v2604_v28  ;;  %v2096_v27 = vsub.f32 %v1420_v41, %v9321_v60  ;;  %v1422_v26 = vpop.f32.mrb[25].mxu0  ;;  %4796 = vmatprep.subr.bf16.mxu0 %v12251_v14 }
 0x1c8   :  { %12284 = vst [vmem:[#allocation97_spill] sm:$0xff] %v9488_v29  ;;  %v9493_v3 = vpop.f32.mrb[58].mxu1  ;;  %v3154_v21 = vmul.f32 1.442695, %v2857_v55  ;;  %v2097_v52 = vsub.f32 %v1422_v26, %v9323_v2  ;;  %v1424_v37 = vpop.f32.mrb[26].mxu0  ;;  %v7494_v5 = vcvt.f32.s32 %v7493_v62  ;;  %v12287_v62 = vpack.c.bf16 %v9415_v24, %v9405_v45  ;;  %v8314_v26 = vld [vmem:[#allocation2 + $0x28] sm:$0xff] }
 0x1c9   :  { %12285 = vst [vmem:[#allocation98_spill] sm:$0xff] %v9493_v3  ;;  %v2861_v17 = vsub.f32 0.0, %v2605_v63  ;;  %v9496_v40 = vpop.f32.mrb[59].mxu1  ;;  %7710 = vpow2.f32 %v3152_v48  ;;  %v3160_v9 = vmul.f32 1.442695, %v2860_v1  ;;  %v2100_v41 = vsub.f32 %v1424_v37, %v9321_v60  ;;  %v1426_v29 = vpop.f32.mrb[27].mxu0 }
 0x1ca   :  { %12286 = vst [vmem:[#allocation99_spill] sm:$0xff] %v9496_v40  ;;  %v2352_v28 = vmul.f32 0.8, %v2096_v27  ;;  %7712 = vpow2.f32 %v3154_v21  ;;  %v2353_v3 = vmul.f32 0.8, %v2097_v52  ;;  %v2101_v55 = vsub.f32 %v1426_v29, %v9323_v2  ;;  %3777 = vperm.xlu0 %7635, %v7494_v5   ;;  %6694 = vmatmul.mubr.msk.bf16.gmra.mrb[164].mxu1 %vm427_vm1, %v8993_v4 }
 0x1cb   :  { %v3162_v50 = vmul.f32 1.442695, %v2861_v17  ;;  %v9501_v63 = vpop.eup %7702  ;;  %4546 = vmatmul.mubr.bf16.gmra.mrb[132].mxu0 %v12287_v62  ;;  %7714 = vpow2.f32 %v3160_v9  ;;  %v2356_v12 = vmul.f32 0.8, %v2100_v41  ;;  %v7500_v48 = vcvt.f32.s32 %v7499_v47  ;;  %1089 = vmatprep.mubr.bf16.mxu1 %v12251_v14  ;;  %v8315_v47 = vld [vmem:[#allocation2 + $0x20] sm:$0xff] }
 0x1cc   :  { %v2608_v37 = vmul.f32 %v2352_v28, %v2352_v28  ;;  %v9508_v1 = vpop.eup %7704  ;;  %v2609_v17 = vmul.f32 %v2353_v3, %v2353_v3  ;;  %v2357_v52 = vmul.f32 0.8, %v2101_v55  ;;  %v12288_v29 = vpack.c.bf16 %v9449_v10, %v9441_v38  ;;  %v7654_v10 = vld [vmem:[#allocation5] sm:$0xff]  }
 0x1cd   :  { %7716 = vpow2.f32 %v3162_v50  ;;  %v7496_v4 = vcvt.f32.s32 %v7495_v20  ;;  %v9514_v27 = vpop.eup %7706  ;;  %v2612_v24 = vmul.f32 %v2356_v12, %v2356_v12  ;;  %3786 = vperm.xlu1 %7636, %v7500_v48   ;;  %v7503_v21 = vtrunc.f32 %v8314_v26  ;;  %v9518_v50 = vpop.f32.mrb[60].mxu1  ;;  %v8316_v20 = vld [vmem:[#allocation2 + $0x38] sm:$0xff]  ;;  %7025 = vmatprep.subr.bf16.mxu1 %v7654_v10 }
 0x1ce   :  { %4553 = vmatprep.mubr.bf16.mxu0 %v12288_v29  ;;  %v2864_v45 = vsub.f32 0.0, %v2608_v37  ;;  %v7501_v5 = vtrunc.f32 %v8315_v47  ;;  %v9516_v9 = vpop.eup %7708  ;;  %12289 = vst [vmem:[#allocation100_spill] sm:$0xff] %v9518_v50  ;;  %v2865_v3 = vsub.f32 0.0, %v2609_v17  ;;  %v2613_v28 = vmul.f32 %v2357_v52, %v2357_v52  ;;  %v1430_v41 = vpop.f32.mrb[28].mxu0 }
 0x1cf   :  { %3780 = vperm.xlu0 %7635, %v7496_v4   ;;  %v7507_v55 = vtrunc.f32 %v8316_v20  ;;  %v9522_v37 = vpop.f32.mrb[61].mxu1  ;;  %v2868_v12 = vsub.f32 0.0, %v2612_v24  ;;  %v2104_v48 = vsub.f32 %v1430_v41, %v9321_v60  ;;  %v1432_v29 = vpop.f32.mrb[29].mxu0  ;;  %v7504_v4 = vcvt.f32.s32 %v7503_v21 }
 0x1d0   :  { %v3168_v62 = vmul.f32 1.442695, %v2864_v45  ;;  %12290 = vst [vmem:[#allocation101_spill] sm:$0xff] %v9522_v37  ;;  %v3170_v17 = vmul.f32 1.442695, %v2865_v3  ;;  %v9527_v52 = vpop.f32.mrb[62].mxu1  ;;  %v2105_v38 = vsub.f32 %v1432_v29, %v9323_v2  ;;  %v12291_v21 = vpack.c.bf16 %v9447_v53, %v9435_v56 }
 0x1d1   :  { %v2869_v47 = vsub.f32 0.0, %v2613_v28  ;;  %v1434_v50 = vpop.f32.mrb[30].mxu0  ;;  %v3176_v45 = vmul.f32 1.442695, %v2868_v12  ;;  %v9530_v20 = vpop.f32.mrb[63].mxu1  ;;  %3792 = vperm.xlu1 %7636, %v7504_v4   ;;  %v8317_v56 = vld [vmem:[#allocation2 + $0x30] sm:$0xff] }
 0x1d2   :  { %7718 = vpow2.f32 %v3168_v62  ;;  %v2360_v24 = vmul.f32 0.8, %v2104_v48  ;;  %v2108_v41 = vsub.f32 %v1434_v50, %v9321_v60  ;;  %v1436_v37 = vpop.f32.mrb[31].mxu0  ;;  %v2361_v26 = vmul.f32 0.8, %v2105_v38  ;;  %6695 = vmatmul.mubr.msk.bf16.gmra.mrb[168].mxu1 %vm427_vm1, %v9006_v35 }
 0x1d3   :  { %7720 = vpow2.f32 %v3170_v17  ;;  %v3178_v40 = vmul.f32 1.442695, %v2869_v47  ;;  %v2109_v3 = vsub.f32 %v1436_v37, %v9323_v2  ;;  %v9534_v28 = vpop.eup %7710  ;;  %4554 = vmatmul.mubr.bf16.gmra.mrb[136].mxu0 %v12291_v21  ;;  %v7502_v50 = vcvt.f32.s32 %v7501_v5  ;;  %1099 = vmatprep.mubr.bf16.mxu1 %v12251_v14  ;;  %v8318_v5 = vld [vmem:[#allocation2 + $0x48] sm:$0xff] }
 0x1d4   :  { %7722 = vpow2.f32 %v3176_v45  ;;  %v2616_v29 = vmul.f32 %v2360_v24, %v2360_v24  ;;  %v2364_v10 = vmul.f32 0.8, %v2108_v41  ;;  %v9541_v62 = vpop.eup %7712  ;;  %v2617_v38 = vmul.f32 %v2361_v26, %v2361_v26 }
 0x1d5   :  { %7724 = vpow2.f32 %v3178_v40  ;;  %v2365_v12 = vmul.f32 0.8, %v2109_v3  ;;  %v12292_v37 = vpack.c.bf16 %v9482_v23, %v9474_v31  ;;  %v7508_v48 = vcvt.f32.s32 %v7507_v55  ;;  %v9547_v17 = vpop.eup %7714  ;;  %3789 = vperm.xlu0 %7635, %v7502_v50   ;;  %v9551_v24 = vpop.f32.mrb[64].mxu1  ;;  %v8319_v23 = vld [vmem:[#allocation2 + $0x40] sm:$0xff] }
 0x1d6   :  { %v2872_v35 = vsub.f32 0.0, %v2616_v29  ;;  %v2620_v47 = vmul.f32 %v2364_v10, %v2364_v10  ;;  %v7505_v53 = vtrunc.f32 %v8317_v56  ;;  %v7511_v4 = vtrunc.f32 %v8318_v5  ;;  %v1440_v41 = vpop.f32.mrb[32].mxu0  ;;  %v9556_v10 = vpop.f32.mrb[65].mxu1 }
 0x1d7   :  { %4561 = vmatprep.mubr.bf16.mxu0 %v12292_v37  ;;  %v9549_v45 = vpop.eup %7716  ;;  %v2873_v40 = vsub.f32 0.0, %v2617_v38  ;;  %v2621_v26 = vmul.f32 %v2365_v12, %v2365_v12  ;;  %3798 = vperm.xlu1 %7636, %v7508_v48   ;;  %v7509_v55 = vtrunc.f32 %v8319_v23  ;;  %v1441_v21 = vadd.f32 %v1440_v41, %v9209_v44  ;;  %12293 = vst [vmem:[#allocation102_spill] sm:$0xff] %v9556_v10  ;;  %v1442_v50 = vpop.f32.mrb[33].mxu0 }
 0x1d8   :  { %v3184_v3 = vmul.f32 1.442695, %v2872_v35  ;;  %v2876_v29 = vsub.f32 0.0, %v2620_v47  ;;  %v1443_v56 = vadd.f32 %v1442_v50, %v9211_v46  ;;  %v9561_v5 = vpop.f32.mrb[66].mxu1  ;;  %v1444_v31 = vpop.f32.mrb[34].mxu0  ;;  %v7506_v48 = vcvt.f32.s32 %v7505_v53 }
 0x1d9   :  { %v3186_v12 = vmul.f32 1.442695, %v2873_v40  ;;  %v2877_v37 = vsub.f32 0.0, %v2621_v26  ;;  %v2112_v35 = vsub.f32 %v1441_v21, %v9321_v60  ;;  %v1445_v44 = vadd.f32 %v1444_v31, %v9213_v59  ;;  %v9565_v47 = vpop.f32.mrb[67].mxu1  ;;  %v1446_v41 = vpop.f32.mrb[35].mxu0 }
 0x1da   :  { %7726 = vpow2.f32 %v3184_v3  ;;  %v3192_v23 = vmul.f32 1.442695, %v2876_v29  ;;  %v2113_v40 = vsub.f32 %v1443_v56, %v9323_v2  ;;  %v1447_v26 = vadd.f32 %v1446_v41, %v9215_v13  ;;  %3795 = vperm.xlu0 %7635, %v7506_v48   ;;  %6696 = vmatmul.mubr.msk.bf16.gmra.mrb[172].mxu1 %vm427_vm1, %v9018_v58 }
 0x1db   :  { %7728 = vpow2.f32 %v3186_v12  ;;  %v3194_v10 = vmul.f32 1.442695, %v2877_v37  ;;  %v2368_v53 = vmul.f32 0.8, %v2112_v35  ;;  %v2116_v3 = vsub.f32 %v1445_v44, %v9321_v60  ;;  %1109 = vmatprep.mubr.bf16.mxu1 %v12251_v14 }
 0x1dc   :  { %v9569_v46 = vpop.eup %7718  ;;  %7730 = vpow2.f32 %v3192_v23  ;;  %v12294_v59 = vpack.c.bf16 %v9480_v42, %v9467_v34  ;;  %v7512_v31 = vcvt.f32.s32 %v7511_v4  ;;  %v2369_v21 = vmul.f32 0.8, %v2113_v40  ;;  %v8320_v34 = vld [vmem:[#allocation2 + $0x58] sm:$0xff]  ;;  %v8321_v4 = vld [vmem:[#allocation2 + $0x50] sm:$0xff] }
 0x1dd   :  { %v9577_v29 = vpop.eup %7720  ;;  %7732 = vpow2.f32 %v3194_v10  ;;  %v2117_v13 = vsub.f32 %v1447_v26, %v9323_v2  ;;  %v12295_v50 = vpack.c.bf16 %v9516_v9, %v9508_v1  ;;  %v7510_v12 = vcvt.f32.s32 %v7509_v55  ;;  %v9588_v44 = vpop.f32.mrb[68].mxu1  ;;  %v9592_v9 = vld [vmem:[#allocation2 + $0x68] sm:$0xff] }
 0x1de   :  { %4562 = vmatmul.mubr.bf16.gmra.mrb[140].mxu0 %v12294_v59  ;;  %v9584_v37 = vpop.eup %7722  ;;  %v2624_v58 = vmul.f32 %v2368_v53, %v2368_v53  ;;  %v2372_v56 = vmul.f32 0.8, %v2116_v3  ;;  %3804 = vperm.xlu1 %7636, %v7512_v31   ;;  %v7515_v42 = vtrunc.f32 %v8320_v34  ;;  %v7513_v48 = vtrunc.f32 %v8321_v4  ;;  %v1450_v41 = vpop.f32.mrb[36].mxu0 }
 0x1df   :  { %4569 = vmatprep.mubr.bf16.mxu0 %v12295_v50  ;;  %v9586_v10 = vpop.eup %7724  ;;  %v2625_v23 = vmul.f32 %v2369_v21, %v2369_v21  ;;  %v2373_v35 = vmul.f32 0.8, %v2117_v13  ;;  %3801 = vperm.xlu0 %7635, %v7510_v12   ;;  %v7519_v55 = vtrunc.f32 %v9592_v9  ;;  %v1451_v53 = vadd.f32 %v1450_v41, %v9223_v25  ;;  %v9596_v3 = vpop.f32.mrb[69].mxu1 }
 0x1e0   :  { %v2880_v40 = vsub.f32 0.0, %v2624_v58  ;;  %v2628_v26 = vmul.f32 %v2372_v56, %v2372_v56  ;;  %12296 = vst [vmem:[#allocation103_spill] sm:$0xff] %v9596_v3  ;;  %v1452_v59 = vpop.f32.mrb[37].mxu0  ;;  %v3609_v31 = vpack.c.bf16 %v9586_v10, %v9577_v29  ;;  %v9601_v34 = vpop.f32.mrb[70].mxu1  ;;  %v7516_v4 = vcvt.f32.s32 %v7515_v42 }
 0x1e1   :  { %v2881_v21 = vsub.f32 0.0, %v2625_v23  ;;  %v2629_v13 = vmul.f32 %v2373_v35, %v2373_v35  ;;  %v1453_v50 = vadd.f32 %v1452_v59, %v9225_v18  ;;  %v1454_v12 = vpop.f32.mrb[38].mxu0  ;;  %v2120_v58 = vsub.f32 %v1451_v53, %v9321_v60  ;;  %v9605_v56 = vpop.f32.mrb[71].mxu1 }
 0x1e2   :  { %v3200_v1 = vmul.f32 1.442695, %v2880_v40  ;;  %v2884_v9 = vsub.f32 0.0, %v2628_v26  ;;  %v1455_v25 = vadd.f32 %v1454_v12, %v9227_v54  ;;  %v1456_v41 = vpop.f32.mrb[39].mxu0  ;;  %3810 = vperm.xlu1 %7636, %v7516_v4   ;;  %6697 = vmatmul.mubr.msk.bf16.gmra.mrb[176].mxu1 %vm427_vm1, %v9031_v36  ;;  %v12297_v54 = vpack.c.bf16 %v9514_v27, %v9501_v63 }
 0x1e3   :  { %v3202_v38 = vmul.f32 1.442695, %v2881_v21  ;;  %v2885_v3 = vsub.f32 0.0, %v2629_v13  ;;  %v2121_v23 = vsub.f32 %v1453_v50, %v9323_v2  ;;  %v1457_v35 = vadd.f32 %v1456_v41, %v9229_v19  ;;  %1119 = vmatprep.mubr.bf16.mxu1 %v12251_v14 }
 0x1e4   :  { %v9609_v18 = vpop.eup %7726  ;;  %7734 = vpow2.f32 %v3200_v1  ;;  %v3208_v42 = vmul.f32 1.442695, %v2884_v9  ;;  %v2376_v40 = vmul.f32 0.8, %v2120_v58  ;;  %v2124_v26 = vsub.f32 %v1455_v25, %v9321_v60  ;;  %v7655_v58 = vld [vmem:[#allocation7 + $0x88] sm:$0xff]  }
 0x1e5   :  { %v9617_v53 = vpop.eup %7728  ;;  %7736 = vpow2.f32 %v3202_v38  ;;  %v3210_v59 = vmul.f32 1.442695, %v2885_v3  ;;  %v2377_v19 = vmul.f32 0.8, %v2121_v23  ;;  %v2125_v21 = vsub.f32 %v1457_v35, %v9323_v2  ;;  %v9628_v12 = vpop.f32.mrb[72].mxu1  ;;  %4797 = vmatpush1.bf16.msra.mxu0 %v7655_v58 }
 0x1e6   :  { %4570 = vmatmul.mubr.bf16.gmra.mrb[144].mxu0 %v12297_v54  ;;  %v12298_v1 = vpack.c.bf16 %v9549_v45, %v9541_v62  ;;  %v9624_v13 = vpop.eup %7730  ;;  %7738 = vpow2.f32 %v3208_v42  ;;  %v2632_v36 = vmul.f32 %v2376_v40, %v2376_v40  ;;  %v2380_v50 = vmul.f32 0.8, %v2124_v26  ;;  %v1460_v4 = vpop.f32.mrb[40].mxu0  ;;  %4798 = vmatprep.subr.bf16.mxu0 %v12251_v14 }
 0x1e7   :  { %v7514_v63 = vcvt.f32.s32 %v7513_v48  ;;  %v9626_v27 = vpop.eup %7732  ;;  %7740 = vpow2.f32 %v3210_v59  ;;  %v2633_v38 = vmul.f32 %v2377_v19, %v2377_v19  ;;  %v2381_v3 = vmul.f32 0.8, %v2125_v21  ;;  %v9633_v41 = vpop.f32.mrb[73].mxu1 }
 0x1e8   :  { %4577 = vmatprep.mubr.bf16.mxu0 %v12298_v1  ;;  %v3612_v9 = vpack.c.bf16 %v9624_v13, %v9609_v18  ;;  %v2888_v62 = vsub.f32 0.0, %v2632_v36  ;;  %v2636_v45 = vmul.f32 %v2380_v50, %v2380_v50  ;;  %v1461_v25 = vadd.f32 %v1460_v4, %v9237_v49  ;;  %v1462_v23 = vpop.f32.mrb[41].mxu0  ;;  %v9638_v26 = vpop.f32.mrb[74].mxu1 }
 0x1e9   :  { %v3613_v48 = vpack.c.bf16 %v9626_v27, %v9617_v53  ;;  %3807 = vperm.xlu0 %7635, %v7514_v63   ;;  %v2889_v35 = vsub.f32 0.0, %v2633_v38  ;;  %v2637_v42 = vmul.f32 %v2381_v3, %v2381_v3  ;;  %v1463_v40 = vadd.f32 %v1462_v23, %v9239_v32  ;;  %v1464_v54 = vpop.f32.mrb[42].mxu0  ;;  %v9642_v36 = vpop.f32.mrb[75].mxu1 }
 0x1ea   :  { %v7520_v59 = vcvt.f32.s32 %v7519_v55  ;;  %v3216_v19 = vmul.f32 1.442695, %v2888_v62  ;;  %v2892_v21 = vsub.f32 0.0, %v2636_v45  ;;  %v2128_v49 = vsub.f32 %v1461_v25, %v9321_v60  ;;  %v1466_v50 = vpop.f32.mrb[43].mxu0  ;;  %6698 = vmatmul.mubr.msk.bf16.gmra.mrb[180].mxu1 %vm427_vm1, %v9043_v6 }
 0x1eb   :  { %v1465_v1 = vadd.f32 %v1464_v54, %v9241_v22  ;;  %v3218_v63 = vmul.f32 1.442695, %v2889_v35  ;;  %v2893_v38 = vsub.f32 0.0, %v2637_v42  ;;  %v2129_v32 = vsub.f32 %v1463_v40, %v9323_v2  ;;  %1129 = vmatprep.mubr.bf16.mxu1 %v12251_v14  ;;  %v8323_v35 = vld [vmem:[#allocation2 + $0x60] sm:$0xff] }
 0x1ec   :  { %v1467_v3 = vadd.f32 %v1466_v50, %v9243_v16  ;;  %3816 = vperm.xlu1 %7636, %v7520_v59   ;;  %7742 = vpow2.f32 %v3216_v19  ;;  %v3224_v55 = vmul.f32 1.442695, %v2892_v21  ;;  %v2384_v4 = vmul.f32 0.8, %v2128_v49  ;;  %v8324_v19 = vld [vmem:[#allocation2 + $0x78] sm:$0xff] }
 0x1ed   :  { %v2132_v58 = vsub.f32 %v1465_v1, %v9321_v60  ;;  %v12299_v22 = vpack.c.bf16 %v9547_v17, %v9534_v28  ;;  %7744 = vpow2.f32 %v3218_v63  ;;  %v3226_v62 = vmul.f32 1.442695, %v2893_v38  ;;  %v9662_v54 = vpop.f32.mrb[76].mxu1  ;;  %v1470_v59 = vpop.f32.mrb[44].mxu0 }
 0x1ee   :  { %v2385_v45 = vmul.f32 0.8, %v2129_v32  ;;  %v2133_v25 = vsub.f32 %v1467_v3, %v9323_v2  ;;  %v9658_v16 = vpop.eup %7734  ;;  %7746 = vpow2.f32 %v3224_v55  ;;  %v2640_v23 = vmul.f32 %v2384_v4, %v2384_v4  ;;  %v9667_v1 = vpop.f32.mrb[77].mxu1 }
 0x1ef   :  { %4578 = vmatmul.mubr.bf16.gmra.mrb[148].mxu0 %v12299_v22  ;;  %v2388_v6 = vmul.f32 0.8, %v2132_v58  ;;  %v7517_v42 = vtrunc.f32 %v8323_v35  ;;  %v9660_v28 = vpop.eup %7736  ;;  %7748 = vpow2.f32 %v3226_v62  ;;  %v7523_v21 = vtrunc.f32 %v8324_v19  ;;  %v1472_v50 = vpop.f32.mrb[45].mxu0 }
 0x1f0   :  { %4585 = vmatprep.mubr.bf16.mxu0 %v3609_v31  ;;  %v2641_v17 = vmul.f32 %v2385_v45, %v2385_v45  ;;  %v2389_v40 = vmul.f32 0.8, %v2133_v25  ;;  %v9664_v49 = vpop.eup %7738  ;;  %v2896_v29 = vsub.f32 0.0, %v2640_v23  ;;  %v1471_v31 = vadd.f32 %v1470_v59, %v9251_v15  ;;  %v9672_v4 = vpop.f32.mrb[78].mxu1 }
 0x1f1   :  { %v2644_v10 = vmul.f32 %v2388_v6, %v2388_v6  ;;  %v7518_v63 = vcvt.f32.s32 %v7517_v42  ;;  %v9669_v38 = vpop.eup %7740  ;;  %v1473_v55 = vadd.f32 %v1472_v50, %v9253_v11  ;;  %v1474_v58 = vpop.f32.mrb[46].mxu0  ;;  %v3616_v22 = vpack.c.bf16 %v9664_v49, %v9658_v16 }
 0x1f2   :  { %v2897_v32 = vsub.f32 0.0, %v2641_v17  ;;  %v2645_v3 = vmul.f32 %v2389_v40, %v2389_v40  ;;  %v3232_v62 = vmul.f32 1.442695, %v2896_v29  ;;  %v2136_v15 = vsub.f32 %v1471_v31, %v9321_v60  ;;  %v9678_v23 = vpop.f32.mrb[79].mxu1  ;;  %v1476_v6 = vpop.f32.mrb[47].mxu0  ;;  %6699 = vmatmul.mubr.msk.bf16.gmra.mrb[184].mxu1 %vm427_vm1, %v9056_v43 }
 0x1f3   :  { %v2900_v45 = vsub.f32 0.0, %v2644_v10  ;;  %v1475_v25 = vadd.f32 %v1474_v58, %v9255_v39  ;;  %3813 = vperm.xlu0 %7635, %v7518_v63   ;;  %v2137_v11 = vsub.f32 %v1473_v55, %v9323_v2  ;;  %v1477_v17 = vadd.f32 %v1476_v6, %v9257_v57  ;;  %1139 = vmatprep.mubr.bf16.mxu1 %v12251_v14 }
 0x1f4   :  { %v3234_v35 = vmul.f32 1.442695, %v2897_v32  ;;  %v2901_v42 = vsub.f32 0.0, %v2645_v3  ;;  %7750 = vpow2.f32 %v3232_v62  ;;  %v2392_v59 = vmul.f32 0.8, %v2136_v15 }
 0x1f5   :  { %v3240_v40 = vmul.f32 1.442695, %v2900_v45  ;;  %v2140_v19 = vsub.f32 %v1475_v25, %v9321_v60  ;;  %v12300_v39 = vpack.c.bf16 %v9584_v37, %v9569_v46  ;;  %v2393_v10 = vmul.f32 0.8, %v2137_v11  ;;  %v9699_v3 = vpop.f32.mrb[80].mxu1  ;;  %v1480_v55 = vpop.f32.mrb[48].mxu0 }
 0x1f6   :  { %7752 = vpow2.f32 %v3234_v35  ;;  %v3242_v29 = vmul.f32 1.442695, %v2901_v42  ;;  %v2141_v31 = vsub.f32 %v1477_v17, %v9323_v2  ;;  %v9693_v57 = vpop.eup %7742  ;;  %v2648_v50 = vmul.f32 %v2392_v59, %v2392_v59  ;;  %v9704_v45 = vpop.f32.mrb[81].mxu1  ;;  %v8325_v25 = vld [vmem:[#allocation2 + $0x70] sm:$0xff] }
 0x1f7   :  { %4586 = vmatmul.mubr.bf16.gmra.mrb[152].mxu0 %v12300_v39  ;;  %7754 = vpow2.f32 %v3240_v40  ;;  %v2396_v43 = vmul.f32 0.8, %v2140_v19  ;;  %v3617_v46 = vpack.c.bf16 %v9669_v38, %v9660_v28  ;;  %v9697_v37 = vpop.eup %7744  ;;  %v2649_v63 = vmul.f32 %v2393_v10, %v2393_v10  ;;  %v1482_v15 = vpop.f32.mrb[49].mxu0 }
 0x1f8   :  { %4593 = vmatprep.mubr.bf16.mxu0 %v3613_v48  ;;  %7756 = vpow2.f32 %v3242_v29  ;;  %v2397_v32 = vmul.f32 0.8, %v2141_v31  ;;  %v7524_v58 = vcvt.f32.s32 %v7523_v21  ;;  %v9701_v62 = vpop.eup %7746  ;;  %v2904_v53 = vsub.f32 0.0, %v2648_v50  ;;  %v9709_v11 = vpop.f32.mrb[82].mxu1 }
 0x1f9   :  { %v2652_v27 = vmul.f32 %v2396_v43, %v2396_v43  ;;  %v1481_v48 = vadd.f32 %v1480_v55, %v9265_v30  ;;  %v7521_v28 = vtrunc.f32 %v8325_v25  ;;  %v9706_v38 = vpop.eup %7748  ;;  %v2905_v6 = vsub.f32 0.0, %v2649_v63  ;;  %v1484_v21 = vpop.f32.mrb[50].mxu0 }
 0x1fa   :  { %v2653_v35 = vmul.f32 %v2397_v32, %v2397_v32  ;;  %v1483_v42 = vadd.f32 %v1482_v15, %v9267_v8  ;;  %v3620_v17 = vpack.c.bf16 %v9701_v62, %v9693_v57  ;;  %3822 = vperm.xlu1 %7636, %v7524_v58   ;;  %v3248_v40 = vmul.f32 1.442695, %v2904_v53  ;;  %v9715_v39 = vpop.f32.mrb[83].mxu1  ;;  %v1486_v29 = vpop.f32.mrb[51].mxu0  ;;  %6700 = vmatmul.mubr.msk.bf16.gmra.mrb[188].mxu1 %vm427_vm1, %v9068_v7 }
 0x1fb   :  { %v2908_v30 = vsub.f32 0.0, %v2652_v27  ;;  %v2144_v59 = vsub.f32 %v1481_v48, %v9321_v60  ;;  %v1485_v19 = vadd.f32 %v1484_v21, %v9269_v33  ;;  %v3250_v10 = vmul.f32 1.442695, %v2905_v6  ;;  %1149 = vmatprep.mubr.bf16.mxu1 %v12251_v14 }
 0x1fc   :  { %v2909_v31 = vsub.f32 0.0, %v2653_v35  ;;  %v2145_v8 = vsub.f32 %v1483_v42, %v9323_v2  ;;  %v1487_v50 = vadd.f32 %v1486_v29, %v9271_v51  ;;  %7758 = vpow2.f32 %v3248_v40 }
 0x1fd   :  { %v3256_v43 = vmul.f32 1.442695, %v2908_v30  ;;  %v2400_v63 = vmul.f32 0.8, %v2144_v59  ;;  %v2148_v32 = vsub.f32 %v1485_v19, %v9321_v60  ;;  %7760 = vpow2.f32 %v3250_v10  ;;  %v1490_v15 = vpop.f32.mrb[52].mxu0 }
 0x1fe   :  { %v3258_v33 = vmul.f32 1.442695, %v2909_v31  ;;  %v2401_v55 = vmul.f32 0.8, %v2145_v8  ;;  %v2149_v58 = vsub.f32 %v1487_v50, %v9323_v2  ;;  %v9727_v51 = vpop.eup %7750  ;;  %v3621_v7 = vpack.c.bf16 %v9706_v38, %v9697_v37  ;;  %v1492_v30 = vpop.f32.mrb[53].mxu0  ;;  %v8326_v37 = vld [vmem:[#allocation2 + $0x88] sm:$0xff] }
 0x1ff   :  { %4594 = vmatmul.mubr.bf16.gmra.mrb[156].mxu0 %v3612_v9  ;;  %7762 = vpow2.f32 %v3256_v43  ;;  %v2656_v53 = vmul.f32 %v2400_v63, %v2400_v63  ;;  %v2404_v27 = vmul.f32 0.8, %v2148_v32  ;;  %v9733_v9 = vpop.f32.mrb[84].mxu1  ;;  %v7522_v25 = vcvt.f32.s32 %v7521_v28  ;;  %v1494_v28 = vpop.f32.mrb[54].mxu0  ;;  %v12301_v63 = vld [vmem:[#allocation62_spill] sm:$0xff] }
 0x200   :  { %4601 = vmatprep.mubr.bf16.mxu0 %v3617_v46  ;;  %v9731_v48 = vpop.eup %7752  ;;  %7764 = vpow2.f32 %v3258_v33  ;;  %v2657_v18 = vmul.f32 %v2401_v55, %v2401_v55  ;;  %v2405_v13 = vmul.f32 0.8, %v2149_v58  ;;  %v7657_v46 = vld [vmem:[#allocation7 + $0x90] sm:$0xff]   ;;  %v1491_v21 = vadd.f32 %v1490_v15, %v9279_v61  ;;  %v9738_v40 = vpop.f32.mrb[85].mxu1 }
 0x201   :  { %v9735_v6 = vpop.eup %7754  ;;  %v2912_v35 = vsub.f32 0.0, %v2656_v53  ;;  %v2660_v42 = vmul.f32 %v2404_v27, %v2404_v27  ;;  %v7527_v38 = vtrunc.f32 %v8326_v37  ;;  %v1493_v10 = vadd.f32 %v1492_v30, %v9281_v0  ;;  %v9743_v31 = vpop.f32.mrb[86].mxu1  ;;  %3819 = vperm.xlu0 %7635, %v7522_v25   ;;  %4799 = vmatpush1.bf16.msra.mxu0 %v7657_v46  ;;  %v12302_v27 = vld [vmem:[#allocation63_spill] sm:$0xff]  ;;  %v12303_v46 = vld [vmem:[#allocation48_spill] sm:$0xff] }
 0x202   :  { %v9740_v59 = vpop.eup %7756  ;;  %v2913_v19 = vsub.f32 0.0, %v2657_v18  ;;  %v2661_v29 = vmul.f32 %v2405_v13, %v2405_v13  ;;  %v2152_v43 = vsub.f32 %v1491_v21, %v9321_v60  ;;  %v1495_v32 = vadd.f32 %v1494_v28, %v12301_v63  ;;  %v9749_v33 = vpop.f32.mrb[87].mxu1  ;;  %4800 = vmatprep.subr.bf16.mxu0 %v12251_v14  ;;  %6701 = vmatmul.mubr.msk.bf16.gmra.mrb[192].mxu1 %vm427_vm1, %v12303_v46  ;;  %v12304_v63 = vld [vmem:[#allocation64_spill] sm:$0xff] }
 0x203   :  { %v3264_v61 = vmul.f32 1.442695, %v2912_v35  ;;  %v2916_v50 = vsub.f32 0.0, %v2660_v42  ;;  %v1496_v55 = vpop.f32.mrb[55].mxu0  ;;  %v2153_v53 = vsub.f32 %v1493_v10, %v9323_v2  ;;  %1159 = vmatprep.mubr.bf16.mxu1 %v12251_v14 }
 0x204   :  { %v3266_v0 = vmul.f32 1.442695, %v2913_v19  ;;  %v2917_v58 = vsub.f32 0.0, %v2661_v29  ;;  %v1497_v18 = vadd.f32 %v1496_v55, %v12302_v27  ;;  %v2408_v15 = vmul.f32 0.8, %v2152_v43 }
 0x205   :  { %7766 = vpow2.f32 %v3264_v61  ;;  %v3272_v13 = vmul.f32 1.442695, %v2916_v50  ;;  %v2156_v25 = vsub.f32 %v1495_v32, %v9321_v60  ;;  %v2409_v42 = vmul.f32 0.8, %v2153_v53  ;;  %v1500_v28 = vpop.f32.mrb[56].mxu0 }
 0x206   :  { %7768 = vpow2.f32 %v3266_v0  ;;  %v3274_v35 = vmul.f32 1.442695, %v2917_v58  ;;  %v2157_v21 = vsub.f32 %v1497_v18, %v9323_v2  ;;  %v9762_v30 = vpop.eup %7758  ;;  %v2664_v37 = vmul.f32 %v2408_v15, %v2408_v15  ;;  %v1502_v0 = vpop.f32.mrb[57].mxu0  ;;  %v8327_v58 = vld [vmem:[#allocation2 + $0x80] sm:$0xff] }
 0x207   :  { %4602 = vmatmul.mubr.bf16.gmra.mrb[160].mxu0 %v3616_v22  ;;  %7770 = vpow2.f32 %v3272_v13  ;;  %v2412_v19 = vmul.f32 0.8, %v2156_v25  ;;  %v3625_v29 = vpack.c.bf16 %v9740_v59, %v9731_v48  ;;  %v9766_v10 = vpop.eup %7760  ;;  %v2665_v16 = vmul.f32 %v2409_v42, %v2409_v42  ;;  %v9768_v22 = vpop.f32.mrb[88].mxu1  ;;  %v12305_v18 = vld [vmem:[#allocation65_spill] sm:$0xff] }
 0x208   :  { %4609 = vmatprep.mubr.bf16.mxu0 %v3621_v7  ;;  %7772 = vpow2.f32 %v3274_v35  ;;  %v2413_v49 = vmul.f32 0.8, %v2157_v21  ;;  %v7528_v61 = vcvt.f32.s32 %v7527_v38  ;;  %v2920_v50 = vsub.f32 0.0, %v2664_v37  ;;  %v9773_v55 = vpop.f32.mrb[89].mxu1  ;;  %v1504_v38 = vpop.f32.mrb[58].mxu0  ;;  %v12306_v21 = vld [vmem:[#allocation66_spill] sm:$0xff] }
 0x209   :  { %v9770_v7 = vpop.eup %7762  ;;  %v2668_v43 = vmul.f32 %v2412_v19, %v2412_v19  ;;  %v1501_v32 = vadd.f32 %v1500_v28, %v12304_v63  ;;  %v7525_v48 = vtrunc.f32 %v8327_v58  ;;  %v2921_v53 = vsub.f32 0.0, %v2665_v16  ;;  %v9778_v15 = vpop.f32.mrb[90].mxu1 }
 0x20a   :  { %v9775_v59 = vpop.eup %7764  ;;  %v2669_v27 = vmul.f32 %v2413_v49, %v2413_v49  ;;  %v1503_v13 = vadd.f32 %v1502_v0, %v12305_v18  ;;  %3828 = vperm.xlu1 %7636, %v7528_v61   ;;  %v3280_v46 = vmul.f32 1.442695, %v2920_v50  ;;  %v1505_v37 = vadd.f32 %v1504_v38, %v12306_v21  ;;  %v9784_v19 = vpop.f32.mrb[91].mxu1  ;;  %v12308_v0 = vld [vmem:[#allocation67_spill] sm:$0xff]  ;;  %v12309_v50 = vld [vmem:[#allocation50_spill] sm:$0xff] }
 0x20b   :  { %v2924_v35 = vsub.f32 0.0, %v2668_v43  ;;  %v2160_v42 = vsub.f32 %v1501_v32, %v9321_v60  ;;  %12307 = vst [vmem:[#allocation62_spill] sm:$0xff] %v9784_v19  ;;  %v1506_v28 = vpop.f32.mrb[59].mxu0  ;;  %v3282_v16 = vmul.f32 1.442695, %v2921_v53  ;;  %6702 = vmatmul.mubr.msk.bf16.gmra.mrb[196].mxu1 %vm427_vm1, %v12309_v50  ;;  %v7526_v21 = vcvt.f32.s32 %v7525_v48 }
 0x20c   :  { %v2925_v49 = vsub.f32 0.0, %v2669_v27  ;;  %v2161_v63 = vsub.f32 %v1503_v13, %v9323_v2  ;;  %v1507_v58 = vadd.f32 %v1506_v28, %v12308_v0  ;;  %7774 = vpow2.f32 %v3280_v46  ;;  %1169 = vmatprep.mubr.bf16.mxu1 %v12251_v14  ;;  %v8328_v0 = vld [vmem:[#allocation2 + $0x98] sm:$0xff] }
 0x20d   :  { %v3288_v18 = vmul.f32 1.442695, %v2924_v35  ;;  %v2416_v8 = vmul.f32 0.8, %v2160_v42  ;;  %v2164_v61 = vsub.f32 %v1505_v37, %v9321_v60  ;;  %7776 = vpow2.f32 %v3282_v16  ;;  %v1510_v42 = vpop.f32.mrb[60].mxu0  ;;  %v12311_v16 = vld [vmem:[#allocation68_spill] sm:$0xff]  ;;  %3825 = vperm.xlu0 %7635, %v7526_v21  }
 0x20e   :  { %v3290_v43 = vmul.f32 1.442695, %v2925_v49  ;;  %v2417_v32 = vmul.f32 0.8, %v2161_v63  ;;  %v2165_v53 = vsub.f32 %v1507_v58, %v9323_v2  ;;  %v3629_v46 = vpack.c.bf16 %v9775_v59, %v9766_v10  ;;  %v1512_v63 = vpop.f32.mrb[61].mxu0 }
 0x20f   :  { %4610 = vmatmul.mubr.bf16.gmra.mrb[164].mxu0 %v3620_v17  ;;  %v9796_v27 = vpop.eup %7766  ;;  %7778 = vpow2.f32 %v3288_v18  ;;  %v2672_v13 = vmul.f32 %v2416_v8, %v2416_v8  ;;  %v2420_v38 = vmul.f32 0.8, %v2164_v61  ;;  %v9802_v17 = vpop.f32.mrb[92].mxu1  ;;  %v1511_v49 = vadd.f32 %v1510_v42, %v12311_v16  ;;  %v12313_v61 = vld [vmem:[#allocation69_spill] sm:$0xff]  ;;  %v12315_v42 = vld [vmem:[#allocation70_spill] sm:$0xff] }
 0x210   :  { %4617 = vmatprep.mubr.bf16.mxu0 %v3625_v29  ;;  %v9800_v35 = vpop.eup %7768  ;;  %7780 = vpow2.f32 %v3290_v43  ;;  %v2673_v57 = vmul.f32 %v2417_v32, %v2417_v32  ;;  %v2421_v62 = vmul.f32 0.8, %v2165_v53  ;;  %12310 = vst [vmem:[#allocation63_spill] sm:$0xff] %v9802_v17  ;;  %v9807_v8 = vpop.f32.mrb[93].mxu1  ;;  %v7531_v10 = vtrunc.f32 %v8328_v0 }
 0x211   :  { %v9804_v29 = vpop.eup %7770  ;;  %v2928_v37 = vsub.f32 0.0, %v2672_v13  ;;  %v2676_v28 = vmul.f32 %v2420_v38, %v2420_v38  ;;  %12312 = vst [vmem:[#allocation48_spill] sm:$0xff] %v9807_v8  ;;  %v1513_v50 = vadd.f32 %v1512_v63, %v12313_v61  ;;  %v9812_v43 = vpop.f32.mrb[94].mxu1  ;;  %v2168_v38 = vsub.f32 %v1511_v49, %v9321_v60  ;;  %v12317_v61 = vld [vmem:[#allocation71_spill] sm:$0xff] }
 0x212   :  { %v9809_v59 = vpop.eup %7772  ;;  %v2929_v58 = vsub.f32 0.0, %v2673_v57  ;;  %v2677_v18 = vmul.f32 %v2421_v62, %v2421_v62  ;;  %12314 = vst [vmem:[#allocation64_spill] sm:$0xff] %v9812_v43  ;;  %v1514_v48 = vpop.f32.mrb[62].mxu0 }
 0x213   :  { %v3296_v53 = vmul.f32 1.442695, %v2928_v37  ;;  %v2932_v13 = vsub.f32 0.0, %v2676_v28  ;;  %v1515_v16 = vadd.f32 %v1514_v48, %v12315_v42  ;;  %v9818_v0 = vpop.f32.mrb[95].mxu1  ;;  %v1516_v25 = vpop.f32.mrb[63].mxu0  ;;  %v2169_v63 = vsub.f32 %v1513_v50, %v9323_v2  ;;  %v12318_v37 = vld [vmem:[#allocation52_spill] sm:$0xff] }
 0x214   :  { %12316 = vst [vmem:[#allocation65_spill] sm:$0xff] %v9818_v0  ;;  %v3298_v57 = vmul.f32 1.442695, %v2929_v58  ;;  %v2933_v62 = vsub.f32 0.0, %v2677_v18  ;;  %v1517_v43 = vadd.f32 %v1516_v25, %v12317_v61  ;;  %v2424_v17 = vmul.f32 0.8, %v2168_v38  ;;  %6703 = vmatmul.mubr.msk.bf16.gmra.mrb[200].mxu1 %vm427_vm1, %v12318_v37 }
 0x215   :  { %7782 = vpow2.f32 %v3296_v53  ;;  %v3304_v8 = vmul.f32 1.442695, %v2932_v13  ;;  %v2172_v21 = vsub.f32 %v1515_v16, %v9321_v60  ;;  %v12319_v28 = vpack.c.bf16 %v9735_v6, %v9727_v51  ;;  %1179 = vmatprep.mubr.bf16.mxu1 %v12251_v14  ;;  %v1520_v38 = vpop.f32.mrb[64].mxu0 }
 0x216   :  { %7784 = vpow2.f32 %v3298_v57  ;;  %v3306_v49 = vmul.f32 1.442695, %v2933_v62  ;;  %v2425_v58 = vmul.f32 0.8, %v2169_v63  ;;  %v2173_v18 = vsub.f32 %v1517_v43, %v9323_v2  ;;  %v9830_v25 = vpop.eup %7774  ;;  %v12320_v57 = vld [vmem:[#allocation72_spill] sm:$0xff]  ;;  %v1522_v63 = vpop.f32.mrb[65].mxu0 }
 0x217   :  { %4618 = vmatmul.mubr.bf16.gmra.mrb[168].mxu0 %v12319_v28  ;;  %7786 = vpow2.f32 %v3304_v8  ;;  %v2680_v50 = vmul.f32 %v2424_v17, %v2424_v17  ;;  %v2428_v48 = vmul.f32 0.8, %v2172_v21  ;;  %v3633_v53 = vpack.c.bf16 %v9809_v59, %v9800_v35  ;;  %v9834_v13 = vpop.eup %7776  ;;  %v8329_v8 = vld [vmem:[#allocation2 + $0x90] sm:$0xff]  ;;  %v12321_v59 = vld [vmem:[#allocation73_spill] sm:$0xff]  ;;  %v1524_v28 = vpop.f32.mrb[66].mxu0 }
 0x218   :  { %4625 = vmatprep.mubr.bf16.mxu0 %v3629_v46  ;;  %7788 = vpow2.f32 %v3306_v49  ;;  %v2681_v51 = vmul.f32 %v2425_v58, %v2425_v58  ;;  %v2429_v6 = vmul.f32 0.8, %v2173_v18  ;;  %v7532_v42 = vcvt.f32.s32 %v7531_v10  ;;  %v12324_v49 = vld [vmem:[#allocation54_spill] sm:$0xff] }
 0x219   :  { %v9836_v16 = vpop.eup %7778  ;;  %v2936_v46 = vsub.f32 0.0, %v2680_v50  ;;  %v2684_v43 = vmul.f32 %v2428_v48, %v2428_v48  ;;  %v1521_v62 = vadd.f32 %v1520_v38, %v12320_v57  ;;  %v7529_v17 = vtrunc.f32 %v8329_v8  ;;  %v12322_v50 = vld [vmem:[#allocation74_spill] sm:$0xff]  ;;  %v1526_v38 = vpop.f32.mrb[67].mxu0 }
 0x21a   :  { %v9839_v61 = vpop.eup %7780  ;;  %v2937_v21 = vsub.f32 0.0, %v2681_v51  ;;  %v2685_v35 = vmul.f32 %v2429_v6, %v2429_v6  ;;  %v1523_v37 = vadd.f32 %v1522_v63, %v12321_v59  ;;  %3834 = vperm.xlu1 %7636, %v7532_v42   ;;  %v1525_v48 = vadd.f32 %v1524_v28, %v12322_v50  ;;  %v12323_v51 = vld [vmem:[#allocation75_spill] sm:$0xff]  ;;  %v12326_v50 = vld [vmem:[#allocation76_spill] sm:$0xff] }
 0x21b   :  { %v3312_v10 = vmul.f32 1.442695, %v2936_v46  ;;  %v2940_v58 = vsub.f32 0.0, %v2684_v43  ;;  %v2176_v18 = vsub.f32 %v1521_v62, %v9321_v60  ;;  %v1527_v6 = vadd.f32 %v1526_v38, %v12323_v51 }
 0x21c   :  { %v3314_v57 = vmul.f32 1.442695, %v2937_v21  ;;  %v2941_v8 = vsub.f32 0.0, %v2685_v35  ;;  %v2177_v32 = vsub.f32 %v1523_v37, %v9323_v2  ;;  %v2180_v0 = vsub.f32 %v1525_v48, %v9321_v60  ;;  %6704 = vmatmul.mubr.msk.bf16.gmra.mrb[204].mxu1 %vm427_vm1, %v12324_v49 }
 0x21d   :  { %7790 = vpow2.f32 %v3312_v10  ;;  %v3320_v63 = vmul.f32 1.442695, %v2940_v58  ;;  %v2432_v59 = vmul.f32 0.8, %v2176_v18  ;;  %v12325_v42 = vpack.c.bf16 %v9770_v7, %v9762_v30  ;;  %1189 = vmatprep.mubr.bf16.mxu1 %v12251_v14  ;;  %v1530_v10 = vpop.f32.mrb[68].mxu0 }
 0x21e   :  { %7792 = vpow2.f32 %v3314_v57  ;;  %v3322_v46 = vmul.f32 1.442695, %v2941_v8  ;;  %v2433_v43 = vmul.f32 0.8, %v2177_v32  ;;  %v2181_v62 = vsub.f32 %v1527_v6, %v9323_v2  ;;  %v1532_v38 = vpop.f32.mrb[69].mxu0  ;;  %v8330_v57 = vld [vmem:[#allocation2 + $0xa8] sm:$0xff] }
 0x21f   :  { %4626 = vmatmul.mubr.bf16.gmra.mrb[172].mxu0 %v12325_v42  ;;  %v9856_v21 = vpop.eup %7782  ;;  %7794 = vpow2.f32 %v3320_v63  ;;  %v2688_v35 = vmul.f32 %v2432_v59, %v2432_v59  ;;  %v2436_v37 = vmul.f32 0.8, %v2180_v0  ;;  %v3637_v28 = vpack.c.bf16 %v9839_v61, %v9834_v13  ;;  %v12327_v61 = vld [vmem:[#allocation77_spill] sm:$0xff]  ;;  %v1534_v63 = vpop.f32.mrb[70].mxu0 }
 0x220   :  { %4633 = vmatprep.mubr.bf16.mxu0 %v3633_v53  ;;  %v9860_v49 = vpop.eup %7784  ;;  %7796 = vpow2.f32 %v3322_v46  ;;  %v2689_v30 = vmul.f32 %v2433_v43, %v2433_v43  ;;  %v2437_v7 = vmul.f32 0.8, %v2181_v62  ;;  %v7530_v32 = vcvt.f32.s32 %v7529_v17  ;;  %v12328_v43 = vld [vmem:[#allocation78_spill] sm:$0xff] }
 0x221   :  { %v9862_v58 = vpop.eup %7786  ;;  %v2944_v53 = vsub.f32 0.0, %v2688_v35  ;;  %v2692_v18 = vmul.f32 %v2436_v37, %v2436_v37  ;;  %v1531_v48 = vadd.f32 %v1530_v10, %v12326_v50  ;;  %v7535_v8 = vtrunc.f32 %v8330_v57  ;;  %v1536_v35 = vpop.f32.mrb[71].mxu0  ;;  %v7659_v57 = vld [vmem:[#allocation7 + $0x98] sm:$0xff]  }
 0x222   :  { %v9865_v0 = vpop.eup %7788  ;;  %v2945_v51 = vsub.f32 0.0, %v2689_v30  ;;  %v2693_v13 = vmul.f32 %v2437_v7, %v2437_v7  ;;  %v1533_v6 = vadd.f32 %v1532_v38, %v12327_v61  ;;  %3831 = vperm.xlu0 %7635, %v7530_v32   ;;  %v1535_v62 = vadd.f32 %v1534_v63, %v12328_v43  ;;  %v12329_v30 = vld [vmem:[#allocation79_spill] sm:$0xff]  ;;  %v12330_v32 = vld [vmem:[#allocation56_spill] sm:$0xff]  ;;  %4801 = vmatpush1.bf16.msra.mxu0 %v7659_v57  ;;  %v12333_v57 = vld [vmem:[#allocation81_spill] sm:$0xff] }
 0x223   :  { %v3328_v17 = vmul.f32 1.442695, %v2944_v53  ;;  %v2948_v42 = vsub.f32 0.0, %v2692_v18  ;;  %v2184_v46 = vsub.f32 %v1531_v48, %v9321_v60  ;;  %v1537_v7 = vadd.f32 %v1536_v35, %v12329_v30  ;;  %4802 = vmatprep.subr.bf16.mxu0 %v12251_v14 }
 0x224   :  { %v3330_v37 = vmul.f32 1.442695, %v2945_v51  ;;  %v2949_v10 = vsub.f32 0.0, %v2693_v13  ;;  %v2185_v50 = vsub.f32 %v1533_v6, %v9323_v2  ;;  %v2188_v59 = vsub.f32 %v1535_v62, %v9321_v60  ;;  %6705 = vmatmul.mubr.msk.bf16.gmra.mrb[208].mxu1 %vm427_vm1, %v12330_v32 }
 0x225   :  { %7798 = vpow2.f32 %v3328_v17  ;;  %v3336_v38 = vmul.f32 1.442695, %v2948_v42  ;;  %v2440_v61 = vmul.f32 0.8, %v2184_v46  ;;  %v12331_v53 = vpack.c.bf16 %v9804_v29, %v9796_v27  ;;  %1199 = vmatprep.mubr.bf16.mxu1 %v12251_v14  ;;  %v1540_v46 = vpop.f32.mrb[72].mxu0 }
 0x226   :  { %7800 = vpow2.f32 %v3330_v37  ;;  %v3338_v18 = vmul.f32 1.442695, %v2949_v10  ;;  %v2441_v48 = vmul.f32 0.8, %v2185_v50  ;;  %v2189_v51 = vsub.f32 %v1537_v7, %v9323_v2  ;;  %v12332_v37 = vld [vmem:[#allocation80_spill] sm:$0xff]  ;;  %v8331_v50 = vld [vmem:[#allocation2 + $0xa0] sm:$0xff] }
 0x227   :  { %4634 = vmatmul.mubr.bf16.gmra.mrb[176].mxu0 %v12331_v53  ;;  %v9882_v13 = vpop.eup %7790  ;;  %7802 = vpow2.f32 %v3336_v38  ;;  %v2696_v6 = vmul.f32 %v2440_v61, %v2440_v61  ;;  %v2444_v63 = vmul.f32 0.8, %v2188_v59  ;;  %v3641_v17 = vpack.c.bf16 %v9865_v0, %v9860_v49  ;;  %v1542_v59 = vpop.f32.mrb[73].mxu0 }
 0x228   :  { %4641 = vmatprep.mubr.bf16.mxu0 %v3637_v28  ;;  %v9886_v42 = vpop.eup %7792  ;;  %7804 = vpow2.f32 %v3338_v18  ;;  %v2697_v27 = vmul.f32 %v2441_v48, %v2441_v48  ;;  %v2445_v29 = vmul.f32 0.8, %v2189_v51  ;;  %v7536_v43 = vcvt.f32.s32 %v7535_v8  ;;  %v1544_v61 = vpop.f32.mrb[74].mxu0  ;;  %v12334_v48 = vld [vmem:[#allocation82_spill] sm:$0xff] }
 0x229   :  { %v9889_v28 = vpop.eup %7794  ;;  %v2952_v62 = vsub.f32 0.0, %v2696_v6  ;;  %v2700_v35 = vmul.f32 %v2444_v63, %v2444_v63  ;;  %v1541_v10 = vadd.f32 %v1540_v46, %v12332_v37  ;;  %v7533_v30 = vtrunc.f32 %v8331_v50  ;;  %v1546_v6 = vpop.f32.mrb[75].mxu0  ;;  %v12336_v8 = vld [vmem:[#allocation58_spill] sm:$0xff] }
 0x22a   :  { %v9892_v49 = vpop.eup %7796  ;;  %v2953_v0 = vsub.f32 0.0, %v2697_v27  ;;  %v2701_v7 = vmul.f32 %v2445_v29, %v2445_v29  ;;  %v1543_v38 = vadd.f32 %v1542_v59, %v12333_v57  ;;  %3840 = vperm.xlu1 %7636, %v7536_v43   ;;  %v1545_v51 = vadd.f32 %v1544_v61, %v12334_v48  ;;  %v12335_v27 = vld [vmem:[#allocation83_spill] sm:$0xff] }
 0x22b   :  { %v3344_v32 = vmul.f32 1.442695, %v2952_v62  ;;  %v2956_v53 = vsub.f32 0.0, %v2700_v35  ;;  %v2192_v18 = vsub.f32 %v1541_v10, %v9321_v60  ;;  %v1547_v29 = vadd.f32 %v1546_v6, %v12335_v27 }
 0x22c   :  { %v3346_v63 = vmul.f32 1.442695, %v2953_v0  ;;  %v2957_v46 = vsub.f32 0.0, %v2701_v7  ;;  %v2193_v37 = vsub.f32 %v1543_v38, %v9323_v2  ;;  %v2196_v57 = vsub.f32 %v1545_v51, %v9321_v60  ;;  %6706 = vmatmul.mubr.msk.bf16.gmra.mrb[212].mxu1 %vm427_vm1, %v12336_v8  ;;  %v12338_v51 = vld [vmem:[#allocation84_spill] sm:$0xff] }
 0x22d   :  { %7806 = vpow2.f32 %v3344_v32  ;;  %v3352_v59 = vmul.f32 1.442695, %v2956_v53  ;;  %v2448_v50 = vmul.f32 0.8, %v2192_v18  ;;  %v12337_v43 = vpack.c.bf16 %v9836_v16, %v9830_v25  ;;  %1209 = vmatprep.mubr.bf16.mxu1 %v12251_v14  ;;  %v1550_v32 = vpop.f32.mrb[76].mxu0 }
 0x22e   :  { %7808 = vpow2.f32 %v3346_v63  ;;  %v3354_v62 = vmul.f32 1.442695, %v2957_v46  ;;  %v2449_v35 = vmul.f32 0.8, %v2193_v37  ;;  %v2197_v10 = vsub.f32 %v1547_v29, %v9323_v2  ;;  %v1552_v63 = vpop.f32.mrb[77].mxu0  ;;  %v8332_v46 = vld [vmem:[#allocation2 + $0xb8] sm:$0xff] }
 0x22f   :  { %4642 = vmatmul.mubr.bf16.gmra.mrb[180].mxu0 %v12337_v43  ;;  %v9909_v0 = vpop.eup %7798  ;;  %7810 = vpow2.f32 %v3352_v59  ;;  %v2704_v7 = vmul.f32 %v2448_v50, %v2448_v50  ;;  %v2452_v38 = vmul.f32 0.8, %v2196_v57  ;;  %v3645_v61 = vpack.c.bf16 %v9892_v49, %v9886_v42  ;;  %v12339_v49 = vld [vmem:[#allocation85_spill] sm:$0xff]  ;;  %v1554_v50 = vpop.f32.mrb[78].mxu0  ;;  %v12342_v57 = vld [vmem:[#allocation60_spill] sm:$0xff] }
 0x230   :  { %4649 = vmatprep.mubr.bf16.mxu0 %v3641_v17  ;;  %v9913_v8 = vpop.eup %7800  ;;  %7812 = vpow2.f32 %v3354_v62  ;;  %v2705_v25 = vmul.f32 %v2449_v35, %v2449_v35  ;;  %v2453_v16 = vmul.f32 0.8, %v2197_v10  ;;  %v7534_v53 = vcvt.f32.s32 %v7533_v30  ;;  %v12340_v35 = vld [vmem:[#allocation86_spill] sm:$0xff] }
 0x231   :  { %v9915_v18 = vpop.eup %7802  ;;  %v2960_v17 = vsub.f32 0.0, %v2704_v7  ;;  %v2708_v48 = vmul.f32 %v2452_v38, %v2452_v38  ;;  %v1551_v6 = vadd.f32 %v1550_v32, %v12338_v51  ;;  %v7539_v37 = vtrunc.f32 %v8332_v46  ;;  %v1556_v7 = vpop.f32.mrb[79].mxu0 }
 0x232   :  { %v9918_v27 = vpop.eup %7804  ;;  %v2961_v29 = vsub.f32 0.0, %v2705_v25  ;;  %v2709_v42 = vmul.f32 %v2453_v16, %v2453_v16  ;;  %v1553_v59 = vadd.f32 %v1552_v63, %v12339_v49  ;;  %3837 = vperm.xlu0 %7635, %v7534_v53   ;;  %v1555_v10 = vadd.f32 %v1554_v50, %v12340_v35  ;;  %v12341_v25 = vld [vmem:[#allocation87_spill] sm:$0xff] }
 0x233   :  { %v3360_v30 = vmul.f32 1.442695, %v2960_v17  ;;  %v2964_v43 = vsub.f32 0.0, %v2708_v48  ;;  %v2200_v62 = vsub.f32 %v1551_v6, %v9321_v60  ;;  %v1557_v16 = vadd.f32 %v1556_v7, %v12341_v25  ;;  %v12344_v7 = vld [vmem:[#allocation88_spill] sm:$0xff] }
 0x234   :  { %v3362_v38 = vmul.f32 1.442695, %v2961_v29  ;;  %v2965_v32 = vsub.f32 0.0, %v2709_v42  ;;  %v2201_v51 = vsub.f32 %v1553_v59, %v9323_v2  ;;  %v2204_v49 = vsub.f32 %v1555_v10, %v9321_v60  ;;  %6707 = vmatmul.mubr.msk.bf16.gmra.mrb[216].mxu1 %vm427_vm1, %v12342_v57 }
 0x235   :  { %7814 = vpow2.f32 %v3360_v30  ;;  %v3368_v63 = vmul.f32 1.442695, %v2964_v43  ;;  %v2456_v46 = vmul.f32 0.8, %v2200_v62  ;;  %v12343_v53 = vpack.c.bf16 %v9862_v58, %v9856_v21  ;;  %1219 = vmatprep.mubr.bf16.mxu1 %v12251_v14  ;;  %v1560_v30 = vpop.f32.mrb[80].mxu0  ;;  %v7661_v62 = vld [vmem:[#allocation7 + $0xa0] sm:$0xff]  }
 0x236   :  { %7816 = vpow2.f32 %v3362_v38  ;;  %v3370_v17 = vmul.f32 1.442695, %v2965_v32  ;;  %v2457_v48 = vmul.f32 0.8, %v2201_v51  ;;  %v2205_v6 = vsub.f32 %v1557_v16, %v9323_v2  ;;  %v1562_v32 = vpop.f32.mrb[81].mxu0  ;;  %v8333_v51 = vld [vmem:[#allocation2 + $0xb0] sm:$0xff]  ;;  %4803 = vmatpush1.bf16.msra.mxu0 %v7661_v62 }
 0x237   :  { %4650 = vmatmul.mubr.bf16.gmra.mrb[184].mxu0 %v12343_v53  ;;  %v9935_v29 = vpop.eup %7806  ;;  %7818 = vpow2.f32 %v3368_v63  ;;  %v2712_v42 = vmul.f32 %v2456_v46, %v2456_v46  ;;  %v2460_v59 = vmul.f32 0.8, %v2204_v49  ;;  %v3649_v50 = vpack.c.bf16 %v9918_v27, %v9913_v8  ;;  %v12345_v63 = vld [vmem:[#allocation89_spill] sm:$0xff]  ;;  %v1564_v49 = vpop.f32.mrb[82].mxu0  ;;  %4804 = vmatprep.subr.bf16.mxu0 %v12251_v14 }
 0x238   :  { %4657 = vmatprep.mubr.bf16.mxu0 %v3645_v61  ;;  %v9939_v57 = vpop.eup %7808  ;;  %7820 = vpow2.f32 %v3370_v17  ;;  %v2713_v21 = vmul.f32 %v2457_v48, %v2457_v48  ;;  %v2461_v58 = vmul.f32 0.8, %v2205_v6  ;;  %v7540_v43 = vcvt.f32.s32 %v7539_v37  ;;  %v12346_v6 = vld [vmem:[#allocation90_spill] sm:$0xff]  ;;  %v12348_v62 = vld [vmem:[#allocation61_spill] sm:$0xff] }
 0x239   :  { %v9941_v35 = vpop.eup %7810  ;;  %v2968_v61 = vsub.f32 0.0, %v2712_v42  ;;  %v2716_v10 = vmul.f32 %v2460_v59, %v2460_v59  ;;  %v1561_v38 = vadd.f32 %v1560_v30, %v12344_v7  ;;  %v7537_v25 = vtrunc.f32 %v8333_v51  ;;  %v1566_v59 = vpop.f32.mrb[83].mxu0  ;;  %v12347_v7 = vld [vmem:[#allocation91_spill] sm:$0xff] }
 0x23a   :  { %v9944_v16 = vpop.eup %7812  ;;  %v2969_v8 = vsub.f32 0.0, %v2713_v21  ;;  %v2717_v27 = vmul.f32 %v2461_v58, %v2461_v58  ;;  %v1563_v46 = vadd.f32 %v1562_v32, %v12345_v63  ;;  %3846 = vperm.xlu1 %7636, %v7540_v43   ;;  %v1565_v42 = vadd.f32 %v1564_v49, %v12346_v6 }
 0x23b   :  { %v3376_v53 = vmul.f32 1.442695, %v2968_v61  ;;  %v2972_v17 = vsub.f32 0.0, %v2716_v10  ;;  %v2208_v48 = vsub.f32 %v1561_v38, %v9321_v60  ;;  %v1567_v32 = vadd.f32 %v1566_v59, %v12347_v7  ;;  %v8334_v7 = vld [vmem:[#allocation2 + $0xc8] sm:$0xff] }
 0x23c   :  { %v3378_v30 = vmul.f32 1.442695, %v2969_v8  ;;  %v2973_v21 = vsub.f32 0.0, %v2717_v27  ;;  %v2209_v58 = vsub.f32 %v1563_v46, %v9323_v2  ;;  %v2212_v43 = vsub.f32 %v1565_v42, %v9321_v60  ;;  %6708 = vmatmul.mubr.msk.bf16.gmra.mrb[220].mxu1 %vm427_vm1, %v12348_v62 }
 0x23d   :  { %7822 = vpow2.f32 %v3376_v53  ;;  %v3384_v51 = vmul.f32 1.442695, %v2972_v17  ;;  %v2464_v63 = vmul.f32 0.8, %v2208_v48  ;;  %v12349_v61 = vpack.c.bf16 %v9889_v28, %v9882_v13  ;;  %1711 = vmatprep.mubr.bf16.mxu1 %v12251_v14  ;;  %v1570_v48 = vpop.f32.mrb[84].mxu0 }
 0x23e   :  { %7824 = vpow2.f32 %v3378_v30  ;;  %v3386_v10 = vmul.f32 1.442695, %v2973_v21  ;;  %v2465_v38 = vmul.f32 0.8, %v2209_v58  ;;  %v2213_v8 = vsub.f32 %v1567_v32, %v9323_v2  ;;  %v12350_v30 = vld [vmem:[#allocation92_spill] sm:$0xff]  ;;  %v1572_v58 = vpop.f32.mrb[85].mxu0 }
 0x23f   :  { %4658 = vmatmul.mubr.bf16.gmra.mrb[188].mxu0 %v12349_v61  ;;  %v9962_v27 = vpop.eup %7814  ;;  %7826 = vpow2.f32 %v3384_v51  ;;  %v2720_v46 = vmul.f32 %v2464_v63, %v2464_v63  ;;  %v2468_v49 = vmul.f32 0.8, %v2212_v43  ;;  %v3653_v53 = vpack.c.bf16 %v9944_v16, %v9939_v57  ;;  %v12351_v16 = vld [vmem:[#allocation93_spill] sm:$0xff]  ;;  %v1574_v62 = vpop.f32.mrb[86].mxu0 }
 0x240   :  { %4665 = vmatprep.mubr.bf16.mxu0 %v3649_v50  ;;  %v9966_v17 = vpop.eup %7816  ;;  %7828 = vpow2.f32 %v3386_v10  ;;  %v2721_v13 = vmul.f32 %v2465_v38, %v2465_v38  ;;  %v2469_v28 = vmul.f32 0.8, %v2213_v8  ;;  %v7538_v6 = vcvt.f32.s32 %v7537_v25  ;;  %v12352_v8 = vld [vmem:[#allocation94_spill] sm:$0xff] }
 0x241   :  { %v9968_v42 = vpop.eup %7818  ;;  %v2976_v50 = vsub.f32 0.0, %v2720_v46  ;;  %v2724_v59 = vmul.f32 %v2468_v49, %v2468_v49  ;;  %v1571_v21 = vadd.f32 %v1570_v48, %v12350_v30  ;;  %v7543_v32 = vtrunc.f32 %v8334_v7  ;;  %v1576_v49 = vpop.f32.mrb[87].mxu0  ;;  %v7656_v48 = vld [vmem:[#allocation5 + $0x8] sm:$0xff]  }
 0x242   :  { %v9971_v51 = vpop.eup %7820  ;;  %v2977_v63 = vsub.f32 0.0, %v2721_v13  ;;  %v2725_v57 = vmul.f32 %v2469_v28, %v2469_v28  ;;  %v1573_v43 = vadd.f32 %v1572_v58, %v12351_v16  ;;  %3843 = vperm.xlu0 %7635, %v7538_v6   ;;  %v1575_v46 = vadd.f32 %v1574_v62, %v12352_v8  ;;  %v12353_v28 = vld [vmem:[#allocation95_spill] sm:$0xff]  ;;  %v12354_v6 = vld [vmem:[#allocation22_spill] sm:$0xff] }
 0x243   :  { %v3392_v25 = vmul.f32 1.442695, %v2976_v50  ;;  %v2980_v10 = vsub.f32 0.0, %v2724_v59  ;;  %v2216_v38 = vsub.f32 %v1571_v21, %v9321_v60  ;;  %v1577_v37 = vadd.f32 %v1576_v49, %v12353_v28  ;;  %v8336_v28 = vld [vmem:[#allocation2 + $0xc0] sm:$0xff] }
 0x244   :  { %v3394_v30 = vmul.f32 1.442695, %v2977_v63  ;;  %v2981_v7 = vsub.f32 0.0, %v2725_v57  ;;  %v2217_v13 = vsub.f32 %v1573_v43, %v9323_v2  ;;  %v2220_v61 = vsub.f32 %v1575_v46, %v9321_v60  ;;  %6757 = vmatmul.mubr.msk.bf16.vlgmr.msra.gmra.mrb[96].mxu1 %vm427_vm1, %v12354_v6  ;;  %v8335_v57 = vld [vmem:[#allocation5] sm:$0xff]  }
 0x245   :  { %7830 = vpow2.f32 %v3392_v25  ;;  %v3400_v58 = vmul.f32 1.442695, %v2980_v10  ;;  %v2472_v16 = vmul.f32 0.8, %v2216_v38  ;;  %v12355_v50 = vpack.c.bf16 %v9915_v18, %v9909_v0  ;;  %7026 = vmatpush3.bf16.msra.mxu1 %v8335_v57  ;;  %1721 = vmatprep.mubr.bf16.mxu1 %v12251_v14  ;;  %v7658_v0 = vld [vmem:[#allocation5 + $0x10] sm:$0xff]   ;;  %v12357_v6 = vld [vmem:[#allocation97_spill] sm:$0xff] }
 0x246   :  { %7832 = vpow2.f32 %v3394_v30  ;;  %v3402_v59 = vmul.f32 1.442695, %v2981_v7  ;;  %v2473_v21 = vmul.f32 0.8, %v2217_v13  ;;  %v2221_v63 = vsub.f32 %v1577_v37, %v9323_v2  ;;  %7027 = vmatprep.subr.bf16.mxu1 %v7656_v48  ;;  %v12356_v7 = vld [vmem:[#allocation96_spill] sm:$0xff] }
 0x247   :  { %4666 = vmatmul.mubr.bf16.gmra.mrb[192].mxu0 %v12355_v50  ;;  %v9987_v43 = vpop.eup %7822  ;;  %7834 = vpow2.f32 %v3400_v58  ;;  %v2728_v62 = vmul.f32 %v2472_v16, %v2472_v16  ;;  %v2476_v25 = vmul.f32 0.8, %v2220_v61  ;;  %v3657_v10 = vpack.c.bf16 %v9971_v51, %v9966_v17 }
 0x248   :  { %4673 = vmatprep.mubr.bf16.mxu0 %v3653_v53  ;;  %v9992_v18 = vpop.eup %7824  ;;  %7836 = vpow2.f32 %v3402_v59  ;;  %v2729_v38 = vmul.f32 %v2473_v21, %v2473_v21  ;;  %v2477_v37 = vmul.f32 0.8, %v2221_v63  ;;  %v1580_v53 = vpop.f32.mrb[88].mxu0  ;;  %v7544_v8 = vcvt.f32.s32 %v7543_v32 }
 0x249   :  { %v9994_v46 = vpop.eup %7826  ;;  %v2984_v49 = vsub.f32 0.0, %v2728_v62  ;;  %v2732_v30 = vmul.f32 %v2476_v25, %v2476_v25  ;;  %v1581_v61 = vadd.f32 %v1580_v53, %v12356_v7  ;;  %v1582_v13 = vpop.f32.mrb[89].mxu0  ;;  %v7541_v58 = vtrunc.f32 %v8336_v28  ;;  %7028 = vmatpush3.bf16.msra.mxu1 %v7656_v48  ;;  %v12358_v62 = vld [vmem:[#allocation98_spill] sm:$0xff] }
 0x24a   :  { %v9997_v16 = vpop.eup %7828  ;;  %v2985_v17 = vsub.f32 0.0, %v2729_v38  ;;  %v2733_v51 = vmul.f32 %v2477_v37, %v2477_v37  ;;  %v1583_v50 = vadd.f32 %v1582_v13, %v12357_v6  ;;  %v1584_v59 = vpop.f32.mrb[90].mxu0  ;;  %3852 = vperm.xlu1 %7636, %v7544_v8   ;;  %7029 = vmatprep.subr.bf16.mxu1 %v7658_v0  ;;  %v12359_v37 = vld [vmem:[#allocation99_spill] sm:$0xff]  ;;  %v7660_v6 = vld [vmem:[#allocation5 + $0x18] sm:$0xff]  }
 0x24b   :  { %v3408_v32 = vmul.f32 1.442695, %v2984_v49  ;;  %v2988_v63 = vsub.f32 0.0, %v2732_v30  ;;  %v2224_v57 = vsub.f32 %v1581_v61, %v9321_v60  ;;  %v1585_v25 = vadd.f32 %v1584_v59, %v12358_v62  ;;  %v1586_v53 = vpop.f32.mrb[91].mxu0  ;;  %v12360_v8 = vld [vmem:[#allocation24_spill] sm:$0xff]  ;;  %v7663_v30 = vld [vmem:[#allocation7 + $0xa8] sm:$0xff]  }
 0x24c   :  { %v3410_v7 = vmul.f32 1.442695, %v2985_v17  ;;  %v2989_v28 = vsub.f32 0.0, %v2733_v51  ;;  %v2225_v38 = vsub.f32 %v1583_v50, %v9323_v2  ;;  %v1587_v13 = vadd.f32 %v1586_v53, %v12359_v37  ;;  %6758 = vmatmul.mubr.msk.bf16.gmra.mrb[100].mxu1 %vm427_vm1, %v12360_v8  ;;  %4805 = vmatpush1.bf16.msra.mxu0 %v7663_v30 }
 0x24d   :  { %7838 = vpow2.f32 %v3408_v32  ;;  %v3416_v19 = vmul.f32 1.442695, %v2988_v63  ;;  %v2480_v21 = vmul.f32 0.8, %v2224_v57  ;;  %v2228_v48 = vsub.f32 %v1585_v25, %v9321_v60  ;;  %1731 = vmatprep.mubr.bf16.mxu1 %v12251_v14  ;;  %7030 = vmatpush3.bf16.msra.mxu1 %v7658_v0  ;;  %v1590_v62 = vpop.f32.mrb[92].mxu0  ;;  %v8337_v0 = vld [vmem:[#allocation2 + $0xd8] sm:$0xff] }
 0x24e   :  { %v12361_v49 = vpack.c.bf16 %v9941_v35, %v9935_v29  ;;  %7840 = vpow2.f32 %v3410_v7  ;;  %v3418_v61 = vmul.f32 1.442695, %v2989_v28  ;;  %v2481_v17 = vmul.f32 0.8, %v2225_v38  ;;  %7031 = vmatprep.subr.bf16.mxu1 %v7660_v6  ;;  %4806 = vmatprep.subr.bf16.mxu0 %v12251_v14  ;;  %v12362_v7 = vld [vmem:[#allocation100_spill] sm:$0xff] }
 0x24f   :  { %v2229_v51 = vsub.f32 %v1587_v13, %v9323_v2  ;;  %v10014_v50 = vpop.eup %7830  ;;  %7842 = vpow2.f32 %v3416_v19  ;;  %v2736_v59 = vmul.f32 %v2480_v21, %v2480_v21  ;;  %v2484_v32 = vmul.f32 0.8, %v2228_v48  ;;  %v12363_v48 = vld [vmem:[#allocation101_spill] sm:$0xff] }
 0x250   :  { %4674 = vmatmul.mubr.bf16.gmra.mrb[196].mxu0 %v12361_v49  ;;  %v3661_v63 = vpack.c.bf16 %v9997_v16, %v9992_v18  ;;  %v10018_v29 = vpop.eup %7832  ;;  %7844 = vpow2.f32 %v3418_v61  ;;  %v2737_v35 = vmul.f32 %v2481_v17, %v2481_v17  ;;  %v7542_v25 = vcvt.f32.s32 %v7541_v58  ;;  %v1592_v18 = vpop.f32.mrb[93].mxu0 }
 0x251   :  { %4681 = vmatprep.mubr.bf16.mxu0 %v3657_v10  ;;  %v2485_v57 = vmul.f32 0.8, %v2229_v51  ;;  %v7662_v10 = vld [vmem:[#allocation5 + $0x20] sm:$0xff]   ;;  %v10021_v53 = vpop.eup %7834  ;;  %v2992_v19 = vsub.f32 0.0, %v2736_v59  ;;  %v2740_v21 = vmul.f32 %v2484_v32, %v2484_v32  ;;  %v1591_v28 = vadd.f32 %v1590_v62, %v12362_v7  ;;  %v1594_v58 = vpop.f32.mrb[94].mxu0  ;;  %7032 = vmatpush3.bf16.msra.mxu1 %v7660_v6 }
 0x252   :  { %v7547_v16 = vtrunc.f32 %v8337_v0  ;;  %v10024_v38 = vpop.eup %7836  ;;  %v2993_v37 = vsub.f32 0.0, %v2737_v35  ;;  %v1593_v8 = vadd.f32 %v1592_v18, %v12363_v48  ;;  %v3664_v49 = vpack.c.bf16 %v10021_v53, %v10014_v50  ;;  %3849 = vperm.xlu0 %7635, %v7542_v25   ;;  %v1596_v59 = vpop.f32.mrb[95].mxu0  ;;  %7033 = vmatprep.subr.bf16.mxu1 %v7662_v10 }
 0x253   :  { %v2741_v13 = vmul.f32 %v2485_v57, %v2485_v57  ;;  %v3424_v30 = vmul.f32 1.442695, %v2992_v19  ;;  %v2996_v61 = vsub.f32 0.0, %v2740_v21  ;;  %v2232_v17 = vsub.f32 %v1591_v28, %v9321_v60  ;;  %v12364_v19 = vld [vmem:[#allocation26_spill] sm:$0xff] }
 0x254   :  { %v1595_v51 = vadd.f32 %v1594_v58, %v9527_v52  ;;  %v3426_v32 = vmul.f32 1.442695, %v2993_v37  ;;  %v2233_v35 = vsub.f32 %v1593_v8, %v9323_v2  ;;  %v1597_v57 = vadd.f32 %v1596_v59, %v9530_v20  ;;  %6759 = vmatmul.mubr.msk.bf16.gmra.mrb[104].mxu1 %vm427_vm1, %v12364_v19  ;;  %v8338_v59 = vld [vmem:[#allocation2 + $0xd0] sm:$0xff] }
 0x255   :  { %v2997_v62 = vsub.f32 0.0, %v2741_v13  ;;  %7846 = vpow2.f32 %v3424_v30  ;;  %v3432_v7 = vmul.f32 1.442695, %v2996_v61  ;;  %v2488_v18 = vmul.f32 0.8, %v2232_v17  ;;  %1741 = vmatprep.mubr.bf16.mxu1 %v12251_v14  ;;  %7034 = vmatpush3.bf16.msra.mxu1 %v7662_v10  ;;  %v1600_v8 = vpop.f32.mrb[96].mxu0 }
 0x256   :  { %v2236_v25 = vsub.f32 %v1595_v51, %v9321_v60  ;;  %v12365_v52 = vpack.c.bf16 %v9968_v42, %v9962_v27  ;;  %7848 = vpow2.f32 %v3426_v32  ;;  %v2489_v21 = vmul.f32 0.8, %v2233_v35  ;;  %v1602_v51 = vpop.f32.mrb[97].mxu0 }
 0x257   :  { %v3434_v6 = vmul.f32 1.442695, %v2997_v62  ;;  %v2237_v28 = vsub.f32 %v1597_v57, %v9323_v2  ;;  %v10041_v20 = vpop.eup %7838  ;;  %7850 = vpow2.f32 %v3432_v7  ;;  %v2744_v0 = vmul.f32 %v2488_v18, %v2488_v18  ;;  %v1604_v57 = vpop.f32.mrb[98].mxu0 }
 0x258   :  { %4682 = vmatmul.mubr.bf16.gmra.mrb[200].mxu0 %v12365_v52  ;;  %v2492_v37 = vmul.f32 0.8, %v2236_v25  ;;  %v3665_v13 = vpack.c.bf16 %v10024_v38, %v10018_v29  ;;  %v10045_v48 = vpop.eup %7840  ;;  %v2745_v27 = vmul.f32 %v2489_v21, %v2489_v21  ;;  %v7548_v58 = vcvt.f32.s32 %v7547_v16  ;;  %v12366_v38 = vld [vmem:[#allocation102_spill] sm:$0xff]  ;;  %v1606_v19 = vpop.f32.mrb[99].mxu0 }
 0x259   :  { %4689 = vmatprep.mubr.bf16.mxu0 %v3661_v63  ;;  %7852 = vpow2.f32 %v3434_v6  ;;  %v2493_v42 = vmul.f32 0.8, %v2237_v28  ;;  %v10047_v30 = vpop.eup %7842  ;;  %v3000_v63 = vsub.f32 0.0, %v2744_v0  ;;  %v1601_v17 = vadd.f32 %v1600_v8, %v9551_v24 }
 0x25a   :  { %v2748_v61 = vmul.f32 %v2492_v37, %v2492_v37  ;;  %v7545_v32 = vtrunc.f32 %v8338_v59  ;;  %v10050_v62 = vpop.eup %7844  ;;  %v3001_v29 = vsub.f32 0.0, %v2745_v27  ;;  %v1603_v35 = vadd.f32 %v1602_v51, %v12366_v38  ;;  %3858 = vperm.xlu1 %7636, %v7548_v58  }
 0x25b   :  { %v2749_v10 = vmul.f32 %v2493_v42, %v2493_v42  ;;  %v3668_v7 = vpack.c.bf16 %v10047_v30, %v10041_v20  ;;  %v3440_v16 = vmul.f32 1.442695, %v3000_v63  ;;  %v2240_v25 = vsub.f32 %v1601_v17, %v9321_v60  ;;  %v12367_v42 = vld [vmem:[#allocation28_spill] sm:$0xff] }
 0x25c   :  { %v3004_v18 = vsub.f32 0.0, %v2748_v61  ;;  %v1605_v24 = vadd.f32 %v1604_v57, %v9561_v5  ;;  %v3442_v52 = vmul.f32 1.442695, %v3001_v29  ;;  %v2241_v21 = vsub.f32 %v1603_v35, %v9323_v2  ;;  %6760 = vmatmul.mubr.msk.bf16.gmra.mrb[108].mxu1 %vm427_vm1, %v12367_v42 }
 0x25d   :  { %v3005_v6 = vsub.f32 0.0, %v2749_v10  ;;  %v1607_v28 = vadd.f32 %v1606_v19, %v9565_v47  ;;  %7854 = vpow2.f32 %v3440_v16  ;;  %v2496_v37 = vmul.f32 0.8, %v2240_v25  ;;  %1751 = vmatprep.mubr.bf16.mxu1 %v12251_v14  ;;  %v1610_v29 = vpop.f32.mrb[100].mxu0 }
 0x25e   :  { %v3448_v0 = vmul.f32 1.442695, %v3004_v18  ;;  %v2244_v27 = vsub.f32 %v1605_v24, %v9321_v60  ;;  %v12368_v8 = vpack.c.bf16 %v9994_v46, %v9987_v43  ;;  %7856 = vpow2.f32 %v3442_v52  ;;  %v1612_v16 = vpop.f32.mrb[101].mxu0  ;;  %v8339_v18 = vld [vmem:[#allocation2 + $0xe8] sm:$0xff] }
 0x25f   :  { %v3450_v5 = vmul.f32 1.442695, %v3005_v6  ;;  %v2497_v58 = vmul.f32 0.8, %v2241_v21  ;;  %v2245_v63 = vsub.f32 %v1607_v28, %v9323_v2  ;;  %v10067_v47 = vpop.eup %7846  ;;  %v2752_v61 = vmul.f32 %v2496_v37, %v2496_v37  ;;  %v1614_v6 = vpop.f32.mrb[102].mxu0 }
 0x260   :  { %4690 = vmatmul.mubr.bf16.gmra.mrb[204].mxu0 %v12368_v8  ;;  %7858 = vpow2.f32 %v3448_v0  ;;  %v2500_v17 = vmul.f32 0.8, %v2244_v27  ;;  %v3669_v51 = vpack.c.bf16 %v10050_v62, %v10045_v48  ;;  %v10071_v59 = vpop.eup %7848  ;;  %v7546_v10 = vcvt.f32.s32 %v7545_v32  ;;  %v12369_v62 = vld [vmem:[#allocation103_spill] sm:$0xff]  ;;  %v1616_v37 = vpop.f32.mrb[103].mxu0 }
 0x261   :  { %4697 = vmatprep.mubr.bf16.mxu0 %v3665_v13  ;;  %7860 = vpow2.f32 %v3450_v5  ;;  %v2753_v43 = vmul.f32 %v2497_v58, %v2497_v58  ;;  %v2501_v46 = vmul.f32 0.8, %v2245_v63  ;;  %v10073_v38 = vpop.eup %7850  ;;  %v3008_v13 = vsub.f32 0.0, %v2752_v61 }
 0x262   :  { %v2756_v35 = vmul.f32 %v2500_v17, %v2500_v17  ;;  %v1611_v57 = vadd.f32 %v1610_v29, %v9588_v44  ;;  %v7551_v25 = vtrunc.f32 %v8339_v18  ;;  %v1613_v52 = vadd.f32 %v1612_v16, %v12369_v62  ;;  %3855 = vperm.xlu0 %7635, %v7546_v10   ;;  %v12370_v17 = vld [vmem:[#allocation30_spill] sm:$0xff] }
 0x263   :  { %v10076_v24 = vpop.eup %7852  ;;  %v3009_v19 = vsub.f32 0.0, %v2753_v43  ;;  %v2757_v48 = vmul.f32 %v2501_v46, %v2501_v46  ;;  %v3672_v21 = vpack.c.bf16 %v10073_v38, %v10067_v47  ;;  %v3456_v32 = vmul.f32 1.442695, %v3008_v13  ;;  %v7665_v43 = vld [vmem:[#allocation7 + $0xb0] sm:$0xff]  }
 0x264   :  { %v3012_v28 = vsub.f32 0.0, %v2756_v35  ;;  %v2248_v0 = vsub.f32 %v1611_v57, %v9321_v60  ;;  %v1615_v44 = vadd.f32 %v1614_v6, %v9601_v34  ;;  %v2249_v8 = vsub.f32 %v1613_v52, %v9323_v2  ;;  %6761 = vmatmul.mubr.msk.bf16.gmra.mrb[112].mxu1 %vm427_vm1, %v12370_v17  ;;  %v7664_v34 = vld [vmem:[#allocation5 + $0x28] sm:$0xff]   ;;  %4807 = vmatpush1.bf16.msra.mxu0 %v7665_v43  ;;  %v12371_v43 = vld [vmem:[#allocation32_spill] sm:$0xff] }
 0x265   :  { %v3458_v27 = vmul.f32 1.442695, %v3009_v19  ;;  %v3013_v42 = vsub.f32 0.0, %v2757_v48  ;;  %v1617_v5 = vadd.f32 %v1616_v37, %v9605_v56  ;;  %7862 = vpow2.f32 %v3456_v32  ;;  %1761 = vmatprep.mubr.bf16.mxu1 %v12251_v14  ;;  %7035 = vmatprep.subr.bf16.mxu1 %v7664_v34  ;;  %v1620_v16 = vpop.f32.mrb[104].mxu0 }
 0x266   :  { %v3464_v58 = vmul.f32 1.442695, %v3012_v28  ;;  %v2504_v63 = vmul.f32 0.8, %v2248_v0  ;;  %v2252_v61 = vsub.f32 %v1615_v44, %v9321_v60  ;;  %v2505_v29 = vmul.f32 0.8, %v2249_v8  ;;  %7036 = vmatpush3.bf16.msra.mxu1 %v7664_v34  ;;  %4808 = vmatprep.subr.bf16.mxu0 %v12251_v14 }
 0x267   :  { %7864 = vpow2.f32 %v3458_v27  ;;  %v3466_v46 = vmul.f32 1.442695, %v3013_v42  ;;  %v2253_v10 = vsub.f32 %v1617_v5, %v9323_v2  ;;  %v10093_v56 = vpop.eup %7854  ;;  %v3673_v57 = vpack.c.bf16 %v10076_v24, %v10071_v59  ;;  %v1622_v52 = vpop.f32.mrb[105].mxu0  ;;  %v8340_v59 = vld [vmem:[#allocation2 + $0xe0] sm:$0xff] }
 0x268   :  { %4698 = vmatmul.mubr.bf16.gmra.mrb[208].mxu0 %v3664_v49  ;;  %7866 = vpow2.f32 %v3464_v58  ;;  %v2760_v13 = vmul.f32 %v2504_v63, %v2504_v63  ;;  %v2508_v35 = vmul.f32 0.8, %v2252_v61  ;;  %v10097_v50 = vpop.eup %7856  ;;  %v2761_v53 = vmul.f32 %v2505_v29, %v2505_v29  ;;  %v1624_v44 = vpop.f32.mrb[106].mxu0 }
 0x269   :  { %4705 = vmatprep.mubr.bf16.mxu0 %v3669_v51  ;;  %7868 = vpow2.f32 %v3466_v46  ;;  %v2509_v49 = vmul.f32 0.8, %v2253_v10  ;;  %v7552_v18 = vcvt.f32.s32 %v7551_v25  ;;  %v1621_v62 = vadd.f32 %v1620_v16, %v9628_v12  ;;  %v1626_v8 = vpop.f32.mrb[107].mxu0 }
 0x26a   :  { %v10100_v51 = vpop.eup %7858  ;;  %v3016_v19 = vsub.f32 0.0, %v2760_v13  ;;  %v2764_v48 = vmul.f32 %v2508_v35, %v2508_v35  ;;  %v7549_v24 = vtrunc.f32 %v8340_v59  ;;  %v3017_v32 = vsub.f32 0.0, %v2761_v53 }
 0x26b   :  { %v10103_v6 = vpop.eup %7860  ;;  %v2765_v28 = vmul.f32 %v2509_v49, %v2509_v49  ;;  %v1623_v0 = vadd.f32 %v1622_v52, %v9633_v41  ;;  %3864 = vperm.xlu1 %7636, %v7552_v18   ;;  %v3676_v25 = vpack.c.bf16 %v10100_v51, %v10093_v56  ;;  %v2256_v42 = vsub.f32 %v1621_v62, %v9321_v60  ;;  %v8341_v62 = vld [vmem:[#allocation2 + $0xf8] sm:$0xff] }
 0x26c   :  { %v3472_v37 = vmul.f32 1.442695, %v3016_v19  ;;  %v3020_v27 = vsub.f32 0.0, %v2764_v48  ;;  %v1625_v12 = vadd.f32 %v1624_v44, %v9638_v26  ;;  %v3474_v5 = vmul.f32 1.442695, %v3017_v32  ;;  %6762 = vmatmul.mubr.msk.bf16.gmra.mrb[116].mxu1 %vm427_vm1, %v12371_v43 }
 0x26d   :  { %v3021_v58 = vsub.f32 0.0, %v2765_v28  ;;  %v2257_v63 = vsub.f32 %v1623_v0, %v9323_v2  ;;  %v1627_v61 = vadd.f32 %v1626_v8, %v9642_v36  ;;  %v2512_v17 = vmul.f32 0.8, %v2256_v42  ;;  %1771 = vmatprep.mubr.bf16.mxu1 %v12251_v14  ;;  %v8342_v0 = vld [vmem:[#allocation2 + $0xf0] sm:$0xff] }
 0x26e   :  { %7870 = vpow2.f32 %v3472_v37  ;;  %v3480_v41 = vmul.f32 1.442695, %v3020_v27  ;;  %v2260_v34 = vsub.f32 %v1625_v12, %v9321_v60  ;;  %v3677_v35 = vpack.c.bf16 %v10103_v6, %v10097_v50 }
 0x26f   :  { %7872 = vpow2.f32 %v3474_v5  ;;  %v3482_v26 = vmul.f32 1.442695, %v3021_v58  ;;  %v2513_v46 = vmul.f32 0.8, %v2257_v63  ;;  %v2261_v29 = vsub.f32 %v1627_v61, %v9323_v2  ;;  %v10120_v36 = vpop.eup %7862 }
 0x270   :  { %4706 = vmatmul.mubr.bf16.gmra.mrb[212].mxu0 %v3668_v7  ;;  %7874 = vpow2.f32 %v3480_v41  ;;  %v2768_v10 = vmul.f32 %v2512_v17, %v2512_v17  ;;  %v2516_v13 = vmul.f32 0.8, %v2260_v34  ;;  %v1630_v7 = vpop.f32.mrb[108].mxu0  ;;  %v7550_v49 = vcvt.f32.s32 %v7549_v24  ;;  %v12372_v41 = vld [vmem:[#allocation34_spill] sm:$0xff] }
 0x271   :  { %4713 = vmatprep.mubr.bf16.mxu0 %v3673_v57  ;;  %v10124_v53 = vpop.eup %7864  ;;  %7876 = vpow2.f32 %v3482_v26  ;;  %v2769_v20 = vmul.f32 %v2513_v46, %v2513_v46  ;;  %v2517_v30 = vmul.f32 0.8, %v2261_v29  ;;  %v1631_v19 = vadd.f32 %v1630_v7, %v9662_v54  ;;  %v1632_v48 = vpop.f32.mrb[109].mxu0 }
 0x272   :  { %v10126_v16 = vpop.eup %7866  ;;  %v3024_v57 = vsub.f32 0.0, %v2768_v10  ;;  %v2772_v18 = vmul.f32 %v2516_v13, %v2516_v13  ;;  %v7555_v52 = vtrunc.f32 %v8341_v62  ;;  %v1633_v6 = vadd.f32 %v1632_v48, %v9667_v1  ;;  %v1634_v28 = vpop.f32.mrb[110].mxu0  ;;  %3861 = vperm.xlu0 %7635, %v7550_v49   ;;  %v8343_v62 = vld [vmem:[#allocation2 + $0x108] sm:$0xff] }
 0x273   :  { %v10129_v59 = vpop.eup %7868  ;;  %v3025_v32 = vsub.f32 0.0, %v2769_v20  ;;  %v2773_v50 = vmul.f32 %v2517_v30, %v2517_v30  ;;  %v7553_v44 = vtrunc.f32 %v8342_v0  ;;  %v2264_v27 = vsub.f32 %v1631_v19, %v9321_v60  ;;  %v1636_v54 = vpop.f32.mrb[111].mxu0 }
 0x274   :  { %v3488_v24 = vmul.f32 1.442695, %v3024_v57  ;;  %v3028_v37 = vsub.f32 0.0, %v2772_v18  ;;  %v1635_v42 = vadd.f32 %v1634_v28, %v9672_v4  ;;  %v2265_v5 = vsub.f32 %v1633_v6, %v9323_v2  ;;  %6763 = vmatmul.mubr.msk.bf16.gmra.mrb[120].mxu1 %vm427_vm1, %v12372_v41 }
 0x275   :  { %v3490_v12 = vmul.f32 1.442695, %v3025_v32  ;;  %v3029_v8 = vsub.f32 0.0, %v2773_v50  ;;  %v1637_v58 = vadd.f32 %v1636_v54, %v9678_v23  ;;  %v2520_v1 = vmul.f32 0.8, %v2264_v27  ;;  %1781 = vmatprep.mubr.bf16.mxu1 %v12251_v14 }
 0x276   :  { %7878 = vpow2.f32 %v3488_v24  ;;  %v3496_v63 = vmul.f32 1.442695, %v3028_v37  ;;  %v2268_v61 = vsub.f32 %v1635_v42, %v9321_v60  ;;  %v2521_v17 = vmul.f32 0.8, %v2265_v5  ;;  %v12373_v42 = vld [vmem:[#allocation36_spill] sm:$0xff] }
 0x277   :  { %7880 = vpow2.f32 %v3490_v12  ;;  %v3498_v4 = vmul.f32 1.442695, %v3029_v8  ;;  %v2269_v34 = vsub.f32 %v1637_v58, %v9323_v2  ;;  %v2776_v43 = vmul.f32 %v2520_v1, %v2520_v1 }
 0x278   :  { %4714 = vmatmul.mubr.bf16.gmra.mrb[216].mxu0 %v3672_v21  ;;  %v10144_v23 = vpop.eup %7870  ;;  %7882 = vpow2.f32 %v3496_v63  ;;  %v2524_v26 = vmul.f32 0.8, %v2268_v61  ;;  %v3681_v46 = vpack.c.bf16 %v10129_v59, %v10124_v53  ;;  %v2777_v47 = vmul.f32 %v2521_v17, %v2521_v17  ;;  %v1640_v21 = vpop.f32.mrb[112].mxu0 }
 0x279   :  { %4721 = vmatprep.mubr.bf16.mxu0 %v3677_v35  ;;  %v10148_v29 = vpop.eup %7872  ;;  %7884 = vpow2.f32 %v3498_v4  ;;  %v2525_v38 = vmul.f32 0.8, %v2269_v34  ;;  %v7556_v10 = vcvt.f32.s32 %v7555_v52  ;;  %v3032_v35 = vsub.f32 0.0, %v2776_v43  ;;  %v1642_v7 = vpop.f32.mrb[113].mxu0 }
 0x27a   :  { %v10150_v13 = vpop.eup %7874  ;;  %v2780_v20 = vmul.f32 %v2524_v26, %v2524_v26  ;;  %v1641_v30 = vadd.f32 %v1640_v21, %v9699_v3  ;;  %v7554_v49 = vcvt.f32.s32 %v7553_v44  ;;  %v3033_v18 = vsub.f32 0.0, %v2777_v47  ;;  %v1644_v48 = vpop.f32.mrb[114].mxu0 }
 0x27b   :  { %v10153_v57 = vpop.eup %7876  ;;  %v2781_v19 = vmul.f32 %v2525_v38, %v2525_v38  ;;  %v1643_v53 = vadd.f32 %v1642_v7, %v9704_v45  ;;  %3870 = vperm.xlu1 %7636, %v7556_v10   ;;  %v7559_v59 = vtrunc.f32 %v8343_v62  ;;  %v3504_v32 = vmul.f32 1.442695, %v3032_v35  ;;  %v1646_v28 = vpop.f32.mrb[115].mxu0  ;;  %v12374_v62 = vld [vmem:[#allocation23_spill] sm:$0xff] }
 0x27c   :  { %v3036_v52 = vsub.f32 0.0, %v2780_v20  ;;  %v2272_v50 = vsub.f32 %v1641_v30, %v9321_v60  ;;  %v1645_v6 = vadd.f32 %v1644_v48, %v9709_v11  ;;  %3867 = vperm.xlu0 %7635, %v7554_v49   ;;  %v3506_v3 = vmul.f32 1.442695, %v3033_v18  ;;  %6764 = vmatmul.mubr.msk.bf16.gmra.mrb[124].mxu1 %vm427_vm1, %v12373_v42 }
 0x27d   :  { %v3037_v0 = vsub.f32 0.0, %v2781_v19  ;;  %v2273_v44 = vsub.f32 %v1643_v53, %v9323_v2  ;;  %v1647_v24 = vadd.f32 %v1646_v28, %v9715_v39  ;;  %7886 = vpow2.f32 %v3504_v32  ;;  %1791 = vmatprep.mubr.bf16.mxu1 %v12251_v14  ;;  %v1650_v51 = vpop.f32.mrb[116].mxu0 }
 0x27e   :  { %v3512_v45 = vmul.f32 1.442695, %v3036_v52  ;;  %v2528_v37 = vmul.f32 0.8, %v2272_v50  ;;  %v2276_v27 = vsub.f32 %v1645_v6, %v9321_v60  ;;  %7888 = vpow2.f32 %v3506_v3  ;;  %v1652_v43 = vpop.f32.mrb[117].mxu0 }
 0x27f   :  { %v3514_v11 = vmul.f32 1.442695, %v3037_v0  ;;  %v2529_v54 = vmul.f32 0.8, %v2273_v44  ;;  %v2277_v12 = vsub.f32 %v1647_v24, %v9323_v2  ;;  %v7560_v58 = vcvt.f32.s32 %v7559_v59  ;;  %v1654_v10 = vpop.f32.mrb[118].mxu0  ;;  %v7666_v59 = vld [vmem:[#allocation5 + $0x30] sm:$0xff]  }
 0x280   :  { %4722 = vmatmul.mubr.bf16.gmra.mrb[220].mxu0 %v3676_v25  ;;  %v10168_v39 = vpop.eup %7878  ;;  %7890 = vpow2.f32 %v3512_v45  ;;  %v2784_v8 = vmul.f32 %v2528_v37, %v2528_v37  ;;  %v2532_v5 = vmul.f32 0.8, %v2276_v27  ;;  %v8344_v25 = vld [vmem:[#allocation2 + $0x100] sm:$0xff]  ;;  %v1651_v34 = vadd.f32 %v1650_v51, %v9733_v9  ;;  %v1656_v9 = vpop.f32.mrb[119].mxu0  ;;  %7037 = vmatprep.subr.bf16.mxu1 %v7666_v59  ;;  %v8345_v24 = vld [vmem:[#allocation2 + $0x118] sm:$0xff] }
 0x281   :  { %4729 = vmatprep.mubr.bf16.mxu0 %v3681_v46  ;;  %v10170_v63 = vpop.eup %7880  ;;  %7892 = vpow2.f32 %v3514_v11  ;;  %v2785_v1 = vmul.f32 %v2529_v54, %v2529_v54  ;;  %v2533_v56 = vmul.f32 0.8, %v2277_v12  ;;  %v7557_v61 = vtrunc.f32 %v8344_v25  ;;  %3876 = vperm.xlu1 %7636, %v7560_v58   ;;  %v8346_v54 = vld [vmem:[#allocation2 + $0x110] sm:$0xff] }
 0x282   :  { %v10172_v41 = vpop.eup %7882  ;;  %v3040_v4 = vsub.f32 0.0, %v2784_v8  ;;  %v2788_v17 = vmul.f32 %v2532_v5, %v2532_v5  ;;  %v3680_v26 = vpack.c.bf16 %v10126_v16, %v10120_v36  ;;  %v1653_v21 = vadd.f32 %v1652_v43, %v9738_v40  ;;  %7038 = vmatpush3.bf16.msra.mxu1 %v7666_v59 }
 0x283   :  { %v10177_v46 = vpop.eup %7884  ;;  %v3041_v47 = vsub.f32 0.0, %v2785_v1  ;;  %v2789_v38 = vmul.f32 %v2533_v56, %v2533_v56  ;;  %v7558_v35 = vcvt.f32.s32 %v7557_v61  ;;  %v2280_v7 = vsub.f32 %v1651_v34, %v9321_v60 }
 0x284   :  { %v3520_v20 = vmul.f32 1.442695, %v3040_v4  ;;  %v3044_v30 = vsub.f32 0.0, %v2788_v17  ;;  %v1655_v49 = vadd.f32 %v1654_v10, %v9743_v31  ;;  %v2281_v53 = vsub.f32 %v1653_v21, %v9323_v2  ;;  %6765 = vmatmul.mubr.msk.bf16.gmra.mrb[128].mxu1 %vm427_vm1, %v12374_v62  ;;  %v8347_v10 = vld [vmem:[#allocation2 + $0x128] sm:$0xff] }
 0x285   :  { %v3522_v18 = vmul.f32 1.442695, %v3041_v47  ;;  %v3045_v19 = vsub.f32 0.0, %v2789_v38  ;;  %3873 = vperm.xlu0 %7635, %v7558_v35   ;;  %v1657_v36 = vadd.f32 %v1656_v9, %v9749_v33  ;;  %v2536_v48 = vmul.f32 0.8, %v2280_v7  ;;  %1801 = vmatprep.mubr.bf16.mxu1 %v12251_v14  ;;  %v1660_v37 = vpop.f32.mrb[120].mxu0 }
 0x286   :  { %7894 = vpow2.f32 %v3520_v20  ;;  %v3528_v16 = vmul.f32 1.442695, %v3044_v30  ;;  %v2284_v40 = vsub.f32 %v1655_v49, %v9321_v60  ;;  %v2537_v32 = vmul.f32 0.8, %v2281_v53  ;;  %v12375_v35 = vld [vmem:[#allocation25_spill] sm:$0xff] }
 0x287   :  { %7896 = vpow2.f32 %v3522_v18  ;;  %v3530_v31 = vmul.f32 1.442695, %v3045_v19  ;;  %v2285_v52 = vsub.f32 %v1657_v36, %v9323_v2  ;;  %v10189_v50 = vpop.eup %7886  ;;  %v2792_v33 = vmul.f32 %v2536_v48, %v2536_v48  ;;  %v7667_v7 = vld [vmem:[#allocation7 + $0xb8] sm:$0xff]   ;;  %v8348_v19 = vld [vmem:[#allocation2 + $0x120] sm:$0xff] }
 0x288   :  { %4730 = vmatmul.mubr.bf16.gmra.mrb[224].mxu0 %v3680_v26  ;;  %7898 = vpow2.f32 %v3528_v16  ;;  %v2540_v6 = vmul.f32 0.8, %v2284_v40  ;;  %v3685_v28 = vpack.c.bf16 %v10153_v57, %v10148_v29  ;;  %v10193_v3 = vpop.eup %7888  ;;  %v2793_v0 = vmul.f32 %v2537_v32, %v2537_v32  ;;  %v1662_v29 = vpop.f32.mrb[121].mxu0  ;;  %v12376_v40 = vld [vmem:[#allocation62_spill] sm:$0xff] }
 0x289   :  { %7900 = vpow2.f32 %v3530_v31  ;;  %v2541_v44 = vmul.f32 0.8, %v2285_v52  ;;  %v7563_v45 = vtrunc.f32 %v8345_v24  ;;  %v3048_v42 = vsub.f32 0.0, %v2792_v33  ;;  %v1664_v51 = vpop.f32.mrb[122].mxu0  ;;  %4809 = vmatpush1.bf16.msra.mxu0 %v7667_v7 }
 0x28a   :  { %v10195_v27 = vpop.eup %7890  ;;  %v2796_v11 = vmul.f32 %v2540_v6, %v2540_v6  ;;  %4737 = vmatprep.mubr.bf16.mxu0 %v3685_v28  ;;  %v7561_v12 = vtrunc.f32 %v8346_v54  ;;  %v1661_v8 = vadd.f32 %v1660_v37, %v9768_v22  ;;  %v3049_v5 = vsub.f32 0.0, %v2793_v0  ;;  %v1666_v34 = vpop.f32.mrb[123].mxu0  ;;  %4810 = vmatprep.subr.bf16.mxu0 %v12251_v14  ;;  %v8349_v37 = vld [vmem:[#allocation2 + $0x138] sm:$0xff]  ;;  %v8350_v54 = vld [vmem:[#allocation2 + $0x130] sm:$0xff] }
 0x28b   :  { %v10198_v57 = vpop.eup %7892  ;;  %v2797_v58 = vmul.f32 %v2541_v44, %v2541_v44  ;;  %v7564_v1 = vcvt.f32.s32 %v7563_v45  ;;  %v1663_v56 = vadd.f32 %v1662_v29, %v9773_v55  ;;  %v3536_v25 = vmul.f32 1.442695, %v3048_v42 }
 0x28c   :  { %v3052_v61 = vsub.f32 0.0, %v2796_v11  ;;  %v7562_v4 = vcvt.f32.s32 %v7561_v12  ;;  %v2288_v17 = vsub.f32 %v1661_v8, %v9321_v60  ;;  %v3538_v43 = vmul.f32 1.442695, %v3049_v5  ;;  %6766 = vmatmul.mubr.msk.bf16.gmra.mrb[132].mxu1 %vm427_vm1, %v12375_v35 }
 0x28d   :  { %v3053_v26 = vsub.f32 0.0, %v2797_v58  ;;  %3882 = vperm.xlu1 %7636, %v7564_v1   ;;  %v2289_v22 = vsub.f32 %v1663_v56, %v9323_v2  ;;  %v1665_v47 = vadd.f32 %v1664_v51, %v9778_v15  ;;  %7902 = vpow2.f32 %v3536_v25  ;;  %1811 = vmatprep.mubr.bf16.mxu1 %v12251_v14  ;;  %v1670_v59 = vpop.f32.mrb[124].mxu0 }
 0x28e   :  { %v3544_v38 = vmul.f32 1.442695, %v3052_v61  ;;  %3879 = vperm.xlu0 %7635, %v7562_v4   ;;  %v2544_v21 = vmul.f32 0.8, %v2288_v17  ;;  %v7567_v55 = vtrunc.f32 %v8347_v10  ;;  %7904 = vpow2.f32 %v3538_v43  ;;  %v1672_v28 = vpop.f32.mrb[125].mxu0  ;;  %v12379_v4 = vld [vmem:[#allocation27_spill] sm:$0xff] }
 0x28f   :  { %v2545_v20 = vmul.f32 0.8, %v2289_v22  ;;  %v2292_v30 = vsub.f32 %v1665_v47, %v9321_v60  ;;  %v3546_v9 = vmul.f32 1.442695, %v3053_v26  ;;  %v7565_v53 = vtrunc.f32 %v8348_v19  ;;  %v1674_v11 = vpop.f32.mrb[126].mxu0  ;;  %v12380_v43 = vld [vmem:[#allocation64_spill] sm:$0xff] }
 0x290   :  { %v10208_v49 = vpop.eup %7894  ;;  %v2800_v15 = vmul.f32 %v2544_v21, %v2544_v21  ;;  %v7568_v18 = vcvt.f32.s32 %v7567_v55  ;;  %7906 = vpow2.f32 %v3544_v38  ;;  %v1667_v62 = vadd.f32 %v1666_v34, %v12376_v40  ;;  %v1676_v8 = vpop.f32.mrb[127].mxu0  ;;  %v8351_v21 = vld [vmem:[#allocation2 + $0x148] sm:$0xff]  ;;  %v8352_v55 = vld [vmem:[#allocation2 + $0x140] sm:$0xff] }
 0x291   :  { %v10210_v36 = vpop.eup %7896  ;;  %v2801_v16 = vmul.f32 %v2545_v20, %v2545_v20  ;;  %v2548_v48 = vmul.f32 0.8, %v2292_v30  ;;  %v7566_v52 = vcvt.f32.s32 %v7565_v53  ;;  %v3684_v33 = vpack.c.bf16 %v10150_v13, %v10144_v23  ;;  %v12377_v13 = vld [vmem:[#allocation63_spill] sm:$0xff] }
 0x292   :  { %v10213_v31 = vpop.eup %7898  ;;  %v3056_v32 = vsub.f32 0.0, %v2800_v15  ;;  %3888 = vperm.xlu1 %7636, %v7568_v18   ;;  %v3689_v6 = vpack.c.bf16 %v10177_v46, %v10170_v63  ;;  %v2293_v45 = vsub.f32 %v1667_v62, %v9323_v2  ;;  %v7571_v42 = vtrunc.f32 %v8349_v37  ;;  %v12378_v63 = vld [vmem:[#allocation48_spill] sm:$0xff] }
 0x293   :  { %v10220_v0 = vpop.eup %7900  ;;  %v3057_v44 = vsub.f32 0.0, %v2801_v16  ;;  %v2804_v24 = vmul.f32 %v2548_v48, %v2548_v48  ;;  %7908 = vpow2.f32 %v3546_v9  ;;  %3885 = vperm.xlu0 %7635, %v7566_v52   ;;  %4738 = vmatmul.mubr.bf16.gmra.mrb[228].mxu0 %v3684_v33  ;;  %v7569_v23 = vtrunc.f32 %v8350_v54  ;;  %v12381_v9 = vld [vmem:[#allocation65_spill] sm:$0xff] }
 0x294   :  { %v1671_v12 = vadd.f32 %v1670_v59, %v12377_v13  ;;  %v1673_v46 = vadd.f32 %v1672_v28, %v12378_v63  ;;  %v2549_v58 = vmul.f32 0.8, %v2293_v45  ;;  %4745 = vmatprep.mubr.bf16.mxu0 %v3689_v6  ;;  %v7572_v1 = vcvt.f32.s32 %v7571_v42  ;;  %6767 = vmatmul.mubr.msk.bf16.gmra.mrb[136].mxu1 %vm427_vm1, %v12379_v4  ;;  %v8353_v6 = vld [vmem:[#allocation2 + $0x158] sm:$0xff]  ;;  %v8354_v45 = vld [vmem:[#allocation2 + $0x150] sm:$0xff]  ;;  %v8356_v13 = vld [vmem:[#allocation2 + $0x160] sm:$0xff] }
 0x295   :  { %v3554_v29 = vmul.f32 1.442695, %v3057_v44  ;;  %v3060_v5 = vsub.f32 0.0, %v2804_v24  ;;  %v3552_v56 = vmul.f32 1.442695, %v3056_v32  ;;  %v7570_v51 = vcvt.f32.s32 %v7569_v23  ;;  %1821 = vmatprep.mubr.bf16.mxu1 %v12251_v14  ;;  %v12382_v54 = vld [vmem:[#allocation29_spill] sm:$0xff] }
 0x296   :  { %v2296_v25 = vsub.f32 %v1671_v12, %v9321_v60  ;;  %v2297_v61 = vsub.f32 %v1673_v46, %v9323_v2  ;;  %v2805_v34 = vmul.f32 %v2549_v58, %v2549_v58  ;;  %3894 = vperm.xlu1 %7636, %v7572_v1   ;;  %v1675_v26 = vadd.f32 %v1674_v11, %v12380_v43 }
 0x297   :  { %7910 = vpow2.f32 %v3554_v29  ;;  %v3560_v17 = vmul.f32 1.442695, %v3060_v5  ;;  %v10231_v22 = vpop.eup %7902  ;;  %3891 = vperm.xlu0 %7635, %v7570_v51   ;;  %v7575_v10 = vtrunc.f32 %v8351_v21  ;;  %v7573_v35 = vtrunc.f32 %v8352_v55  ;;  %v8357_v51 = vld [vmem:[#allocation2 + $0x178] sm:$0xff]  ;;  %v12383_v21 = vld [vmem:[#allocation31_spill] sm:$0xff] }
 0x298   :  { %v2552_v47 = vmul.f32 0.8, %v2296_v25  ;;  %v2553_v38 = vmul.f32 0.8, %v2297_v61  ;;  %v10233_v20 = vpop.eup %7904  ;;  %v3061_v30 = vsub.f32 0.0, %v2805_v34  ;;  %v2300_v7 = vsub.f32 %v1675_v26, %v9321_v60  ;;  %v8358_v61 = vld [vmem:[#allocation2 + $0x170] sm:$0xff] }
 0x299   :  { %7912 = vpow2.f32 %v3560_v17  ;;  %v1677_v15 = vadd.f32 %v1676_v8, %v12381_v9  ;;  %v7576_v53 = vcvt.f32.s32 %v7575_v10  ;;  %v7574_v16 = vcvt.f32.s32 %v7573_v35  ;;  %v8361_v35 = vld [vmem:[#allocation2 + $0x198] sm:$0xff]  ;;  %v8362_v9 = vld [vmem:[#allocation2 + $0x190] sm:$0xff] }
 0x29a   :  { %v2808_v18 = vmul.f32 %v2552_v47, %v2552_v47  ;;  %v2809_v19 = vmul.f32 %v2553_v38, %v2553_v38  ;;  %v10237_v48 = vpop.eup %7906  ;;  %v3562_v40 = vmul.f32 1.442695, %v3061_v30  ;;  %v2556_v62 = vmul.f32 0.8, %v2300_v7  ;;  %v8360_v47 = vld [vmem:[#allocation2 + $0x180] sm:$0xff] }
 0x29b   :  { %v2301_v59 = vsub.f32 %v1677_v15, %v9323_v2  ;;  %v3688_v32 = vpack.c.bf16 %v10172_v41, %v10168_v39  ;;  %3900 = vperm.xlu1 %7636, %v7576_v53   ;;  %3897 = vperm.xlu0 %7635, %v7574_v16   ;;  %v3693_v60 = vpack.c.bf16 %v10198_v57, %v10193_v3  ;;  %v7579_v28 = vtrunc.f32 %v8353_v6  ;;  %v8355_v41 = vld [vmem:[#allocation2 + $0x168] sm:$0xff] }
 0x29c   :  { %v3064_v52 = vsub.f32 0.0, %v2808_v18  ;;  %v3065_v33 = vsub.f32 0.0, %v2809_v19  ;;  %7914 = vpow2.f32 %v3562_v40  ;;  %v2812_v44 = vmul.f32 %v2556_v62, %v2556_v62  ;;  %6768 = vmatmul.mubr.msk.bf16.gmra.mrb[140].mxu1 %vm427_vm1, %v12382_v54  ;;  %v8363_v53 = vld [vmem:[#allocation2 + $0x1a8] sm:$0xff]  ;;  %v8364_v62 = vld [vmem:[#allocation2 + $0x1a0] sm:$0xff] }
 0x29d   :  { %v2557_v24 = vmul.f32 0.8, %v2301_v59  ;;  %4746 = vmatmul.mubr.bf16.gmra.mrb[232].mxu0 %v3688_v32  ;;  %v7577_v37 = vtrunc.f32 %v8354_v45  ;;  %v10244_v42 = vpop.eup %7908  ;;  %7916 = vpow2.f32 %v3552_v56  ;;  %v7580_v39 = vcvt.f32.s32 %v7579_v28  ;;  %1831 = vmatprep.mubr.bf16.mxu1 %v12251_v14  ;;  %v8365_v28 = vld [vmem:[#allocation2 + $0x1b8] sm:$0xff]  ;;  %v7668_v45 = vld [vmem:[#allocation7 + $0xc0] sm:$0xff]  }
 0x29e   :  { %v3568_v2 = vmul.f32 1.442695, %v3064_v52  ;;  %4753 = vmatprep.mubr.bf16.mxu0 %v3693_v60  ;;  %v7583_v11 = vtrunc.f32 %v8355_v41  ;;  %v3068_v3 = vsub.f32 0.0, %v2812_v44  ;;  %v7581_v12 = vtrunc.f32 %v8356_v13  ;;  %v12384_v52 = vld [vmem:[#allocation33_spill] sm:$0xff]  ;;  %4811 = vmatpush1.bf16.msra.mxu0 %v7668_v45  ;;  %v12385_v13 = vld [vmem:[#allocation35_spill] sm:$0xff] }
 0x29f   :  { %v2813_v57 = vmul.f32 %v2557_v24, %v2557_v24  ;;  %v7578_v23 = vcvt.f32.s32 %v7577_v37  ;;  %v3570_v63 = vmul.f32 1.442695, %v3065_v33  ;;  %3906 = vperm.xlu1 %7636, %v7580_v39   ;;  %v3692_v8 = vpack.c.bf16 %v10195_v27, %v10189_v50  ;;  %v7669_v39 = vld [vmem:[#allocation5 + $0x38] sm:$0xff]  }
 0x2a0   :  { %v7584_v46 = vcvt.f32.s32 %v7583_v11  ;;  %v3697_v29 = vpack.c.bf16 %v10220_v0, %v10210_v36  ;;  %v3576_v58 = vmul.f32 1.442695, %v3068_v3  ;;  %v7582_v56 = vcvt.f32.s32 %v7581_v12  ;;  %v8359_v0 = vld [vmem:[#allocation2 + $0x188] sm:$0xff]  ;;  %7039 = vmatprep.subr.bf16.mxu1 %v7669_v39 }
 0x2a1   :  { %v10253_v5 = vpop.eup %7910  ;;  %v3069_v1 = vsub.f32 0.0, %v2813_v57  ;;  %3903 = vperm.xlu0 %7635, %v7578_v23   ;;  %7918 = vpow2.f32 %v3568_v2  ;;  %v7587_v25 = vtrunc.f32 %v8357_v51  ;;  %v7585_v4 = vtrunc.f32 %v8358_v61  ;;  %v8367_v11 = vld [vmem:[#allocation2 + $0x1c8] sm:$0xff]  ;;  %7040 = vmatpush3.bf16.msra.mxu1 %v7669_v39  ;;  %v8368_v57 = vld [vmem:[#allocation2 + $0x1c0] sm:$0xff] }
 0x2a2   :  { %7920 = vpow2.f32 %v3576_v58  ;;  %v3696_v50 = vpack.c.bf16 %v10213_v31, %v10208_v49  ;;  %v3701_v27 = vpack.c.bf16 %v10244_v42, %v10233_v20  ;;  %v7591_v43 = vtrunc.f32 %v8359_v0  ;;  %v8366_v42 = vld [vmem:[#allocation2 + $0x1b0] sm:$0xff] }
 0x2a3   :  { %v10255_v17 = vpop.eup %7912  ;;  %v3578_v34 = vmul.f32 1.442695, %v3069_v1  ;;  %7922 = vpow2.f32 %v3570_v63  ;;  %3912 = vperm.xlu1 %7636, %v7584_v46   ;;  %v7588_v36 = vcvt.f32.s32 %v7587_v25  ;;  %v7586_v26 = vcvt.f32.s32 %v7585_v4  ;;  %v8369_v63 = vld [vmem:[#allocation2 + $0x1d8] sm:$0xff]  ;;  %v8371_v1 = vld [vmem:[#allocation2 + $0x1e8] sm:$0xff]  ;;  %v8372_v25 = vld [vmem:[#allocation2 + $0x1e0] sm:$0xff] }
 0x2a4   :  { %v7589_v38 = vtrunc.f32 %v8360_v47  ;;  %6769 = vmatmul.mubr.msk.bf16.gmra.mrb[144].mxu1 %vm427_vm1, %v12383_v21  ;;  %v3700_v49 = vpack.c.bf16 %v10237_v48, %v10231_v22  ;;  %v7592_v55 = vcvt.f32.s32 %v7591_v43  ;;  %v7595_v20 = vtrunc.f32 %v8361_v35  ;;  %v12386_v4 = vld [vmem:[#allocation37_spill] sm:$0xff]  ;;  %v12387_v47 = vld [vmem:[#allocation38_spill] sm:$0xff]  ;;  %v12389_v21 = vld [vmem:[#allocation40_spill] sm:$0xff]  ;;  %v10307_v35 = vpop.permute.xlu1 %3783 }
 0x2a5   :  { %7924 = vpow2.f32 %v3578_v34  ;;  %3909 = vperm.xlu0 %7635, %v7582_v56   ;;  %4754 = vmatmul.mubr.bf16.gmra.mrb[236].mxu0 %v3692_v8  ;;  %v7593_v15 = vtrunc.f32 %v8362_v9  ;;  %v7599_v16 = vtrunc.f32 %v8363_v53  ;;  %v7597_v59 = vtrunc.f32 %v8364_v62  ;;  %v8373_v34 = vld [vmem:[#allocation2 + $0x1f8] sm:$0xff] }
 0x2a6   :  { %4761 = vmatprep.mubr.bf16.mxu0 %v3697_v29  ;;  %v7915_v31 = vpop.eup %7914  ;;  %1841 = vmatprep.mubr.bf16.mxu1 %v12251_v14  ;;  %v7590_v7 = vcvt.f32.s32 %v7589_v38  ;;  %v7596_v22 = vcvt.f32.s32 %v7595_v20  ;;  %v7603_v44 = vtrunc.f32 %v8365_v28  ;;  %v7601_v2 = vtrunc.f32 %v8366_v42  ;;  %v8370_v29 = vld [vmem:[#allocation2 + $0x1d0] sm:$0xff]  ;;  %v10309_v20 = vpop.permute.xlu0 %3777 }
 0x2a7   :  { %v10266_v10 = vpop.eup %7916  ;;  %3918 = vperm.xlu1 %7636, %v7588_v36   ;;  %v3705_v30 = vpack.c.bf16 %v7915_v31, %v10253_v5  ;;  %v7594_v40 = vcvt.f32.s32 %v7593_v15  ;;  %v7600_v6 = vcvt.f32.s32 %v7599_v16  ;;  %v7598_v37 = vcvt.f32.s32 %v7597_v59  ;;  %v8374_v36 = vld [vmem:[#allocation2 + $0x1f0] sm:$0xff]  ;;  %v12391_v31 = vld [vmem:[#allocation42_spill] sm:$0xff] }
 0x2a8   :  { %v3704_v18 = vpack.c.bf16 %v10255_v17, %v10266_v10  ;;  %v7604_v41 = vcvt.f32.s32 %v7603_v44  ;;  %v7607_v54 = vtrunc.f32 %v8367_v11  ;;  %v7602_v3 = vcvt.f32.s32 %v7601_v2  ;;  %v12388_v38 = vld [vmem:[#allocation39_spill] sm:$0xff]  ;;  %v12395_v15 = vld [vmem:[#allocation46_spill] sm:$0xff]  ;;  %v12397_v16 = vld [vmem:[#allocation20_spill] sm:$0xff] }
 0x2a9   :  { %3915 = vperm.xlu0 %7635, %v7586_v26   ;;  %v7605_v23 = vtrunc.f32 %v8368_v57  ;;  %v7611_v46 = vtrunc.f32 %v8369_v63  ;;  %v7609_v5 = vtrunc.f32 %v8370_v29  ;;  %v7615_v56 = vtrunc.f32 %v8371_v1  ;;  %v12392_v10 = vld [vmem:[#allocation43_spill] sm:$0xff] }
 0x2aa   :  { %v7608_v12 = vcvt.f32.s32 %v7607_v54  ;;  %v7613_v61 = vtrunc.f32 %v8372_v25  ;;  %v7617_v0 = vtrunc.f32 %v8374_v36  ;;  %v10316_v9 = vpop.permute.xlu0 %3780 }
 0x2ab   :  { %v10271_v19 = vpop.eup %7918  ;;  %3924 = vperm.xlu1 %7636, %v7592_v55   ;;  %v7606_v8 = vcvt.f32.s32 %v7605_v23  ;;  %v7612_v58 = vcvt.f32.s32 %v7611_v46  ;;  %v7610_v51 = vcvt.f32.s32 %v7609_v5  ;;  %v7616_v17 = vcvt.f32.s32 %v7615_v56  ;;  %v12393_v55 = vld [vmem:[#allocation44_spill] sm:$0xff]  ;;  %v12400_v46 = vld [vmem:[#allocation51_spill] sm:$0xff] }
 0x2ac   :  { %v10273_v48 = vpop.eup %7920  ;;  %6770 = vmatmul.mubr.msk.bf16.gmra.mrb[148].mxu1 %vm427_vm1, %v12384_v52  ;;  %v7618_v26 = vcvt.f32.s32 %v7617_v0 }
 0x2ad   :  { %3921 = vperm.xlu0 %7635, %v7590_v7   ;;  %4762 = vmatmul.mubr.bf16.gmra.mrb[240].mxu0 %v3696_v50  ;;  %v7923_v32 = vpop.eup %7922  ;;  %v3708_v33 = vpack.c.bf16 %v10273_v48, %v10271_v19  ;;  %v7619_v50 = vtrunc.f32 %v8373_v34  ;;  %v10314_v7 = vpop.permute.xlu1 %3786  ;;  %v2035_v48 = vand.u32 15, %v12397_v16 }
 0x2ae   :  { %4769 = vmatprep.mubr.bf16.mxu0 %v3701_v27  ;;  %1851 = vmatprep.mubr.bf16.mxu1 %v12251_v14  ;;  %v7614_v27 = vcvt.f32.s32 %v7613_v61  ;;  %v10323_v19 = vpop.permute.xlu0 %3789 }
 0x2af   :  { %v7925_v60 = vpop.eup %7924  ;;  %3930 = vperm.xlu1 %7636, %v7596_v22   ;;  %v7620_v43 = vcvt.f32.s32 %v7619_v50  ;;  %v12396_v22 = vld [vmem:[#allocation21_spill] sm:$0xff]  ;;  %v2039_v52 = vcvt.s32.f32 %v2035_v48 }
 0x2b0   :  { %v3709_v24 = vpack.c.bf16 %v7925_v60, %v7923_v32  ;;  %v2034_v53 = vand.u32 15, %v12396_v22  ;;  %v12398_v32 = vld [vmem:[#allocation47_spill] sm:$0xff] }
 0x2b1   :  { %3927 = vperm.xlu0 %7635, %v7594_v40   ;;  %v2043_v60 = vmul.f32 1.3333334, %v2039_v52 }
 0x2b2   :  { %v2038_v62 = vcvt.s32.f32 %v2034_v53  ;;  %v10329_v59 = vpop.permute.xlu0 %3795  ;;  %v12401_v53 = vld [vmem:[#allocation53_spill] sm:$0xff] }
 0x2b3   :  { %3936 = vperm.xlu1 %7636, %v7600_v6   ;;  %v10342_v45 = vadd.f32 2.0, %v2043_v60 }
 0x2b4   :  { %6771 = vmatmul.mubr.msk.bf16.gmra.mrb[152].mxu1 %vm427_vm1, %v12385_v13 }
 0x2b5   :  { %3933 = vperm.xlu0 %7635, %v7598_v37   ;;  %4770 = vmatmul.mubr.bf16.gmra.mrb[244].mxu0 %v3700_v49  ;;  %v12390_v49 = vld [vmem:[#allocation41_spill] sm:$0xff] }
 0x2b6   :  { %4777 = vmatprep.mubr.bf16.mxu0 %v3705_v30  ;;  %1861 = vmatprep.mubr.bf16.mxu1 %v12251_v14  ;;  %v12394_v30 = vld [vmem:[#allocation45_spill] sm:$0xff]  ;;  %v10336_v28 = vpop.permute.xlu0 %3801 }
 0x2b7   :  { %3942 = vperm.xlu1 %7636, %v7604_v41  }
 0x2b9   :  { %3939 = vperm.xlu0 %7635, %v7602_v3  }
 0x2ba   :  { %v10347_v2 = vpop.permute.xlu0 %3807 }
 0x2bb   :  { %3948 = vperm.xlu1 %7636, %v7608_v12  }
 0x2bc   :  { %6772 = vmatmul.mubr.msk.bf16.gmra.mrb[156].mxu1 %vm427_vm1, %v12386_v4 }
 0x2bd   :  { %3945 = vperm.xlu0 %7635, %v7606_v8   ;;  %4778 = vmatmul.mubr.bf16.gmra.mrb[248].mxu0 %v3704_v18  ;;  %v10320_v18 = vpop.permute.xlu1 %3792 }
 0x2be   :  { %4785 = vmatprep.mubr.bf16.mxu0 %v3709_v24  ;;  %1871 = vmatprep.mubr.bf16.mxu1 %v12251_v14  ;;  %v12399_v24 = vld [vmem:[#allocation49_spill] sm:$0xff] }
 0x2bf   :  { %3954 = vperm.xlu1 %7636, %v7612_v58   ;;  %v10358_v58 = vpop.permute.xlu0 %3813 }
 0x2c1   :  { %3951 = vperm.xlu0 %7635, %v7610_v51   ;;  %v10327_v40 = vpop.permute.xlu1 %3798 }
 0x2c3   :  { %3960 = vperm.xlu1 %7636, %v7616_v17  }
 0x2c4   :  { %6773 = vmatmul.mubr.msk.bf16.gmra.mrb[160].mxu1 %vm427_vm1, %v12387_v47 }
 0x2c5   :  { %3957 = vperm.xlu0 %7635, %v7614_v27   ;;  %4786 = vmatmul.mubr.bf16.gmra.mrb[252].mxu0 %v3708_v33  ;;  %v2042_v33 = vmul.f32 1.3333334, %v2038_v62  ;;  %v10334_v6 = vpop.permute.xlu1 %3804 }
 0x2c6   :  { %1881 = vmatprep.mubr.bf16.mxu1 %v12251_v14 }
 0x2c7   :  { %3966 = vperm.xlu1 %7636, %v7620_v43   ;;  %v10338_v44 = vadd.f32 2.0, %v2042_v33 }
 0x2c9   :  { %3963 = vperm.xlu0 %7635, %v7618_v26   ;;  %v10345_v37 = vpop.permute.xlu1 %3810 }
 0x2cc   :  { %6774 = vmatmul.mubr.msk.bf16.gmra.mrb[164].mxu1 %vm427_vm1, %v12388_v38 }
 0x2cd   :  { %1891 = vmatprep.mubr.bf16.mxu1 %v12251_v14  ;;  %v10355_v8 = vpop.permute.xlu1 %3816 }
 0x2d4   :  { %6775 = vmatmul.mubr.msk.bf16.gmra.mrb[168].mxu1 %vm427_vm1, %v12389_v21  ;;  %v10362_v21 = vpop.permute.xlu1 %3822 }
 0x2d5   :  { %1901 = vmatprep.mubr.bf16.mxu1 %v12251_v14 }
 0x2dc   :  { %6776 = vmatmul.mubr.msk.bf16.gmra.mrb[172].mxu1 %vm427_vm1, %v12390_v49 }
 0x2dd   :  { %1911 = vmatprep.mubr.bf16.mxu1 %v12251_v14 }
 0x2e4   :  { %6777 = vmatmul.mubr.msk.bf16.gmra.mrb[176].mxu1 %vm427_vm1, %v12391_v31 }
 0x2e5   :  { %1921 = vmatprep.mubr.bf16.mxu1 %v12251_v14 }
 0x2ec   :  { %6778 = vmatmul.mubr.msk.bf16.gmra.mrb[180].mxu1 %vm427_vm1, %v12392_v10  ;;  %v10364_v10 = vpop.permute.xlu0 %3819 }
 0x2ed   :  { %1931 = vmatprep.mubr.bf16.mxu1 %v12251_v14 }
 0x2f4   :  { %6779 = vmatmul.mubr.msk.bf16.gmra.mrb[184].mxu1 %vm427_vm1, %v12393_v55 }
 0x2f5   :  { %1941 = vmatprep.mubr.bf16.mxu1 %v12251_v14 }
 0x2fc   :  { %6780 = vmatmul.mubr.msk.bf16.gmra.mrb[188].mxu1 %vm427_vm1, %v12394_v30 }
 0x2fd   :  { %1951 = vmatprep.mubr.bf16.mxu1 %v12251_v14 }
 0x304   :  { %6781 = vmatmul.mubr.msk.bf16.gmra.mrb[192].mxu1 %vm427_vm1, %v12395_v15 }
 0x305   :  { %1961 = vmatprep.mubr.bf16.mxu1 %v12251_v14 }
 0x30c   :  { %6782 = vmatmul.mubr.msk.bf16.gmra.mrb[196].mxu1 %vm427_vm1, %v12398_v32 }
 0x30d   :  { %1971 = vmatprep.mubr.bf16.mxu1 %v12251_v14 }
 0x314   :  { %6783 = vmatmul.mubr.msk.bf16.gmra.mrb[200].mxu1 %vm427_vm1, %v12399_v24 }
 0x315   :  { %1981 = vmatprep.mubr.bf16.mxu1 %v12251_v14 }
 0x317   :  { %v1713_v42 = vpop.f32.mrb[96].mxu1 }
 0x318   :  { %v2050_v39 = vsub.f32 %v1713_v42, %v10338_v44  ;;  %v1715_v41 = vpop.f32.mrb[97].mxu1  ;;  %v10372_v42 = vpop.permute.xlu1 %3828 }
 0x319   :  { %v2051_v11 = vsub.f32 %v1715_v41, %v10342_v45  ;;  %v1717_v3 = vpop.f32.mrb[98].mxu1 }
 0x31a   :  { %v2306_v54 = vmul.f32 0.8, %v2050_v39  ;;  %v2054_v23 = vsub.f32 %v1717_v3, %v10338_v44  ;;  %v1719_v13 = vpop.f32.mrb[99].mxu1 }
 0x31b   :  { %v2307_v57 = vmul.f32 0.8, %v2051_v11  ;;  %v2055_v63 = vsub.f32 %v1719_v13, %v10342_v45 }
 0x31c   :  { %v2562_v12 = vmul.f32 %v2306_v54, %v2306_v54  ;;  %6784 = vmatmul.mubr.msk.bf16.gmra.mrb[204].mxu1 %vm427_vm1, %v12400_v46  ;;  %v2310_v5 = vmul.f32 0.8, %v2054_v23 }
 0x31d   :  { %v2563_v29 = vmul.f32 %v2307_v57, %v2307_v57  ;;  %1991 = vmatprep.mubr.bf16.mxu1 %v12251_v14  ;;  %v2311_v56 = vmul.f32 0.8, %v2055_v63  ;;  %v10375_v57 = vpop.permute.xlu0 %3825 }
 0x31e   :  { %v2818_v1 = vsub.f32 0.0, %v2562_v12  ;;  %v2566_v25 = vmul.f32 %v2310_v5, %v2310_v5 }
 0x31f   :  { %v2819_v51 = vsub.f32 0.0, %v2563_v29  ;;  %v1723_v61 = vpop.f32.mrb[100].mxu1  ;;  %v2567_v17 = vmul.f32 %v2311_v56, %v2311_v56 }
 0x320   :  { %v3076_v4 = vmul.f32 1.442695, %v2818_v1  ;;  %v2058_v34 = vsub.f32 %v1723_v61, %v10338_v44  ;;  %v1725_v50 = vpop.f32.mrb[101].mxu1  ;;  %v2822_v36 = vsub.f32 0.0, %v2566_v25  ;;  %v12402_v25 = vld [vmem:[#allocation55_spill] sm:$0xff] }
 0x321   :  { %v3078_v27 = vmul.f32 1.442695, %v2819_v51  ;;  %v2059_v0 = vsub.f32 %v1725_v50, %v10342_v45  ;;  %v1727_v43 = vpop.f32.mrb[102].mxu1  ;;  %v2823_v26 = vsub.f32 0.0, %v2567_v17 }
 0x322   :  { %7926 = vpow2.f32 %v3076_v4  ;;  %v2314_v47 = vmul.f32 0.8, %v2058_v34  ;;  %v1729_v38 = vpop.f32.mrb[103].mxu1  ;;  %v3084_v49 = vmul.f32 1.442695, %v2822_v36  ;;  %v2062_v15 = vsub.f32 %v1727_v43, %v10338_v44 }
 0x323   :  { %7928 = vpow2.f32 %v3078_v27  ;;  %v2315_v31 = vmul.f32 0.8, %v2059_v0  ;;  %v3086_v55 = vmul.f32 1.442695, %v2823_v26  ;;  %v2063_v22 = vsub.f32 %v1729_v38, %v10342_v45  ;;  %v10382_v0 = vpop.permute.xlu1 %3834  ;;  %v10384_v38 = vpop.permute.xlu0 %3831 }
 0x324   :  { %v2570_v30 = vmul.f32 %v2314_v47, %v2314_v47  ;;  %6785 = vmatmul.mubr.msk.bf16.gmra.mrb[208].mxu1 %vm427_vm1, %v12401_v53  ;;  %7930 = vpow2.f32 %v3084_v49  ;;  %v2318_v62 = vmul.f32 0.8, %v2062_v15 }
 0x325   :  { %v2571_v16 = vmul.f32 %v2315_v31, %v2315_v31  ;;  %2001 = vmatprep.mubr.bf16.mxu1 %v12251_v14  ;;  %7932 = vpow2.f32 %v3086_v55  ;;  %v2319_v32 = vmul.f32 0.8, %v2063_v22 }
 0x326   :  { %v2826_v48 = vsub.f32 0.0, %v2570_v30  ;;  %v2574_v33 = vmul.f32 %v2318_v62, %v2318_v62 }
 0x327   :  { %v1733_v52 = vpop.f32.mrb[104].mxu1  ;;  %v2827_v41 = vsub.f32 0.0, %v2571_v16  ;;  %v2575_v11 = vmul.f32 %v2319_v32, %v2319_v32 }
 0x328   :  { %v2066_v60 = vsub.f32 %v1733_v52, %v10338_v44  ;;  %v1735_v24 = vpop.f32.mrb[105].mxu1  ;;  %v3092_v39 = vmul.f32 1.442695, %v2826_v48  ;;  %v2830_v23 = vsub.f32 0.0, %v2574_v33 }
 0x329   :  { %v2067_v54 = vsub.f32 %v1735_v24, %v10342_v45  ;;  %v1737_v3 = vpop.f32.mrb[106].mxu1  ;;  %v2831_v63 = vsub.f32 0.0, %v2575_v11  ;;  %v3094_v4 = vmul.f32 1.442695, %v2827_v41 }
 0x32a   :  { %v2322_v13 = vmul.f32 0.8, %v2066_v60  ;;  %v1739_v12 = vpop.f32.mrb[107].mxu1  ;;  %v3100_v5 = vmul.f32 1.442695, %v2830_v23  ;;  %v2070_v56 = vsub.f32 %v1737_v3, %v10338_v44  ;;  %7934 = vpow2.f32 %v3092_v39  ;;  %v12403_v3 = vld [vmem:[#allocation57_spill] sm:$0xff]  ;;  %v10393_v23 = vpop.permute.xlu1 %3840 }
 0x32b   :  { %v2323_v46 = vmul.f32 0.8, %v2067_v54  ;;  %v2071_v51 = vsub.f32 %v1739_v12, %v10342_v45  ;;  %v3102_v17 = vmul.f32 1.442695, %v2831_v63  ;;  %v10396_v63 = vpop.permute.xlu0 %3837 }
 0x32c   :  { %v7927_v29 = vpop.eup %7926  ;;  %v2578_v1 = vmul.f32 %v2322_v13, %v2322_v13  ;;  %6786 = vmatmul.mubr.msk.bf16.gmra.mrb[212].mxu1 %vm427_vm1, %v12402_v25  ;;  %7936 = vpow2.f32 %v3100_v5  ;;  %v2326_v27 = vmul.f32 0.8, %v2070_v56  ;;  %v12404_v56 = vld [vmem:[#allocation19_spill] sm:$0xff] }
 0x32d   :  { %v7929_v61 = vpop.eup %7928  ;;  %2011 = vmatprep.mubr.bf16.mxu1 %v12251_v14  ;;  %v2579_v50 = vmul.f32 %v2323_v46, %v2323_v46  ;;  %v2327_v43 = vmul.f32 0.8, %v2071_v51  ;;  %7938 = vpow2.f32 %v3102_v17  ;;  %vm3968_vm10 = vcmp.eq.s32.totalorder %v12404_v56, %v10309_v20 }
 0x32e   :  { %v2834_v34 = vsub.f32 0.0, %v2578_v1  ;;  %v7931_v36 = vpop.eup %7930  ;;  %v2582_v49 = vmul.f32 %v2326_v27, %v2326_v27  ;;  %7940 = vpow2.f32 %v3094_v4  ;;  %vm3969_vm11 = vcmp.eq.s32.totalorder %v12404_v56, %v10316_v9 }
 0x32f   :  { %v1743_v26 = vpop.f32.mrb[108].mxu1  ;;  %v7933_v47 = vpop.eup %7932  ;;  %v3586_v30 = vpack.c.bf16 %v7931_v36, %v7927_v29  ;;  %v2583_v22 = vmul.f32 %v2327_v43, %v2327_v43  ;;  %v2835_v62 = vsub.f32 0.0, %v2579_v50  ;;  %vm10410_vm12 = vmpackc.low %vm3969_vm11, %vm3968_vm10  ;;  %vm3970_vm13 = vcmp.eq.s32.totalorder %v12404_v56, %v10307_v35 }
 0x330   :  { %v2074_v31 = vsub.f32 %v1743_v26, %v10338_v44  ;;  %v1745_v55 = vpop.f32.mrb[109].mxu1  ;;  %v3108_v15 = vmul.f32 1.442695, %v2834_v34  ;;  %v3587_v48 = vpack.c.bf16 %v7933_v47, %v7929_v61  ;;  %v2838_v32 = vsub.f32 0.0, %v2582_v49 }
 0x331   :  { %v2075_v53 = vsub.f32 %v1745_v55, %v10342_v45  ;;  %v1747_v16 = vpop.f32.mrb[110].mxu1  ;;  %v2839_v60 = vsub.f32 0.0, %v2583_v22  ;;  %v3110_v46 = vmul.f32 1.442695, %v2835_v62  ;;  %vm3971_vm14 = vcmp.eq.s32.totalorder %v12404_v56, %v10314_v7 }
 0x332   :  { %v2330_v52 = vmul.f32 0.8, %v2074_v31  ;;  %v1749_v33 = vpop.f32.mrb[111].mxu1  ;;  %6878 = vmatprep.mubr.msk.bf16.mxu0 %vm4408_vm9, %v3587_v48  ;;  %v3116_v39 = vmul.f32 1.442695, %v2838_v32  ;;  %v2078_v11 = vsub.f32 %v1747_v16, %v10338_v44  ;;  %7942 = vpow2.f32 %v3108_v15  ;;  %v10416_v15 = vpop.permute.xlu1 %3846  ;;  %vm6920_vm2 = vmpackc.low %vm3971_vm14, %vm3970_vm13 }
 0x333   :  { %v2331_v24 = vmul.f32 0.8, %v2075_v53  ;;  %v2079_v54 = vsub.f32 %v1749_v33, %v10342_v45  ;;  %4827 = vmatmul.mubr.bf16.vlgmr.msra.gmra.mrb[128].mxu0 %v3586_v30  ;;  %v3118_v13 = vmul.f32 1.442695, %v2839_v60  ;;  %v10418_v48 = vpop.permute.xlu0 %3843  ;;  %v12407_v33 = vld [vmem:[#allocation59_spill] sm:$0xff]  ;;  %vm3973_vm15 = vcmp.eq.s32.totalorder %v12404_v56, %v10320_v18 }
 0x334   :  { %v2586_v41 = vmul.f32 %v2330_v52, %v2330_v52  ;;  %6787 = vmatmul.mubr.msk.bf16.gmra.mrb[216].mxu1 %vm427_vm1, %v12403_v3  ;;  %7944 = vpow2.f32 %v3116_v39  ;;  %v2334_v5 = vmul.f32 0.8, %v2078_v11  ;;  %v7935_v1 = vpop.eup %7934  ;;  %vm3972_vm0 = vcmp.eq.s32.totalorder %v12404_v56, %v10323_v19 }
 0x335   :  { %v2587_v12 = vmul.f32 %v2331_v24, %v2331_v24  ;;  %2021 = vmatprep.mubr.bf16.mxu1 %v12251_v14  ;;  %v2335_v25 = vmul.f32 0.8, %v2079_v54  ;;  %7946 = vpow2.f32 %v3118_v13  ;;  %vm3974_vm3 = vcmp.eq.s32.totalorder %v12404_v56, %v10329_v59  ;;  %vm6922_vm4 = vmpackc.low %vm3973_vm15, %vm3972_vm0 }
 0x336   :  { %v2842_v29 = vsub.f32 0.0, %v2586_v41  ;;  %v7937_v4 = vpop.eup %7936  ;;  %v2590_v17 = vmul.f32 %v2334_v5, %v2334_v5  ;;  %7948 = vpow2.f32 %v3110_v46  ;;  %v12408_v41 = vmov 1.0|1.0  }
 0x337   :  { %v2843_v51 = vsub.f32 0.0, %v2587_v12  ;;  %v1753_v61 = vpop.f32.mrb[112].mxu1  ;;  %v2591_v27 = vmul.f32 %v2335_v25, %v2335_v25  ;;  %v3590_v26 = vpack.c.bf16 %v7937_v4, %v7935_v1  ;;  %v7939_v47 = vpop.eup %7938  ;;  %vm3977_vm5 = vcmp.eq.s32.totalorder %v12404_v56, %v10334_v6 }
 0x338   :  { %v2082_v14 = vsub.f32 %v1753_v61, %v10338_v44  ;;  %v1755_v34 = vpop.f32.mrb[113].mxu1  ;;  %v3124_v50 = vmul.f32 1.442695, %v2842_v29  ;;  %v2846_v31 = vsub.f32 0.0, %v2590_v17  ;;  %v7941_v20 = vpop.eup %7940  ;;  %vm3976_vm6 = vcmp.eq.s32.totalorder %v12404_v56, %v10336_v28 }
 0x339   :  { %v2083_v36 = vsub.f32 %v1755_v34, %v10342_v45  ;;  %v1757_v43 = vpop.f32.mrb[114].mxu1  ;;  %v3126_v22 = vmul.f32 1.442695, %v2843_v51  ;;  %v2847_v53 = vsub.f32 0.0, %v2591_v27  ;;  %v3591_v39 = vpack.c.bf16 %v7939_v47, %v7941_v20  ;;  %v10435_v25 = vpop.permute.xlu1 %3852  ;;  %vm6926_vm11 = vmpackc.low %vm3977_vm5, %vm3976_vm6 }
 0x33a   :  { %v2338_v55 = vmul.f32 0.8, %v2082_v14  ;;  %v1759_v30 = vpop.f32.mrb[115].mxu1  ;;  %v3132_v9 = vmul.f32 1.442695, %v2846_v31  ;;  %v2086_v32 = vsub.f32 %v1757_v43, %v10338_v44  ;;  %7950 = vpow2.f32 %v3124_v50  ;;  %v10440_v27 = vpop.permute.xlu0 %3849 }
 0x33b   :  { %v2339_v16 = vmul.f32 0.8, %v2083_v36  ;;  %v2087_v52 = vsub.f32 %v1759_v30, %v10342_v45  ;;  %v3134_v60 = vmul.f32 1.442695, %v2847_v53  ;;  %6879 = vmatprep.mubr.msk.bf16.mxu0 %vm4408_vm9, %v3591_v39  ;;  %vm3979_vm7 = vcmp.eq.s32.totalorder %v12404_v56, %v10345_v37 }
 0x33c   :  { %v2594_v62 = vmul.f32 %v2338_v55, %v2338_v55  ;;  %6788 = vmatmul.mubr.msk.bf16.gmra.mrb[220].mxu1 %vm427_vm1, %v12407_v33  ;;  %7952 = vpow2.f32 %v3132_v9  ;;  %v2342_v54 = vmul.f32 0.8, %v2086_v32  ;;  %v7943_v3 = vpop.eup %7942  ;;  %4835 = vmatmul.mubr.bf16.gmra.mrb[132].mxu0 %v3590_v26  ;;  %vm3975_vm1 = vcmp.eq.s32.totalorder %v12404_v56, %v10327_v40 }
 0x33d   :  { %v2595_v24 = vmul.f32 %v2339_v16, %v2339_v16  ;;  %7041 = vmatprep.mubr.msk.bf16.mxu1 %vm10410_vm12, %v12408_v41  ;;  %7954 = vpow2.f32 %v3134_v60  ;;  %v2343_v12 = vmul.f32 0.8, %v2087_v52  ;;  %vm3978_vm8 = vcmp.eq.s32.totalorder %v12404_v56, %v10347_v2  ;;  %vm6924_vm10 = vmpackc.low %vm3975_vm1, %vm3974_vm3 }
 0x33e   :  { %v2850_v11 = vsub.f32 0.0, %v2594_v62  ;;  %v7945_v29 = vpop.eup %7944  ;;  %7956 = vpow2.f32 %v3126_v22  ;;  %v2598_v5 = vmul.f32 %v2342_v54, %v2342_v54  ;;  %v10464_v62 = vpop.permute.xlu1 %3858  ;;  %vm3981_vm12 = vcmp.eq.s32.totalorder %v12404_v56, %v10355_v8  ;;  %vm6928_vm14 = vmpackc.low %vm3979_vm7, %vm3978_vm8 }
 0x33f   :  { %v2851_v13 = vsub.f32 0.0, %v2595_v24  ;;  %v1763_v46 = vpop.f32.mrb[116].mxu1  ;;  %v2599_v4 = vmul.f32 %v2343_v12, %v2343_v12  ;;  %v3594_v34 = vpack.c.bf16 %v7945_v29, %v7943_v3  ;;  %v7947_v50 = vpop.eup %7946  ;;  %vm3980_vm13 = vcmp.eq.s32.totalorder %v12404_v56, %v10358_v58 }
 0x340   :  { %v2090_v1 = vsub.f32 %v1763_v46, %v10338_v44  ;;  %v1765_v51 = vpop.f32.mrb[117].mxu1  ;;  %v3140_v61 = vmul.f32 1.442695, %v2850_v11  ;;  %v2854_v36 = vsub.f32 0.0, %v2598_v5  ;;  %v7949_v55 = vpop.eup %7948  ;;  %vm6930_vm15 = vmpackc.low %vm3981_vm12, %vm3980_vm13  ;;  %vm3983_vm0 = vcmp.eq.s32.totalorder %v12404_v56, %v10362_v21 }
 0x341   :  { %v2091_v17 = vsub.f32 %v1765_v51, %v10342_v45  ;;  %v1767_v14 = vpop.f32.mrb[118].mxu1  ;;  %v3142_v47 = vmul.f32 1.442695, %v2851_v13  ;;  %v2855_v49 = vsub.f32 0.0, %v2599_v4  ;;  %v3595_v20 = vpack.c.bf16 %v7947_v50, %v7949_v55  ;;  %v10469_v24 = vpop.permute.xlu0 %3855 }
 0x342   :  { %v2346_v43 = vmul.f32 0.8, %v2090_v1  ;;  %v1769_v26 = vpop.f32.mrb[119].mxu1  ;;  %v3148_v30 = vmul.f32 1.442695, %v2854_v36  ;;  %v2094_v22 = vsub.f32 %v1767_v14, %v10338_v44  ;;  %7958 = vpow2.f32 %v3140_v61  ;;  %v10490_v40 = vpop.permute.xlu1 %3864 }
 0x343   :  { %v2347_v31 = vmul.f32 0.8, %v2091_v17  ;;  %v2095_v7 = vsub.f32 %v1769_v26, %v10342_v45  ;;  %v3150_v53 = vmul.f32 1.442695, %v2855_v49  ;;  %6880 = vmatprep.mubr.msk.bf16.mxu0 %vm4408_vm9, %v3595_v20  ;;  %vm3982_vm1 = vcmp.eq.s32.totalorder %v12404_v56, %v10364_v10 }
 0x344   :  { %v2602_v35 = vmul.f32 %v2346_v43, %v2346_v43  ;;  %7042 = vmatmul.mubr.msk.bf16.vlgmr.msra.gmra.mrb[224].mxu1 %vm6920_vm2, %v12408_v41  ;;  %7960 = vpow2.f32 %v3148_v30  ;;  %v2350_v19 = vmul.f32 0.8, %v2094_v22  ;;  %v7951_v9 = vpop.eup %7950  ;;  %4843 = vmatmul.mubr.bf16.gmra.mrb[136].mxu0 %v3594_v34  ;;  %vm3985_vm2 = vcmp.eq.s32.totalorder %v12404_v56, %v10372_v42 }
 0x345   :  { %v2603_v16 = vmul.f32 %v2347_v31, %v2347_v31  ;;  %7045 = vmatprep.mubr.msk.bf16.mxu1 %vm6922_vm4, %v12408_v41  ;;  %7962 = vpow2.f32 %v3150_v53  ;;  %v2351_v52 = vmul.f32 0.8, %v2095_v7  ;;  %v10495_v28 = vpop.permute.xlu0 %3861  ;;  %vm3984_vm3 = vcmp.eq.s32.totalorder %v12404_v56, %v10375_v57  ;;  %vm6932_vm4 = vmpackc.low %vm3983_vm0, %vm3982_vm1 }
 0x346   :  { %v2858_v18 = vsub.f32 0.0, %v2602_v35  ;;  %v7953_v60 = vpop.eup %7952  ;;  %7964 = vpow2.f32 %v3142_v47  ;;  %v2606_v39 = vmul.f32 %v2350_v19, %v2350_v19  ;;  %vm6934_vm5 = vmpackc.low %vm3985_vm2, %vm3984_vm3  ;;  %vm3987_vm6 = vcmp.eq.s32.totalorder %v12404_v56, %v10382_v0 }
 0x347   :  { %v2859_v32 = vsub.f32 0.0, %v2603_v16  ;;  %v1773_v33 = vpop.f32.mrb[120].mxu1  ;;  %v7955_v3 = vpop.eup %7954  ;;  %v2607_v12 = vmul.f32 %v2351_v52, %v2351_v52  ;;  %v3598_v5 = vpack.c.bf16 %v7953_v60, %v7951_v9  ;;  %vm3986_vm7 = vcmp.eq.s32.totalorder %v12404_v56, %v10384_v38 }
 0x348   :  { %v2098_v11 = vsub.f32 %v1773_v33, %v10338_v44  ;;  %v1775_v54 = vpop.f32.mrb[121].mxu1  ;;  %v3156_v13 = vmul.f32 1.442695, %v2858_v18  ;;  %v7957_v1 = vpop.eup %7956  ;;  %v2862_v51 = vsub.f32 0.0, %v2606_v39  ;;  %vm3989_vm8 = vcmp.eq.s32.totalorder %v12404_v56, %v10393_v23 }
 0x349   :  { %v2099_v46 = vsub.f32 %v1775_v54, %v10342_v45  ;;  %v1777_v29 = vpop.f32.mrb[122].mxu1  ;;  %v3158_v14 = vmul.f32 1.442695, %v2859_v32  ;;  %v2863_v34 = vsub.f32 0.0, %v2607_v12  ;;  %v3599_v59 = vpack.c.bf16 %v7955_v3, %v7957_v1 }
 0x34a   :  { %v2354_v61 = vmul.f32 0.8, %v2098_v11  ;;  %v2102_v4 = vsub.f32 %v1777_v29, %v10338_v44  ;;  %v1779_v17 = vpop.f32.mrb[123].mxu1  ;;  %v3164_v43 = vmul.f32 1.442695, %v2862_v51  ;;  %7966 = vpow2.f32 %v3156_v13  ;;  %v10509_v29 = vpop.permute.xlu1 %3870 }
 0x34b   :  { %v2355_v50 = vmul.f32 0.8, %v2099_v46  ;;  %v2103_v36 = vsub.f32 %v1779_v17, %v10342_v45  ;;  %v3166_v49 = vmul.f32 1.442695, %v2863_v34  ;;  %6881 = vmatprep.mubr.msk.bf16.mxu0 %vm4408_vm9, %v3599_v59  ;;  %vm3991_vm13 = vcmp.eq.s32.totalorder %v12404_v56, %v10416_v15 }
 0x34c   :  { %v2610_v26 = vmul.f32 %v2354_v61, %v2354_v61  ;;  %v2358_v47 = vmul.f32 0.8, %v2102_v4  ;;  %7046 = vmatmul.mubr.msk.bf16.gmra.mrb[228].mxu1 %vm6924_vm10, %v12408_v41  ;;  %7968 = vpow2.f32 %v3164_v43  ;;  %v7959_v35 = vpop.eup %7958  ;;  %4851 = vmatmul.mubr.bf16.gmra.mrb[140].mxu0 %v3598_v5  ;;  %v10518_v61 = vpop.permute.xlu0 %3867  ;;  %vm3988_vm10 = vcmp.eq.s32.totalorder %v12404_v56, %v10396_v63 }
 0x34d   :  { %v2611_v31 = vmul.f32 %v2355_v50, %v2355_v50  ;;  %v2359_v55 = vmul.f32 0.8, %v2103_v36  ;;  %7049 = vmatprep.mubr.msk.bf16.mxu1 %vm6926_vm11, %v12408_v41  ;;  %7970 = vpow2.f32 %v3166_v49  ;;  %vm6936_vm11 = vmpackc.low %vm3987_vm6, %vm3986_vm7  ;;  %vm3992_vm0 = vcmp.eq.s32.totalorder %v12404_v56, %v10440_v27 }
 0x34e   :  { %v2866_v6 = vsub.f32 0.0, %v2610_v26  ;;  %v2614_v30 = vmul.f32 %v2358_v47, %v2358_v47  ;;  %v7961_v16 = vpop.eup %7960  ;;  %7972 = vpow2.f32 %v3158_v14  ;;  %vm6938_vm12 = vmpackc.low %vm3989_vm8, %vm3988_vm10  ;;  %vm3995_vm3 = vcmp.eq.s32.totalorder %v12404_v56, %v10464_v62 }
 0x34f   :  { %v2867_v22 = vsub.f32 0.0, %v2611_v31  ;;  %v2615_v7 = vmul.f32 %v2359_v55, %v2359_v55  ;;  %v1783_v53 = vpop.f32.mrb[124].mxu1  ;;  %v7963_v32 = vpop.eup %7962  ;;  %v3602_v11 = vpack.c.bf16 %v7961_v16, %v7959_v35  ;;  %vm3996_vm6 = vcmp.eq.s32.totalorder %v12404_v56, %v10495_v28 }
 0x350   :  { %v3172_v20 = vmul.f32 1.442695, %v2866_v6  ;;  %v2870_v18 = vsub.f32 0.0, %v2614_v30  ;;  %v2106_v19 = vsub.f32 %v1783_v53, %v10338_v44  ;;  %v1785_v9 = vpop.f32.mrb[125].mxu1  ;;  %v7965_v54 = vpop.eup %7964  ;;  %vm3999_vm10 = vcmp.eq.s32.totalorder %v12404_v56, %v10509_v29 }
 0x351   :  { %v3174_v52 = vmul.f32 1.442695, %v2867_v22  ;;  %v2871_v33 = vsub.f32 0.0, %v2615_v7  ;;  %v2107_v60 = vsub.f32 %v1785_v9, %v10342_v45  ;;  %v1787_v39 = vpop.f32.mrb[126].mxu1  ;;  %v3603_v4 = vpack.c.bf16 %v7963_v32, %v7965_v54  ;;  %v10532_v6 = vpop.permute.xlu1 %3876 }
 0x352   :  { %7974 = vpow2.f32 %v3172_v20  ;;  %v3180_v3 = vmul.f32 1.442695, %v2870_v18  ;;  %v2362_v13 = vmul.f32 0.8, %v2106_v19  ;;  %v2110_v12 = vsub.f32 %v1787_v39, %v10338_v44  ;;  %v1789_v46 = vpop.f32.mrb[127].mxu1  ;;  %v10535_v20 = vpop.permute.xlu0 %3873 }
 0x353   :  { %7976 = vpow2.f32 %v3174_v52  ;;  %v3182_v5 = vmul.f32 1.442695, %v2871_v33  ;;  %v2363_v1 = vmul.f32 0.8, %v2107_v60  ;;  %v2111_v51 = vsub.f32 %v1789_v46, %v10342_v45  ;;  %6882 = vmatprep.mubr.msk.bf16.mxu0 %vm4408_vm9, %v3603_v4 }
 0x354   :  { %7978 = vpow2.f32 %v3180_v3  ;;  %v2618_v2 = vmul.f32 %v2362_v13, %v2362_v13  ;;  %v2366_v37 = vmul.f32 0.8, %v2110_v12  ;;  %7050 = vmatmul.mubr.msk.bf16.gmra.mrb[232].mxu1 %vm6928_vm14, %v12408_v41  ;;  %v7967_v8 = vpop.eup %7966  ;;  %4859 = vmatmul.mubr.bf16.gmra.mrb[144].mxu0 %v3602_v11  ;;  %vm3990_vm14 = vcmp.eq.s32.totalorder %v12404_v56, %v10418_v48 }
 0x355   :  { %7980 = vpow2.f32 %v3182_v5  ;;  %v2619_v17 = vmul.f32 %v2363_v1, %v2363_v1  ;;  %v2367_v14 = vmul.f32 0.8, %v2111_v51  ;;  %7053 = vmatprep.mubr.msk.bf16.mxu1 %vm6930_vm15, %v12408_v41  ;;  %v10562_v5 = vpop.permute.xlu1 %3882  ;;  %vm3993_vm15 = vcmp.eq.s32.totalorder %v12404_v56, %v10435_v25  ;;  %vm6940_vm1 = vmpackc.low %vm3991_vm13, %vm3990_vm14 }
 0x356   :  { %v2874_v58 = vsub.f32 0.0, %v2618_v2  ;;  %v2622_v34 = vmul.f32 %v2366_v37, %v2366_v37  ;;  %v7969_v26 = vpop.eup %7968  ;;  %v10565_v4 = vpop.permute.xlu0 %3879  ;;  %vm6942_vm2 = vmpackc.low %vm3993_vm15, %vm3992_vm0  ;;  %vm4000_vm13 = vcmp.eq.s32.totalorder %v12404_v56, %v10535_v20  ;;  %vm4003_vm0 = vcmp.eq.s32.totalorder %v12404_v56, %v10562_v5 }
 0x357   :  { %v2875_v50 = vsub.f32 0.0, %v2619_v17  ;;  %v2623_v36 = vmul.f32 %v2367_v14, %v2367_v14  ;;  %v1793_v43 = vpop.f32.mrb[128].mxu1  ;;  %v7971_v55 = vpop.eup %7970  ;;  %v3606_v53 = vpack.c.bf16 %v7969_v26, %v7967_v8 }
 0x358   :  { %v3188_v47 = vmul.f32 1.442695, %v2874_v58  ;;  %v2878_v59 = vsub.f32 0.0, %v2622_v34  ;;  %v2114_v49 = vsub.f32 %v1793_v43, %v10338_v44  ;;  %v1795_v31 = vpop.f32.mrb[129].mxu1  ;;  %v7973_v16 = vpop.eup %7972 }
 0x359   :  { %v3190_v30 = vmul.f32 1.442695, %v2875_v50  ;;  %v2879_v35 = vsub.f32 0.0, %v2623_v36  ;;  %v2115_v22 = vsub.f32 %v1795_v31, %v10342_v45  ;;  %v1797_v7 = vpop.f32.mrb[130].mxu1  ;;  %v3607_v54 = vpack.c.bf16 %v7971_v55, %v7973_v16 }
 0x35a   :  { %7982 = vpow2.f32 %v3188_v47  ;;  %v3196_v18 = vmul.f32 1.442695, %v2878_v59  ;;  %v2370_v19 = vmul.f32 0.8, %v2114_v49  ;;  %v2118_v9 = vsub.f32 %v1797_v7, %v10338_v44  ;;  %v1799_v32 = vpop.f32.mrb[131].mxu1  ;;  %v10596_v23 = vpop.permute.xlu0 %3885 }
 0x35b   :  { %7984 = vpow2.f32 %v3190_v30  ;;  %v3198_v52 = vmul.f32 1.442695, %v2879_v35  ;;  %v2371_v33 = vmul.f32 0.8, %v2115_v22  ;;  %v2119_v60 = vsub.f32 %v1799_v32, %v10342_v45  ;;  %6883 = vmatprep.mubr.msk.bf16.mxu0 %vm4408_vm9, %v3607_v54 }
 0x35c   :  { %v10545_v39 = vpop.eup %7974  ;;  %7986 = vpow2.f32 %v3196_v18  ;;  %v2626_v10 = vmul.f32 %v2370_v19, %v2370_v19  ;;  %v2374_v11 = vmul.f32 0.8, %v2118_v9  ;;  %7054 = vmatmul.mubr.msk.bf16.gmra.mrb[236].mxu1 %vm6932_vm4, %v12408_v41  ;;  %4867 = vmatmul.mubr.bf16.gmra.mrb[148].mxu0 %v3606_v53  ;;  %v10589_v53 = vpop.permute.xlu1 %3888  ;;  %vm3994_vm4 = vcmp.eq.s32.totalorder %v12404_v56, %v10469_v24 }
 0x35d   :  { %v7977_v21 = vpop.eup %7976  ;;  %7988 = vpow2.f32 %v3198_v52  ;;  %v2627_v3 = vmul.f32 %v2371_v33, %v2371_v33  ;;  %v2375_v13 = vmul.f32 0.8, %v2119_v60  ;;  %7057 = vmatprep.mubr.msk.bf16.mxu1 %vm6934_vm5, %v12408_v41  ;;  %vm3997_vm5 = vcmp.eq.s32.totalorder %v12404_v56, %v10490_v40  ;;  %vm6944_vm7 = vmpackc.low %vm3995_vm3, %vm3994_vm4 }
 0x35e   :  { %v7979_v12 = vpop.eup %7978  ;;  %v2882_v42 = vsub.f32 0.0, %v2626_v10  ;;  %v2630_v57 = vmul.f32 %v2374_v11, %v2374_v11  ;;  %v10624_v48 = vpop.permute.xlu0 %3891  ;;  %vm6946_vm8 = vmpackc.low %vm3997_vm5, %vm3996_vm6  ;;  %vm4004_vm3 = vcmp.eq.s32.totalorder %v12404_v56, %v10596_v23 }
 0x35f   :  { %v7981_v46 = vpop.eup %7980  ;;  %v2883_v1 = vsub.f32 0.0, %v2627_v3  ;;  %v2631_v51 = vmul.f32 %v2375_v13, %v2375_v13  ;;  %v1803_v2 = vpop.f32.mrb[132].mxu1  ;;  %v3610_v37 = vpack.c.bf16 %v7979_v12, %v10545_v39 }
 0x360   :  { %v3204_v17 = vmul.f32 1.442695, %v2882_v42  ;;  %v2886_v14 = vsub.f32 0.0, %v2630_v57  ;;  %v2122_v58 = vsub.f32 %v1803_v2, %v10338_v44  ;;  %v1805_v34 = vpop.f32.mrb[133].mxu1  ;;  %v3611_v8 = vpack.c.bf16 %v7981_v46, %v7977_v21 }
 0x361   :  { %v3206_v50 = vmul.f32 1.442695, %v2883_v1  ;;  %v2887_v36 = vsub.f32 0.0, %v2631_v51  ;;  %v2123_v43 = vsub.f32 %v1805_v34, %v10342_v45  ;;  %v1807_v26 = vpop.f32.mrb[134].mxu1 }
 0x362   :  { %7990 = vpow2.f32 %v3204_v17  ;;  %v3212_v47 = vmul.f32 1.442695, %v2886_v14  ;;  %v2378_v59 = vmul.f32 0.8, %v2122_v58  ;;  %v2126_v49 = vsub.f32 %v1807_v26, %v10338_v44  ;;  %v1809_v31 = vpop.f32.mrb[135].mxu1  ;;  %6884 = vmatprep.mubr.msk.bf16.mxu0 %vm4408_vm9, %v3611_v8 }
 0x363   :  { %7992 = vpow2.f32 %v3206_v50  ;;  %v3214_v55 = vmul.f32 1.442695, %v2887_v36  ;;  %v2379_v30 = vmul.f32 0.8, %v2123_v43  ;;  %v2127_v35 = vsub.f32 %v1809_v31, %v10342_v45 }
 0x364   :  { %v10580_v22 = vpop.eup %7982  ;;  %7994 = vpow2.f32 %v3212_v47  ;;  %v2634_v38 = vmul.f32 %v2378_v59, %v2378_v59  ;;  %v2382_v7 = vmul.f32 0.8, %v2126_v49  ;;  %7058 = vmatmul.mubr.msk.bf16.gmra.mrb[240].mxu1 %vm6936_vm11, %v12408_v41  ;;  %4875 = vmatmul.mubr.bf16.gmra.mrb[152].mxu0 %v3610_v37  ;;  %v10613_v37 = vpop.permute.xlu1 %3894  ;;  %vm3998_vm11 = vcmp.eq.s32.totalorder %v12404_v56, %v10518_v61 }
 0x365   :  { %v7985_v0 = vpop.eup %7984  ;;  %7996 = vpow2.f32 %v3214_v55  ;;  %v2635_v16 = vmul.f32 %v2379_v30, %v2379_v30  ;;  %v2383_v18 = vmul.f32 0.8, %v2127_v35  ;;  %7061 = vmatprep.mubr.msk.bf16.mxu1 %vm6938_vm12, %v12408_v41  ;;  %vm4001_vm12 = vcmp.eq.s32.totalorder %v12404_v56, %v10532_v6  ;;  %vm6948_vm14 = vmpackc.low %vm3999_vm10, %vm3998_vm11 }
 0x366   :  { %v7987_v19 = vpop.eup %7986  ;;  %v2890_v63 = vsub.f32 0.0, %v2634_v38  ;;  %v2638_v9 = vmul.f32 %v2382_v7, %v2382_v7  ;;  %vm6950_vm15 = vmpackc.low %vm4001_vm12, %vm4000_vm13  ;;  %vm4007_vm6 = vcmp.eq.s32.totalorder %v12404_v56, %v10613_v37 }
 0x367   :  { %v7989_v32 = vpop.eup %7988  ;;  %v2891_v52 = vsub.f32 0.0, %v2635_v16  ;;  %v2639_v33 = vmul.f32 %v2383_v18, %v2383_v18  ;;  %v1813_v60 = vpop.f32.mrb[136].mxu1  ;;  %v3614_v39 = vpack.c.bf16 %v7987_v19, %v10580_v22 }
 0x368   :  { %v3220_v10 = vmul.f32 1.442695, %v2890_v63  ;;  %v2894_v11 = vsub.f32 0.0, %v2638_v9  ;;  %v2130_v54 = vsub.f32 %v1813_v60, %v10338_v44  ;;  %v1815_v21 = vpop.f32.mrb[137].mxu1  ;;  %v3615_v3 = vpack.c.bf16 %v7989_v32, %v7985_v0  ;;  %v10638_v0 = vpop.permute.xlu1 %3900 }
 0x369   :  { %v3222_v13 = vmul.f32 1.442695, %v2891_v52  ;;  %v2895_v12 = vsub.f32 0.0, %v2639_v33  ;;  %v2131_v42 = vsub.f32 %v1815_v21, %v10342_v45  ;;  %v1817_v57 = vpop.f32.mrb[138].mxu1  ;;  %v10641_v9 = vpop.permute.xlu0 %3897 }
 0x36a   :  { %7998 = vpow2.f32 %v3220_v10  ;;  %v3228_v46 = vmul.f32 1.442695, %v2894_v11  ;;  %v2386_v1 = vmul.f32 0.8, %v2130_v54  ;;  %v2134_v51 = vsub.f32 %v1817_v57, %v10338_v44  ;;  %v1819_v2 = vpop.f32.mrb[139].mxu1  ;;  %6885 = vmatprep.mubr.msk.bf16.mxu0 %vm4408_vm9, %v3615_v3 }
 0x36b   :  { %8000 = vpow2.f32 %v3222_v13  ;;  %v3230_v17 = vmul.f32 1.442695, %v2895_v12  ;;  %v2387_v14 = vmul.f32 0.8, %v2131_v42  ;;  %v2135_v58 = vsub.f32 %v1819_v2, %v10342_v45 }
 0x36c   :  { %v10616_v34 = vpop.eup %7990  ;;  %8002 = vpow2.f32 %v3228_v46  ;;  %v2642_v15 = vmul.f32 %v2386_v1, %v2386_v1  ;;  %v2390_v8 = vmul.f32 0.8, %v2134_v51  ;;  %7062 = vmatmul.mubr.msk.bf16.gmra.mrb[244].mxu1 %vm6940_vm1, %v12408_v41  ;;  %4883 = vmatmul.mubr.bf16.gmra.mrb[156].mxu0 %v3614_v39  ;;  %v10668_v57 = vpop.permute.xlu1 %3906  ;;  %vm4002_vm1 = vcmp.eq.s32.totalorder %v12404_v56, %v10565_v4 }
 0x36d   :  { %v7993_v50 = vpop.eup %7992  ;;  %8004 = vpow2.f32 %v3230_v17  ;;  %v2643_v36 = vmul.f32 %v2387_v14, %v2387_v14  ;;  %v2391_v43 = vmul.f32 0.8, %v2135_v58  ;;  %7065 = vmatprep.mubr.msk.bf16.mxu1 %vm6942_vm2, %v12408_v41  ;;  %v10671_v17 = vpop.permute.xlu0 %3903  ;;  %vm4005_vm2 = vcmp.eq.s32.totalorder %v12404_v56, %v10589_v53  ;;  %vm6952_vm4 = vmpackc.low %vm4003_vm0, %vm4002_vm1 }
 0x36e   :  { %v7995_v26 = vpop.eup %7994  ;;  %v2898_v25 = vsub.f32 0.0, %v2642_v15  ;;  %v2646_v27 = vmul.f32 %v2390_v8, %v2390_v8  ;;  %vm6954_vm5 = vmpackc.low %vm4005_vm2, %vm4004_vm3  ;;  %vm4008_vm10 = vcmp.eq.s32.totalorder %v12404_v56, %v10641_v9  ;;  %vm4011_vm13 = vcmp.eq.s32.totalorder %v12404_v56, %v10668_v57 }
 0x36f   :  { %v7997_v47 = vpop.eup %7996  ;;  %v2899_v59 = vsub.f32 0.0, %v2643_v36  ;;  %v2647_v49 = vmul.f32 %v2391_v43, %v2391_v43  ;;  %v1823_v31 = vpop.f32.mrb[140].mxu1  ;;  %v3618_v55 = vpack.c.bf16 %v7995_v26, %v10616_v34 }
 0x370   :  { %v3236_v30 = vmul.f32 1.442695, %v2898_v25  ;;  %v2902_v35 = vsub.f32 0.0, %v2646_v27  ;;  %v2138_v22 = vsub.f32 %v1823_v31, %v10338_v44  ;;  %v1825_v38 = vpop.f32.mrb[141].mxu1  ;;  %v3619_v7 = vpack.c.bf16 %v7997_v47, %v7993_v50 }
 0x371   :  { %v3238_v16 = vmul.f32 1.442695, %v2899_v59  ;;  %v2903_v18 = vsub.f32 0.0, %v2647_v49  ;;  %v2139_v19 = vsub.f32 %v1825_v38, %v10342_v45  ;;  %v1827_v63 = vpop.f32.mrb[142].mxu1  ;;  %v10702_v6 = vpop.permute.xlu0 %3909 }
 0x372   :  { %8006 = vpow2.f32 %v3236_v30  ;;  %v3244_v32 = vmul.f32 1.442695, %v2902_v35  ;;  %v2394_v52 = vmul.f32 0.8, %v2138_v22  ;;  %v2142_v33 = vsub.f32 %v1827_v63, %v10338_v44  ;;  %v1829_v60 = vpop.f32.mrb[143].mxu1  ;;  %6886 = vmatprep.mubr.msk.bf16.mxu0 %vm4408_vm9, %v3619_v7  ;;  %v10695_v22 = vpop.permute.xlu1 %3912 }
 0x373   :  { %8008 = vpow2.f32 %v3238_v16  ;;  %v3246_v39 = vmul.f32 1.442695, %v2903_v18  ;;  %v2395_v10 = vmul.f32 0.8, %v2139_v19  ;;  %v2143_v11 = vsub.f32 %v1829_v60, %v10342_v45 }
 0x374   :  { %v10652_v54 = vpop.eup %7998  ;;  %8010 = vpow2.f32 %v3244_v32  ;;  %v2650_v24 = vmul.f32 %v2394_v52, %v2394_v52  ;;  %v2398_v21 = vmul.f32 0.8, %v2142_v33  ;;  %7066 = vmatmul.mubr.msk.bf16.gmra.mrb[248].mxu1 %vm6944_vm7, %v12408_v41  ;;  %4891 = vmatmul.mubr.bf16.gmra.mrb[160].mxu0 %v3618_v55  ;;  %vm4006_vm7 = vcmp.eq.s32.totalorder %v12404_v56, %v10624_v48 }
 0x375   :  { %v8001_v62 = vpop.eup %8000  ;;  %8012 = vpow2.f32 %v3246_v39  ;;  %v2651_v3 = vmul.f32 %v2395_v10, %v2395_v10  ;;  %v2399_v13 = vmul.f32 0.8, %v2143_v11  ;;  %7069 = vmatprep.mubr.msk.bf16.mxu1 %vm6946_vm8, %v12408_v41  ;;  %v10730_v4 = vpop.permute.xlu0 %3915  ;;  %vm4009_vm8 = vcmp.eq.s32.totalorder %v12404_v56, %v10638_v0  ;;  %vm6956_vm11 = vmpackc.low %vm4007_vm6, %vm4006_vm7 }
 0x376   :  { %v8003_v12 = vpop.eup %8002  ;;  %v2906_v40 = vsub.f32 0.0, %v2650_v24  ;;  %v2654_v28 = vmul.f32 %v2398_v21, %v2398_v21  ;;  %vm6958_vm12 = vmpackc.low %vm4009_vm8, %vm4008_vm10  ;;  %vm4012_vm0 = vcmp.eq.s32.totalorder %v12404_v56, %v10702_v6 }
 0x377   :  { %v8005_v42 = vpop.eup %8004  ;;  %v2907_v46 = vsub.f32 0.0, %v2651_v3  ;;  %v2655_v1 = vmul.f32 %v2399_v13, %v2399_v13  ;;  %v1833_v51 = vpop.f32.mrb[144].mxu1  ;;  %v3622_v2 = vpack.c.bf16 %v8003_v12, %v10652_v54 }
 0x378   :  { %v3252_v14 = vmul.f32 1.442695, %v2906_v40  ;;  %v2910_v58 = vsub.f32 0.0, %v2654_v28  ;;  %v2146_v34 = vsub.f32 %v1833_v51, %v10338_v44  ;;  %v1835_v15 = vpop.f32.mrb[145].mxu1  ;;  %v3623_v8 = vpack.c.bf16 %v8005_v42, %v8001_v62  ;;  %v10719_v42 = vpop.permute.xlu1 %3918 }
 0x379   :  { %v3254_v50 = vmul.f32 1.442695, %v2907_v46  ;;  %v2911_v36 = vsub.f32 0.0, %v2655_v1  ;;  %v2147_v43 = vsub.f32 %v1835_v15, %v10342_v45  ;;  %v1837_v26 = vpop.f32.mrb[146].mxu1  ;;  %vm4015_vm3 = vcmp.eq.s32.totalorder %v12404_v56, %v10719_v42 }
 0x37a   :  { %8014 = vpow2.f32 %v3252_v14  ;;  %v3260_v25 = vmul.f32 1.442695, %v2910_v58  ;;  %v2402_v27 = vmul.f32 0.8, %v2146_v34  ;;  %v2150_v47 = vsub.f32 %v1837_v26, %v10338_v44  ;;  %v1839_v59 = vpop.f32.mrb[147].mxu1  ;;  %6887 = vmatprep.mubr.msk.bf16.mxu0 %vm4408_vm9, %v3623_v8 }
 0x37b   :  { %8016 = vpow2.f32 %v3254_v50  ;;  %v3262_v49 = vmul.f32 1.442695, %v2911_v36  ;;  %v2403_v31 = vmul.f32 0.8, %v2147_v43  ;;  %v2151_v55 = vsub.f32 %v1839_v59, %v10342_v45 }
 0x37c   :  { %v10686_v30 = vpop.eup %8006  ;;  %8018 = vpow2.f32 %v3260_v25  ;;  %v2658_v61 = vmul.f32 %v2402_v27, %v2402_v27  ;;  %v2406_v35 = vmul.f32 0.8, %v2150_v47  ;;  %7070 = vmatmul.mubr.msk.bf16.gmra.mrb[252].mxu1 %vm6948_vm14, %v12408_v41  ;;  %4899 = vmatmul.mubr.bf16.gmra.mrb[164].mxu0 %v3622_v2  ;;  %vm4010_vm14 = vcmp.eq.s32.totalorder %v12404_v56, %v10671_v17 }
 0x37d   :  { %v8009_v29 = vpop.eup %8008  ;;  %8020 = vpow2.f32 %v3262_v49  ;;  %v2659_v38 = vmul.f32 %v2403_v31, %v2403_v31  ;;  %v2407_v7 = vmul.f32 0.8, %v2151_v55  ;;  %7073 = vmatprep.mubr.msk.bf16.mxu1 %vm6950_vm15, %v12408_v41  ;;  %v10744_v55 = vpop.permute.xlu1 %3924  ;;  %vm4013_vm15 = vcmp.eq.s32.totalorder %v12404_v56, %v10695_v22  ;;  %vm6960_vm1 = vmpackc.low %vm4011_vm13, %vm4010_vm14 }
 0x37e   :  { %v8011_v16 = vpop.eup %8010  ;;  %v2914_v20 = vsub.f32 0.0, %v2658_v61  ;;  %v2662_v18 = vmul.f32 %v2406_v35, %v2406_v35  ;;  %vm6962_vm2 = vmpackc.low %vm4013_vm15, %vm4012_vm0 }
 0x37f   :  { %v8013_v19 = vpop.eup %8012  ;;  %v2915_v63 = vsub.f32 0.0, %v2659_v38  ;;  %v2663_v32 = vmul.f32 %v2407_v7, %v2407_v7  ;;  %v1843_v52 = vpop.f32.mrb[148].mxu1  ;;  %v3626_v33 = vpack.c.bf16 %v8011_v16, %v10686_v30 }
 0x380   :  { %v3268_v60 = vmul.f32 1.442695, %v2914_v20  ;;  %v2918_v39 = vsub.f32 0.0, %v2662_v18  ;;  %v2154_v10 = vsub.f32 %v1843_v52, %v10338_v44  ;;  %v1845_v11 = vpop.f32.mrb[149].mxu1  ;;  %v3627_v54 = vpack.c.bf16 %v8013_v19, %v8009_v29  ;;  %v10747_v38 = vpop.permute.xlu0 %3921 }
 0x381   :  { %v3270_v24 = vmul.f32 1.442695, %v2915_v63  ;;  %v2919_v21 = vsub.f32 0.0, %v2663_v32  ;;  %v2155_v62 = vsub.f32 %v1845_v11, %v10342_v45  ;;  %v1847_v3 = vpop.f32.mrb[150].mxu1  ;;  %vm4016_vm6 = vcmp.eq.s32.totalorder %v12404_v56, %v10747_v38 }
 0x382   :  { %8022 = vpow2.f32 %v3268_v60  ;;  %v3276_v13 = vmul.f32 1.442695, %v2918_v39  ;;  %v2410_v12 = vmul.f32 0.8, %v2154_v10  ;;  %v2158_v40 = vsub.f32 %v1847_v3, %v10338_v44  ;;  %v1849_v28 = vpop.f32.mrb[151].mxu1  ;;  %6888 = vmatprep.mubr.msk.bf16.mxu0 %vm4408_vm9, %v3627_v54  ;;  %v10774_v54 = vpop.permute.xlu1 %3930 }
 0x383   :  { %8024 = vpow2.f32 %v3270_v24  ;;  %v3278_v46 = vmul.f32 1.442695, %v2919_v21  ;;  %v2411_v1 = vmul.f32 0.8, %v2155_v62  ;;  %v2159_v51 = vsub.f32 %v1849_v28, %v10342_v45 }
 0x384   :  { %v10722_v2 = vpop.eup %8014  ;;  %8026 = vpow2.f32 %v3276_v13  ;;  %v2666_v5 = vmul.f32 %v2410_v12, %v2410_v12  ;;  %v2414_v14 = vmul.f32 0.8, %v2158_v40  ;;  %7074 = vmatmul.mubr.msk.bf16.gmra.mrb[0].mxu1 %vm6952_vm4, %v12408_v41  ;;  %4907 = vmatmul.mubr.bf16.gmra.mrb[168].mxu0 %v3626_v33  ;;  %v10777_v13 = vpop.permute.xlu0 %3927  ;;  %vm4014_vm4 = vcmp.eq.s32.totalorder %v12404_v56, %v10730_v4 }
 0x385   :  { %v8017_v58 = vpop.eup %8016  ;;  %8028 = vpow2.f32 %v3278_v46  ;;  %v2667_v34 = vmul.f32 %v2411_v1, %v2411_v1  ;;  %v2415_v15 = vmul.f32 0.8, %v2159_v51  ;;  %7077 = vmatprep.mubr.msk.bf16.mxu1 %vm6954_vm5, %v12408_v41  ;;  %vm4017_vm5 = vcmp.eq.s32.totalorder %v12404_v56, %v10744_v55  ;;  %vm6964_vm7 = vmpackc.low %vm4015_vm3, %vm4014_vm4 }
 0x386   :  { %v8019_v8 = vpop.eup %8018  ;;  %v2922_v53 = vsub.f32 0.0, %v2666_v5  ;;  %v2670_v23 = vmul.f32 %v2414_v14, %v2414_v14  ;;  %vm6966_vm8 = vmpackc.low %vm4017_vm5, %vm4016_vm6  ;;  %vm4019_vm10 = vcmp.eq.s32.totalorder %v12404_v56, %v10774_v54 }
 0x387   :  { %v8021_v50 = vpop.eup %8020  ;;  %v2923_v36 = vsub.f32 0.0, %v2667_v34  ;;  %v2671_v43 = vmul.f32 %v2415_v15, %v2415_v15  ;;  %v1853_v26 = vpop.f32.mrb[152].mxu1  ;;  %v3630_v25 = vpack.c.bf16 %v8019_v8, %v10722_v2 }
 0x388   :  { %v3284_v27 = vmul.f32 1.442695, %v2922_v53  ;;  %v2926_v47 = vsub.f32 0.0, %v2670_v23  ;;  %v2162_v59 = vsub.f32 %v1853_v26, %v10338_v44  ;;  %v1855_v49 = vpop.f32.mrb[153].mxu1  ;;  %v3631_v31 = vpack.c.bf16 %v8021_v50, %v8017_v58  ;;  %v10801_v26 = vpop.permute.xlu1 %3936 }
 0x389   :  { %v3286_v30 = vmul.f32 1.442695, %v2923_v36  ;;  %v2927_v61 = vsub.f32 0.0, %v2671_v43  ;;  %v2163_v35 = vsub.f32 %v1855_v49, %v10342_v45  ;;  %v1857_v29 = vpop.f32.mrb[154].mxu1  ;;  %v10808_v22 = vpop.permute.xlu0 %3933 }
 0x38a   :  { %8030 = vpow2.f32 %v3284_v27  ;;  %v3292_v7 = vmul.f32 1.442695, %v2926_v47  ;;  %v2418_v16 = vmul.f32 0.8, %v2162_v59  ;;  %v2166_v20 = vsub.f32 %v1857_v29, %v10338_v44  ;;  %v1859_v18 = vpop.f32.mrb[155].mxu1  ;;  %6889 = vmatprep.mubr.msk.bf16.mxu0 %vm4408_vm9, %v3631_v31 }
 0x38b   :  { %8032 = vpow2.f32 %v3286_v30  ;;  %v3294_v19 = vmul.f32 1.442695, %v2927_v61  ;;  %v2419_v63 = vmul.f32 0.8, %v2163_v35  ;;  %v2167_v32 = vsub.f32 %v1859_v18, %v10342_v45 }
 0x38c   :  { %v10758_v52 = vpop.eup %8022  ;;  %8034 = vpow2.f32 %v3292_v7  ;;  %v2674_v48 = vmul.f32 %v2418_v16, %v2418_v16  ;;  %v2422_v33 = vmul.f32 0.8, %v2166_v20  ;;  %7078 = vmatmul.mubr.msk.bf16.gmra.mrb[4].mxu1 %vm6956_vm11, %v12408_v41  ;;  %4915 = vmatmul.mubr.bf16.gmra.mrb[172].mxu0 %v3630_v25  ;;  %vm4018_vm11 = vcmp.eq.s32.totalorder %v12404_v56, %v10777_v13 }
 0x38d   :  { %v8025_v37 = vpop.eup %8024  ;;  %8036 = vpow2.f32 %v3294_v19  ;;  %v2675_v60 = vmul.f32 %v2419_v63, %v2419_v63  ;;  %v2423_v39 = vmul.f32 0.8, %v2167_v32  ;;  %7081 = vmatprep.mubr.msk.bf16.mxu1 %vm6958_vm12, %v12408_v41  ;;  %v10836_v4 = vpop.permute.xlu0 %3939  ;;  %vm4021_vm12 = vcmp.eq.s32.totalorder %v12404_v56, %v10801_v26  ;;  %vm6968_vm14 = vmpackc.low %vm4019_vm10, %vm4018_vm11 }
 0x38e   :  { %v8027_v10 = vpop.eup %8026  ;;  %v2930_v0 = vsub.f32 0.0, %v2674_v48  ;;  %v2678_v9 = vmul.f32 %v2422_v33, %v2422_v33  ;;  %vm4020_vm13 = vcmp.eq.s32.totalorder %v12404_v56, %v10808_v22 }
 0x38f   :  { %v8029_v11 = vpop.eup %8028  ;;  %v2931_v24 = vsub.f32 0.0, %v2675_v60  ;;  %v2679_v21 = vmul.f32 %v2423_v39, %v2423_v39  ;;  %v1863_v62 = vpop.f32.mrb[156].mxu1  ;;  %v3634_v3 = vpack.c.bf16 %v8027_v10, %v10758_v52  ;;  %vm6970_vm15 = vmpackc.low %vm4021_vm12, %vm4020_vm13 }
 0x390   :  { %v3300_v12 = vmul.f32 1.442695, %v2930_v0  ;;  %v2934_v40 = vsub.f32 0.0, %v2678_v9  ;;  %v2170_v28 = vsub.f32 %v1863_v62, %v10338_v44  ;;  %v1865_v46 = vpop.f32.mrb[157].mxu1  ;;  %v3635_v1 = vpack.c.bf16 %v8029_v11, %v8025_v37  ;;  %v10825_v39 = vpop.permute.xlu1 %3942 }
 0x391   :  { %v3302_v51 = vmul.f32 1.442695, %v2931_v24  ;;  %v2935_v2 = vsub.f32 0.0, %v2679_v21  ;;  %v2171_v5 = vsub.f32 %v1865_v46, %v10342_v45  ;;  %v1867_v14 = vpop.f32.mrb[158].mxu1  ;;  %vm4023_vm0 = vcmp.eq.s32.totalorder %v12404_v56, %v10825_v39 }
 0x392   :  { %8038 = vpow2.f32 %v3300_v12  ;;  %v3308_v58 = vmul.f32 1.442695, %v2934_v40  ;;  %v2426_v34 = vmul.f32 0.8, %v2170_v28  ;;  %v2174_v15 = vsub.f32 %v1867_v14, %v10338_v44  ;;  %v1869_v8 = vpop.f32.mrb[159].mxu1  ;;  %6890 = vmatprep.mubr.msk.bf16.mxu0 %vm4408_vm9, %v3635_v1 }
 0x393   :  { %8040 = vpow2.f32 %v3302_v51  ;;  %v3310_v53 = vmul.f32 1.442695, %v2935_v2  ;;  %v2427_v23 = vmul.f32 0.8, %v2171_v5  ;;  %v2175_v50 = vsub.f32 %v1869_v8, %v10342_v45 }
 0x394   :  { %v10792_v36 = vpop.eup %8030  ;;  %8042 = vpow2.f32 %v3308_v58  ;;  %v2682_v17 = vmul.f32 %v2426_v34, %v2426_v34  ;;  %v2430_v43 = vmul.f32 0.8, %v2174_v15  ;;  %7082 = vmatmul.mubr.msk.bf16.gmra.mrb[8].mxu1 %vm6960_vm1, %v12408_v41  ;;  %4923 = vmatmul.mubr.bf16.gmra.mrb[176].mxu0 %v3634_v3  ;;  %v10850_v15 = vpop.permute.xlu1 %3948  ;;  %vm4022_vm1 = vcmp.eq.s32.totalorder %v12404_v56, %v10836_v4 }
 0x395   :  { %v8033_v57 = vpop.eup %8032  ;;  %8044 = vpow2.f32 %v3310_v53  ;;  %v2683_v25 = vmul.f32 %v2427_v23, %v2427_v23  ;;  %v2431_v27 = vmul.f32 0.8, %v2175_v50  ;;  %7085 = vmatprep.mubr.msk.bf16.mxu1 %vm6962_vm2, %v12408_v41  ;;  %vm4025_vm2 = vcmp.eq.s32.totalorder %v12404_v56, %v10850_v15  ;;  %vm6972_vm4 = vmpackc.low %vm4023_vm0, %vm4022_vm1 }
 0x396   :  { %v8035_v47 = vpop.eup %8034  ;;  %v2938_v6 = vsub.f32 0.0, %v2682_v17  ;;  %v2686_v59 = vmul.f32 %v2430_v43, %v2430_v43 }
 0x397   :  { %v8037_v49 = vpop.eup %8036  ;;  %v2939_v31 = vsub.f32 0.0, %v2683_v25  ;;  %v2687_v30 = vmul.f32 %v2431_v27, %v2431_v27  ;;  %v1873_v61 = vpop.f32.mrb[160].mxu1  ;;  %v3638_v35 = vpack.c.bf16 %v8035_v47, %v10792_v36 }
 0x398   :  { %v3316_v29 = vmul.f32 1.442695, %v2938_v6  ;;  %v2942_v7 = vsub.f32 0.0, %v2686_v59  ;;  %v2178_v16 = vsub.f32 %v1873_v61, %v10338_v44  ;;  %v1875_v20 = vpop.f32.mrb[161].mxu1  ;;  %v3639_v18 = vpack.c.bf16 %v8037_v49, %v8033_v57  ;;  %v3946_v36 = vpop.permute.xlu0 %3945 }
 0x399   :  { %v3318_v19 = vmul.f32 1.442695, %v2939_v31  ;;  %v2943_v63 = vsub.f32 0.0, %v2687_v30  ;;  %v2179_v32 = vsub.f32 %v1875_v20, %v10342_v45  ;;  %v1877_v52 = vpop.f32.mrb[162].mxu1  ;;  %vm4024_vm3 = vcmp.eq.s32.totalorder %v12404_v56, %v3946_v36 }
 0x39a   :  { %8046 = vpow2.f32 %v3316_v29  ;;  %v3324_v48 = vmul.f32 1.442695, %v2942_v7  ;;  %v2434_v33 = vmul.f32 0.8, %v2178_v16  ;;  %v2182_v37 = vsub.f32 %v1877_v52, %v10338_v44  ;;  %v1879_v60 = vpop.f32.mrb[163].mxu1  ;;  %6891 = vmatprep.mubr.msk.bf16.mxu0 %vm4408_vm9, %v3639_v18  ;;  %v10878_v29 = vpop.permute.xlu1 %3954  ;;  %vm6974_vm5 = vmpackc.low %vm4025_vm2, %vm4024_vm3 }
 0x39b   :  { %8048 = vpow2.f32 %v3318_v19  ;;  %v3326_v10 = vmul.f32 1.442695, %v2943_v63  ;;  %v2435_v0 = vmul.f32 0.8, %v2179_v32  ;;  %v2183_v9 = vsub.f32 %v1879_v60, %v10342_v45 }
 0x39c   :  { %v10828_v11 = vpop.eup %8038  ;;  %8050 = vpow2.f32 %v3324_v48  ;;  %v2690_v42 = vmul.f32 %v2434_v33, %v2434_v33  ;;  %v2438_v24 = vmul.f32 0.8, %v2182_v37  ;;  %7086 = vmatmul.mubr.msk.bf16.gmra.mrb[12].mxu1 %vm6964_vm7, %v12408_v41  ;;  %4931 = vmatmul.mubr.bf16.gmra.mrb[180].mxu0 %v3638_v35  ;;  %v10881_v19 = vpop.permute.xlu0 %3951  ;;  %vm4027_vm6 = vcmp.eq.s32.totalorder %v12404_v56, %v10878_v29 }
 0x39d   :  { %v8041_v21 = vpop.eup %8040  ;;  %8052 = vpow2.f32 %v3326_v10  ;;  %v2691_v62 = vmul.f32 %v2435_v0, %v2435_v0  ;;  %v2439_v3 = vmul.f32 0.8, %v2183_v9  ;;  %7089 = vmatprep.mubr.msk.bf16.mxu1 %vm6966_vm8, %v12408_v41  ;;  %vm4026_vm7 = vcmp.eq.s32.totalorder %v12404_v56, %v10881_v19 }
 0x39e   :  { %v8043_v12 = vpop.eup %8042  ;;  %v2946_v55 = vsub.f32 0.0, %v2690_v42  ;;  %v2694_v38 = vmul.f32 %v2438_v24, %v2438_v24  ;;  %vm6976_vm11 = vmpackc.low %vm4027_vm6, %vm4026_vm7 }
 0x39f   :  { %v8045_v40 = vpop.eup %8044  ;;  %v2947_v28 = vsub.f32 0.0, %v2691_v62  ;;  %v2695_v46 = vmul.f32 %v2439_v3, %v2439_v3  ;;  %v1883_v1 = vpop.f32.mrb[164].mxu1  ;;  %v3642_v51 = vpack.c.bf16 %v8043_v12, %v10828_v11 }
 0x3a0   :  { %v3332_v2 = vmul.f32 1.442695, %v2946_v55  ;;  %v2950_v5 = vsub.f32 0.0, %v2694_v38  ;;  %v2186_v14 = vsub.f32 %v1883_v1, %v10338_v44  ;;  %v1885_v58 = vpop.f32.mrb[165].mxu1  ;;  %v3643_v34 = vpack.c.bf16 %v8045_v40, %v8041_v21  ;;  %v3961_v38 = vpop.permute.xlu1 %3960 }
 0x3a1   :  { %v3334_v8 = vmul.f32 1.442695, %v2947_v28  ;;  %v2951_v53 = vsub.f32 0.0, %v2695_v46  ;;  %v2187_v23 = vsub.f32 %v1885_v58, %v10342_v45  ;;  %v1887_v50 = vpop.f32.mrb[166].mxu1  ;;  %v3958_v1 = vpop.permute.xlu0 %3957  ;;  %vm4029_vm8 = vcmp.eq.s32.totalorder %v12404_v56, %v3961_v38 }
 0x3a2   :  { %8054 = vpow2.f32 %v3332_v2  ;;  %v3340_v17 = vmul.f32 1.442695, %v2950_v5  ;;  %v2442_v43 = vmul.f32 0.8, %v2186_v14  ;;  %v2190_v57 = vsub.f32 %v1887_v50, %v10338_v44  ;;  %v1889_v25 = vpop.f32.mrb[167].mxu1  ;;  %6892 = vmatprep.mubr.msk.bf16.mxu0 %vm4408_vm9, %v3643_v34 }
 0x3a3   :  { %8056 = vpow2.f32 %v3334_v8  ;;  %v3342_v27 = vmul.f32 1.442695, %v2951_v53  ;;  %v2443_v47 = vmul.f32 0.8, %v2187_v23  ;;  %v2191_v6 = vsub.f32 %v1889_v25, %v10342_v45 }
 0x3a4   :  { %v10862_v59 = vpop.eup %8046  ;;  %8058 = vpow2.f32 %v3340_v17  ;;  %v2698_v13 = vmul.f32 %v2442_v43, %v2442_v43  ;;  %v2446_v49 = vmul.f32 0.8, %v2190_v57  ;;  %7090 = vmatmul.mubr.msk.bf16.gmra.mrb[16].mxu1 %vm6968_vm14, %v12408_v41  ;;  %4939 = vmatmul.mubr.bf16.gmra.mrb[184].mxu0 %v3642_v51  ;;  %vm4028_vm10 = vcmp.eq.s32.totalorder %v12404_v56, %v3958_v1 }
 0x3a5   :  { %v8049_v54 = vpop.eup %8048  ;;  %8060 = vpow2.f32 %v3342_v27  ;;  %v2699_v31 = vmul.f32 %v2443_v47, %v2443_v47  ;;  %v2447_v30 = vmul.f32 0.8, %v2191_v6  ;;  %7093 = vmatprep.mubr.msk.bf16.mxu1 %vm6970_vm15, %v12408_v41  ;;  %vm6978_vm12 = vmpackc.low %vm4029_vm8, %vm4028_vm10 }
 0x3a6   :  { %v8051_v61 = vpop.eup %8050  ;;  %v2954_v26 = vsub.f32 0.0, %v2698_v13  ;;  %v2702_v22 = vmul.f32 %v2446_v49, %v2446_v49  ;;  %v3967_v13 = vpop.permute.xlu1 %3966 }
 0x3a7   :  { %v8053_v35 = vpop.eup %8052  ;;  %v2955_v7 = vsub.f32 0.0, %v2699_v31  ;;  %v2703_v16 = vmul.f32 %v2447_v30, %v2447_v30  ;;  %v1893_v20 = vpop.f32.mrb[168].mxu1  ;;  %v3646_v18 = vpack.c.bf16 %v8051_v61, %v10862_v59  ;;  %vm4031_vm13 = vcmp.eq.s32.totalorder %v12404_v56, %v3967_v13 }
 0x3a8   :  { %v3348_v63 = vmul.f32 1.442695, %v2954_v26  ;;  %v2958_v32 = vsub.f32 0.0, %v2702_v22  ;;  %v2194_v52 = vsub.f32 %v1893_v20, %v10338_v44  ;;  %v1895_v48 = vpop.f32.mrb[169].mxu1  ;;  %v3647_v33 = vpack.c.bf16 %v8053_v35, %v8049_v54  ;;  %v3964_v61 = vpop.permute.xlu0 %3963 }
 0x3a9   :  { %v3350_v37 = vmul.f32 1.442695, %v2955_v7  ;;  %v2959_v60 = vsub.f32 0.0, %v2703_v16  ;;  %v2195_v10 = vsub.f32 %v1895_v48, %v10342_v45  ;;  %v1897_v0 = vpop.f32.mrb[170].mxu1  ;;  %vm4030_vm14 = vcmp.eq.s32.totalorder %v12404_v56, %v3964_v61 }
 0x3aa   :  { %8062 = vpow2.f32 %v3348_v63  ;;  %v3356_v9 = vmul.f32 1.442695, %v2958_v32  ;;  %v2450_v11 = vmul.f32 0.8, %v2194_v52  ;;  %v2198_v42 = vsub.f32 %v1897_v0, %v10338_v44  ;;  %v1899_v24 = vpop.f32.mrb[171].mxu1  ;;  %6893 = vmatprep.mubr.msk.bf16.mxu0 %vm4408_vm9, %v3647_v33  ;;  %vm6980_vm15 = vmpackc.low %vm4031_vm13, %vm4030_vm14 }
 0x3ab   :  { %8064 = vpow2.f32 %v3350_v37  ;;  %v3358_v21 = vmul.f32 1.442695, %v2959_v60  ;;  %v2451_v62 = vmul.f32 0.8, %v2195_v10  ;;  %v2199_v3 = vsub.f32 %v1899_v24, %v10342_v45 }
 0x3ac   :  { %v10895_v12 = vpop.eup %8054  ;;  %8066 = vpow2.f32 %v3356_v9  ;;  %v2706_v55 = vmul.f32 %v2450_v11, %v2450_v11  ;;  %v2454_v4 = vmul.f32 0.8, %v2198_v42  ;;  %7094 = vmatmul.mubr.msk.bf16.gmra.mrb[20].mxu1 %vm6972_vm4, %v12408_v41  ;;  %4947 = vmatmul.mubr.bf16.gmra.mrb[188].mxu0 %v3646_v18 }
 0x3ad   :  { %v8057_v39 = vpop.eup %8056  ;;  %8068 = vpow2.f32 %v3358_v21  ;;  %v2707_v40 = vmul.f32 %v2451_v62, %v2451_v62  ;;  %v2455_v28 = vmul.f32 0.8, %v2199_v3  ;;  %7097 = vmatprep.mubr.msk.bf16.mxu1 %vm6974_vm5, %v12408_v41 }
 0x3ae   :  { %v8059_v46 = vpop.eup %8058  ;;  %v2962_v51 = vsub.f32 0.0, %v2706_v55  ;;  %v2710_v2 = vmul.f32 %v2454_v4, %v2454_v4 }
 0x3af   :  { %v8061_v5 = vpop.eup %8060  ;;  %v2963_v14 = vsub.f32 0.0, %v2707_v40  ;;  %v2711_v58 = vmul.f32 %v2455_v28, %v2455_v28  ;;  %v1903_v34 = vpop.f32.mrb[172].mxu1  ;;  %v3650_v15 = vpack.c.bf16 %v8059_v46, %v10895_v12 }
 0x3b0   :  { %v3364_v8 = vmul.f32 1.442695, %v2962_v51  ;;  %v2966_v53 = vsub.f32 0.0, %v2710_v2  ;;  %v2202_v23 = vsub.f32 %v1903_v34, %v10338_v44  ;;  %v1905_v50 = vpop.f32.mrb[173].mxu1  ;;  %v3651_v36 = vpack.c.bf16 %v8061_v5, %v8057_v39 }
 0x3b1   :  { %v3366_v17 = vmul.f32 1.442695, %v2963_v14  ;;  %v2967_v43 = vsub.f32 0.0, %v2711_v58  ;;  %v2203_v57 = vsub.f32 %v1905_v50, %v10342_v45  ;;  %v1907_v25 = vpop.f32.mrb[174].mxu1 }
 0x3b2   :  { %8070 = vpow2.f32 %v3364_v8  ;;  %v3372_v27 = vmul.f32 1.442695, %v2966_v53  ;;  %v2458_v47 = vmul.f32 0.8, %v2202_v23  ;;  %v2206_v6 = vsub.f32 %v1907_v25, %v10338_v44  ;;  %v1909_v59 = vpop.f32.mrb[175].mxu1  ;;  %6894 = vmatprep.mubr.msk.bf16.mxu0 %vm4408_vm9, %v3651_v36 }
 0x3b3   :  { %8072 = vpow2.f32 %v3366_v17  ;;  %v3374_v49 = vmul.f32 1.442695, %v2967_v43  ;;  %v2459_v54 = vmul.f32 0.8, %v2203_v57  ;;  %v2207_v31 = vsub.f32 %v1909_v59, %v10342_v45 }
 0x3b4   :  { %v8063_v30 = vpop.eup %8062  ;;  %8074 = vpow2.f32 %v3372_v27  ;;  %v2714_v26 = vmul.f32 %v2458_v47, %v2458_v47  ;;  %v2462_v22 = vmul.f32 0.8, %v2206_v6  ;;  %7098 = vmatmul.mubr.msk.bf16.gmra.mrb[24].mxu1 %vm6976_vm11, %v12408_v41  ;;  %4955 = vmatmul.mubr.bf16.gmra.mrb[192].mxu0 %v3650_v15 }
 0x3b5   :  { %v8065_v35 = vpop.eup %8064  ;;  %8076 = vpow2.f32 %v3374_v49  ;;  %v2715_v29 = vmul.f32 %v2459_v54, %v2459_v54  ;;  %v2463_v7 = vmul.f32 0.8, %v2207_v31  ;;  %7101 = vmatprep.mubr.msk.bf16.mxu1 %vm6978_vm12, %v12408_v41 }
 0x3b6   :  { %v8067_v16 = vpop.eup %8066  ;;  %v2970_v20 = vsub.f32 0.0, %v2714_v26  ;;  %v2718_v18 = vmul.f32 %v2462_v22, %v2462_v22 }
 0x3b7   :  { %v8069_v19 = vpop.eup %8068  ;;  %v2971_v63 = vsub.f32 0.0, %v2715_v29  ;;  %v2719_v32 = vmul.f32 %v2463_v7, %v2463_v7  ;;  %v1913_v52 = vpop.f32.mrb[176].mxu1  ;;  %v3654_v48 = vpack.c.bf16 %v8067_v16, %v8063_v30 }
 0x3b8   :  { %v3380_v33 = vmul.f32 1.442695, %v2970_v20  ;;  %v2974_v37 = vsub.f32 0.0, %v2718_v18  ;;  %v2210_v60 = vsub.f32 %v1913_v52, %v10338_v44  ;;  %v1915_v10 = vpop.f32.mrb[177].mxu1  ;;  %v3655_v0 = vpack.c.bf16 %v8069_v19, %v8065_v35 }
 0x3b9   :  { %v3382_v9 = vmul.f32 1.442695, %v2971_v63  ;;  %v2975_v11 = vsub.f32 0.0, %v2719_v32  ;;  %v2211_v42 = vsub.f32 %v1915_v10, %v10342_v45  ;;  %v1917_v24 = vpop.f32.mrb[178].mxu1 }
 0x3ba   :  { %8078 = vpow2.f32 %v3380_v33  ;;  %v3388_v21 = vmul.f32 1.442695, %v2974_v37  ;;  %v2466_v62 = vmul.f32 0.8, %v2210_v60  ;;  %v2214_v3 = vsub.f32 %v1917_v24, %v10338_v44  ;;  %v1919_v12 = vpop.f32.mrb[179].mxu1  ;;  %6895 = vmatprep.mubr.msk.bf16.mxu0 %vm4408_vm9, %v3655_v0 }
 0x3bb   :  { %8080 = vpow2.f32 %v3382_v9  ;;  %v3390_v55 = vmul.f32 1.442695, %v2975_v11  ;;  %v2467_v4 = vmul.f32 0.8, %v2211_v42  ;;  %v2215_v39 = vsub.f32 %v1919_v12, %v10342_v45 }
 0x3bc   :  { %v8071_v38 = vpop.eup %8070  ;;  %8082 = vpow2.f32 %v3388_v21  ;;  %v2722_v40 = vmul.f32 %v2466_v62, %v2466_v62  ;;  %v2470_v28 = vmul.f32 0.8, %v2214_v3  ;;  %7102 = vmatmul.mubr.msk.bf16.gmra.mrb[28].mxu1 %vm6980_vm15, %v12408_v41  ;;  %4963 = vmatmul.mubr.bf16.gmra.mrb[196].mxu0 %v3654_v48 }
 0x3bd   :  { %v8073_v46 = vpop.eup %8072  ;;  %8084 = vpow2.f32 %v3390_v55  ;;  %v2723_v1 = vmul.f32 %v2467_v4, %v2467_v4  ;;  %v2471_v51 = vmul.f32 0.8, %v2215_v39 }
 0x3be   :  { %v8075_v2 = vpop.eup %8074  ;;  %v2978_v5 = vsub.f32 0.0, %v2722_v40  ;;  %v2726_v14 = vmul.f32 %v2470_v28, %v2470_v28 }
 0x3bf   :  { %v8077_v56 = vpop.eup %8076  ;;  %v2979_v58 = vsub.f32 0.0, %v2723_v1  ;;  %v2727_v34 = vmul.f32 %v2471_v51, %v2471_v51  ;;  %v1923_v15 = vpop.f32.mrb[180].mxu1  ;;  %v3658_v8 = vpack.c.bf16 %v8075_v2, %v8071_v38 }
 0x3c0   :  { %v3396_v53 = vmul.f32 1.442695, %v2978_v5  ;;  %v2982_v23 = vsub.f32 0.0, %v2726_v14  ;;  %v2218_v50 = vsub.f32 %v1923_v15, %v10338_v44  ;;  %v1925_v36 = vpop.f32.mrb[181].mxu1  ;;  %v3659_v17 = vpack.c.bf16 %v8077_v56, %v8073_v46 }
 0x3c1   :  { %v3398_v41 = vmul.f32 1.442695, %v2979_v58  ;;  %v2983_v43 = vsub.f32 0.0, %v2727_v34  ;;  %v2219_v57 = vsub.f32 %v1925_v36, %v10342_v45  ;;  %v1927_v25 = vpop.f32.mrb[182].mxu1 }
 0x3c2   :  { %8086 = vpow2.f32 %v3396_v53  ;;  %v3404_v27 = vmul.f32 1.442695, %v2982_v23  ;;  %v2474_v47 = vmul.f32 0.8, %v2218_v50  ;;  %v2222_v6 = vsub.f32 %v1927_v25, %v10338_v44  ;;  %v1929_v59 = vpop.f32.mrb[183].mxu1  ;;  %6896 = vmatprep.mubr.msk.bf16.mxu0 %vm4408_vm9, %v3659_v17 }
 0x3c3   :  { %8088 = vpow2.f32 %v3398_v41  ;;  %v3406_v13 = vmul.f32 1.442695, %v2983_v43  ;;  %v2475_v49 = vmul.f32 0.8, %v2219_v57  ;;  %v2223_v54 = vsub.f32 %v1929_v59, %v10342_v45 }
 0x3c4   :  { %v8079_v31 = vpop.eup %8078  ;;  %8090 = vpow2.f32 %v3404_v27  ;;  %v2730_v30 = vmul.f32 %v2474_v47, %v2474_v47  ;;  %v2478_v61 = vmul.f32 0.8, %v2222_v6  ;;  %4971 = vmatmul.mubr.bf16.gmra.mrb[200].mxu0 %v3658_v8 }
 0x3c5   :  { %v8081_v26 = vpop.eup %8080  ;;  %8092 = vpow2.f32 %v3406_v13  ;;  %v2731_v22 = vmul.f32 %v2475_v49, %v2475_v49  ;;  %v2479_v35 = vmul.f32 0.8, %v2223_v54 }
 0x3c6   :  { %v8083_v29 = vpop.eup %8082  ;;  %v2986_v7 = vsub.f32 0.0, %v2730_v30  ;;  %v2734_v16 = vmul.f32 %v2478_v61, %v2478_v61 }
 0x3c7   :  { %v8085_v20 = vpop.eup %8084  ;;  %v2987_v18 = vsub.f32 0.0, %v2731_v22  ;;  %v2735_v19 = vmul.f32 %v2479_v35, %v2479_v35  ;;  %v1933_v63 = vpop.f32.mrb[184].mxu1  ;;  %v3662_v32 = vpack.c.bf16 %v8083_v29, %v8079_v31 }
 0x3c8   :  { %v3412_v52 = vmul.f32 1.442695, %v2986_v7  ;;  %v2990_v48 = vsub.f32 0.0, %v2734_v16  ;;  %v2226_v33 = vsub.f32 %v1933_v63, %v10338_v44  ;;  %v1935_v37 = vpop.f32.mrb[185].mxu1  ;;  %v3663_v60 = vpack.c.bf16 %v8085_v20, %v8081_v26 }
 0x3c9   :  { %v3414_v10 = vmul.f32 1.442695, %v2987_v18  ;;  %v2991_v0 = vsub.f32 0.0, %v2735_v19  ;;  %v2227_v9 = vsub.f32 %v1935_v37, %v10342_v45  ;;  %v1937_v11 = vpop.f32.mrb[186].mxu1 }
 0x3ca   :  { %8094 = vpow2.f32 %v3412_v52  ;;  %v3420_v42 = vmul.f32 1.442695, %v2990_v48  ;;  %v2482_v24 = vmul.f32 0.8, %v2226_v33  ;;  %v2230_v21 = vsub.f32 %v1937_v11, %v10338_v44  ;;  %v1939_v62 = vpop.f32.mrb[187].mxu1  ;;  %6897 = vmatprep.mubr.msk.bf16.mxu0 %vm4408_vm9, %v3663_v60 }
 0x3cb   :  { %8096 = vpow2.f32 %v3414_v10  ;;  %v3422_v3 = vmul.f32 1.442695, %v2991_v0  ;;  %v2483_v12 = vmul.f32 0.8, %v2227_v9  ;;  %v2231_v55 = vsub.f32 %v1939_v62, %v10342_v45 }
 0x3cc   :  { %v8087_v4 = vpop.eup %8086  ;;  %8098 = vpow2.f32 %v3420_v42  ;;  %v2738_v39 = vmul.f32 %v2482_v24, %v2482_v24  ;;  %v2486_v38 = vmul.f32 0.8, %v2230_v21  ;;  %4979 = vmatmul.mubr.bf16.gmra.mrb[204].mxu0 %v3662_v32 }
 0x3cd   :  { %v8089_v40 = vpop.eup %8088  ;;  %8100 = vpow2.f32 %v3422_v3  ;;  %v2739_v28 = vmul.f32 %v2483_v12, %v2483_v12  ;;  %v2487_v46 = vmul.f32 0.8, %v2231_v55 }
 0x3ce   :  { %v8091_v1 = vpop.eup %8090  ;;  %v2994_v51 = vsub.f32 0.0, %v2738_v39  ;;  %v2742_v2 = vmul.f32 %v2486_v38, %v2486_v38 }
 0x3cf   :  { %v8093_v5 = vpop.eup %8092  ;;  %v2995_v14 = vsub.f32 0.0, %v2739_v28  ;;  %v2743_v56 = vmul.f32 %v2487_v46, %v2487_v46  ;;  %v1943_v58 = vpop.f32.mrb[188].mxu1  ;;  %v3666_v34 = vpack.c.bf16 %v8091_v1, %v8087_v4 }
 0x3d0   :  { %v3428_v15 = vmul.f32 1.442695, %v2994_v51  ;;  %v2998_v8 = vsub.f32 0.0, %v2742_v2  ;;  %v2234_v53 = vsub.f32 %v1943_v58, %v10338_v44  ;;  %v1945_v23 = vpop.f32.mrb[189].mxu1  ;;  %v3667_v50 = vpack.c.bf16 %v8093_v5, %v8089_v40 }
 0x3d1   :  { %v3430_v36 = vmul.f32 1.442695, %v2995_v14  ;;  %v2999_v17 = vsub.f32 0.0, %v2743_v56  ;;  %v2235_v41 = vsub.f32 %v1945_v23, %v10342_v45  ;;  %v1947_v43 = vpop.f32.mrb[190].mxu1 }
 0x3d2   :  { %8102 = vpow2.f32 %v3428_v15  ;;  %v3436_v57 = vmul.f32 1.442695, %v2998_v8  ;;  %v2490_v25 = vmul.f32 0.8, %v2234_v53  ;;  %v2238_v27 = vsub.f32 %v1947_v43, %v10338_v44  ;;  %v1949_v47 = vpop.f32.mrb[191].mxu1  ;;  %6898 = vmatprep.mubr.msk.bf16.mxu0 %vm4408_vm9, %v3667_v50 }
 0x3d3   :  { %8104 = vpow2.f32 %v3430_v36  ;;  %v3438_v6 = vmul.f32 1.442695, %v2999_v17  ;;  %v2491_v59 = vmul.f32 0.8, %v2235_v41  ;;  %v2239_v13 = vsub.f32 %v1949_v47, %v10342_v45 }
 0x3d4   :  { %v8095_v49 = vpop.eup %8094  ;;  %8106 = vpow2.f32 %v3436_v57  ;;  %v2746_v54 = vmul.f32 %v2490_v25, %v2490_v25  ;;  %v2494_v31 = vmul.f32 0.8, %v2238_v27  ;;  %4987 = vmatmul.mubr.bf16.gmra.mrb[208].mxu0 %v3666_v34 }
 0x3d5   :  { %v8097_v30 = vpop.eup %8096  ;;  %8108 = vpow2.f32 %v3438_v6  ;;  %v2747_v61 = vmul.f32 %v2491_v59, %v2491_v59  ;;  %v2495_v26 = vmul.f32 0.8, %v2239_v13 }
 0x3d6   :  { %v8099_v22 = vpop.eup %8098  ;;  %v3002_v35 = vsub.f32 0.0, %v2746_v54  ;;  %v2750_v29 = vmul.f32 %v2494_v31, %v2494_v31 }
 0x3d7   :  { %v8101_v7 = vpop.eup %8100  ;;  %v3003_v16 = vsub.f32 0.0, %v2747_v61  ;;  %v2751_v20 = vmul.f32 %v2495_v26, %v2495_v26  ;;  %v1953_v18 = vpop.f32.mrb[192].mxu1  ;;  %v3670_v19 = vpack.c.bf16 %v8099_v22, %v8095_v49 }
 0x3d8   :  { %v3444_v63 = vmul.f32 1.442695, %v3002_v35  ;;  %v3006_v32 = vsub.f32 0.0, %v2750_v29  ;;  %v2242_v52 = vsub.f32 %v1953_v18, %v10338_v44  ;;  %v1955_v48 = vpop.f32.mrb[193].mxu1  ;;  %v3671_v33 = vpack.c.bf16 %v8101_v7, %v8097_v30 }
 0x3d9   :  { %v3446_v37 = vmul.f32 1.442695, %v3003_v16  ;;  %v3007_v60 = vsub.f32 0.0, %v2751_v20  ;;  %v2243_v10 = vsub.f32 %v1955_v48, %v10342_v45  ;;  %v1957_v0 = vpop.f32.mrb[194].mxu1 }
 0x3da   :  { %8110 = vpow2.f32 %v3444_v63  ;;  %v3452_v9 = vmul.f32 1.442695, %v3006_v32  ;;  %v2498_v11 = vmul.f32 0.8, %v2242_v52  ;;  %v2246_v42 = vsub.f32 %v1957_v0, %v10338_v44  ;;  %v1959_v24 = vpop.f32.mrb[195].mxu1  ;;  %6899 = vmatprep.mubr.msk.bf16.mxu0 %vm4408_vm9, %v3671_v33 }
 0x3db   :  { %8112 = vpow2.f32 %v3446_v37  ;;  %v3454_v21 = vmul.f32 1.442695, %v3007_v60  ;;  %v2499_v62 = vmul.f32 0.8, %v2243_v10  ;;  %v2247_v3 = vsub.f32 %v1959_v24, %v10342_v45 }
 0x3dc   :  { %v8103_v12 = vpop.eup %8102  ;;  %8114 = vpow2.f32 %v3452_v9  ;;  %v2754_v55 = vmul.f32 %v2498_v11, %v2498_v11  ;;  %v2502_v4 = vmul.f32 0.8, %v2246_v42  ;;  %4995 = vmatmul.mubr.bf16.gmra.mrb[212].mxu0 %v3670_v19 }
 0x3dd   :  { %v8105_v39 = vpop.eup %8104  ;;  %8116 = vpow2.f32 %v3454_v21  ;;  %v2755_v38 = vmul.f32 %v2499_v62, %v2499_v62  ;;  %v2503_v40 = vmul.f32 0.8, %v2247_v3 }
 0x3de   :  { %v8107_v28 = vpop.eup %8106  ;;  %v3010_v46 = vsub.f32 0.0, %v2754_v55  ;;  %v2758_v1 = vmul.f32 %v2502_v4, %v2502_v4 }
 0x3df   :  { %v8109_v51 = vpop.eup %8108  ;;  %v3011_v2 = vsub.f32 0.0, %v2755_v38  ;;  %v2759_v5 = vmul.f32 %v2503_v40, %v2503_v40  ;;  %v1963_v14 = vpop.f32.mrb[196].mxu1  ;;  %v3674_v56 = vpack.c.bf16 %v8107_v28, %v8103_v12 }
 0x3e0   :  { %v3460_v58 = vmul.f32 1.442695, %v3010_v46  ;;  %v3014_v34 = vsub.f32 0.0, %v2758_v1  ;;  %v2250_v15 = vsub.f32 %v1963_v14, %v10338_v44  ;;  %v1965_v8 = vpop.f32.mrb[197].mxu1  ;;  %v3675_v53 = vpack.c.bf16 %v8109_v51, %v8105_v39 }
 0x3e1   :  { %v3462_v23 = vmul.f32 1.442695, %v3011_v2  ;;  %v3015_v50 = vsub.f32 0.0, %v2759_v5  ;;  %v2251_v36 = vsub.f32 %v1965_v8, %v10342_v45  ;;  %v1967_v17 = vpop.f32.mrb[198].mxu1 }
 0x3e2   :  { %8118 = vpow2.f32 %v3460_v58  ;;  %v3468_v41 = vmul.f32 1.442695, %v3014_v34  ;;  %v2506_v43 = vmul.f32 0.8, %v2250_v15  ;;  %v2254_v57 = vsub.f32 %v1967_v17, %v10338_v44  ;;  %v1969_v25 = vpop.f32.mrb[199].mxu1  ;;  %6900 = vmatprep.mubr.msk.bf16.mxu0 %vm4408_vm9, %v3675_v53 }
 0x3e3   :  { %8120 = vpow2.f32 %v3462_v23  ;;  %v3470_v27 = vmul.f32 1.442695, %v3015_v50  ;;  %v2507_v47 = vmul.f32 0.8, %v2251_v36  ;;  %v2255_v6 = vsub.f32 %v1969_v25, %v10342_v45 }
 0x3e4   :  { %v8111_v59 = vpop.eup %8110  ;;  %8122 = vpow2.f32 %v3468_v41  ;;  %v2762_v13 = vmul.f32 %v2506_v43, %v2506_v43  ;;  %v2510_v49 = vmul.f32 0.8, %v2254_v57  ;;  %5003 = vmatmul.mubr.bf16.gmra.mrb[216].mxu0 %v3674_v56 }
 0x3e5   :  { %v8113_v54 = vpop.eup %8112  ;;  %8124 = vpow2.f32 %v3470_v27  ;;  %v2763_v31 = vmul.f32 %v2507_v47, %v2507_v47  ;;  %v2511_v30 = vmul.f32 0.8, %v2255_v6 }
 0x3e6   :  { %v8115_v61 = vpop.eup %8114  ;;  %v3018_v26 = vsub.f32 0.0, %v2762_v13  ;;  %v2766_v22 = vmul.f32 %v2510_v49, %v2510_v49 }
 0x3e7   :  { %v8117_v35 = vpop.eup %8116  ;;  %v3019_v29 = vsub.f32 0.0, %v2763_v31  ;;  %v2767_v7 = vmul.f32 %v2511_v30, %v2511_v30  ;;  %v1973_v16 = vpop.f32.mrb[200].mxu1  ;;  %v3678_v20 = vpack.c.bf16 %v8115_v61, %v8111_v59 }
 0x3e8   :  { %v3476_v18 = vmul.f32 1.442695, %v3018_v26  ;;  %v3022_v19 = vsub.f32 0.0, %v2766_v22  ;;  %v2258_v63 = vsub.f32 %v1973_v16, %v10338_v44  ;;  %v1975_v32 = vpop.f32.mrb[201].mxu1  ;;  %v3679_v52 = vpack.c.bf16 %v8117_v35, %v8113_v54 }
 0x3e9   :  { %v3478_v48 = vmul.f32 1.442695, %v3019_v29  ;;  %v3023_v33 = vsub.f32 0.0, %v2767_v7  ;;  %v2259_v37 = vsub.f32 %v1975_v32, %v10342_v45  ;;  %v1977_v60 = vpop.f32.mrb[202].mxu1 }
 0x3ea   :  { %8126 = vpow2.f32 %v3476_v18  ;;  %v3484_v10 = vmul.f32 1.442695, %v3022_v19  ;;  %v2514_v0 = vmul.f32 0.8, %v2258_v63  ;;  %v2262_v9 = vsub.f32 %v1977_v60, %v10338_v44  ;;  %v1979_v11 = vpop.f32.mrb[203].mxu1  ;;  %6901 = vmatprep.mubr.msk.bf16.mxu0 %vm4408_vm9, %v3679_v52 }
 0x3eb   :  { %8128 = vpow2.f32 %v3478_v48  ;;  %v3486_v42 = vmul.f32 1.442695, %v3023_v33  ;;  %v2515_v24 = vmul.f32 0.8, %v2259_v37  ;;  %v2263_v21 = vsub.f32 %v1979_v11, %v10342_v45 }
 0x3ec   :  { %v8119_v62 = vpop.eup %8118  ;;  %8130 = vpow2.f32 %v3484_v10  ;;  %v2770_v3 = vmul.f32 %v2514_v0, %v2514_v0  ;;  %v2518_v12 = vmul.f32 0.8, %v2262_v9  ;;  %5011 = vmatmul.mubr.bf16.gmra.mrb[220].mxu0 %v3678_v20 }
 0x3ed   :  { %v8121_v55 = vpop.eup %8120  ;;  %8132 = vpow2.f32 %v3486_v42  ;;  %v2771_v4 = vmul.f32 %v2515_v24, %v2515_v24  ;;  %v2519_v39 = vmul.f32 0.8, %v2263_v21 }
 0x3ee   :  { %v8123_v38 = vpop.eup %8122  ;;  %v3026_v40 = vsub.f32 0.0, %v2770_v3  ;;  %v2774_v28 = vmul.f32 %v2518_v12, %v2518_v12 }
 0x3ef   :  { %v8125_v46 = vpop.eup %8124  ;;  %v3027_v1 = vsub.f32 0.0, %v2771_v4  ;;  %v2775_v51 = vmul.f32 %v2519_v39, %v2519_v39  ;;  %v1983_v2 = vpop.f32.mrb[204].mxu1  ;;  %v3682_v5 = vpack.c.bf16 %v8123_v38, %v8119_v62 }
 0x3f0   :  { %v3492_v14 = vmul.f32 1.442695, %v3026_v40  ;;  %v3030_v56 = vsub.f32 0.0, %v2774_v28  ;;  %v2266_v58 = vsub.f32 %v1983_v2, %v10338_v44  ;;  %v1985_v34 = vpop.f32.mrb[205].mxu1  ;;  %v3683_v15 = vpack.c.bf16 %v8125_v46, %v8121_v55 }
 0x3f1   :  { %v3494_v8 = vmul.f32 1.442695, %v3027_v1  ;;  %v3031_v53 = vsub.f32 0.0, %v2775_v51  ;;  %v2267_v23 = vsub.f32 %v1985_v34, %v10342_v45  ;;  %v1987_v50 = vpop.f32.mrb[206].mxu1 }
 0x3f2   :  { %8134 = vpow2.f32 %v3492_v14  ;;  %v3500_v36 = vmul.f32 1.442695, %v3030_v56  ;;  %v2522_v17 = vmul.f32 0.8, %v2266_v58  ;;  %v2270_v41 = vsub.f32 %v1987_v50, %v10338_v44  ;;  %v1989_v43 = vpop.f32.mrb[207].mxu1  ;;  %6902 = vmatprep.mubr.msk.bf16.mxu0 %vm4408_vm9, %v3683_v15 }
 0x3f3   :  { %8136 = vpow2.f32 %v3494_v8  ;;  %v3502_v57 = vmul.f32 1.442695, %v3031_v53  ;;  %v2523_v25 = vmul.f32 0.8, %v2267_v23  ;;  %v2271_v27 = vsub.f32 %v1989_v43, %v10342_v45 }
 0x3f4   :  { %v8127_v47 = vpop.eup %8126  ;;  %8138 = vpow2.f32 %v3500_v36  ;;  %v2778_v6 = vmul.f32 %v2522_v17, %v2522_v17  ;;  %v2526_v59 = vmul.f32 0.8, %v2270_v41  ;;  %5019 = vmatmul.mubr.bf16.gmra.mrb[224].mxu0 %v3682_v5 }
 0x3f5   :  { %v8129_v13 = vpop.eup %8128  ;;  %8140 = vpow2.f32 %v3502_v57  ;;  %v2779_v49 = vmul.f32 %v2523_v25, %v2523_v25  ;;  %v2527_v54 = vmul.f32 0.8, %v2271_v27 }
 0x3f6   :  { %v8131_v31 = vpop.eup %8130  ;;  %v3034_v30 = vsub.f32 0.0, %v2778_v6  ;;  %v2782_v61 = vmul.f32 %v2526_v59, %v2526_v59 }
 0x3f7   :  { %v8133_v26 = vpop.eup %8132  ;;  %v3035_v22 = vsub.f32 0.0, %v2779_v49  ;;  %v2783_v35 = vmul.f32 %v2527_v54, %v2527_v54  ;;  %v1993_v29 = vpop.f32.mrb[208].mxu1  ;;  %v3686_v7 = vpack.c.bf16 %v8131_v31, %v8127_v47 }
 0x3f8   :  { %v3508_v16 = vmul.f32 1.442695, %v3034_v30  ;;  %v3038_v20 = vsub.f32 0.0, %v2782_v61  ;;  %v2274_v18 = vsub.f32 %v1993_v29, %v10338_v44  ;;  %v1995_v19 = vpop.f32.mrb[209].mxu1  ;;  %v3687_v63 = vpack.c.bf16 %v8133_v26, %v8129_v13 }
 0x3f9   :  { %v3510_v32 = vmul.f32 1.442695, %v3035_v22  ;;  %v3039_v52 = vsub.f32 0.0, %v2783_v35  ;;  %v2275_v48 = vsub.f32 %v1995_v19, %v10342_v45  ;;  %v1997_v33 = vpop.f32.mrb[210].mxu1 }
 0x3fa   :  { %8142 = vpow2.f32 %v3508_v16  ;;  %v3516_v37 = vmul.f32 1.442695, %v3038_v20  ;;  %v2530_v60 = vmul.f32 0.8, %v2274_v18  ;;  %v2278_v10 = vsub.f32 %v1997_v33, %v10338_v44  ;;  %v1999_v0 = vpop.f32.mrb[211].mxu1  ;;  %6903 = vmatprep.mubr.msk.bf16.mxu0 %vm4408_vm9, %v3687_v63 }
 0x3fb   :  { %8144 = vpow2.f32 %v3510_v32  ;;  %v3518_v9 = vmul.f32 1.442695, %v3039_v52  ;;  %v2531_v11 = vmul.f32 0.8, %v2275_v48  ;;  %v2279_v42 = vsub.f32 %v1999_v0, %v10342_v45 }
 0x3fc   :  { %v8135_v24 = vpop.eup %8134  ;;  %8146 = vpow2.f32 %v3516_v37  ;;  %v2786_v21 = vmul.f32 %v2530_v60, %v2530_v60  ;;  %v2534_v62 = vmul.f32 0.8, %v2278_v10  ;;  %5027 = vmatmul.mubr.bf16.gmra.mrb[228].mxu0 %v3686_v7 }
 0x3fd   :  { %v8137_v3 = vpop.eup %8136  ;;  %8148 = vpow2.f32 %v3518_v9  ;;  %v2787_v12 = vmul.f32 %v2531_v11, %v2531_v11  ;;  %v2535_v55 = vmul.f32 0.8, %v2279_v42 }
 0x3fe   :  { %v8139_v4 = vpop.eup %8138  ;;  %v3042_v39 = vsub.f32 0.0, %v2786_v21  ;;  %v2790_v38 = vmul.f32 %v2534_v62, %v2534_v62 }
 0x3ff   :  { %v8141_v40 = vpop.eup %8140  ;;  %v3043_v28 = vsub.f32 0.0, %v2787_v12  ;;  %v2791_v46 = vmul.f32 %v2535_v55, %v2535_v55  ;;  %v2003_v1 = vpop.f32.mrb[212].mxu1  ;;  %v3690_v51 = vpack.c.bf16 %v8139_v4, %v8135_v24 }
 0x400   :  { %v3524_v2 = vmul.f32 1.442695, %v3042_v39  ;;  %v3046_v5 = vsub.f32 0.0, %v2790_v38  ;;  %v2282_v14 = vsub.f32 %v2003_v1, %v10338_v44  ;;  %v2005_v56 = vpop.f32.mrb[213].mxu1  ;;  %v3691_v58 = vpack.c.bf16 %v8141_v40, %v8137_v3 }
 0x401   :  { %v3526_v34 = vmul.f32 1.442695, %v3043_v28  ;;  %v3047_v15 = vsub.f32 0.0, %v2791_v46  ;;  %v2283_v8 = vsub.f32 %v2005_v56, %v10342_v45  ;;  %v2007_v53 = vpop.f32.mrb[214].mxu1 }
 0x402   :  { %8150 = vpow2.f32 %v3524_v2  ;;  %v3532_v23 = vmul.f32 1.442695, %v3046_v5  ;;  %v2538_v50 = vmul.f32 0.8, %v2282_v14  ;;  %v2286_v36 = vsub.f32 %v2007_v53, %v10338_v44  ;;  %v2009_v17 = vpop.f32.mrb[215].mxu1  ;;  %6904 = vmatprep.mubr.msk.bf16.mxu0 %vm4408_vm9, %v3691_v58 }
 0x403   :  { %8152 = vpow2.f32 %v3526_v34  ;;  %v3534_v41 = vmul.f32 1.442695, %v3047_v15  ;;  %v2539_v43 = vmul.f32 0.8, %v2283_v8  ;;  %v2287_v57 = vsub.f32 %v2009_v17, %v10342_v45 }
 0x404   :  { %v8143_v25 = vpop.eup %8142  ;;  %8154 = vpow2.f32 %v3532_v23  ;;  %v2794_v27 = vmul.f32 %v2538_v50, %v2538_v50  ;;  %v2542_v47 = vmul.f32 0.8, %v2286_v36  ;;  %5035 = vmatmul.mubr.bf16.gmra.mrb[232].mxu0 %v3690_v51 }
 0x405   :  { %v8145_v6 = vpop.eup %8144  ;;  %8156 = vpow2.f32 %v3534_v41  ;;  %v2795_v59 = vmul.f32 %v2539_v43, %v2539_v43  ;;  %v2543_v13 = vmul.f32 0.8, %v2287_v57 }
 0x406   :  { %v8147_v49 = vpop.eup %8146  ;;  %v3050_v54 = vsub.f32 0.0, %v2794_v27  ;;  %v2798_v31 = vmul.f32 %v2542_v47, %v2542_v47  ;;  %v10985_v22 = vpop.f32.mrb[128].mxu0 }
 0x407   :  { %v8149_v30 = vpop.eup %8148  ;;  %v3051_v61 = vsub.f32 0.0, %v2795_v59  ;;  %v2799_v26 = vmul.f32 %v2543_v13, %v2543_v13  ;;  %v2013_v35 = vpop.f32.mrb[216].mxu1  ;;  %v3694_v29 = vpack.c.bf16 %v8147_v49, %v8143_v25 }
 0x408   :  { %v3540_v7 = vmul.f32 1.442695, %v3050_v54  ;;  %v3054_v16 = vsub.f32 0.0, %v2798_v31  ;;  %v2290_v20 = vsub.f32 %v2013_v35, %v10338_v44  ;;  %v4830_v18 = vpop.f32.mrb[129].mxu0  ;;  %v2015_v19 = vpop.f32.mrb[217].mxu1  ;;  %v3695_v63 = vpack.c.bf16 %v8149_v30, %v8145_v6 }
 0x409   :  { %v3542_v32 = vmul.f32 1.442695, %v3051_v61  ;;  %v3055_v52 = vsub.f32 0.0, %v2799_v26  ;;  %v2291_v48 = vsub.f32 %v2015_v19, %v10342_v45  ;;  %v10989_v33 = vpop.f32.mrb[130].mxu0  ;;  %v2017_v37 = vpop.f32.mrb[218].mxu1 }
 0x40a   :  { %8158 = vpow2.f32 %v3540_v7  ;;  %v3548_v60 = vmul.f32 1.442695, %v3054_v16  ;;  %v2546_v10 = vmul.f32 0.8, %v2290_v20  ;;  %v2294_v0 = vsub.f32 %v2017_v37, %v10338_v44  ;;  %v4833_v9 = vpop.f32.mrb[131].mxu0  ;;  %v2019_v11 = vpop.f32.mrb[219].mxu1  ;;  %6905 = vmatprep.mubr.msk.bf16.mxu0 %vm4408_vm9, %v3695_v63 }
 0x40b   :  { %8160 = vpow2.f32 %v3542_v32  ;;  %v3550_v42 = vmul.f32 1.442695, %v3055_v52  ;;  %v2547_v24 = vmul.f32 0.8, %v2291_v48  ;;  %v2295_v21 = vsub.f32 %v2019_v11, %v10342_v45  ;;  %v10999_v19 = vld [vmem:[#allocation8] ss:$0 sm:$0xff] }
 0x40c   :  { %v8151_v62 = vpop.eup %8150  ;;  %8162 = vpow2.f32 %v3548_v60  ;;  %v2802_v3 = vmul.f32 %v2546_v10, %v2546_v10  ;;  %v2550_v12 = vmul.f32 0.8, %v2294_v0  ;;  %5043 = vmatmul.mubr.bf16.gmra.mrb[236].mxu0 %v3694_v29 }
 0x40d   :  { %v8153_v55 = vpop.eup %8152  ;;  %8164 = vpow2.f32 %v3550_v42  ;;  %v2803_v4 = vmul.f32 %v2547_v24, %v2547_v24  ;;  %v2551_v39 = vmul.f32 0.8, %v2295_v21 }
 0x40e   :  { %v8155_v38 = vpop.eup %8154  ;;  %v3058_v40 = vsub.f32 0.0, %v2802_v3  ;;  %v2806_v28 = vmul.f32 %v2550_v12, %v2550_v12 }
 0x40f   :  { %v8157_v46 = vpop.eup %8156  ;;  %v3059_v1 = vsub.f32 0.0, %v2803_v4  ;;  %v2807_v51 = vmul.f32 %v2551_v39, %v2551_v39  ;;  %v2023_v2 = vpop.f32.mrb[220].mxu1  ;;  %v3698_v5 = vpack.c.bf16 %v8155_v38, %v8151_v62 }
 0x410   :  { %v3556_v14 = vmul.f32 1.442695, %v3058_v40  ;;  %v3062_v56 = vsub.f32 0.0, %v2806_v28  ;;  %v2298_v58 = vsub.f32 %v2023_v2, %v10338_v44  ;;  %v2025_v34 = vpop.f32.mrb[221].mxu1  ;;  %v3699_v15 = vpack.c.bf16 %v8157_v46, %v8153_v55  ;;  %v4836_v25 = vpop.f32.mrb[132].mxu0 }
 0x411   :  { %v3558_v8 = vmul.f32 1.442695, %v3059_v1  ;;  %v3063_v53 = vsub.f32 0.0, %v2807_v51  ;;  %v2299_v23 = vsub.f32 %v2025_v34, %v10342_v45  ;;  %v2027_v50 = vpop.f32.mrb[222].mxu1  ;;  %v4838_v13 = vpop.f32.mrb[133].mxu0 }
 0x412   :  { %8166 = vpow2.f32 %v3556_v14  ;;  %v3564_v36 = vmul.f32 1.442695, %v3062_v56  ;;  %v2554_v17 = vmul.f32 0.8, %v2298_v58  ;;  %v2302_v41 = vsub.f32 %v2027_v50, %v10338_v44  ;;  %v2029_v43 = vpop.f32.mrb[223].mxu1  ;;  %6906 = vmatprep.mubr.msk.bf16.mxu0 %vm4408_vm9, %v3699_v15  ;;  %v4839_v30 = vpop.f32.mrb[134].mxu0 }
 0x413   :  { %8168 = vpow2.f32 %v3558_v8  ;;  %v3566_v57 = vmul.f32 1.442695, %v3063_v53  ;;  %v2555_v27 = vmul.f32 0.8, %v2299_v23  ;;  %v2303_v47 = vsub.f32 %v2029_v43, %v10342_v45  ;;  %v4841_v29 = vpop.f32.mrb[135].mxu0 }
 0x414   :  { %v8159_v6 = vpop.eup %8158  ;;  %8170 = vpow2.f32 %v3564_v36  ;;  %v2810_v59 = vmul.f32 %v2554_v17, %v2554_v17  ;;  %v2558_v49 = vmul.f32 0.8, %v2302_v41  ;;  %5051 = vmatmul.mubr.bf16.gmra.mrb[240].mxu0 %v3698_v5 }
 0x415   :  { %v8161_v54 = vpop.eup %8160  ;;  %8172 = vpow2.f32 %v3566_v57  ;;  %v2811_v31 = vmul.f32 %v2555_v27, %v2555_v27  ;;  %v2559_v61 = vmul.f32 0.8, %v2303_v47 }
 0x416   :  { %v8163_v44 = vpop.eup %8162  ;;  %v3066_v26 = vsub.f32 0.0, %v2810_v59  ;;  %v2814_v35 = vmul.f32 %v2558_v49, %v2558_v49 }
 0x417   :  { %v8165_v7 = vpop.eup %8164  ;;  %v3067_v16 = vsub.f32 0.0, %v2811_v31  ;;  %v2815_v20 = vmul.f32 %v2559_v61, %v2559_v61  ;;  %v7043_v18 = vpop.f32.mrb[224].mxu1  ;;  %v3702_v45 = vpack.c.bf16 %v8163_v44, %v8159_v6 }
 0x418   :  { %v3572_v63 = vmul.f32 1.442695, %v3066_v26  ;;  %v3070_v32 = vsub.f32 0.0, %v2814_v35  ;;  %v5174_v52 = vadd.f32 %v7043_v18, %v4836_v25  ;;  %v5165_v48 = vpop.f32.mrb[225].mxu1  ;;  %v3703_v37 = vpack.c.bf16 %v8165_v7, %v8161_v54  ;;  %v4844_v3 = vpop.f32.mrb[136].mxu0 }
 0x419   :  { %v3574_v60 = vmul.f32 1.442695, %v3067_v16  ;;  %v3071_v10 = vsub.f32 0.0, %v2815_v20  ;;  %v5166_v0 = vadd.f32 %v5165_v48, %v10985_v22  ;;  %v7044_v9 = vpop.f32.mrb[226].mxu1  ;;  %v4846_v4 = vpop.f32.mrb[137].mxu0 }
 0x41a   :  { %8174 = vpow2.f32 %v3572_v63  ;;  %v3580_v11 = vmul.f32 1.442695, %v3070_v32  ;;  %v11003_v42 = vadd.f32 %v10999_v19, %v5174_v52  ;;  %v5177_v24 = vadd.f32 %v7044_v9, %v4839_v30  ;;  %6907 = vmatprep.mubr.msk.bf16.mxu0 %vm4408_vm9, %v3703_v37  ;;  %v5168_v21 = vpop.f32.mrb[227].mxu1  ;;  %v4847_v38 = vpop.f32.mrb[138].mxu0 }
 0x41b   :  { %8176 = vpow2.f32 %v3574_v60  ;;  %v3582_v62 = vmul.f32 1.442695, %v3071_v10  ;;  %v5169_v12 = vadd.f32 %v5168_v21, %v10989_v33  ;;  %v11011_v28 = vadd.f32 %v10999_v19, %v5166_v0  ;;  %v4849_v46 = vpop.f32.mrb[139].mxu0 }
 0x41c   :  { %v8167_v55 = vpop.eup %8166  ;;  %8178 = vpow2.f32 %v3580_v11  ;;  %5495 = vadd.xlane.f32.xlu0 %v11003_v42  ;;  %v5621_v22 = vmul.f32 %v11003_v42, %v11003_v42  ;;  %5059 = vmatmul.mubr.bf16.gmra.mrb[244].mxu0 %v3702_v45  ;;  %v11018_v34 = vadd.f32 %v10999_v19, %v5177_v24 }
 0x41d   :  { %v8169_v39 = vpop.eup %8168  ;;  %8180 = vpow2.f32 %v3582_v62  ;;  %v11014_v2 = vadd.f32 %v10999_v19, %v5169_v12  ;;  %v5619_v17 = vmul.f32 %v11011_v28, %v11011_v28 }
 0x41e   :  { %v8171_v40 = vpop.eup %8170  ;;  %5687 = vadd.xlane.f32.xlu1 %v5621_v22  ;;  %v5622_v47 = vmul.f32 %v11018_v34, %v11018_v34 }
 0x41f   :  { %v8173_v1 = vpop.eup %8172  ;;  %v7047_v51 = vpop.f32.mrb[228].mxu1  ;;  %v3706_v33 = vpack.c.bf16 %v8171_v40, %v8167_v55  ;;  %v5620_v44 = vmul.f32 %v11014_v2, %v11014_v2 }
 0x420   :  { %v5181_v5 = vpop.f32.mrb[229].mxu1  ;;  %5491 = vadd.xlane.f32.xlu0 %v11011_v28  ;;  %v3707_v14 = vpack.c.bf16 %v8173_v1, %v8169_v39  ;;  %v4852_v8 = vpop.f32.mrb[140].mxu0 }
 0x421   :  { %v5182_v56 = vadd.f32 %v5181_v5, %v4844_v3  ;;  %v7048_v58 = vpop.f32.mrb[230].mxu1  ;;  %v4854_v50 = vpop.f32.mrb[141].mxu0  ;;  %v5190_v36 = vadd.f32 %v7047_v51, %v4852_v8 }
 0x422   :  { %6908 = vmatprep.mubr.msk.bf16.mxu0 %vm4408_vm9, %v3707_v14  ;;  %v5184_v15 = vpop.f32.mrb[231].mxu1  ;;  %5493 = vadd.xlane.f32.xlu1 %v11014_v2  ;;  %v4855_v43 = vpop.f32.mrb[142].mxu0 }
 0x423   :  { %v5185_v53 = vadd.f32 %v5184_v15, %v4847_v38  ;;  %v4857_v25 = vpop.f32.mrb[143].mxu0  ;;  %v5193_v27 = vadd.f32 %v7048_v58, %v4855_v43  ;;  %v11028_v49 = vadd.f32 %v10999_v19, %v5190_v36  ;;  %v11035_v35 = vadd.f32 %v10999_v19, %v5182_v56 }
 0x424   :  { %v8175_v23 = vpop.eup %8174  ;;  %5497 = vadd.xlane.f32.xlu0 %v11018_v34  ;;  %5067 = vmatmul.mubr.bf16.gmra.mrb[248].mxu0 %v3706_v33 }
 0x425   :  { %v8177_v41 = vpop.eup %8176  ;;  %v11038_v20 = vadd.f32 %v10999_v19, %v5193_v27  ;;  %v5625_v52 = vmul.f32 %v11028_v49, %v11028_v49  ;;  %v11045_v37 = vadd.f32 %v10999_v19, %v5185_v53  ;;  %v5623_v11 = vmul.f32 %v11035_v35, %v11035_v35 }
 0x426   :  { %v8179_v57 = vpop.eup %8178  ;;  %5683 = vadd.xlane.f32.xlu1 %v5619_v17 }
 0x427   :  { %v8181_v6 = vpop.eup %8180  ;;  %v7051_v59 = vpop.f32.mrb[232].mxu1  ;;  %v3710_v13 = vpack.c.bf16 %v8179_v57, %v8175_v23  ;;  %v5626_v3 = vmul.f32 %v11038_v20, %v11038_v20  ;;  %v5624_v38 = vmul.f32 %v11045_v37, %v11045_v37 }
 0x428   :  { %v5197_v54 = vpop.f32.mrb[233].mxu1  ;;  %5689 = vadd.xlane.f32.xlu0 %v5622_v47  ;;  %v3711_v31 = vpack.c.bf16 %v8181_v6, %v8177_v41  ;;  %v4860_v26 = vpop.f32.mrb[144].mxu0 }
 0x429   :  { %v7052_v30 = vpop.f32.mrb[234].mxu1  ;;  %v4862_v29 = vpop.f32.mrb[145].mxu0  ;;  %v5198_v7 = vadd.f32 %v5197_v54, %v4860_v26 }
 0x42a   :  { %6909 = vmatprep.mubr.msk.bf16.mxu0 %vm4408_vm9, %v3711_v31  ;;  %v5200_v61 = vpop.f32.mrb[235].mxu1  ;;  %5503 = vadd.xlane.f32.xlu1 %v11028_v49  ;;  %v4863_v16 = vpop.f32.mrb[146].mxu0 }
 0x42b   :  { %v4865_v18 = vpop.f32.mrb[147].mxu0  ;;  %v5201_v45 = vadd.f32 %v5200_v61, %v4863_v16  ;;  %v11055_v55 = vadd.f32 %v10999_v19, %v5198_v7 }
 0x42c   :  { %5685 = vadd.xlane.f32.xlu0 %v5620_v44  ;;  %5075 = vmatmul.mubr.bf16.gmra.mrb[252].mxu0 %v3710_v13 }
 0x42d   :  { %v5627_v51 = vmul.f32 %v11055_v55, %v11055_v55  ;;  %v11065_v5 = vadd.f32 %v10999_v19, %v5201_v45 }
 0x42e   :  { %5499 = vadd.xlane.f32.xlu1 %v11035_v35 }
 0x42f   :  { %v7055_v63 = vpop.f32.mrb[236].mxu1  ;;  %v4868_v10 = vpop.f32.mrb[148].mxu0  ;;  %v5628_v50 = vmul.f32 %v11065_v5, %v11065_v5 }
 0x430   :  { %v5213_v32 = vpop.f32.mrb[237].mxu1  ;;  %5505 = vadd.xlane.f32.xlu0 %v11038_v20  ;;  %v5206_v0 = vadd.f32 %v7051_v59, %v4868_v10  ;;  %v4870_v9 = vpop.f32.mrb[149].mxu0 }
 0x431   :  { %v7056_v48 = vpop.f32.mrb[238].mxu1  ;;  %v4871_v24 = vpop.f32.mrb[150].mxu0 }
 0x432   :  { %v5216_v60 = vpop.f32.mrb[239].mxu1  ;;  %5695 = vadd.xlane.f32.xlu1 %v5625_v52  ;;  %v5209_v21 = vadd.f32 %v7052_v30, %v4871_v24  ;;  %v4873_v62 = vpop.f32.mrb[151].mxu0  ;;  %v11070_v15 = vadd.f32 %v10999_v19, %v5206_v0 }
 0x434   :  { %5501 = vadd.xlane.f32.xlu0 %v11045_v37  ;;  %v5629_v43 = vmul.f32 %v11070_v15, %v11070_v15  ;;  %v11083_v25 = vadd.f32 %v10999_v19, %v5209_v21 }
 0x436   :  { %5691 = vadd.xlane.f32.xlu1 %v5623_v11  ;;  %v5630_v30 = vmul.f32 %v11083_v25, %v11083_v25 }
 0x437   :  { %v11052_v12 = vpop.f32.mrb[240].mxu1  ;;  %v4876_v40 = vpop.f32.mrb[152].mxu0 }
 0x438   :  { %v5229_v4 = vpop.f32.mrb[241].mxu1  ;;  %5697 = vadd.xlane.f32.xlu0 %v5626_v3  ;;  %v5214_v46 = vadd.f32 %v5213_v32, %v4876_v40  ;;  %v4878_v1 = vpop.f32.mrb[153].mxu0 }
 0x439   :  { %v11057_v22 = vpop.f32.mrb[242].mxu1  ;;  %v4879_v33 = vpop.f32.mrb[154].mxu0 }
 0x43a   :  { %v5232_v39 = vpop.f32.mrb[243].mxu1  ;;  %5507 = vadd.xlane.f32.xlu1 %v11055_v55  ;;  %v5217_v14 = vadd.f32 %v5216_v60, %v4879_v33  ;;  %v4881_v56 = vpop.f32.mrb[155].mxu0  ;;  %v11088_v59 = vadd.f32 %v10999_v19, %v5214_v46 }
 0x43c   :  { %5693 = vadd.xlane.f32.xlu0 %v5624_v38  ;;  %v5631_v29 = vmul.f32 %v11088_v59, %v11088_v59  ;;  %v11103_v16 = vadd.f32 %v10999_v19, %v5217_v14 }
 0x43e   :  { %5699 = vadd.xlane.f32.xlu1 %v5627_v51  ;;  %v5632_v10 = vmul.f32 %v11103_v16, %v11103_v16 }
 0x43f   :  { %v11067_v58 = vpop.f32.mrb[244].mxu1  ;;  %v4884_v36 = vpop.f32.mrb[156].mxu0 }
 0x440   :  { %v5245_v8 = vpop.f32.mrb[245].mxu1  ;;  %5509 = vadd.xlane.f32.xlu0 %v11065_v5  ;;  %v5222_v17 = vadd.f32 %v7055_v63, %v4884_v36  ;;  %v4886_v41 = vpop.f32.mrb[157].mxu0 }
 0x441   :  { %v11073_v53 = vpop.f32.mrb[246].mxu1  ;;  %v4887_v57 = vpop.f32.mrb[158].mxu0 }
 0x442   :  { %v11075_v23 = vpop.f32.mrb[247].mxu1  ;;  %5511 = vadd.xlane.f32.xlu1 %v11070_v15  ;;  %v5225_v27 = vadd.f32 %v7056_v48, %v4887_v57  ;;  %v4889_v47 = vpop.f32.mrb[159].mxu0  ;;  %v11108_v32 = vadd.f32 %v10999_v19, %v5222_v17 }
 0x444   :  { %5701 = vadd.xlane.f32.xlu0 %v5628_v50  ;;  %v5633_v24 = vmul.f32 %v11108_v32, %v11108_v32  ;;  %v11124_v62 = vadd.f32 %v10999_v19, %v5225_v27 }
 0x446   :  { %5703 = vadd.xlane.f32.xlu1 %v5629_v43 }
 0x447   :  { %v11085_v6 = vpop.f32.mrb[248].mxu1  ;;  %v4892_v61 = vpop.f32.mrb[160].mxu0 }
 0x448   :  { %v11090_v13 = vpop.f32.mrb[249].mxu1  ;;  %5513 = vadd.xlane.f32.xlu0 %v11083_v25  ;;  %v5230_v44 = vadd.f32 %v5229_v4, %v4892_v61  ;;  %v4894_v26 = vpop.f32.mrb[161].mxu0 }
 0x449   :  { %v11093_v54 = vpop.f32.mrb[250].mxu1  ;;  %v4895_v7 = vpop.f32.mrb[162].mxu0 }
 0x44a   :  { %v11095_v31 = vpop.f32.mrb[251].mxu1  ;;  %5515 = vadd.xlane.f32.xlu1 %v11088_v59  ;;  %v5233_v18 = vadd.f32 %v5232_v39, %v4895_v7  ;;  %v4897_v45 = vpop.f32.mrb[163].mxu0  ;;  %v11130_v38 = vadd.f32 %v10999_v19, %v5230_v44 }
 0x44c   :  { %5705 = vadd.xlane.f32.xlu0 %v5630_v30  ;;  %v5635_v14 = vmul.f32 %v11130_v38, %v11130_v38  ;;  %v11145_v50 = vadd.f32 %v10999_v19, %v5233_v18 }
 0x44e   :  { %5707 = vadd.xlane.f32.xlu1 %v5631_v29  ;;  %12409 = vst [vmem:[#allocation66_spill] sm:$0xff] %v11145_v50 }
 0x44f   :  { %v11105_v63 = vpop.f32.mrb[252].mxu1  ;;  %v4900_v0 = vpop.f32.mrb[164].mxu0 }
 0x450   :  { %v11110_v52 = vpop.f32.mrb[253].mxu1  ;;  %5517 = vadd.xlane.f32.xlu0 %v11103_v16  ;;  %v5238_v9 = vadd.f32 %v11052_v12, %v4900_v0  ;;  %v4902_v11 = vpop.f32.mrb[165].mxu0 }
 0x451   :  { %v11113_v48 = vpop.f32.mrb[254].mxu1  ;;  %v4903_v21 = vpop.f32.mrb[166].mxu0 }
 0x452   :  { %v11115_v60 = vpop.f32.mrb[255].mxu1  ;;  %5519 = vadd.xlane.f32.xlu1 %v11108_v32  ;;  %v5241_v3 = vadd.f32 %v11057_v22, %v4903_v21  ;;  %v4905_v4 = vpop.f32.mrb[167].mxu0  ;;  %v5634_v22 = vmul.f32 %v11124_v62, %v11124_v62  ;;  %v11151_v43 = vadd.f32 %v10999_v19, %v5238_v9 }
 0x454   :  { %5709 = vadd.xlane.f32.xlu0 %v5632_v10  ;;  %12410 = vst [vmem:[#allocation67_spill] sm:$0xff] %v11151_v43  ;;  %v5637_v44 = vmul.f32 %v11151_v43, %v11151_v43  ;;  %v11167_v29 = vadd.f32 %v10999_v19, %v5241_v3 }
 0x456   :  { %5711 = vadd.xlane.f32.xlu1 %v5633_v24  ;;  %12411 = vst [vmem:[#allocation50_spill] sm:$0xff] %v11167_v29 }
 0x457   :  { %v11127_v39 = vpop.f32.mrb[0].mxu1  ;;  %v4908_v1 = vpop.f32.mrb[168].mxu0 }
 0x458   :  { %v11132_v40 = vpop.f32.mrb[1].mxu1  ;;  %5521 = vadd.xlane.f32.xlu0 %v11124_v62  ;;  %v5246_v51 = vadd.f32 %v5245_v8, %v4908_v1  ;;  %v4910_v33 = vpop.f32.mrb[169].mxu0 }
 0x459   :  { %v11135_v12 = vpop.f32.mrb[2].mxu1  ;;  %v4911_v56 = vpop.f32.mrb[170].mxu0 }
 0x45a   :  { %v11137_v46 = vpop.f32.mrb[3].mxu1  ;;  %5523 = vadd.xlane.f32.xlu1 %v11130_v38  ;;  %v5249_v36 = vadd.f32 %v11075_v23, %v4911_v56  ;;  %v4913_v17 = vpop.f32.mrb[171].mxu0  ;;  %v5636_v23 = vmul.f32 %v11145_v50, %v11145_v50  ;;  %v11173_v10 = vadd.f32 %v10999_v19, %v5246_v51 }
 0x45c   :  { %5713 = vadd.xlane.f32.xlu0 %v5634_v22  ;;  %12412 = vst [vmem:[#allocation68_spill] sm:$0xff] %v11173_v10  ;;  %v5639_v3 = vmul.f32 %v11173_v10, %v11173_v10  ;;  %v11189_v22 = vadd.f32 %v10999_v19, %v5249_v36 }
 0x45e   :  { %5715 = vadd.xlane.f32.xlu1 %v5635_v14  ;;  %12413 = vst [vmem:[#allocation69_spill] sm:$0xff] %v11189_v22 }
 0x45f   :  { %v11148_v41 = vpop.f32.mrb[4].mxu1  ;;  %v4916_v47 = vpop.f32.mrb[172].mxu0 }
 0x460   :  { %v11153_v57 = vpop.f32.mrb[5].mxu1  ;;  %5525 = vadd.xlane.f32.xlu0 %v11145_v50  ;;  %v5254_v30 = vadd.f32 %v11067_v58, %v4916_v47  ;;  %v4918_v61 = vpop.f32.mrb[173].mxu0  ;;  %v11393_v50 = vld [vmem:[#allocation10] ss:$0 sm:$0xff] }
 0x461   :  { %v11156_v8 = vpop.f32.mrb[6].mxu1  ;;  %v4919_v26 = vpop.f32.mrb[174].mxu0 }
 0x462   :  { %v11158_v27 = vpop.f32.mrb[7].mxu1  ;;  %5527 = vadd.xlane.f32.xlu1 %v11151_v43  ;;  %v5257_v7 = vadd.f32 %v11073_v53, %v4919_v26  ;;  %v4921_v18 = vpop.f32.mrb[175].mxu0  ;;  %v5638_v53 = vmul.f32 %v11167_v29, %v11167_v29  ;;  %v11195_v14 = vadd.f32 %v10999_v19, %v5254_v30 }
 0x464   :  { %5717 = vadd.xlane.f32.xlu0 %v5636_v23  ;;  %12414 = vst [vmem:[#allocation70_spill] sm:$0xff] %v11195_v14  ;;  %v5641_v30 = vmul.f32 %v11195_v14, %v11195_v14 }
 0x466   :  { %5719 = vadd.xlane.f32.xlu1 %v5637_v44  ;;  %v11211_v44 = vadd.f32 %v10999_v19, %v5257_v7 }
 0x467   :  { %v11170_v45 = vpop.f32.mrb[8].mxu1  ;;  %v4924_v11 = vpop.f32.mrb[176].mxu0 }
 0x468   :  { %v11175_v0 = vpop.f32.mrb[9].mxu1  ;;  %5529 = vadd.xlane.f32.xlu0 %v11167_v29  ;;  %v5262_v24 = vadd.f32 %v11090_v13, %v4924_v11  ;;  %v4926_v21 = vpop.f32.mrb[177].mxu0  ;;  %12415 = vst [vmem:[#allocation71_spill] sm:$0xff] %v11211_v44 }
 0x469   :  { %v11178_v58 = vpop.f32.mrb[10].mxu1  ;;  %v4927_v4 = vpop.f32.mrb[178].mxu0 }
 0x46a   :  { %v11180_v9 = vpop.f32.mrb[11].mxu1  ;;  %5531 = vadd.xlane.f32.xlu1 %v11173_v10  ;;  %v5265_v1 = vadd.f32 %v11095_v31, %v4927_v4  ;;  %v4929_v51 = vpop.f32.mrb[179].mxu0  ;;  %v5640_v31 = vmul.f32 %v11189_v22, %v11189_v22  ;;  %v11217_v11 = vadd.f32 %v10999_v19, %v5262_v24 }
 0x46c   :  { %5721 = vadd.xlane.f32.xlu0 %v5638_v53  ;;  %12416 = vst [vmem:[#allocation52_spill] sm:$0xff] %v11217_v11  ;;  %v5643_v24 = vmul.f32 %v11217_v11, %v11217_v11 }
 0x46e   :  { %5723 = vadd.xlane.f32.xlu1 %v5639_v3 }
 0x46f   :  { %v11192_v33 = vpop.f32.mrb[12].mxu1  ;;  %v4932_v36 = vpop.f32.mrb[180].mxu0 }
 0x470   :  { %v11197_v56 = vpop.f32.mrb[13].mxu1  ;;  %5533 = vadd.xlane.f32.xlu0 %v11189_v22  ;;  %v5270_v23 = vadd.f32 %v11085_v6, %v4932_v36  ;;  %v4934_v47 = vpop.f32.mrb[181].mxu0  ;;  %v11233_v36 = vadd.f32 %v10999_v19, %v5265_v1 }
 0x471   :  { %v11200_v13 = vpop.f32.mrb[14].mxu1  ;;  %v4935_v61 = vpop.f32.mrb[182].mxu0 }
 0x472   :  { %v11202_v17 = vpop.f32.mrb[15].mxu1  ;;  %5535 = vadd.xlane.f32.xlu1 %v11195_v14  ;;  %v5273_v26 = vadd.f32 %v11093_v54, %v4935_v61  ;;  %v4937_v18 = vpop.f32.mrb[183].mxu0  ;;  %v5642_v54 = vmul.f32 %v11211_v44, %v11211_v44  ;;  %12417 = vst [vmem:[#allocation72_spill] sm:$0xff] %v11233_v36 }
 0x473   :  { %v11239_v18 = vadd.f32 %v10999_v19, %v5270_v23 }
 0x474   :  { %5725 = vadd.xlane.f32.xlu0 %v5640_v31 }
 0x475   :  { %12418 = vst [vmem:[#allocation73_spill] sm:$0xff] %v11239_v18  ;;  %v5645_v23 = vmul.f32 %v11239_v18, %v11239_v18 }
 0x476   :  { %5727 = vadd.xlane.f32.xlu1 %v5641_v30 }
 0x477   :  { %v11214_v53 = vpop.f32.mrb[16].mxu1  ;;  %v4940_v7 = vpop.f32.mrb[184].mxu0 }
 0x478   :  { %v11219_v21 = vpop.f32.mrb[17].mxu1  ;;  %5537 = vadd.xlane.f32.xlu0 %v11211_v44  ;;  %v5278_v4 = vadd.f32 %v11110_v52, %v4940_v7  ;;  %v4942_v51 = vpop.f32.mrb[185].mxu0 }
 0x479   :  { %v11222_v6 = vpop.f32.mrb[18].mxu1  ;;  %v4943_v31 = vpop.f32.mrb[186].mxu0 }
 0x47a   :  { %v11224_v3 = vpop.f32.mrb[19].mxu1  ;;  %5539 = vadd.xlane.f32.xlu1 %v11217_v11  ;;  %v5281_v47 = vadd.f32 %v11115_v60, %v4943_v31  ;;  %v4945_v30 = vpop.f32.mrb[187].mxu0  ;;  %v5644_v60 = vmul.f32 %v11233_v36, %v11233_v36  ;;  %v11255_v31 = vadd.f32 %v10999_v19, %v5273_v26 }
 0x47c   :  { %5729 = vadd.xlane.f32.xlu0 %v5642_v54  ;;  %12419 = vst [vmem:[#allocation74_spill] sm:$0xff] %v11255_v31 }
 0x47e   :  { %5731 = vadd.xlane.f32.xlu1 %v5643_v24 }
 0x47f   :  { %v11236_v61 = vpop.f32.mrb[20].mxu1  ;;  %v4948_v1 = vpop.f32.mrb[188].mxu0 }
 0x480   :  { %v11241_v44 = vpop.f32.mrb[21].mxu1  ;;  %5541 = vadd.xlane.f32.xlu0 %v11233_v36  ;;  %v5286_v7 = vadd.f32 %v11105_v63, %v4948_v1  ;;  %v4950_v51 = vpop.f32.mrb[189].mxu0  ;;  %v11261_v36 = vadd.f32 %v10999_v19, %v5278_v4 }
 0x481   :  { %v11244_v52 = vpop.f32.mrb[22].mxu1  ;;  %v4951_v24 = vpop.f32.mrb[190].mxu0 }
 0x482   :  { %v11246_v54 = vpop.f32.mrb[23].mxu1  ;;  %5543 = vadd.xlane.f32.xlu1 %v11239_v18  ;;  %v5289_v30 = vadd.f32 %v11113_v48, %v4951_v24  ;;  %v4953_v11 = vpop.f32.mrb[191].mxu0  ;;  %12420 = vst [vmem:[#allocation75_spill] sm:$0xff] %v11261_v36  ;;  %v5646_v48 = vmul.f32 %v11255_v31, %v11255_v31  ;;  %v5647_v4 = vmul.f32 %v11261_v36, %v11261_v36 }
 0x484   :  { %5733 = vadd.xlane.f32.xlu0 %v5644_v60 }
 0x486   :  { %5735 = vadd.xlane.f32.xlu1 %v5645_v23  ;;  %v11277_v23 = vadd.f32 %v10999_v19, %v5281_v47 }
 0x487   :  { %v11258_v14 = vpop.f32.mrb[24].mxu1  ;;  %v4956_v26 = vpop.f32.mrb[192].mxu0 }
 0x488   :  { %v11263_v22 = vpop.f32.mrb[25].mxu1  ;;  %5545 = vadd.xlane.f32.xlu0 %v11255_v31  ;;  %v5294_v11 = vadd.f32 %v11132_v40, %v4956_v26  ;;  %v4958_v1 = vpop.f32.mrb[193].mxu0  ;;  %12421 = vst [vmem:[#allocation54_spill] sm:$0xff] %v11277_v23  ;;  %v11283_v31 = vadd.f32 %v10999_v19, %v5286_v7 }
 0x489   :  { %v11266_v63 = vpop.f32.mrb[26].mxu1  ;;  %v4959_v51 = vpop.f32.mrb[194].mxu0 }
 0x48a   :  { %v11268_v60 = vpop.f32.mrb[27].mxu1  ;;  %5547 = vadd.xlane.f32.xlu1 %v11261_v36  ;;  %v5297_v24 = vadd.f32 %v11137_v46, %v4959_v51  ;;  %v4961_v18 = vpop.f32.mrb[195].mxu0  ;;  %12423 = vst [vmem:[#allocation77_spill] sm:$0xff] %v11283_v31  ;;  %v5648_v46 = vmul.f32 %v11277_v23, %v11277_v23  ;;  %v5649_v7 = vmul.f32 %v11283_v31, %v11283_v31 }
 0x48c   :  { %5737 = vadd.xlane.f32.xlu0 %v5646_v48 }
 0x48e   :  { %5739 = vadd.xlane.f32.xlu1 %v5647_v4  ;;  %v11299_v4 = vadd.f32 %v10999_v19, %v5289_v30  ;;  %v11313_v30 = vadd.f32 %v10999_v19, %v5297_v24 }
 0x48f   :  { %v11280_v10 = vpop.f32.mrb[28].mxu1  ;;  %v4964_v47 = vpop.f32.mrb[196].mxu0 }
 0x490   :  { %12422 = vst [vmem:[#allocation76_spill] sm:$0xff] %v11280_v10  ;;  %v11285_v29 = vpop.f32.mrb[29].mxu1  ;;  %5549 = vadd.xlane.f32.xlu0 %v11277_v23  ;;  %v5302_v18 = vadd.f32 %v11127_v39, %v4964_v47  ;;  %v4966_v26 = vpop.f32.mrb[197].mxu0  ;;  %12425 = vst [vmem:[#allocation79_spill] sm:$0xff] %v11299_v4  ;;  %v5650_v39 = vmul.f32 %v11299_v4, %v11299_v4 }
 0x491   :  { %v11288_v40 = vpop.f32.mrb[30].mxu1  ;;  %v4967_v1 = vpop.f32.mrb[198].mxu0  ;;  %12427 = vst [vmem:[#allocation80_spill] sm:$0xff] %v11313_v30 }
 0x492   :  { %12424 = vst [vmem:[#allocation78_spill] sm:$0xff] %v11288_v40  ;;  %v11290_v48 = vpop.f32.mrb[31].mxu1  ;;  %5551 = vadd.xlane.f32.xlu1 %v11283_v31  ;;  %v5305_v51 = vadd.f32 %v11135_v12, %v4967_v1  ;;  %v4969_v36 = vpop.f32.mrb[199].mxu0  ;;  %v11303_v40 = vadd.f32 %v10999_v19, %v5294_v11  ;;  %v11317_v1 = vadd.f32 %v10999_v19, %v5302_v18 }
 0x494   :  { %5741 = vadd.xlane.f32.xlu0 %v5648_v46  ;;  %12426 = vst [vmem:[#allocation56_spill] sm:$0xff] %v11303_v40  ;;  %v5651_v12 = vmul.f32 %v11303_v40, %v11303_v40  ;;  %12428 = vst [vmem:[#allocation81_spill] sm:$0xff] %v11317_v1 }
 0x496   :  { %5743 = vadd.xlane.f32.xlu1 %v5649_v7 }
 0x497   :  { %v4972_v46 = vpop.f32.mrb[200].mxu0 }
 0x498   :  { %5553 = vadd.xlane.f32.xlu0 %v11299_v4  ;;  %v5310_v47 = vadd.f32 %v11153_v57, %v4972_v46  ;;  %v4974_v26 = vpop.f32.mrb[201].mxu0  ;;  %v5652_v57 = vmul.f32 %v11313_v30, %v11313_v30 }
 0x499   :  { %v4975_v36 = vpop.f32.mrb[202].mxu0 }
 0x49a   :  { %5555 = vadd.xlane.f32.xlu1 %v11303_v40  ;;  %v5313_v11 = vadd.f32 %v11158_v27, %v4975_v36  ;;  %v4977_v7 = vpop.f32.mrb[203].mxu0  ;;  %v5653_v27 = vmul.f32 %v11317_v1, %v11317_v1 }
 0x49b   :  { %v11331_v7 = vadd.f32 %v10999_v19, %v5310_v47 }
 0x49c   :  { %5745 = vadd.xlane.f32.xlu0 %v5650_v39 }
 0x49d   :  { %12430 = vst [vmem:[#allocation83_spill] sm:$0xff] %v11331_v7 }
 0x49e   :  { %5747 = vadd.xlane.f32.xlu1 %v5651_v12  ;;  %v11327_v12 = vadd.f32 %v10999_v19, %v5305_v51 }
 0x49f   :  { %v4980_v39 = vpop.f32.mrb[204].mxu0 }
 0x4a0   :  { %5557 = vadd.xlane.f32.xlu0 %v11313_v30  ;;  %v5318_v46 = vadd.f32 %v11148_v41, %v4980_v39  ;;  %v4982_v26 = vpop.f32.mrb[205].mxu0  ;;  %12429 = vst [vmem:[#allocation82_spill] sm:$0xff] %v11327_v12 }
 0x4a1   :  { %v4983_v24 = vpop.f32.mrb[206].mxu0 }
 0x4a2   :  { %5559 = vadd.xlane.f32.xlu1 %v11317_v1  ;;  %v5321_v18 = vadd.f32 %v11156_v8, %v4983_v24  ;;  %v4985_v36 = vpop.f32.mrb[207].mxu0  ;;  %v5655_v24 = vmul.f32 %v11331_v7, %v11331_v7  ;;  %v11345_v1 = vadd.f32 %v10999_v19, %v5313_v11 }
 0x4a4   :  { %5749 = vadd.xlane.f32.xlu0 %v5652_v57  ;;  %v5654_v57 = vmul.f32 %v11327_v12, %v11327_v12  ;;  %12431 = vst [vmem:[#allocation58_spill] sm:$0xff] %v11345_v1 }
 0x4a6   :  { %5751 = vadd.xlane.f32.xlu1 %v5653_v27 }
 0x4a7   :  { %v4988_v39 = vpop.f32.mrb[208].mxu0 }
 0x4a8   :  { %5561 = vadd.xlane.f32.xlu0 %v11327_v12  ;;  %v5326_v26 = vadd.f32 %v11175_v0, %v4988_v39  ;;  %v4990_v8 = vpop.f32.mrb[209].mxu0  ;;  %v11349_v39 = vadd.f32 %v10999_v19, %v5318_v46 }
 0x4a9   :  { %v5496_v30 = vpop.xlane.xlu0 %5495 }
 0x4aa   :  { %v11334_v41 = vmul.f32 0.03125, %v5496_v30  ;;  %5563 = vadd.xlane.f32.xlu1 %v11331_v7  ;;  %v4991_v30 = vpop.f32.mrb[210].mxu0  ;;  %12432 = vst [vmem:[#allocation84_spill] sm:$0xff] %v11349_v39 }
 0x4ab   :  { %v5688_v51 = vpop.xlane.xlu1 %5687  ;;  %v5329_v12 = vadd.f32 %v11180_v9, %v4991_v30  ;;  %v4993_v40 = vpop.f32.mrb[211].mxu0  ;;  %v5656_v9 = vmul.f32 %v11345_v1, %v11345_v1 }
 0x4ac   :  { %v5941_v27 = vmul.f32 %v11334_v41, %v11334_v41  ;;  %v5877_v47 = vmul.f32 0.03125, %v5688_v51  ;;  %5753 = vadd.xlane.f32.xlu0 %v5654_v57 }
 0x4ad   :  { %v5492_v36 = vpop.xlane.xlu0 %5491  ;;  %v11391_v10 = vadd.f32 %v10999_v19, %v5329_v12 }
 0x4ae   :  { %v6005_v4 = vsub.f32 %v5877_v47, %v5941_v27  ;;  %5755 = vadd.xlane.f32.xlu1 %v5655_v24  ;;  %v11352_v57 = vmul.f32 0.03125, %v5492_v36  ;;  %v11363_v47 = vadd.f32 %v10999_v19, %v5321_v18  ;;  %v11375_v18 = vadd.f32 %v10999_v19, %v5326_v26 }
 0x4af   :  { %v5494_v0 = vpop.xlane.xlu1 %5493  ;;  %v4996_v40 = vpop.f32.mrb[212].mxu0 }
 0x4b0   :  { %v6069_v8 = vmax.f32 %v6005_v4, 0.0  ;;  %5565 = vadd.xlane.f32.xlu0 %v11345_v1  ;;  %v5334_v46 = vadd.f32 %v11170_v45, %v4996_v40  ;;  %v4998_v27 = vpop.f32.mrb[213].mxu0  ;;  %v5657_v4 = vmul.f32 %v11349_v39, %v11349_v39  ;;  %12433 = vst [vmem:[#allocation85_spill] sm:$0xff] %v11363_v47  ;;  %v5939_v24 = vmul.f32 %v11352_v57, %v11352_v57 }
 0x4b1   :  { %v5498_v51 = vpop.xlane.xlu0 %5497  ;;  %v4999_v30 = vpop.f32.mrb[214].mxu0 }
 0x4b2   :  { %v6197_v7 = vadd.f32 1e-05, %v6069_v8  ;;  %v11354_v31 = vmul.f32 0.03125, %v5498_v51  ;;  %5567 = vadd.xlane.f32.xlu1 %v11349_v39  ;;  %v11367_v51 = vmul.f32 0.03125, %v5494_v0 }
 0x4b3   :  { %v5684_v11 = vpop.xlane.xlu1 %5683 }
 0x4b4   :  { %8182 = vrsqrt.f32 %v6197_v7  ;;  %5757 = vadd.xlane.f32.xlu0 %v5656_v9  ;;  %v5875_v36 = vmul.f32 0.03125, %v5684_v11  ;;  %v11370_v7 = vadd.f32 %v11178_v58, %v4999_v30  ;;  %v5942_v45 = vmul.f32 %v11354_v31, %v11354_v31  ;;  %v5001_v9 = vpop.f32.mrb[215].mxu0 }
 0x4b5   :  { %v5690_v8 = vpop.xlane.xlu0 %5689  ;;  %v5940_v58 = vmul.f32 %v11367_v51, %v11367_v51 }
 0x4b6   :  { %v5878_v40 = vmul.f32 0.03125, %v5690_v8  ;;  %5759 = vadd.xlane.f32.xlu1 %v5657_v4  ;;  %v6003_v27 = vsub.f32 %v5875_v36, %v5939_v24  ;;  %v5658_v4 = vmul.f32 %v11363_v47, %v11363_v47  ;;  %v5659_v24 = vmul.f32 %v11375_v18, %v11375_v18 }
 0x4b7   :  { %v5504_v39 = vpop.xlane.xlu1 %5503  ;;  %v5004_v26 = vpop.f32.mrb[216].mxu0 }
 0x4b8   :  { %v6006_v1 = vsub.f32 %v5878_v40, %v5942_v45  ;;  %5569 = vadd.xlane.f32.xlu0 %v11363_v47  ;;  %v6067_v11 = vmax.f32 %v6003_v27, 0.0  ;;  %v5342_v45 = vadd.f32 %v11197_v56, %v5004_v26  ;;  %v11386_v40 = vmul.f32 0.03125, %v5504_v39  ;;  %v5006_v27 = vpop.f32.mrb[217].mxu0 }
 0x4b9   :  { %v5686_v0 = vpop.xlane.xlu0 %5685 }
 0x4ba   :  { %v6070_v30 = vmax.f32 %v6006_v1, 0.0  ;;  %v5876_v23 = vmul.f32 0.03125, %v5686_v0  ;;  %5571 = vadd.xlane.f32.xlu1 %v11375_v18  ;;  %v6195_v8 = vadd.f32 1e-05, %v6067_v11  ;;  %v6133_v1 = vsub.f32 %v11003_v42, %v11334_v41  ;;  %v5007_v0 = vpop.f32.mrb[218].mxu0 }
 0x4bb   :  { %v5500_v9 = vpop.xlane.xlu1 %5499  ;;  %v11396_v56 = vadd.f32 %v11202_v17, %v5007_v0  ;;  %v11401_v42 = vadd.f32 %v10999_v19, %v5334_v46  ;;  %v5945_v12 = vmul.f32 %v11386_v40, %v11386_v40  ;;  %v5660_v46 = vmul.f32 %v11391_v10, %v11391_v10 }
 0x4bc   :  { %v6198_v36 = vadd.f32 1e-05, %v6070_v30  ;;  %v6004_v43 = vsub.f32 %v5876_v23, %v5940_v58  ;;  %5761 = vadd.xlane.f32.xlu0 %v5658_v4  ;;  %8184 = vrsqrt.f32 %v6195_v8  ;;  %v5009_v30 = vpop.f32.mrb[219].mxu0  ;;  %v11398_v4 = vld [vmem:[#allocation11] ss:$0 sm:$0xff]  ;;  %v11407_v26 = vmul.f32 0.03125, %v5500_v9 }
 0x4bd   :  { %v5506_v47 = vpop.xlane.xlu0 %5505  ;;  %12434 = vst [vmem:[#allocation86_spill] sm:$0xff] %v11401_v42  ;;  %v5661_v30 = vmul.f32 %v11401_v42, %v11401_v42 }
 0x4be   :  { %v8183_v11 = vpop.eup %8182  ;;  %8186 = vrsqrt.f32 %v6198_v36  ;;  %v6068_v39 = vmax.f32 %v6004_v43, 0.0  ;;  %5763 = vadd.xlane.f32.xlu1 %v5659_v24  ;;  %v11409_v43 = vmul.f32 0.03125, %v5506_v47 }
 0x4bf   :  { %v6325_v23 = vmul.f32 %v8183_v11, %v6133_v1  ;;  %v5696_v58 = vpop.xlane.xlu1 %5695  ;;  %v5012_v1 = vpop.f32.mrb[220].mxu0  ;;  %v6131_v11 = vsub.f32 %v11011_v28, %v11352_v57 }
 0x4c0   :  { %v6196_v41 = vadd.f32 1e-05, %v6068_v39  ;;  %v5881_v8 = vmul.f32 0.03125, %v5696_v58  ;;  %5573 = vadd.xlane.f32.xlu0 %v11391_v10  ;;  %v11418_v9 = vadd.f32 %v11192_v33, %v5012_v1  ;;  %v5014_v39 = vpop.f32.mrb[221].mxu0  ;;  %v5943_v58 = vmul.f32 %v11407_v26, %v11407_v26 }
 0x4c1   :  { %v6396_v17 = vmul.f32 %v11393_v50, %v6325_v23  ;;  %v5502_v24 = vpop.xlane.xlu0 %5501  ;;  %v11424_v23 = vadd.f32 %v10999_v19, %v11370_v7  ;;  %v5946_v28 = vmul.f32 %v11409_v43, %v11409_v43  ;;  %v5015_v57 = vpop.f32.mrb[222].mxu0  ;;  %v11438_v1 = vadd.f32 %v10999_v19, %v5342_v45 }
 0x4c2   :  { %8188 = vrsqrt.f32 %v6196_v41  ;;  %v6009_v36 = vsub.f32 %v5881_v8, %v5945_v12  ;;  %5575 = vadd.xlane.f32.xlu1 %v11401_v42  ;;  %v11431_v8 = vadd.f32 %v11200_v13, %v5015_v57 }
 0x4c3   :  { %v6467_v27 = vadd.f32 %v11398_v4, %v6396_v17  ;;  %v5692_v0 = vpop.xlane.xlu1 %5691  ;;  %12435 = vst [vmem:[#allocation87_spill] sm:$0xff] %v11424_v23  ;;  %v11433_v17 = vmul.f32 0.03125, %v5502_v24  ;;  %12436 = vst [vmem:[#allocation60_spill] sm:$0xff] %v11438_v1 }
 0x4c4   :  { %v6073_v47 = vmax.f32 %v6009_v36, 0.0  ;;  %5765 = vadd.xlane.f32.xlu0 %v5660_v46  ;;  %v5879_v33 = vmul.f32 0.03125, %v5692_v0  ;;  %v5017_v36 = vpop.f32.mrb[223].mxu0 }
 0x4c5   :  { %6531 = vst [vmem:[#allocation13 + $0x10] sm:$0xff] %v6467_v27  ;;  %v5698_v12 = vpop.xlane.xlu0 %5697  ;;  %v6134_v27 = vsub.f32 %v11018_v34, %v11354_v31  ;;  %v5662_v34 = vmul.f32 %v11424_v23, %v11424_v23  ;;  %v5944_v45 = vmul.f32 %v11433_v17, %v11433_v17 }
 0x4c6   :  { %v6201_v41 = vadd.f32 1e-05, %v6073_v47  ;;  %v5882_v46 = vmul.f32 0.03125, %v5698_v12  ;;  %5767 = vadd.xlane.f32.xlu1 %v5661_v30  ;;  %v8185_v7 = vpop.eup %8184  ;;  %v6007_v39 = vsub.f32 %v5879_v33, %v5943_v58  ;;  %v6132_v47 = vsub.f32 %v11014_v2, %v11367_v51 }
 0x4c7   :  { %v5508_v42 = vpop.xlane.xlu1 %5507  ;;  %v6323_v13 = vmul.f32 %v8185_v7, %v6131_v11 }
 0x4c8   :  { %v8187_v0 = vpop.eup %8186  ;;  %8190 = vrsqrt.f32 %v6201_v41  ;;  %v6010_v24 = vsub.f32 %v5882_v46, %v5946_v28  ;;  %5577 = vadd.xlane.f32.xlu0 %v11424_v23  ;;  %v6071_v30 = vmax.f32 %v6007_v39, 0.0  ;;  %v11443_v12 = vmul.f32 0.03125, %v5508_v42  ;;  %v5020_v28 = vpop.f32.mrb[224].mxu0 }
 0x4c9   :  { %v6326_v57 = vmul.f32 %v8187_v0, %v6134_v27  ;;  %v5694_v36 = vpop.xlane.xlu0 %5693  ;;  %v6394_v31 = vmul.f32 %v11393_v50, %v6323_v13  ;;  %v5663_v41 = vmul.f32 %v11438_v1, %v11438_v1  ;;  %v11458_v39 = vadd.f32 %v11219_v21, %v5020_v28  ;;  %v5022_v0 = vpop.f32.mrb[225].mxu0 }
 0x4ca   :  { %v6074_v58 = vmax.f32 %v6010_v24, 0.0  ;;  %v5880_v2 = vmul.f32 0.03125, %v5694_v36  ;;  %5579 = vadd.xlane.f32.xlu1 %v11438_v1  ;;  %v6199_v11 = vadd.f32 1e-05, %v6071_v30  ;;  %v5947_v42 = vmul.f32 %v11443_v12, %v11443_v12  ;;  %v5023_v30 = vpop.f32.mrb[226].mxu0 }
 0x4cb   :  { %v6397_v51 = vmul.f32 %v11393_v50, %v6326_v57  ;;  %v5700_v33 = vpop.xlane.xlu1 %5699  ;;  %v6465_v7 = vadd.f32 %v11398_v4, %v6394_v31  ;;  %v11463_v1 = vadd.f32 %v10999_v19, %v11396_v56  ;;  %v11466_v31 = vadd.f32 %v11224_v3, %v5023_v30 }
 0x4cc   :  { %v8189_v46 = vpop.eup %8188  ;;  %v6202_v27 = vadd.f32 1e-05, %v6074_v58  ;;  %v6008_v13 = vsub.f32 %v5880_v2, %v5944_v45  ;;  %5769 = vadd.xlane.f32.xlu0 %v5662_v34  ;;  %8192 = vrsqrt.f32 %v6199_v11  ;;  %v5883_v36 = vmul.f32 0.03125, %v5700_v33  ;;  %v5025_v58 = vpop.f32.mrb[227].mxu0 }
 0x4cd   :  { %v6468_v24 = vadd.f32 %v11398_v4, %v6397_v51  ;;  %v6324_v57 = vmul.f32 %v8189_v46, %v6132_v47  ;;  %v5510_v23 = vpop.xlane.xlu0 %5509  ;;  %6529 = vst [vmem:[#allocation13] sm:$0xff] %v6465_v7  ;;  %v11469_v47 = vld [vmem:[#allocation8] ss:$0 sm:$0xff]  ;;  %v6137_v3 = vsub.f32 %v11028_v49, %v11386_v40 }
 0x4ce   :  { %8194 = vrsqrt.f32 %v6202_v27  ;;  %v6072_v21 = vmax.f32 %v6008_v13, 0.0  ;;  %5771 = vadd.xlane.f32.xlu1 %v5663_v41  ;;  %v11473_v45 = vadd.f32 %v11469_v47, %v11418_v9  ;;  %v6011_v2 = vsub.f32 %v5883_v36, %v5947_v42 }
 0x4cf   :  { %6532 = vst [vmem:[#allocation13 + $0x18] sm:$0xff] %v6468_v24  ;;  %v6395_v34 = vmul.f32 %v11393_v50, %v6324_v57  ;;  %v11475_v51 = vmul.f32 0.03125, %v5510_v23  ;;  %v5512_v19 = vpop.xlane.xlu1 %5511  ;;  %v5664_v42 = vmul.f32 %v11463_v1, %v11463_v1  ;;  %v5028_v0 = vpop.f32.mrb[228].mxu0  ;;  %v11498_v58 = vadd.f32 %v11469_v47, %v11431_v8 }
 0x4d0   :  { %v6200_v56 = vadd.f32 1e-05, %v6072_v21  ;;  %v11477_v11 = vmul.f32 0.03125, %v5512_v19  ;;  %5581 = vadd.xlane.f32.xlu0 %v11463_v1  ;;  %v6075_v33 = vmax.f32 %v6011_v2, 0.0  ;;  %v5665_v40 = vmul.f32 %v11473_v45, %v11473_v45  ;;  %v5030_v57 = vpop.f32.mrb[229].mxu0 }
 0x4d1   :  { %v6466_v28 = vadd.f32 %v11398_v4, %v6395_v34  ;;  %v5702_v41 = vpop.xlane.xlu0 %5701  ;;  %v5948_v9 = vmul.f32 %v11475_v51, %v11475_v51  ;;  %v11491_v13 = vadd.f32 %v11214_v53, %v5028_v0  ;;  %v5031_v34 = vpop.f32.mrb[230].mxu0  ;;  %v6135_v53 = vsub.f32 %v11035_v35, %v11407_v26 }
 0x4d2   :  { %v8191_v46 = vpop.eup %8190  ;;  %8196 = vrsqrt.f32 %v6200_v56  ;;  %v5884_v23 = vmul.f32 0.03125, %v5702_v41  ;;  %5583 = vadd.xlane.f32.xlu1 %v11473_v45  ;;  %v6203_v27 = vadd.f32 1e-05, %v6075_v33  ;;  %v5949_v24 = vmul.f32 %v11477_v11, %v11477_v11 }
 0x4d3   :  { %6530 = vst [vmem:[#allocation13 + $0x8] sm:$0xff] %v6466_v28  ;;  %v6329_v7 = vmul.f32 %v8191_v46, %v6137_v3  ;;  %v5704_v49 = vpop.xlane.xlu1 %5703  ;;  %v11503_v19 = vadd.f32 %v11222_v6, %v5031_v34  ;;  %v5033_v3 = vpop.f32.mrb[231].mxu0  ;;  %v6138_v41 = vsub.f32 %v11038_v20, %v11409_v43  ;;  %v11510_v46 = vadd.f32 %v11469_v47, %v11458_v39 }
 0x4d4   :  { %v6012_v30 = vsub.f32 %v5884_v23, %v5948_v9  ;;  %v5885_v36 = vmul.f32 0.03125, %v5704_v49  ;;  %5773 = vadd.xlane.f32.xlu0 %v5664_v42  ;;  %8198 = vrsqrt.f32 %v6203_v27  ;;  %v5666_v39 = vmul.f32 %v11498_v58, %v11498_v58 }
 0x4d5   :  { %v6400_v21 = vmul.f32 %v11393_v50, %v6329_v7  ;;  %v5514_v2 = vpop.xlane.xlu0 %5513  ;;  %v5667_v34 = vmul.f32 %v11510_v46, %v11510_v46 }
 0x4d6   :  { %v6076_v56 = vmax.f32 %v6012_v30, 0.0  ;;  %v6013_v28 = vsub.f32 %v5885_v36, %v5949_v24  ;;  %5775 = vadd.xlane.f32.xlu1 %v5665_v40  ;;  %v8193_v33 = vpop.eup %8192  ;;  %v11512_v9 = vmul.f32 0.03125, %v5514_v2  ;;  %v6136_v24 = vsub.f32 %v11045_v37, %v11433_v17 }
 0x4d7   :  { %v6471_v8 = vadd.f32 %v11398_v4, %v6400_v21  ;;  %v5516_v35 = vpop.xlane.xlu1 %5515  ;;  %v6327_v6 = vmul.f32 %v8193_v33, %v6135_v53  ;;  %v11528_v30 = vadd.f32 %v11469_v47, %v11466_v31  ;;  %v5036_v36 = vpop.f32.mrb[232].mxu0 }
 0x4d8   :  { %v8195_v26 = vpop.eup %8194  ;;  %v6204_v23 = vadd.f32 1e-05, %v6076_v56  ;;  %v6077_v42 = vmax.f32 %v6013_v28, 0.0  ;;  %5585 = vadd.xlane.f32.xlu0 %v11498_v58  ;;  %v5950_v20 = vmul.f32 %v11512_v9, %v11512_v9  ;;  %v11517_v43 = vmul.f32 0.03125, %v5516_v35  ;;  %v5038_v3 = vpop.f32.mrb[233].mxu0 }
 0x4d9   :  { %6535 = vst [vmem:[#allocation13 + $0x30] sm:$0xff] %v6471_v8  ;;  %v6330_v7 = vmul.f32 %v8195_v26, %v6138_v41  ;;  %v5706_v27 = vpop.xlane.xlu0 %5705  ;;  %v6398_v0 = vmul.f32 %v11393_v50, %v6327_v6  ;;  %v11534_v56 = vadd.f32 %v11241_v44, %v5036_v36  ;;  %v5039_v33 = vpop.f32.mrb[234].mxu0  ;;  %v6139_v35 = vsub.f32 %v11055_v55, %v11443_v12 }
 0x4da   :  { %8200 = vrsqrt.f32 %v6204_v23  ;;  %v6205_v49 = vadd.f32 1e-05, %v6077_v42  ;;  %v5886_v40 = vmul.f32 0.03125, %v5706_v27  ;;  %5587 = vadd.xlane.f32.xlu1 %v11510_v46  ;;  %v5951_v31 = vmul.f32 %v11517_v43, %v11517_v43  ;;  %v5041_v6 = vpop.f32.mrb[235].mxu0 }
 0x4db   :  { %v6401_v57 = vmul.f32 %v11393_v50, %v6330_v7  ;;  %v5708_v21 = vpop.xlane.xlu1 %5707  ;;  %v6469_v53 = vadd.f32 %v11398_v4, %v6398_v0  ;;  %v11542_v26 = vadd.f32 %v11246_v54, %v5039_v33 }
 0x4dc   :  { %v8197_v2 = vpop.eup %8196  ;;  %8202 = vrsqrt.f32 %v6205_v49  ;;  %v6014_v37 = vsub.f32 %v5886_v40, %v5950_v20  ;;  %5777 = vadd.xlane.f32.xlu0 %v5666_v39  ;;  %v5887_v41 = vmul.f32 0.03125, %v5708_v21  ;;  %v11549_v20 = vadd.f32 %v11469_v47, %v11491_v13 }
 0x4dd   :  { %v6472_v17 = vadd.f32 %v11398_v4, %v6401_v57  ;;  %v6328_v28 = vmul.f32 %v8197_v2, %v6136_v24  ;;  %v5518_v8 = vpop.xlane.xlu0 %5517  ;;  %6533 = vst [vmem:[#allocation13 + $0x20] sm:$0xff] %v6469_v53  ;;  %v5668_v24 = vmul.f32 %v11528_v30, %v11528_v30  ;;  %v6140_v21 = vsub.f32 %v11065_v5, %v11475_v51 }
 0x4de   :  { %v6078_v44 = vmax.f32 %v6014_v37, 0.0  ;;  %v11544_v23 = vmul.f32 0.03125, %v5518_v8  ;;  %5779 = vadd.xlane.f32.xlu1 %v5667_v34  ;;  %v8199_v42 = vpop.eup %8198  ;;  %v6015_v27 = vsub.f32 %v5887_v41, %v5951_v31  ;;  %v5669_v37 = vmul.f32 %v11549_v20, %v11549_v20 }
 0x4df   :  { %6536 = vst [vmem:[#allocation13 + $0x38] sm:$0xff] %v6472_v17  ;;  %v6399_v7 = vmul.f32 %v11393_v50, %v6328_v28  ;;  %v5520_v39 = vpop.xlane.xlu1 %5519  ;;  %v6331_v0 = vmul.f32 %v8199_v42, %v6139_v35  ;;  %v5044_v2 = vpop.f32.mrb[236].mxu0  ;;  %v6141_v5 = vsub.f32 %v11070_v15, %v11477_v11  ;;  %v11575_v42 = vadd.f32 %v11469_v47, %v11503_v19 }
 0x4e0   :  { %v6206_v55 = vadd.f32 1e-05, %v6078_v44  ;;  %5589 = vadd.xlane.f32.xlu0 %v11528_v30  ;;  %v6079_v12 = vmax.f32 %v6015_v27, 0.0  ;;  %v11553_v49 = vmul.f32 0.03125, %v5520_v39  ;;  %v5952_v13 = vmul.f32 %v11544_v23, %v11544_v23  ;;  %v5046_v33 = vpop.f32.mrb[237].mxu0 }
 0x4e1   :  { %v6470_v54 = vadd.f32 %v11398_v4, %v6399_v7  ;;  %v5710_v40 = vpop.xlane.xlu0 %5709  ;;  %v6402_v57 = vmul.f32 %v11393_v50, %v6331_v0  ;;  %v11569_v31 = vadd.f32 %v11236_v61, %v5044_v2  ;;  %v5047_v35 = vpop.f32.mrb[238].mxu0  ;;  %v11583_v11 = vadd.f32 %v11469_v47, %v11534_v56 }
 0x4e2   :  { %8204 = vrsqrt.f32 %v6206_v55  ;;  %v5888_v36 = vmul.f32 0.03125, %v5710_v40  ;;  %5591 = vadd.xlane.f32.xlu1 %v11549_v20  ;;  %v6207_v34 = vadd.f32 1e-05, %v6079_v12  ;;  %v5953_v53 = vmul.f32 %v11553_v49, %v11553_v49  ;;  %v5049_v27 = vpop.f32.mrb[239].mxu0 }
 0x4e3   :  { %6534 = vst [vmem:[#allocation13 + $0x28] sm:$0xff] %v6470_v54  ;;  %v5712_v3 = vpop.xlane.xlu1 %5711  ;;  %v6473_v28 = vadd.f32 %v11398_v4, %v6402_v57  ;;  %v11578_v61 = vadd.f32 %v11244_v52, %v5047_v35 }
 0x4e4   :  { %v8201_v17 = vpop.eup %8200  ;;  %v6016_v41 = vsub.f32 %v5888_v36, %v5952_v13  ;;  %v5889_v8 = vmul.f32 0.03125, %v5712_v3  ;;  %5781 = vadd.xlane.f32.xlu0 %v5668_v24  ;;  %8206 = vrsqrt.f32 %v6207_v34  ;;  %v6142_v13 = vsub.f32 %v11083_v25, %v11512_v9 }
 0x4e5   :  { %v6332_v51 = vmul.f32 %v8201_v17, %v6140_v21  ;;  %v5522_v44 = vpop.xlane.xlu0 %5521  ;;  %6537 = vst [vmem:[#allocation13 + $0x40] sm:$0xff] %v6473_v28  ;;  %v5670_v36 = vmul.f32 %v11575_v42, %v11575_v42 }
 0x4e6   :  { %v8203_v6 = vpop.eup %8202  ;;  %v6080_v7 = vmax.f32 %v6016_v41, 0.0  ;;  %v6017_v39 = vsub.f32 %v5889_v8, %v5953_v53  ;;  %5783 = vadd.xlane.f32.xlu1 %v5669_v37  ;;  %v11585_v55 = vmul.f32 0.03125, %v5522_v44  ;;  %v5671_v37 = vmul.f32 %v11583_v11, %v11583_v11 }
 0x4e7   :  { %v6403_v0 = vmul.f32 %v11393_v50, %v6332_v51  ;;  %v6333_v15 = vmul.f32 %v8203_v6, %v6141_v5  ;;  %v5524_v54 = vpop.xlane.xlu1 %5523  ;;  %v5052_v2 = vpop.f32.mrb[240].mxu0  ;;  %v11609_v41 = vadd.f32 %v11469_v47, %v11542_v26  ;;  %v6143_v44 = vsub.f32 %v11088_v59, %v11517_v43 }
 0x4e8   :  { %v6208_v12 = vadd.f32 1e-05, %v6080_v7  ;;  %v6081_v19 = vmax.f32 %v6017_v39, 0.0  ;;  %v11587_v40 = vmul.f32 0.03125, %v5524_v54  ;;  %5593 = vadd.xlane.f32.xlu0 %v11575_v42  ;;  %v5954_v34 = vmul.f32 %v11585_v55, %v11585_v55  ;;  %v5054_v28 = vpop.f32.mrb[241].mxu0 }
 0x4e9   :  { %v6474_v52 = vadd.f32 %v11398_v4, %v6403_v0  ;;  %v6404_v24 = vmul.f32 %v11393_v50, %v6333_v15  ;;  %v5714_v57 = vpop.xlane.xlu0 %5713  ;;  %v11603_v9 = vadd.f32 %v11263_v22, %v5052_v2  ;;  %v5055_v5 = vpop.f32.mrb[242].mxu0  ;;  %v11621_v26 = vadd.f32 %v11469_v47, %v11569_v31 }
 0x4ea   :  { %8208 = vrsqrt.f32 %v6208_v12  ;;  %v6209_v56 = vadd.f32 1e-05, %v6081_v19  ;;  %5595 = vadd.xlane.f32.xlu1 %v11583_v11  ;;  %v5890_v53 = vmul.f32 0.03125, %v5714_v57  ;;  %v5955_v17 = vmul.f32 %v11587_v40, %v11587_v40  ;;  %v5057_v6 = vpop.f32.mrb[243].mxu0 }
 0x4eb   :  { %6538 = vst [vmem:[#allocation13 + $0x48] sm:$0xff] %v6474_v52  ;;  %v6475_v21 = vadd.f32 %v11398_v4, %v6404_v24  ;;  %v5716_v3 = vpop.xlane.xlu1 %5715  ;;  %v11614_v22 = vadd.f32 %v11268_v60, %v5055_v5  ;;  %v5672_v24 = vmul.f32 %v11609_v41, %v11609_v41  ;;  %v5673_v2 = vmul.f32 %v11621_v26, %v11621_v26 }
 0x4ec   :  { %v8205_v25 = vpop.eup %8204  ;;  %8210 = vrsqrt.f32 %v6209_v56  ;;  %v5891_v33 = vmul.f32 0.03125, %v5716_v3  ;;  %5785 = vadd.xlane.f32.xlu0 %v5670_v36  ;;  %v6018_v51 = vsub.f32 %v5890_v53, %v5954_v34  ;;  %v6144_v36 = vsub.f32 %v11103_v16, %v11544_v23 }
 0x4ed   :  { %6539 = vst [vmem:[#allocation13 + $0x50] sm:$0xff] %v6475_v21  ;;  %v6334_v8 = vmul.f32 %v8205_v25, %v6142_v13  ;;  %v5526_v35 = vpop.xlane.xlu0 %5525  ;;  %v6145_v28 = vsub.f32 %v11108_v32, %v11553_v49 }
 0x4ee   :  { %v6019_v7 = vsub.f32 %v5891_v33, %v5955_v17  ;;  %v11616_v27 = vmul.f32 0.03125, %v5526_v35  ;;  %5787 = vadd.xlane.f32.xlu1 %v5671_v37  ;;  %v8207_v39 = vpop.eup %8206  ;;  %v6082_v15 = vmax.f32 %v6018_v51, 0.0  ;;  %v11647_v35 = vadd.f32 %v11469_v47, %v11578_v61 }
 0x4ef   :  { %v6405_v0 = vmul.f32 %v11393_v50, %v6334_v8  ;;  %v5528_v54 = vpop.xlane.xlu1 %5527  ;;  %v6335_v12 = vmul.f32 %v8207_v39, %v6143_v44  ;;  %v5060_v21 = vpop.f32.mrb[244].mxu0 }
 0x4f0   :  { %v6083_v19 = vmax.f32 %v6019_v7, 0.0  ;;  %5597 = vadd.xlane.f32.xlu0 %v11609_v41  ;;  %v6210_v60 = vadd.f32 1e-05, %v6082_v15  ;;  %v11625_v43 = vmul.f32 0.03125, %v5528_v54  ;;  %v5956_v31 = vmul.f32 %v11616_v27, %v11616_v27  ;;  %v5062_v25 = vpop.f32.mrb[245].mxu0 }
 0x4f1   :  { %v6476_v59 = vadd.f32 %v11398_v4, %v6405_v0  ;;  %v5718_v52 = vpop.xlane.xlu0 %5717  ;;  %v6406_v57 = vmul.f32 %v11393_v50, %v6335_v12  ;;  %v11639_v37 = vadd.f32 %v11258_v14, %v5060_v21  ;;  %v5063_v33 = vpop.f32.mrb[246].mxu0  ;;  %v11657_v15 = vadd.f32 %v11469_v47, %v11603_v9 }
 0x4f2   :  { %v6211_v13 = vadd.f32 1e-05, %v6083_v19  ;;  %v5892_v56 = vmul.f32 0.03125, %v5718_v52  ;;  %5599 = vadd.xlane.f32.xlu1 %v11621_v26  ;;  %8212 = vrsqrt.f32 %v6210_v60  ;;  %v5957_v23 = vmul.f32 %v11625_v43, %v11625_v43  ;;  %v5065_v6 = vpop.f32.mrb[247].mxu0 }
 0x4f3   :  { %6540 = vst [vmem:[#allocation13 + $0x58] sm:$0xff] %v6476_v59  ;;  %v5720_v34 = vpop.xlane.xlu1 %5719  ;;  %v6477_v3 = vadd.f32 %v11398_v4, %v6406_v57  ;;  %v11650_v14 = vadd.f32 %v11266_v63, %v5063_v33  ;;  %v5674_v9 = vmul.f32 %v11647_v35, %v11647_v35  ;;  %v6146_v57 = vsub.f32 %v11124_v62, %v11585_v55 }
 0x4f4   :  { %v8209_v53 = vpop.eup %8208  ;;  %8214 = vrsqrt.f32 %v6211_v13  ;;  %v6020_v17 = vsub.f32 %v5892_v56, %v5956_v31  ;;  %5789 = vadd.xlane.f32.xlu0 %v5672_v24  ;;  %v5893_v8 = vmul.f32 0.03125, %v5720_v34  ;;  %v6147_v25 = vsub.f32 %v11130_v38, %v11587_v40 }
 0x4f5   :  { %v6336_v16 = vmul.f32 %v8209_v53, %v6144_v36  ;;  %v5530_v5 = vpop.xlane.xlu0 %5529  ;;  %6541 = vst [vmem:[#allocation13 + $0x60] sm:$0xff] %v6477_v3  ;;  %v5675_v53 = vmul.f32 %v11657_v15, %v11657_v15  ;;  %v11693_v6 = vadd.f32 %v11469_v47, %v11639_v37 }
 0x4f6   :  { %v8211_v51 = vpop.eup %8210  ;;  %v6084_v44 = vmax.f32 %v6020_v17, 0.0  ;;  %v11652_v7 = vmul.f32 0.03125, %v5530_v5  ;;  %5791 = vadd.xlane.f32.xlu1 %v5673_v2  ;;  %v6021_v39 = vsub.f32 %v5893_v8, %v5957_v23 }
 0x4f7   :  { %v6407_v32 = vmul.f32 %v11393_v50, %v6336_v16  ;;  %v6337_v49 = vmul.f32 %v8211_v51, %v6145_v28  ;;  %v5532_v0 = vpop.xlane.xlu1 %5531  ;;  %v5068_v31 = vpop.f32.mrb[248].mxu0  ;;  %v11683_v28 = vadd.f32 %v11469_v47, %v11614_v22 }
 0x4f8   :  { %v6212_v54 = vadd.f32 1e-05, %v6084_v44  ;;  %5601 = vadd.xlane.f32.xlu0 %v11647_v35  ;;  %v6085_v12 = vmax.f32 %v6021_v39, 0.0  ;;  %v11662_v19 = vmul.f32 0.03125, %v5532_v0  ;;  %v5958_v60 = vmul.f32 %v11652_v7, %v11652_v7  ;;  %v5070_v21 = vpop.f32.mrb[249].mxu0 }
 0x4f9   :  { %v6478_v63 = vadd.f32 %v11398_v4, %v6407_v32  ;;  %v6408_v61 = vmul.f32 %v11393_v50, %v6337_v49  ;;  %v5722_v59 = vpop.xlane.xlu0 %5721  ;;  %v11673_v36 = vadd.f32 %v11285_v29, %v5068_v31  ;;  %v5071_v55 = vpop.f32.mrb[250].mxu0  ;;  %v5676_v37 = vmul.f32 %v11683_v28, %v11683_v28 }
 0x4fa   :  { %8216 = vrsqrt.f32 %v6212_v54  ;;  %v5894_v52 = vmul.f32 0.03125, %v5722_v59  ;;  %5603 = vadd.xlane.f32.xlu1 %v11657_v15  ;;  %v6213_v13 = vadd.f32 1e-05, %v6085_v12  ;;  %v5959_v62 = vmul.f32 %v11662_v19, %v11662_v19  ;;  %v5073_v8 = vpop.f32.mrb[251].mxu0  ;;  %v12437_v54 = vld [vmem:[#allocation66_spill] sm:$0xff] }
 0x4fb   :  { %6542 = vst [vmem:[#allocation13 + $0x68] sm:$0xff] %v6478_v63  ;;  %v6479_v24 = vadd.f32 %v11398_v4, %v6408_v61  ;;  %v5724_v56 = vpop.xlane.xlu1 %5723  ;;  %v11686_v23 = vadd.f32 %v11290_v48, %v5071_v55  ;;  %v6148_v63 = vsub.f32 %v12437_v54, %v11616_v27  ;;  %v5677_v21 = vmul.f32 %v11693_v6, %v11693_v6 }
 0x4fc   :  { %v6022_v34 = vsub.f32 %v5894_v52, %v5958_v60  ;;  %v5895_v2 = vmul.f32 0.03125, %v5724_v56  ;;  %5793 = vadd.xlane.f32.xlu0 %v5674_v9  ;;  %v8213_v3 = vpop.eup %8212  ;;  %8218 = vrsqrt.f32 %v6213_v13 }
 0x4fd   :  { %6543 = vst [vmem:[#allocation13 + $0x70] sm:$0xff] %v6479_v24  ;;  %v5534_v17 = vpop.xlane.xlu0 %5533  ;;  %v6338_v16 = vmul.f32 %v8213_v3, %v6146_v57  ;;  %v12438_v57 = vld [vmem:[#allocation76_spill] sm:$0xff] }
 0x4fe   :  { %v8215_v29 = vpop.eup %8214  ;;  %v6086_v33 = vmax.f32 %v6022_v34, 0.0  ;;  %5795 = vadd.xlane.f32.xlu1 %v5675_v53  ;;  %v6023_v38 = vsub.f32 %v5895_v2, %v5959_v62  ;;  %v11688_v40 = vmul.f32 0.03125, %v5534_v17  ;;  %v11715_v34 = vadd.f32 %v11469_v47, %v11650_v14  ;;  %v12439_v62 = vld [vmem:[#allocation67_spill] sm:$0xff]  ;;  %v12440_v17 = vld [vmem:[#allocation78_spill] sm:$0xff] }
 0x4ff   :  { %v6339_v5 = vmul.f32 %v8215_v29, %v6147_v25  ;;  %v5536_v51 = vpop.xlane.xlu1 %5535  ;;  %v6409_v44 = vmul.f32 %v11393_v50, %v6338_v16  ;;  %v5076_v60 = vpop.f32.mrb[252].mxu0  ;;  %v6149_v55 = vsub.f32 %v12439_v62, %v11625_v43 }
 0x500   :  { %v6214_v22 = vadd.f32 1e-05, %v6086_v33  ;;  %v11695_v32 = vmul.f32 0.03125, %v5536_v51  ;;  %5605 = vadd.xlane.f32.xlu0 %v11683_v28  ;;  %v6087_v49 = vmax.f32 %v6023_v38, 0.0  ;;  %v5960_v59 = vmul.f32 %v11688_v40, %v11688_v40  ;;  %v5078_v31 = vpop.f32.mrb[253].mxu0 }
 0x501   :  { %v6410_v48 = vmul.f32 %v11393_v50, %v6339_v5  ;;  %v5726_v39 = vpop.xlane.xlu0 %5725  ;;  %v6480_v0 = vadd.f32 %v11398_v4, %v6409_v44  ;;  %v5414_v13 = vadd.f32 %v12438_v57, %v5076_v60  ;;  %v5079_v53 = vpop.f32.mrb[254].mxu0  ;;  %v11727_v38 = vadd.f32 %v11469_v47, %v11673_v36 }
 0x502   :  { %8220 = vrsqrt.f32 %v6214_v22  ;;  %5607 = vadd.xlane.f32.xlu1 %v11693_v6  ;;  %v6215_v12 = vadd.f32 1e-05, %v6087_v49  ;;  %v5896_v52 = vmul.f32 0.03125, %v5726_v39  ;;  %v5961_v27 = vmul.f32 %v11695_v32, %v11695_v32  ;;  %v5081_v16 = vpop.f32.mrb[255].mxu0 }
 0x503   :  { %v6481_v61 = vadd.f32 %v11398_v4, %v6410_v48  ;;  %v5728_v9 = vpop.xlane.xlu1 %5727  ;;  %6544 = vst [vmem:[#allocation13 + $0x78] sm:$0xff] %v6480_v0  ;;  %v11720_v29 = vadd.f32 %v12440_v17, %v5079_v53  ;;  %v5678_v54 = vmul.f32 %v11715_v34, %v11715_v34  ;;  %v11756_v16 = vadd.f32 %v11469_v47, %v5414_v13 }
 0x504   :  { %v8217_v24 = vpop.eup %8216  ;;  %v5897_v56 = vmul.f32 0.03125, %v5728_v9  ;;  %5797 = vadd.xlane.f32.xlu0 %v5676_v37  ;;  %8222 = vrsqrt.f32 %v6215_v12  ;;  %v6024_v3 = vsub.f32 %v5896_v52, %v5960_v59  ;;  %v12441_v12 = vld [vmem:[#allocation50_spill] sm:$0xff]  ;;  %v5679_v9 = vmul.f32 %v11727_v38, %v11727_v38 }
 0x505   :  { %6545 = vst [vmem:[#allocation13 + $0x80] sm:$0xff] %v6481_v61  ;;  %v6340_v2 = vmul.f32 %v8217_v24, %v6148_v63  ;;  %v5538_v25 = vpop.xlane.xlu0 %5537  ;;  %v6150_v59 = vsub.f32 %v12441_v12, %v11652_v7 }
 0x506   :  { %v6025_v33 = vsub.f32 %v5897_v56, %v5961_v27  ;;  %v11722_v8 = vmul.f32 0.03125, %v5538_v25  ;;  %5799 = vadd.xlane.f32.xlu1 %v5677_v21  ;;  %v8219_v5 = vpop.eup %8218  ;;  %v6088_v51 = vmax.f32 %v6024_v3, 0.0  ;;  %v11748_v56 = vadd.f32 %v11469_v47, %v11686_v23 }
 0x507   :  { %v6411_v14 = vmul.f32 %v11393_v50, %v6340_v2  ;;  %v5540_v44 = vpop.xlane.xlu1 %5539  ;;  %v6341_v22 = vmul.f32 %v8219_v5, %v6149_v55  ;;  %v12442_v2 = vld [vmem:[#allocation68_spill] sm:$0xff] }
 0x508   :  { %v6089_v48 = vmax.f32 %v6025_v33, 0.0  ;;  %5609 = vadd.xlane.f32.xlu0 %v11715_v34  ;;  %v6216_v49 = vadd.f32 1e-05, %v6088_v51  ;;  %v11731_v39 = vmul.f32 0.03125, %v5540_v44  ;;  %v5962_v36 = vmul.f32 %v11722_v8, %v11722_v8 }
 0x509   :  { %v6482_v43 = vadd.f32 %v11398_v4, %v6411_v14  ;;  %v5730_v0 = vpop.xlane.xlu0 %5729  ;;  %v6412_v63 = vmul.f32 %v11393_v50, %v6341_v22  ;;  %v6151_v53 = vsub.f32 %v12442_v2, %v11662_v19 }
 0x50a   :  { %v6217_v37 = vadd.f32 1e-05, %v6089_v48  ;;  %v5898_v61 = vmul.f32 0.03125, %v5730_v0  ;;  %5611 = vadd.xlane.f32.xlu1 %v11727_v38  ;;  %8224 = vrsqrt.f32 %v6216_v49  ;;  %v5963_v60 = vmul.f32 %v11731_v39, %v11731_v39  ;;  %v12443_v0 = vld [vmem:[#allocation69_spill] sm:$0xff] }
 0x50b   :  { %6546 = vst [vmem:[#allocation13 + $0x88] sm:$0xff] %v6482_v43  ;;  %v5732_v52 = vpop.xlane.xlu1 %5731  ;;  %v6483_v57 = vadd.f32 %v11398_v4, %v6412_v63  ;;  %v5680_v48 = vmul.f32 %v11748_v56, %v11748_v56 }
 0x50c   :  { %v8221_v24 = vpop.eup %8220  ;;  %8226 = vrsqrt.f32 %v6217_v37  ;;  %v6026_v27 = vsub.f32 %v5898_v61, %v5962_v36  ;;  %v5899_v31 = vmul.f32 0.03125, %v5732_v52  ;;  %5801 = vadd.xlane.f32.xlu0 %v5678_v54  ;;  %v6152_v54 = vsub.f32 %v12443_v0, %v11688_v40  ;;  %v12444_v52 = vld [vmem:[#allocation70_spill] sm:$0xff]  ;;  %v12446_v0 = vld [vmem:[#allocation52_spill] sm:$0xff] }
 0x50d   :  { %v6342_v7 = vmul.f32 %v8221_v24, %v6150_v59  ;;  %v5542_v21 = vpop.xlane.xlu0 %5541  ;;  %6547 = vst [vmem:[#allocation13 + $0x90] sm:$0xff] %v6483_v57  ;;  %v5681_v36 = vmul.f32 %v11756_v16, %v11756_v16  ;;  %v11779_v40 = vadd.f32 %v11469_v47, %v11720_v29 }
 0x50e   :  { %v6090_v3 = vmax.f32 %v6026_v27, 0.0  ;;  %v6027_v25 = vsub.f32 %v5899_v31, %v5963_v60  ;;  %v11752_v62 = vmul.f32 0.03125, %v5542_v21  ;;  %5803 = vadd.xlane.f32.xlu1 %v5679_v9  ;;  %v8223_v55 = vpop.eup %8222  ;;  %v6153_v9 = vsub.f32 %v12444_v52, %v11695_v32 }
 0x50f   :  { %v6413_v17 = vmul.f32 %v11393_v50, %v6342_v7  ;;  %v5544_v33 = vpop.xlane.xlu1 %5543  ;;  %v6343_v23 = vmul.f32 %v8223_v55, %v6151_v53 }
 0x510   :  { %v6218_v5 = vadd.f32 1e-05, %v6090_v3  ;;  %v6091_v14 = vmax.f32 %v6027_v25, 0.0  ;;  %5613 = vadd.xlane.f32.xlu0 %v11748_v56  ;;  %v5964_v19 = vmul.f32 %v11752_v62, %v11752_v62  ;;  %v11762_v44 = vmul.f32 0.03125, %v5544_v33 }
 0x511   :  { %v6484_v51 = vadd.f32 %v11398_v4, %v6413_v17  ;;  %v5734_v22 = vpop.xlane.xlu0 %5733  ;;  %v6414_v13 = vmul.f32 %v11393_v50, %v6343_v23  ;;  %v5682_v33 = vmul.f32 %v11779_v40, %v11779_v40 }
 0x512   :  { %8228 = vrsqrt.f32 %v6218_v5  ;;  %v6219_v43 = vadd.f32 1e-05, %v6091_v14  ;;  %v5900_v49 = vmul.f32 0.03125, %v5734_v22  ;;  %5615 = vadd.xlane.f32.xlu1 %v11756_v16  ;;  %v5965_v63 = vmul.f32 %v11762_v44, %v11762_v44 }
 0x513   :  { %6548 = vst [vmem:[#allocation13 + $0x98] sm:$0xff] %v6484_v51  ;;  %v5736_v37 = vpop.xlane.xlu1 %5735  ;;  %v6485_v61 = vadd.f32 %v11398_v4, %v6414_v13 }
 0x514   :  { %8230 = vrsqrt.f32 %v6219_v43  ;;  %v6028_v12 = vsub.f32 %v5900_v49, %v5964_v19  ;;  %v5901_v59 = vmul.f32 0.03125, %v5736_v37  ;;  %5805 = vadd.xlane.f32.xlu0 %v5680_v48  ;;  %v8225_v60 = vpop.eup %8224  ;;  %v12445_v19 = vld [vmem:[#allocation71_spill] sm:$0xff] }
 0x515   :  { %v5546_v24 = vpop.xlane.xlu0 %5545  ;;  %6549 = vst [vmem:[#allocation13 + $0xa0] sm:$0xff] %v6485_v61  ;;  %v6344_v27 = vmul.f32 %v8225_v60, %v6152_v54  ;;  %v6154_v22 = vsub.f32 %v12445_v19, %v11722_v8  ;;  %v6155_v54 = vsub.f32 %v12446_v0, %v11731_v39 }
 0x516   :  { %v8227_v57 = vpop.eup %8226  ;;  %v6092_v31 = vmax.f32 %v6028_v12, 0.0  ;;  %v6029_v7 = vsub.f32 %v5901_v59, %v5965_v63  ;;  %v11781_v21 = vmul.f32 0.03125, %v5546_v24  ;;  %5807 = vadd.xlane.f32.xlu1 %v5681_v36  ;;  %v11802_v59 = vld [vmem:[#allocation10] ss:$0 sm:$0xff] }
 0x517   :  { %v6345_v2 = vmul.f32 %v8227_v57, %v6153_v9  ;;  %v5548_v53 = vpop.xlane.xlu1 %5547  ;;  %v6415_v3 = vmul.f32 %v11393_v50, %v6344_v27 }
 0x518   :  { %v6220_v25 = vadd.f32 1e-05, %v6092_v31  ;;  %v6093_v55 = vmax.f32 %v6029_v7, 0.0  ;;  %5617 = vadd.xlane.f32.xlu0 %v11779_v40  ;;  %v5966_v32 = vmul.f32 %v11781_v21, %v11781_v21  ;;  %v11788_v29 = vmul.f32 0.03125, %v5548_v53 }
 0x519   :  { %v6416_v47 = vmul.f32 %v11393_v50, %v6345_v2  ;;  %v5738_v17 = vpop.xlane.xlu0 %5737  ;;  %v6486_v23 = vadd.f32 %v11398_v4, %v6415_v3 }
 0x51a   :  { %8232 = vrsqrt.f32 %v6220_v25  ;;  %v6221_v5 = vadd.f32 1e-05, %v6093_v55  ;;  %v5902_v14 = vmul.f32 0.03125, %v5738_v17  ;;  %v5967_v13 = vmul.f32 %v11788_v29, %v11788_v29  ;;  %v11811_v25 = vld [vmem:[#allocation11] ss:$0 sm:$0xff] }
 0x51b   :  { %v6487_v51 = vadd.f32 %v11398_v4, %v6416_v47  ;;  %v5740_v50 = vpop.xlane.xlu1 %5739  ;;  %6550 = vst [vmem:[#allocation13 + $0xa8] sm:$0xff] %v6486_v23  ;;  %v12447_v47 = vld [vmem:[#allocation72_spill] sm:$0xff] }
 0x51c   :  { %v8229_v48 = vpop.eup %8228  ;;  %8234 = vrsqrt.f32 %v6221_v5  ;;  %v6030_v43 = vsub.f32 %v5902_v14, %v5966_v32  ;;  %v5903_v49 = vmul.f32 0.03125, %v5740_v50  ;;  %5809 = vadd.xlane.f32.xlu0 %v5682_v33  ;;  %v6156_v32 = vsub.f32 %v12447_v47, %v11752_v62  ;;  %v12448_v14 = vld [vmem:[#allocation73_spill] sm:$0xff] }
 0x51d   :  { %6551 = vst [vmem:[#allocation13 + $0xb0] sm:$0xff] %v6487_v51  ;;  %v6346_v63 = vmul.f32 %v8229_v48, %v6154_v22  ;;  %v5550_v37 = vpop.xlane.xlu0 %5549  ;;  %v6157_v51 = vsub.f32 %v12448_v14, %v11762_v44 }
 0x51e   :  { %v8231_v36 = vpop.eup %8230  ;;  %v6094_v61 = vmax.f32 %v6030_v43, 0.0  ;;  %v6031_v12 = vsub.f32 %v5903_v49, %v5967_v13  ;;  %v11800_v8 = vmul.f32 0.03125, %v5550_v37 }
 0x51f   :  { %v6417_v60 = vmul.f32 %v11802_v59, %v6346_v63  ;;  %v6347_v52 = vmul.f32 %v8231_v36, %v6155_v54  ;;  %v5552_v9 = vpop.xlane.xlu1 %5551 }
 0x520   :  { %v6222_v24 = vadd.f32 1e-05, %v6094_v61  ;;  %v6095_v57 = vmax.f32 %v6031_v12, 0.0  ;;  %v11807_v39 = vmul.f32 0.03125, %v5552_v9  ;;  %v5968_v53 = vmul.f32 %v11800_v8, %v11800_v8 }
 0x521   :  { %v6488_v27 = vadd.f32 %v11398_v4, %v6417_v60  ;;  %v6418_v31 = vmul.f32 %v11802_v59, %v6347_v52  ;;  %v5742_v7 = vpop.xlane.xlu0 %5741 }
 0x522   :  { %8236 = vrsqrt.f32 %v6222_v24  ;;  %v6223_v2 = vadd.f32 1e-05, %v6095_v57  ;;  %v5904_v3 = vmul.f32 0.03125, %v5742_v7  ;;  %v5969_v33 = vmul.f32 %v11807_v39, %v11807_v39  ;;  %v12449_v24 = vld [vmem:[#allocation74_spill] sm:$0xff] }
 0x523   :  { %6552 = vst [vmem:[#allocation13 + $0xb8] sm:$0xff] %v6488_v27  ;;  %v6489_v55 = vadd.f32 %v11811_v25, %v6418_v31  ;;  %v5744_v4 = vpop.xlane.xlu1 %5743  ;;  %v6158_v57 = vsub.f32 %v12449_v24, %v11781_v21 }
 0x524   :  { %v8233_v17 = vpop.eup %8232  ;;  %8238 = vrsqrt.f32 %v6223_v2  ;;  %v6032_v23 = vsub.f32 %v5904_v3, %v5968_v53  ;;  %v5905_v5 = vmul.f32 0.03125, %v5744_v4  ;;  %v12450_v3 = vld [vmem:[#allocation75_spill] sm:$0xff] }
 0x525   :  { %6553 = vst [vmem:[#allocation13 + $0xc0] sm:$0xff] %v6489_v55  ;;  %v6348_v19 = vmul.f32 %v8233_v17, %v6156_v32  ;;  %v5554_v22 = vpop.xlane.xlu0 %5553  ;;  %v6159_v55 = vsub.f32 %v12450_v3, %v11788_v29 }
 0x526   :  { %v8235_v50 = vpop.eup %8234  ;;  %v6096_v48 = vmax.f32 %v6032_v23, 0.0  ;;  %v6033_v13 = vsub.f32 %v5905_v5, %v5969_v33  ;;  %v11820_v43 = vmul.f32 0.03125, %v5554_v22 }
 0x527   :  { %v6419_v62 = vmul.f32 %v11802_v59, %v6348_v19  ;;  %v6349_v49 = vmul.f32 %v8235_v50, %v6157_v51  ;;  %v5556_v0 = vpop.xlane.xlu1 %5555 }
 0x528   :  { %v6224_v54 = vadd.f32 1e-05, %v6096_v48  ;;  %v6097_v63 = vmax.f32 %v6033_v13, 0.0  ;;  %v11825_v61 = vmul.f32 0.03125, %v5556_v0  ;;  %v5970_v60 = vmul.f32 %v11820_v43, %v11820_v43 }
 0x529   :  { %v6490_v37 = vadd.f32 %v11811_v25, %v6419_v62  ;;  %v6420_v36 = vmul.f32 %v11802_v59, %v6349_v49  ;;  %v5746_v44 = vpop.xlane.xlu0 %5745 }
 0x52a   :  { %8240 = vrsqrt.f32 %v6224_v54  ;;  %v6225_v12 = vadd.f32 1e-05, %v6097_v63  ;;  %v5906_v52 = vmul.f32 0.03125, %v5746_v44  ;;  %v5971_v7 = vmul.f32 %v11825_v61, %v11825_v61  ;;  %v12451_v54 = vld [vmem:[#allocation54_spill] sm:$0xff] }
 0x52b   :  { %6554 = vst [vmem:[#allocation13 + $0xc8] sm:$0xff] %v6490_v37  ;;  %v6491_v9 = vadd.f32 %v11811_v25, %v6420_v36  ;;  %v5748_v27 = vpop.xlane.xlu1 %5747  ;;  %v6160_v63 = vsub.f32 %v12451_v54, %v11800_v8 }
 0x52c   :  { %v8237_v31 = vpop.eup %8236  ;;  %8242 = vrsqrt.f32 %v6225_v12  ;;  %v6034_v2 = vsub.f32 %v5906_v52, %v5970_v60  ;;  %v5907_v53 = vmul.f32 0.03125, %v5748_v27  ;;  %v12452_v52 = vld [vmem:[#allocation77_spill] sm:$0xff] }
 0x52d   :  { %6555 = vst [vmem:[#allocation13 + $0xd0] sm:$0xff] %v6491_v9  ;;  %v6350_v47 = vmul.f32 %v8237_v31, %v6158_v57  ;;  %v5558_v32 = vpop.xlane.xlu0 %5557  ;;  %v6161_v9 = vsub.f32 %v12452_v52, %v11807_v39 }
 0x52e   :  { %v8239_v4 = vpop.eup %8238  ;;  %v6098_v17 = vmax.f32 %v6034_v2, 0.0  ;;  %v6035_v33 = vsub.f32 %v5907_v53, %v5971_v7  ;;  %v11836_v23 = vmul.f32 0.03125, %v5558_v32 }
 0x52f   :  { %v6421_v21 = vmul.f32 %v11802_v59, %v6350_v47  ;;  %v6351_v5 = vmul.f32 %v8239_v4, %v6159_v55  ;;  %v5560_v14 = vpop.xlane.xlu1 %5559 }
 0x530   :  { %v6226_v51 = vadd.f32 1e-05, %v6098_v17  ;;  %v6099_v19 = vmax.f32 %v6035_v33, 0.0  ;;  %v11841_v48 = vmul.f32 0.03125, %v5560_v14  ;;  %v5972_v62 = vmul.f32 %v11836_v23, %v11836_v23 }
 0x531   :  { %v6492_v22 = vadd.f32 %v11811_v25, %v6421_v21  ;;  %v6422_v50 = vmul.f32 %v11802_v59, %v6351_v5  ;;  %v5750_v29 = vpop.xlane.xlu0 %5749 }
 0x532   :  { %8244 = vrsqrt.f32 %v6226_v51  ;;  %v6227_v13 = vadd.f32 1e-05, %v6099_v19  ;;  %v5908_v49 = vmul.f32 0.03125, %v5750_v29  ;;  %v5973_v44 = vmul.f32 %v11841_v48, %v11841_v48  ;;  %v12453_v51 = vld [vmem:[#allocation79_spill] sm:$0xff] }
 0x533   :  { %6556 = vst [vmem:[#allocation13 + $0xd8] sm:$0xff] %v6492_v22  ;;  %v6493_v0 = vadd.f32 %v11811_v25, %v6422_v50  ;;  %v5752_v37 = vpop.xlane.xlu1 %5751  ;;  %v6162_v19 = vsub.f32 %v12453_v51, %v11820_v43 }
 0x534   :  { %v8241_v36 = vpop.eup %8240  ;;  %8246 = vrsqrt.f32 %v6227_v13  ;;  %v6036_v12 = vsub.f32 %v5908_v49, %v5972_v62  ;;  %v5909_v60 = vmul.f32 0.03125, %v5752_v37  ;;  %v12454_v49 = vld [vmem:[#allocation56_spill] sm:$0xff] }
 0x535   :  { %6557 = vst [vmem:[#allocation13 + $0xe0] sm:$0xff] %v6493_v0  ;;  %v6352_v24 = vmul.f32 %v8241_v36, %v6160_v63  ;;  %v5562_v57 = vpop.xlane.xlu0 %5561  ;;  %v6163_v0 = vsub.f32 %v12454_v49, %v11825_v61 }
 0x536   :  { %v8243_v27 = vpop.eup %8242  ;;  %v6100_v31 = vmax.f32 %v6036_v12, 0.0  ;;  %v6037_v7 = vsub.f32 %v5909_v60, %v5973_v44  ;;  %v11852_v2 = vmul.f32 0.03125, %v5562_v57 }
 0x537   :  { %v6423_v8 = vmul.f32 %v11802_v59, %v6352_v24  ;;  %v6353_v53 = vmul.f32 %v8243_v27, %v6161_v9  ;;  %v5564_v3 = vpop.xlane.xlu1 %5563 }
 0x538   :  { %v6228_v55 = vadd.f32 1e-05, %v6100_v31  ;;  %v6101_v47 = vmax.f32 %v6037_v7, 0.0  ;;  %v11857_v17 = vmul.f32 0.03125, %v5564_v3  ;;  %v5974_v21 = vmul.f32 %v11852_v2, %v11852_v2 }
 0x539   :  { %v6494_v32 = vadd.f32 %v11811_v25, %v6423_v8  ;;  %v6424_v4 = vmul.f32 %v11802_v59, %v6353_v53  ;;  %v5754_v39 = vpop.xlane.xlu0 %5753 }
 0x53a   :  { %8248 = vrsqrt.f32 %v6228_v55  ;;  %v6229_v33 = vadd.f32 1e-05, %v6101_v47  ;;  %v5910_v5 = vmul.f32 0.03125, %v5754_v39  ;;  %v5975_v29 = vmul.f32 %v11857_v17, %v11857_v17  ;;  %v12455_v55 = vld [vmem:[#allocation80_spill] sm:$0xff] }
 0x53b   :  { %6558 = vst [vmem:[#allocation13 + $0xe8] sm:$0xff] %v6494_v32  ;;  %v6495_v14 = vadd.f32 %v11811_v25, %v6424_v4  ;;  %v5756_v22 = vpop.xlane.xlu1 %5755  ;;  %v6164_v47 = vsub.f32 %v12455_v55, %v11836_v23 }
 0x53c   :  { %v8245_v50 = vpop.eup %8244  ;;  %8250 = vrsqrt.f32 %v6229_v33  ;;  %v6038_v13 = vsub.f32 %v5910_v5, %v5974_v21  ;;  %v5911_v62 = vmul.f32 0.03125, %v5756_v22  ;;  %v12456_v5 = vld [vmem:[#allocation81_spill] sm:$0xff] }
 0x53d   :  { %6559 = vst [vmem:[#allocation13 + $0xf0] sm:$0xff] %v6495_v14  ;;  %v6354_v54 = vmul.f32 %v8245_v50, %v6162_v19  ;;  %v5566_v63 = vpop.xlane.xlu0 %5565  ;;  %v6165_v14 = vsub.f32 %v12456_v5, %v11841_v48 }
 0x53e   :  { %v8247_v37 = vpop.eup %8246  ;;  %v6102_v36 = vmax.f32 %v6038_v13, 0.0  ;;  %v6039_v44 = vsub.f32 %v5911_v62, %v5975_v29  ;;  %v11868_v12 = vmul.f32 0.03125, %v5566_v63 }
 0x53f   :  { %v6425_v43 = vmul.f32 %v11802_v59, %v6354_v54  ;;  %v6355_v60 = vmul.f32 %v8247_v37, %v6163_v0  ;;  %v5568_v52 = vpop.xlane.xlu1 %5567 }
 0x540   :  { %v6230_v9 = vadd.f32 1e-05, %v6102_v36  ;;  %v6103_v24 = vmax.f32 %v6039_v44, 0.0  ;;  %v11873_v31 = vmul.f32 0.03125, %v5568_v52  ;;  %v5976_v8 = vmul.f32 %v11868_v12, %v11868_v12 }
 0x541   :  { %v6496_v57 = vadd.f32 %v11811_v25, %v6425_v43  ;;  %v6426_v27 = vmul.f32 %v11802_v59, %v6355_v60  ;;  %v5758_v61 = vpop.xlane.xlu0 %5757 }
 0x542   :  { %8252 = vrsqrt.f32 %v6230_v9  ;;  %v6231_v7 = vadd.f32 1e-05, %v6103_v24  ;;  %v5912_v53 = vmul.f32 0.03125, %v5758_v61  ;;  %v5977_v39 = vmul.f32 %v11873_v31, %v11873_v31  ;;  %v12457_v9 = vld [vmem:[#allocation82_spill] sm:$0xff] }
 0x543   :  { %6560 = vst [vmem:[#allocation13 + $0xf8] sm:$0xff] %v6496_v57  ;;  %v6497_v3 = vadd.f32 %v11811_v25, %v6426_v27  ;;  %v5760_v32 = vpop.xlane.xlu1 %5759  ;;  %v6166_v24 = vsub.f32 %v12457_v9, %v11852_v2 }
 0x544   :  { %v8249_v4 = vpop.eup %8248  ;;  %8254 = vrsqrt.f32 %v6231_v7  ;;  %v6040_v33 = vsub.f32 %v5912_v53, %v5976_v8  ;;  %v5913_v21 = vmul.f32 0.03125, %v5760_v32  ;;  %v12458_v53 = vld [vmem:[#allocation83_spill] sm:$0xff] }
 0x545   :  { %6561 = vst [vmem:[#allocation13 + $0x100] sm:$0xff] %v6497_v3  ;;  %v6356_v51 = vmul.f32 %v8249_v4, %v6164_v47  ;;  %v5570_v19 = vpop.xlane.xlu0 %5569  ;;  %v6167_v3 = vsub.f32 %v12458_v53, %v11857_v17 }
 0x546   :  { %v8251_v22 = vpop.eup %8250  ;;  %v6104_v50 = vmax.f32 %v6040_v33, 0.0  ;;  %v6041_v29 = vsub.f32 %v5913_v21, %v5977_v39  ;;  %v11884_v13 = vmul.f32 0.03125, %v5570_v19 }
 0x547   :  { %v6427_v23 = vmul.f32 %v11802_v59, %v6356_v51  ;;  %v6357_v62 = vmul.f32 %v8251_v22, %v6165_v14  ;;  %v5572_v49 = vpop.xlane.xlu1 %5571 }
 0x548   :  { %v6232_v0 = vadd.f32 1e-05, %v6104_v50  ;;  %v6105_v54 = vmax.f32 %v6041_v29, 0.0  ;;  %v11889_v36 = vmul.f32 0.03125, %v5572_v49  ;;  %v5978_v43 = vmul.f32 %v11884_v13, %v11884_v13 }
 0x549   :  { %v6498_v63 = vadd.f32 %v11811_v25, %v6427_v23  ;;  %v6428_v37 = vmul.f32 %v11802_v59, %v6357_v62  ;;  %v5762_v48 = vpop.xlane.xlu0 %5761 }
 0x54a   :  { %8256 = vrsqrt.f32 %v6232_v0  ;;  %v6233_v44 = vadd.f32 1e-05, %v6105_v54  ;;  %v5914_v60 = vmul.f32 0.03125, %v5762_v48  ;;  %v5979_v61 = vmul.f32 %v11889_v36, %v11889_v36  ;;  %v12459_v0 = vld [vmem:[#allocation58_spill] sm:$0xff] }
 0x54b   :  { %6562 = vst [vmem:[#allocation13 + $0x108] sm:$0xff] %v6498_v63  ;;  %v6499_v52 = vadd.f32 %v11811_v25, %v6428_v37  ;;  %v5764_v57 = vpop.xlane.xlu1 %5763  ;;  %v6168_v54 = vsub.f32 %v12459_v0, %v11868_v12 }
 0x54c   :  { %v8253_v27 = vpop.eup %8252  ;;  %8258 = vrsqrt.f32 %v6233_v44  ;;  %v6042_v7 = vsub.f32 %v5914_v60, %v5978_v43  ;;  %v5915_v8 = vmul.f32 0.03125, %v5764_v57  ;;  %v12460_v60 = vld [vmem:[#allocation84_spill] sm:$0xff] }
 0x54d   :  { %6563 = vst [vmem:[#allocation13 + $0x110] sm:$0xff] %v6499_v52  ;;  %v6358_v55 = vmul.f32 %v8253_v27, %v6166_v24  ;;  %v5574_v47 = vpop.xlane.xlu0 %5573  ;;  %v6169_v52 = vsub.f32 %v12460_v60, %v11873_v31 }
 0x54e   :  { %v8255_v32 = vpop.eup %8254  ;;  %v6106_v4 = vmax.f32 %v6042_v7, 0.0  ;;  %v6043_v39 = vsub.f32 %v5915_v8, %v5979_v61  ;;  %v11900_v33 = vmul.f32 0.03125, %v5574_v47 }
 0x54f   :  { %v6429_v2 = vmul.f32 %v11802_v59, %v6358_v55  ;;  %v6359_v21 = vmul.f32 %v8255_v32, %v6167_v3  ;;  %v5576_v5 = vpop.xlane.xlu1 %5575 }
 0x550   :  { %v6234_v14 = vadd.f32 1e-05, %v6106_v4  ;;  %v6107_v51 = vmax.f32 %v6043_v39, 0.0  ;;  %v11905_v50 = vmul.f32 0.03125, %v5576_v5  ;;  %v5980_v23 = vmul.f32 %v11900_v33, %v11900_v33 }
 0x551   :  { %v6500_v19 = vadd.f32 %v11811_v25, %v6429_v2  ;;  %v6430_v22 = vmul.f32 %v11802_v59, %v6359_v21  ;;  %v5766_v17 = vpop.xlane.xlu0 %5765 }
 0x552   :  { %8260 = vrsqrt.f32 %v6234_v14  ;;  %v6235_v29 = vadd.f32 1e-05, %v6107_v51  ;;  %v5916_v62 = vmul.f32 0.03125, %v5766_v17  ;;  %v5981_v48 = vmul.f32 %v11905_v50, %v11905_v50  ;;  %v12461_v14 = vld [vmem:[#allocation85_spill] sm:$0xff] }
 0x553   :  { %6564 = vst [vmem:[#allocation13 + $0x118] sm:$0xff] %v6500_v19  ;;  %v6501_v49 = vadd.f32 %v11811_v25, %v6430_v22  ;;  %v5768_v63 = vpop.xlane.xlu1 %5767  ;;  %v6170_v51 = vsub.f32 %v12461_v14, %v11884_v13 }
 0x554   :  { %v8257_v37 = vpop.eup %8256  ;;  %8262 = vrsqrt.f32 %v6235_v29  ;;  %v6044_v44 = vsub.f32 %v5916_v62, %v5980_v23  ;;  %v5917_v43 = vmul.f32 0.03125, %v5768_v63  ;;  %v6171_v62 = vsub.f32 %v11375_v18, %v11889_v36 }
 0x555   :  { %6565 = vst [vmem:[#allocation13 + $0x120] sm:$0xff] %v6501_v49  ;;  %v6360_v9 = vmul.f32 %v8257_v37, %v6168_v54  ;;  %v5578_v24 = vpop.xlane.xlu0 %5577 }
 0x556   :  { %v8259_v57 = vpop.eup %8258  ;;  %v6108_v27 = vmax.f32 %v6044_v44, 0.0  ;;  %v6045_v61 = vsub.f32 %v5917_v43, %v5981_v48  ;;  %v11916_v7 = vmul.f32 0.03125, %v5578_v24 }
 0x557   :  { %v6431_v12 = vmul.f32 %v11802_v59, %v6360_v9  ;;  %v6361_v8 = vmul.f32 %v8259_v57, %v6169_v52  ;;  %v5580_v53 = vpop.xlane.xlu1 %5579 }
 0x558   :  { %v6236_v3 = vadd.f32 1e-05, %v6108_v27  ;;  %v6109_v55 = vmax.f32 %v6045_v61, 0.0  ;;  %v11921_v4 = vmul.f32 0.03125, %v5580_v53  ;;  %v5982_v2 = vmul.f32 %v11916_v7, %v11916_v7 }
 0x559   :  { %v6502_v47 = vadd.f32 %v11811_v25, %v6431_v12  ;;  %v6432_v32 = vmul.f32 %v11802_v59, %v6361_v8  ;;  %v5770_v31 = vpop.xlane.xlu0 %5769  ;;  %v6172_v8 = vsub.f32 %v11391_v10, %v11900_v33 }
 0x55a   :  { %8264 = vrsqrt.f32 %v6236_v3  ;;  %v6237_v39 = vadd.f32 1e-05, %v6109_v55  ;;  %v5918_v21 = vmul.f32 0.03125, %v5770_v31  ;;  %v5983_v17 = vmul.f32 %v11921_v4, %v11921_v4  ;;  %v12462_v31 = vld [vmem:[#allocation86_spill] sm:$0xff] }
 0x55b   :  { %6566 = vst [vmem:[#allocation13 + $0x128] sm:$0xff] %v6502_v47  ;;  %v6503_v5 = vadd.f32 %v11811_v25, %v6432_v32  ;;  %v5772_v19 = vpop.xlane.xlu1 %5771 }
 0x55c   :  { %v8261_v22 = vpop.eup %8260  ;;  %8266 = vrsqrt.f32 %v6237_v39  ;;  %v6046_v29 = vsub.f32 %v5918_v21, %v5982_v2  ;;  %v5919_v23 = vmul.f32 0.03125, %v5772_v19  ;;  %v6173_v39 = vsub.f32 %v12462_v31, %v11905_v50 }
 0x55d   :  { %6567 = vst [vmem:[#allocation13 + $0x130] sm:$0xff] %v6503_v5  ;;  %v6362_v49 = vmul.f32 %v8261_v22, %v6170_v51  ;;  %v5582_v0 = vpop.xlane.xlu0 %5581 }
 0x55e   :  { %v8263_v54 = vpop.eup %8262  ;;  %v6110_v63 = vmax.f32 %v6046_v29, 0.0  ;;  %v6047_v37 = vsub.f32 %v5919_v23, %v5983_v17  ;;  %v11932_v48 = vmul.f32 0.03125, %v5582_v0 }
 0x55f   :  { %v6433_v13 = vmul.f32 %v11802_v59, %v6362_v49  ;;  %v6363_v44 = vmul.f32 %v8263_v54, %v6171_v62  ;;  %v5584_v43 = vpop.xlane.xlu1 %5583 }
 0x560   :  { %v6238_v60 = vadd.f32 1e-05, %v6110_v63  ;;  %v6111_v52 = vmax.f32 %v6047_v37, 0.0  ;;  %v11937_v57 = vmul.f32 0.03125, %v5584_v43  ;;  %v5984_v27 = vmul.f32 %v11932_v48, %v11932_v48 }
 0x561   :  { %v6504_v9 = vadd.f32 %v11811_v25, %v6433_v13  ;;  %v6434_v24 = vmul.f32 %v11802_v59, %v6363_v44  ;;  %v5774_v18 = vpop.xlane.xlu0 %5773  ;;  %v12463_v13 = vld [vmem:[#allocation87_spill] sm:$0xff] }
 0x562   :  { %8268 = vrsqrt.f32 %v6238_v60  ;;  %v6239_v36 = vadd.f32 1e-05, %v6111_v52  ;;  %v5920_v61 = vmul.f32 0.03125, %v5774_v18  ;;  %v5985_v55 = vmul.f32 %v11937_v57, %v11937_v57  ;;  %v12464_v18 = vld [vmem:[#allocation60_spill] sm:$0xff] }
 0x563   :  { %6568 = vst [vmem:[#allocation13 + $0x138] sm:$0xff] %v6504_v9  ;;  %v6505_v12 = vadd.f32 %v11811_v25, %v6434_v24  ;;  %v5776_v53 = vpop.xlane.xlu1 %5775  ;;  %v6174_v44 = vsub.f32 %v12463_v13, %v11916_v7 }
 0x564   :  { %v8265_v3 = vpop.eup %8264  ;;  %8270 = vrsqrt.f32 %v6239_v36  ;;  %v6048_v47 = vsub.f32 %v5920_v61, %v5984_v27  ;;  %v5921_v32 = vmul.f32 0.03125, %v5776_v53  ;;  %v6175_v36 = vsub.f32 %v12464_v18, %v11921_v4 }
 0x565   :  { %6569 = vst [vmem:[#allocation13 + $0x140] sm:$0xff] %v6505_v12  ;;  %v6364_v2 = vmul.f32 %v8265_v3, %v6172_v8  ;;  %v5586_v21 = vpop.xlane.xlu0 %5585 }
 0x566   :  { %v8267_v5 = vpop.eup %8266  ;;  %v6112_v14 = vmax.f32 %v6048_v47, 0.0  ;;  %v6049_v51 = vsub.f32 %v5921_v32, %v5985_v55  ;;  %v11948_v19 = vmul.f32 0.03125, %v5586_v21 }
 0x567   :  { %v6435_v10 = vmul.f32 %v11802_v59, %v6364_v2  ;;  %v6365_v33 = vmul.f32 %v8267_v5, %v6173_v39  ;;  %v5588_v22 = vpop.xlane.xlu1 %5587 }
 0x568   :  { %v6240_v17 = vadd.f32 1e-05, %v6112_v14  ;;  %v6113_v29 = vmax.f32 %v6049_v51, 0.0  ;;  %v11953_v49 = vmul.f32 0.03125, %v5588_v22  ;;  %v5986_v54 = vmul.f32 %v11948_v19, %v11948_v19 }
 0x569   :  { %v6506_v23 = vadd.f32 %v11811_v25, %v6435_v10  ;;  %v6436_v62 = vmul.f32 %v11802_v59, %v6365_v33  ;;  %v5778_v50 = vpop.xlane.xlu0 %5777  ;;  %v6176_v33 = vsub.f32 %v11463_v1, %v11932_v48 }
 0x56a   :  { %8272 = vrsqrt.f32 %v6240_v17  ;;  %v6241_v0 = vadd.f32 1e-05, %v6113_v29  ;;  %v5922_v63 = vmul.f32 0.03125, %v5778_v50  ;;  %v5987_v52 = vmul.f32 %v11953_v49, %v11953_v49 }
 0x56b   :  { %6570 = vst [vmem:[#allocation13 + $0x148] sm:$0xff] %v6506_v23  ;;  %v6507_v37 = vadd.f32 %v11811_v25, %v6436_v62  ;;  %v5780_v43 = vpop.xlane.xlu1 %5779  ;;  %v6177_v50 = vsub.f32 %v11473_v45, %v11937_v57 }
 0x56c   :  { %v8269_v60 = vpop.eup %8268  ;;  %8274 = vrsqrt.f32 %v6241_v0  ;;  %v6050_v9 = vsub.f32 %v5922_v63, %v5986_v54  ;;  %v5923_v24 = vmul.f32 0.03125, %v5780_v43 }
 0x56d   :  { %6571 = vst [vmem:[#allocation13 + $0x150] sm:$0xff] %v6507_v37  ;;  %v6366_v27 = vmul.f32 %v8269_v60, %v6174_v44  ;;  %v5590_v61 = vpop.xlane.xlu0 %5589 }
 0x56e   :  { %v8271_v12 = vpop.eup %8270  ;;  %v6114_v8 = vmax.f32 %v6050_v9, 0.0  ;;  %v6051_v53 = vsub.f32 %v5923_v24, %v5987_v52  ;;  %v11964_v3 = vmul.f32 0.03125, %v5590_v61 }
 0x56f   :  { %v6437_v7 = vmul.f32 %v11802_v59, %v6366_v27  ;;  %v6367_v55 = vmul.f32 %v8271_v12, %v6175_v36  ;;  %v5592_v47 = vpop.xlane.xlu1 %5591  ;;  %v6178_v12 = vsub.f32 %v11498_v58, %v11948_v19 }
 0x570   :  { %v6242_v32 = vadd.f32 1e-05, %v6114_v8  ;;  %v6115_v31 = vmax.f32 %v6051_v53, 0.0  ;;  %v11969_v21 = vmul.f32 0.03125, %v5592_v47  ;;  %v5988_v14 = vmul.f32 %v11964_v3, %v11964_v3 }
 0x571   :  { %v6508_v39 = vadd.f32 %v11811_v25, %v6437_v7  ;;  %v6438_v2 = vmul.f32 %v11802_v59, %v6367_v55  ;;  %v5782_v4 = vpop.xlane.xlu0 %5781 }
 0x572   :  { %8276 = vrsqrt.f32 %v6242_v32  ;;  %v6243_v5 = vadd.f32 1e-05, %v6115_v31  ;;  %v5924_v51 = vmul.f32 0.03125, %v5782_v4  ;;  %v5989_v29 = vmul.f32 %v11969_v21, %v11969_v21 }
 0x573   :  { %6572 = vst [vmem:[#allocation13 + $0x158] sm:$0xff] %v6508_v39  ;;  %v6509_v10 = vadd.f32 %v11811_v25, %v6438_v2  ;;  %v5784_v22 = vpop.xlane.xlu1 %5783  ;;  %v6179_v32 = vsub.f32 %v11510_v46, %v11953_v49 }
 0x574   :  { %v8273_v17 = vpop.eup %8272  ;;  %8278 = vrsqrt.f32 %v6243_v5  ;;  %v6052_v23 = vsub.f32 %v5924_v51, %v5988_v14  ;;  %v5925_v62 = vmul.f32 0.03125, %v5784_v22 }
 0x575   :  { %6573 = vst [vmem:[#allocation13 + $0x160] sm:$0xff] %v6509_v10  ;;  %v6368_v0 = vmul.f32 %v8273_v17, %v6176_v33  ;;  %v5594_v54 = vpop.xlane.xlu0 %5593 }
 0x576   :  { %v8275_v63 = vpop.eup %8274  ;;  %v6116_v37 = vmax.f32 %v6052_v23, 0.0  ;;  %v6053_v13 = vsub.f32 %v5925_v62, %v5989_v29  ;;  %v11980_v44 = vmul.f32 0.03125, %v5594_v54 }
 0x577   :  { %v6439_v1 = vmul.f32 %v11802_v59, %v6368_v0  ;;  %v6369_v48 = vmul.f32 %v8275_v63, %v6177_v50  ;;  %v5596_v43 = vpop.xlane.xlu1 %5595  ;;  %v6180_v0 = vsub.f32 %v11528_v30, %v11964_v3 }
 0x578   :  { %v6244_v60 = vadd.f32 1e-05, %v6116_v37  ;;  %v6117_v52 = vmax.f32 %v6053_v13, 0.0  ;;  %v11985_v18 = vmul.f32 0.03125, %v5596_v43  ;;  %v5990_v36 = vmul.f32 %v11980_v44, %v11980_v44 }
 0x579   :  { %v6510_v9 = vadd.f32 %v11811_v25, %v6439_v1  ;;  %v6440_v24 = vmul.f32 %v11802_v59, %v6369_v48  ;;  %v5786_v45 = vpop.xlane.xlu0 %5785  ;;  %v6181_v48 = vsub.f32 %v11549_v20, %v11969_v21 }
 0x57a   :  { %8280 = vrsqrt.f32 %v6244_v60  ;;  %v6245_v57 = vadd.f32 1e-05, %v6117_v52  ;;  %v5926_v27 = vmul.f32 0.03125, %v5786_v45  ;;  %v5991_v7 = vmul.f32 %v11985_v18, %v11985_v18 }
 0x57b   :  { %6574 = vst [vmem:[#allocation13 + $0x168] sm:$0xff] %v6510_v9  ;;  %v6511_v61 = vadd.f32 %v11811_v25, %v6440_v24  ;;  %v5788_v8 = vpop.xlane.xlu1 %5787 }
 0x57c   :  { %v8277_v53 = vpop.eup %8276  ;;  %8282 = vrsqrt.f32 %v6245_v57  ;;  %v6054_v55 = vsub.f32 %v5926_v27, %v5990_v36  ;;  %v5927_v47 = vmul.f32 0.03125, %v5788_v8 }
 0x57d   :  { %6575 = vst [vmem:[#allocation13 + $0x170] sm:$0xff] %v6511_v61  ;;  %v6370_v31 = vmul.f32 %v8277_v53, %v6178_v12  ;;  %v5598_v39 = vpop.xlane.xlu0 %5597 }
 0x57e   :  { %v8279_v2 = vpop.eup %8278  ;;  %v6118_v4 = vmax.f32 %v6054_v55, 0.0  ;;  %v6055_v5 = vsub.f32 %v5927_v47, %v5991_v7  ;;  %v11996_v14 = vmul.f32 0.03125, %v5598_v39  ;;  %v6182_v47 = vsub.f32 %v11575_v42, %v11980_v44 }
 0x57f   :  { %v6441_v58 = vmul.f32 %v11802_v59, %v6370_v31  ;;  %v6371_v19 = vmul.f32 %v8279_v2, %v6179_v32  ;;  %v5600_v51 = vpop.xlane.xlu1 %5599 }
 0x580   :  { %v6246_v10 = vadd.f32 1e-05, %v6118_v4  ;;  %v6119_v33 = vmax.f32 %v6055_v5, 0.0  ;;  %v12001_v29 = vmul.f32 0.03125, %v5600_v51  ;;  %v5992_v23 = vmul.f32 %v11996_v14, %v11996_v14 }
 0x581   :  { %v6512_v22 = vadd.f32 %v11811_v25, %v6441_v58  ;;  %v6442_v17 = vmul.f32 %v11802_v59, %v6371_v19  ;;  %v5790_v46 = vpop.xlane.xlu0 %5789  ;;  %v6183_v5 = vsub.f32 %v11583_v11, %v11985_v18 }
 0x582   :  { %8284 = vrsqrt.f32 %v6246_v10  ;;  %v6247_v49 = vadd.f32 1e-05, %v6119_v33  ;;  %v5928_v62 = vmul.f32 0.03125, %v5790_v46  ;;  %v5993_v37 = vmul.f32 %v12001_v29, %v12001_v29 }
 0x583   :  { %6576 = vst [vmem:[#allocation13 + $0x178] sm:$0xff] %v6512_v22  ;;  %v6513_v50 = vadd.f32 %v11811_v25, %v6442_v17  ;;  %v5792_v54 = vpop.xlane.xlu1 %5791 }
 0x584   :  { %v8281_v63 = vpop.eup %8280  ;;  %8286 = vrsqrt.f32 %v6247_v49  ;;  %v6056_v13 = vsub.f32 %v5928_v62, %v5992_v23  ;;  %v5929_v1 = vmul.f32 0.03125, %v5792_v54 }
 0x585   :  { %6577 = vst [vmem:[#allocation13 + $0x180] sm:$0xff] %v6513_v50  ;;  %v6372_v43 = vmul.f32 %v8281_v63, %v6180_v0  ;;  %v5602_v60 = vpop.xlane.xlu0 %5601 }
 0x586   :  { %v8283_v52 = vpop.eup %8282  ;;  %v6120_v9 = vmax.f32 %v6056_v13, 0.0  ;;  %v6057_v24 = vsub.f32 %v5929_v1, %v5993_v37  ;;  %v12012_v45 = vmul.f32 0.03125, %v5602_v60  ;;  %v6184_v37 = vsub.f32 %v11609_v41, %v11996_v14 }
 0x587   :  { %v6443_v30 = vmul.f32 %v11802_v59, %v6372_v43  ;;  %v6373_v3 = vmul.f32 %v8283_v52, %v6181_v48  ;;  %v5604_v57 = vpop.xlane.xlu1 %5603  ;;  %v6185_v52 = vsub.f32 %v11621_v26, %v12001_v29 }
 0x588   :  { %v6248_v36 = vadd.f32 1e-05, %v6120_v9  ;;  %v6121_v27 = vmax.f32 %v6057_v24, 0.0  ;;  %v12017_v8 = vmul.f32 0.03125, %v5604_v57  ;;  %v5994_v53 = vmul.f32 %v12012_v45, %v12012_v45 }
 0x589   :  { %v6514_v61 = vadd.f32 %v11811_v25, %v6443_v30  ;;  %v6444_v12 = vmul.f32 %v11802_v59, %v6373_v3  ;;  %v5794_v20 = vpop.xlane.xlu0 %5793 }
 0x58a   :  { %8288 = vrsqrt.f32 %v6248_v36  ;;  %v6249_v21 = vadd.f32 1e-05, %v6121_v27  ;;  %v5930_v7 = vmul.f32 0.03125, %v5794_v20  ;;  %v5995_v39 = vmul.f32 %v12017_v8, %v12017_v8 }
 0x58b   :  { %6578 = vst [vmem:[#allocation13 + $0x188] sm:$0xff] %v6514_v61  ;;  %v6515_v55 = vadd.f32 %v11811_v25, %v6444_v12  ;;  %v5796_v32 = vpop.xlane.xlu1 %5795 }
 0x58c   :  { %v8285_v31 = vpop.eup %8284  ;;  %8290 = vrsqrt.f32 %v6249_v21  ;;  %v6058_v2 = vsub.f32 %v5930_v7, %v5994_v53  ;;  %v5931_v4 = vmul.f32 0.03125, %v5796_v32  ;;  %v6186_v32 = vsub.f32 %v11647_v35, %v12012_v45 }
 0x58d   :  { %6579 = vst [vmem:[#allocation13 + $0x190] sm:$0xff] %v6515_v55  ;;  %v6374_v58 = vmul.f32 %v8285_v31, %v6182_v47  ;;  %v5606_v19 = vpop.xlane.xlu0 %5605 }
 0x58e   :  { %v8287_v51 = vpop.eup %8286  ;;  %v6122_v10 = vmax.f32 %v6058_v2, 0.0  ;;  %v6059_v33 = vsub.f32 %v5931_v4, %v5995_v39  ;;  %v12028_v22 = vmul.f32 0.03125, %v5606_v19 }
 0x58f   :  { %v6445_v42 = vmul.f32 %v11802_v59, %v6374_v58  ;;  %v6375_v44 = vmul.f32 %v8287_v51, %v6183_v5  ;;  %v5608_v17 = vpop.xlane.xlu1 %5607  ;;  %v6187_v58 = vsub.f32 %v11657_v15, %v12017_v8 }
 0x590   :  { %v6250_v46 = vadd.f32 1e-05, %v6122_v10  ;;  %v6123_v49 = vmax.f32 %v6059_v33, 0.0  ;;  %v12033_v50 = vmul.f32 0.03125, %v5608_v17  ;;  %v5996_v0 = vmul.f32 %v12028_v22, %v12028_v22 }
 0x591   :  { %v6516_v23 = vadd.f32 %v11811_v25, %v6445_v42  ;;  %v6446_v62 = vmul.f32 %v11802_v59, %v6375_v44  ;;  %v5798_v11 = vpop.xlane.xlu0 %5797 }
 0x592   :  { %8292 = vrsqrt.f32 %v6250_v46  ;;  %v6251_v18 = vadd.f32 1e-05, %v6123_v49  ;;  %v5932_v54 = vmul.f32 0.03125, %v5798_v11  ;;  %v5997_v48 = vmul.f32 %v12033_v50, %v12033_v50 }
 0x593   :  { %6580 = vst [vmem:[#allocation13 + $0x198] sm:$0xff] %v6516_v23  ;;  %v6517_v63 = vadd.f32 %v11811_v25, %v6446_v62  ;;  %v5800_v13 = vpop.xlane.xlu1 %5799 }
 0x594   :  { %v8289_v1 = vpop.eup %8288  ;;  %8294 = vrsqrt.f32 %v6251_v18  ;;  %v6060_v43 = vsub.f32 %v5932_v54, %v5996_v0  ;;  %v5933_v60 = vmul.f32 0.03125, %v5800_v13 }
 0x595   :  { %6581 = vst [vmem:[#allocation13 + $0x1a0] sm:$0xff] %v6517_v63  ;;  %v6376_v9 = vmul.f32 %v8289_v1, %v6184_v37  ;;  %v5610_v24 = vpop.xlane.xlu0 %5609  ;;  %v6188_v63 = vsub.f32 %v11683_v28, %v12028_v22 }
 0x596   :  { %v8291_v30 = vpop.eup %8290  ;;  %v6124_v3 = vmax.f32 %v6060_v43, 0.0  ;;  %v6061_v57 = vsub.f32 %v5933_v60, %v5997_v48  ;;  %v12044_v36 = vmul.f32 0.03125, %v5610_v24  ;;  %v6189_v60 = vsub.f32 %v11693_v6, %v12033_v50 }
 0x597   :  { %v6447_v41 = vmul.f32 %v11802_v59, %v6376_v9  ;;  %v6377_v14 = vmul.f32 %v8291_v30, %v6185_v52  ;;  %v5612_v27 = vpop.xlane.xlu1 %5611 }
 0x598   :  { %v6252_v61 = vadd.f32 1e-05, %v6124_v3  ;;  %v6125_v12 = vmax.f32 %v6061_v57, 0.0  ;;  %v12049_v53 = vmul.f32 0.03125, %v5612_v27  ;;  %v5998_v7 = vmul.f32 %v12044_v36, %v12044_v36 }
 0x599   :  { %v6518_v20 = vadd.f32 %v11811_v25, %v6447_v41  ;;  %v6448_v21 = vmul.f32 %v11802_v59, %v6377_v14  ;;  %v5802_v26 = vpop.xlane.xlu0 %5801 }
 0x59a   :  { %8296 = vrsqrt.f32 %v6252_v61  ;;  %v6253_v29 = vadd.f32 1e-05, %v6125_v12  ;;  %v5934_v55 = vmul.f32 0.03125, %v5802_v26  ;;  %v5999_v2 = vmul.f32 %v12049_v53, %v12049_v53  ;;  %v8378_v61 = vld [vmem:[#allocation10] ss:$0 sm:$0xff] }
 0x59b   :  { %6582 = vst [vmem:[#allocation13 + $0x1a8] sm:$0xff] %v6518_v20  ;;  %v6519_v47 = vadd.f32 %v11811_v25, %v6448_v21  ;;  %v5804_v31 = vpop.xlane.xlu1 %5803 }
 0x59c   :  { %v8293_v39 = vpop.eup %8292  ;;  %8298 = vrsqrt.f32 %v6253_v29  ;;  %v6062_v4 = vsub.f32 %v5934_v55, %v5998_v7  ;;  %v5935_v5 = vmul.f32 0.03125, %v5804_v31  ;;  %v6190_v29 = vsub.f32 %v11715_v34, %v12044_v36 }
 0x59d   :  { %6583 = vst [vmem:[#allocation13 + $0x1b0] sm:$0xff] %v6519_v47  ;;  %v6378_v19 = vmul.f32 %v8293_v39, %v6186_v32  ;;  %v5614_v51 = vpop.xlane.xlu0 %5613  ;;  %v6191_v55 = vsub.f32 %v11727_v38, %v12049_v53 }
 0x59e   :  { %v8295_v10 = vpop.eup %8294  ;;  %v6126_v33 = vmax.f32 %v6062_v4, 0.0  ;;  %v6063_v42 = vsub.f32 %v5935_v5, %v5999_v2  ;;  %v12060_v44 = vmul.f32 0.03125, %v5614_v51  ;;  %v8379_v5 = vld [vmem:[#allocation11] ss:$0 sm:$0xff] }
 0x59f   :  { %v6449_v35 = vmul.f32 %v11802_v59, %v6378_v19  ;;  %v6379_v45 = vmul.f32 %v8295_v10, %v6187_v58  ;;  %v5616_v17 = vpop.xlane.xlu1 %5615 }
 0x5a0   :  { %v6254_v46 = vadd.f32 1e-05, %v6126_v33  ;;  %v6127_v49 = vmax.f32 %v6063_v42, 0.0  ;;  %v12065_v11 = vmul.f32 0.03125, %v5616_v17  ;;  %v6000_v18 = vmul.f32 %v12060_v44, %v12060_v44 }
 0x5a1   :  { %v6520_v23 = vadd.f32 %v11811_v25, %v6449_v35  ;;  %v6450_v62 = vmul.f32 %v11802_v59, %v6379_v45  ;;  %v5806_v15 = vpop.xlane.xlu0 %5805  ;;  %v6192_v34 = vsub.f32 %v11748_v56, %v12060_v44 }
 0x5a2   :  { %8300 = vrsqrt.f32 %v6254_v46  ;;  %v6255_v8 = vadd.f32 1e-05, %v6127_v49  ;;  %v5936_v0 = vmul.f32 0.03125, %v5806_v15  ;;  %v6001_v1 = vmul.f32 %v12065_v11, %v12065_v11 }
 0x5a3   :  { %6584 = vst [vmem:[#allocation13 + $0x1b8] sm:$0xff] %v6520_v23  ;;  %v6521_v54 = vadd.f32 %v11811_v25, %v6450_v62  ;;  %v5808_v37 = vpop.xlane.xlu1 %5807  ;;  %v6193_v38 = vsub.f32 %v11756_v16, %v12065_v11 }
 0x5a4   :  { %v8297_v13 = vpop.eup %8296  ;;  %8302 = vrsqrt.f32 %v6255_v8  ;;  %v6064_v48 = vsub.f32 %v5936_v0, %v6000_v18  ;;  %v5937_v43 = vmul.f32 0.03125, %v5808_v37 }
 0x5a5   :  { %6585 = vst [vmem:[#allocation13 + $0x1c0] sm:$0xff] %v6521_v54  ;;  %v6380_v52 = vmul.f32 %v8297_v13, %v6188_v63  ;;  %v5618_v9 = vpop.xlane.xlu0 %5617 }
 0x5a6   :  { %v8299_v24 = vpop.eup %8298  ;;  %v6128_v30 = vmax.f32 %v6064_v48, 0.0  ;;  %v6065_v3 = vsub.f32 %v5937_v43, %v6001_v1  ;;  %v5874_v57 = vmul.f32 0.03125, %v5618_v9 }
 0x5a7   :  { %v6451_v28 = vmul.f32 %v11802_v59, %v6380_v52  ;;  %v6381_v22 = vmul.f32 %v8299_v24, %v6189_v60 }
 0x5a8   :  { %v6256_v41 = vadd.f32 1e-05, %v6128_v30  ;;  %v6129_v14 = vmax.f32 %v6065_v3, 0.0  ;;  %v6002_v26 = vmul.f32 %v5874_v57, %v5874_v57  ;;  %v6194_v17 = vsub.f32 %v11779_v40, %v5874_v57 }
 0x5a9   :  { %v6522_v27 = vadd.f32 %v11811_v25, %v6451_v28  ;;  %v6452_v12 = vmul.f32 %v8378_v61, %v6381_v22  ;;  %v5810_v20 = vpop.xlane.xlu0 %5809 }
 0x5aa   :  { %8304 = vrsqrt.f32 %v6256_v41  ;;  %v6257_v21 = vadd.f32 1e-05, %v6129_v14  ;;  %v5938_v6 = vmul.f32 0.03125, %v5810_v20 }
 0x5ab   :  { %6586 = vst [vmem:[#allocation13 + $0x1c8] sm:$0xff] %v6522_v27  ;;  %v6523_v50 = vadd.f32 %v11811_v25, %v6452_v12 }
 0x5ac   :  { %v8301_v7 = vpop.eup %8300  ;;  %8306 = vrsqrt.f32 %v6257_v21  ;;  %v6066_v59 = vsub.f32 %v5938_v6, %v6002_v26 }
 0x5ad   :  { %6587 = vst [vmem:[#allocation13 + $0x1d0] sm:$0xff] %v6523_v50  ;;  %v6382_v47 = vmul.f32 %v8301_v7, %v6190_v29 }
 0x5ae   :  { %v8303_v32 = vpop.eup %8302  ;;  %v6130_v31 = vmax.f32 %v6066_v59, 0.0 }
 0x5af   :  { %v6453_v39 = vmul.f32 %v8378_v61, %v6382_v47  ;;  %v6383_v2 = vmul.f32 %v8303_v32, %v6191_v55 }
 0x5b0   :  { %v6258_v4 = vadd.f32 1e-05, %v6130_v31 }
 0x5b1   :  { %v6524_v58 = vadd.f32 %v8379_v5, %v6453_v39  ;;  %v6454_v19 = vmul.f32 %v8378_v61, %v6383_v2 }
 0x5b2   :  { %8308 = vrsqrt.f32 %v6258_v4 }
 0x5b3   :  { %6588 = vst [vmem:[#allocation13 + $0x1d8] sm:$0xff] %v6524_v58  ;;  %v6525_v25 = vadd.f32 %v8379_v5, %v6454_v19 }
 0x5b4   :  { %v8305_v36 = vpop.eup %8304 }
 0x5b5   :  { %6589 = vst [vmem:[#allocation13 + $0x1e0] sm:$0xff] %v6525_v25  ;;  %v6384_v53 = vmul.f32 %v8305_v36, %v6192_v34 }
 0x5b6   :  { %v8307_v51 = vpop.eup %8306 }
 0x5b7   :  { %v6455_v10 = vmul.f32 %v8378_v61, %v6384_v53  ;;  %v6385_v33 = vmul.f32 %v8307_v51, %v6193_v38 }
 0x5b9   :  { %v6526_v42 = vadd.f32 %v8379_v5, %v6455_v10  ;;  %v6456_v35 = vmul.f32 %v8378_v61, %v6385_v33 }
 0x5bb   :  { %6590 = vst [vmem:[#allocation13 + $0x1e8] sm:$0xff] %v6526_v42  ;;  %v6527_v45 = vadd.f32 %v8379_v5, %v6456_v35 }
 0x5bc   :  { %v8309_v46 = vpop.eup %8308 }
 0x5bd   :  { %6591 = vst [vmem:[#allocation13 + $0x1f0] sm:$0xff] %v6527_v45  ;;  %v6386_v49 = vmul.f32 %v8309_v46, %v6194_v17 }
 0x5bf   :  { %v6457_v56 = vmul.f32 %v8378_v61, %v6386_v49 }
 0x5c1   :  { %v6528_v44 = vadd.f32 %v8379_v5, %v6457_v56 }
 0x5c3   :  { %6592 = vst [vmem:[#allocation13 + $0x1f8] sm:$0xff] %v6528_v44 }
 0x5c4   :  { %8523 = shalt.err (!%p8520_p10)
}
 0x5c5   :  { %s8524_s27 = scalar_lea.hbm %s12109_s6, 8192 }
 0x5c6   :  { %p8525_p11 = scmp.ne.s32.totalorder %s12109_s6, %s8524_s27  ;;  %p8528_p12 = scmp.lt.u32.totalorder %s8524_s27, %s12109_s6 }
 0x5c8   :  { %p8530_p13 = pnand %p8528_p12, %p8525_p11 }
 0x5ca   :  { %8533 = shalt.err (!%p8530_p13)
}
 0x5cb   :  { %6604 = dma.vmem_to_hbm [thread:$0]  %s6599_s0, 8192, %s12109_s6, [#allocation4], %s8549_s3, %s8549_s3, %s8550_s11  }
 0x5cc   :  { %8542 = dma.done.wait [#allocation4], 8192  }
 0x5cd   :  { %8543 = vsyncadd [#allocation4], 4294959104 }
 0x5ce   :  { %6608 = vsyncpa [#allocation3], 1 }
 0x5cf   :  { %6609 = vsyncpa [#allocation6], 1 }
 0x5d0   :  { %6610 = vsyncpa [#allocation9], 1 }
 0x5d1   :  { %6611 = vsyncpa [#allocation12], 1 }
 0x5d2   :  { %6612 = vsyncpa [#allocation4], 1 }

</bundles_post_ra>
